<compile_context>
chip_gen: v6e
topology: v6e:2x2x1
jax: 0.10.0
libtpu: 0.0.40
codegen_flags: <defaults>
</compile_context>

<pallas_src>
import numpy as np
import jax
import jax.numpy as jnp
from jax.experimental import pallas as pl
from jax.experimental.pallas import tpu as pltpu

EMBEDDING_SIZE = 64
LINEAR_EMBEDDINGS = 32      # E
SEQ_LEN = 768               # L; fixed by Linear(12288 = 32 * 384)
CNN_CHANNELS = 32           # C

_VMEM = pl.BlockSpec(memory_space=pltpu.MemorySpace.VMEM)
_SMEM = pl.BlockSpec(memory_space=pltpu.MemorySpace.SMEM)
_NEG = -1e30                # "minus infinity" for masked max (avoids inf arithmetic)


# ----------------------------- small math helpers (inside kernels) -----------
def _softplus(x):
    # numerically stable log(1 + exp(x)) == torch Softplus(beta=1)
    return jnp.maximum(x, 0.0) + jnp.log(1.0 + jnp.exp(-jnp.abs(x)))


def _sigmoid(x):
    return 1.0 / (1.0 + jnp.exp(-x))


# ----------------------------- kernel 1: fused GCN branch --------------------
def _gcn_branch_kernel(a_ref, x_ref, w0_ref, b0_ref, w2_ref, b2_ref,
                       member_ref, negmask_ref, ow_ref, ob_ref, o_ref):
    # TODO(synk): gridless + fully VMEM-resident; for large node counts (esp. v7x's
    # 64 MiB VMEM) this should become a grid-tiled A @ (X W) pipeline.
    a = a_ref[...]                                           # (N, N) normalized adjacency
    h = jnp.dot(x_ref[...], w0_ref[...], preferred_element_type=jnp.float32)
    h = jnp.tanh(jnp.dot(a, h, preferred_element_type=jnp.float32) + b0_ref[...])
    h = jnp.dot(h, w2_ref[...], preferred_element_type=jnp.float32)
    h = jnp.tanh(jnp.dot(a, h, preferred_element_type=jnp.float32) + b2_ref[...])
    h = jnp.dot(h, w2_ref[...], preferred_element_type=jnp.float32)
    h = jnp.dot(a, h, preferred_element_type=jnp.float32) + b2_ref[...]   # (N, 64), no tanh

    member = member_ref[...]                                 # (B, N) 0/1 graph membership
    counts = jnp.sum(member, axis=1, keepdims=True)          # (B, 1)
    sums = jnp.dot(member, h, preferred_element_type=jnp.float32)        # gap numerator (MXU)
    mean = sums / jnp.maximum(counts, 1.0)                   # global_mean_pool
    mx = jnp.max(h[None, :, :] + negmask_ref[...], axis=1)   # global_max_pool (additive mask)
    mx = jnp.where(counts > 0.0, mx, 0.0)                    # empty-graph guard

    # hidden = cat([gmp, gap]); Linear(128 -> 768) split into two sublane-aligned halves
    # (avoids a lane concat; mathematically identical).
    e = h.shape[1]
    out = (jnp.dot(mx, ow_ref[0:e, :], preferred_element_type=jnp.float32)
           + jnp.dot(mean, ow_ref[e:2 * e, :], preferred_element_type=jnp.float32)
           + ob_ref[...])                                    # (B, 768)
    o_ref[:, 0, :] = out.astype(o_ref.dtype)                 # output shaped (B, 1, 768)


# ----------------------------- kernel 2: convs + CBAM + SAM + pool + head ----
def _conv3_folded(x, wcat_ref, b_ref, xcat_ref, not_first, not_last):
    # Conv1d(kernel=3, padding=1, stride=1), NCL layout, as ONE MXU matmul with K = 3*Cin.
    # The three taps [x(l-1); x(l); x(l+1)] are stacked along sublanes in a VMEM scratch
    # via plain row stores (no in-kernel concatenate), then matmul'd in bf16 / f32 accum.
    cin, L = x.shape
    left = pltpu.roll(x, 1, axis=1) * not_first              # zero-padded x[l-1]
    right = pltpu.roll(x, L - 1, axis=1) * not_last          # zero-padded x[l+1]
    xcat_ref[0:cin, :] = left
    xcat_ref[cin:2 * cin, :] = x
    xcat_ref[2 * cin:3 * cin, :] = right
    xcat = xcat_ref[0:3 * cin, :].astype(jnp.bfloat16)
    return jnp.dot(wcat_ref[...], xcat, preferred_element_type=jnp.float32) + b_ref[...]


def _cnn_cbam_head_kernel(gcn_ref, prot_ref,
                          w1_ref, b1_ref, w2_ref, b2_ref, w3_ref, b3_ref,
                          cw1_ref, cw2_ref, sam_ref,
                          wwide_ref, dmask_ref, fold_ref,
                          l1b_ref, l2w_ref, l2b_ref, l3w_ref, l3b_ref,
                          o_ref, xcat_ref):
    L = gcn_ref.shape[-1]

    # Hoisted lane boundary masks, reused by all convs + SAM (review item 7).
    lane = jax.lax.broadcasted_iota(jnp.int32, (1, L), 1)
    not_first = (lane > 0).astype(jnp.float32)               # zero out wrapped x[-1]
    not_last = (lane < L - 1).astype(jnp.float32)            # zero out wrapped x[L]

    # --- conv1: Cin=2 (ch0 = GCN output, ch1 = protein, torch cat order) -----
    g = gcn_ref[0]                                           # (1, L)
    p = prot_ref[0]                                          # (1, L)
    xcat_ref[0:1, :] = pltpu.roll(g, 1, axis=1) * not_first
    xcat_ref[1:2, :] = pltpu.roll(p, 1, axis=1) * not_first
    xcat_ref[2:3, :] = g
    xcat_ref[3:4, :] = p
    xcat_ref[4:5, :] = pltpu.roll(g, L - 1, axis=1) * not_last
    xcat_ref[5:6, :] = pltpu.roll(p, L - 1, axis=1) * not_last
    x = jnp.dot(w1_ref[...], xcat_ref[0:6, :].astype(jnp.bfloat16),
                preferred_element_type=jnp.float32) + b1_ref[...]        # (32, L)

    # --- conv2 / conv3 (folded-tap K=96 matmuls) ------------------------------
    x = _conv3_folded(x, w2_ref, b2_ref, xcat_ref, not_first, not_last)
    x = _conv3_folded(x, w3_ref, b3_ref, xcat_ref, not_first, not_last)
    # TODO(synk): nn.Dropout(0.6) treated as inference-mode identity (no RNG mask).

    # --- CBAM channel attention: MLP(Linear 32->16, Linear 16->32, ReLU) ------
    xmax = jnp.max(x, axis=1, keepdims=True)                 # AdaptiveMaxPool1d(1) -> (32, 1)
    xavg = jnp.mean(x, axis=1, keepdims=True)                # AdaptiveAvgPool1d(1) -> (32, 1)
    w1c = cw1_ref[...]                                       # (16, 32) torch Linear weight
    w2c = cw2_ref[...]                                       # (32, 16)

    def mlp(v):                                              # column-vector form of x @ W.T
        hcol = jnp.dot(w1c, v, preferred_element_type=jnp.float32)
        hcol = jnp.dot(w2c, hcol, preferred_element_type=jnp.float32)
        return jnp.maximum(hcol, 0.0)                        # ReLU after both linears

    feats = _sigmoid(mlp(xmax) + mlp(xavg))                  # (32, 1)
    xc = x * feats                                           # channel-refined feats (32, L)

    # --- SAM: cat(mean_c, max_c) -> Conv1d(2, 1, k3, p1) -> sigmoid ----------
    s_mean = jnp.mean(xc, axis=0, keepdims=True)             # (1, L)  (torch dim=1 in NCL)
    s_max = jnp.max(xc, axis=0, keepdims=True)               # (1, L)
    ml = pltpu.roll(s_mean, 1, axis=1) * not_first
    mr = pltpu.roll(s_mean, L - 1, axis=1) * not_last
    xl = pltpu.roll(s_max, 1, axis=1) * not_first
    xr = pltpu.roll(s_max, L - 1, axis=1) * not_last
    # SAM conv scalars read from SMEM: [wm0, wm1, wm2, wx0, wx1, wx2, bias]
    att = (sam_ref[0] * ml + sam_ref[1] * s_mean + sam_ref[2] * mr
           + sam_ref[3] * xl + sam_ref[4] * s_max + sam_ref[5] * xr + sam_ref[6])
    y = xc * _sigmoid(att)                                   # refined spatial feats (32, L)

    # --- MaxPool1d(2) + flatten + Linear(12288->32), all folded together ------
    # m[:, 2t] = max(y[:, 2t], y[:, 2t+1]) is the pooled value; odd lanes are garbage but
    # hit zero rows of the pre-interleaved weight w_wide, so no selection matmul is needed.
    m = jnp.maximum(y, pltpu.roll(y, L - 1, axis=1))         # (32, L)
    full = jnp.dot(m.astype(jnp.bfloat16), wwide_ref[...],
                   preferred_element_type=jnp.float32)       # (32, C*E) = (32, 1024)
    # block-diagonal extraction: v[c*E + j] = full[c, c*E + j]
    v = jnp.sum(full * dmask_ref[...], axis=0, keepdims=True)            # (1, 1024)
    z = jnp.dot(v, fold_ref[...], preferred_element_type=jnp.float32) + l1b_ref[...]
    z = _softplus(z)
    z = jnp.dot(z, l2w_ref[...], preferred_element_type=jnp.float32) + l2b_ref[...]
    z = _softplus(z)
    z = jnp.dot(z, l3w_ref[...], preferred_element_type=jnp.float32) + l3b_ref[...]
    o_ref[0] = _softplus(z).astype(o_ref.dtype)              # (1, 1)


# ----------------------------- glue: GCN normalized adjacency ----------------
def gcn_norm_dense(edge_index, num_nodes):
    src, dst = edge_index[0], edge_index[1]
    a = jnp.zeros((num_nodes, num_nodes), jnp.float32)
    a = a.at[dst, src].add(1.0)                              # A[target, source]
    a = a + jnp.eye(num_nodes, dtype=jnp.float32)            # add self loops
    deg = jnp.sum(a, axis=1)
    dinv = jnp.where(deg > 0, 1.0 / jnp.sqrt(deg), 0.0)
    return a * dinv[:, None] * dinv[None, :]


def _head_selectors():
    # Compile-time 0/1 constants for the block-diagonal head extraction.
    C, E = CNN_CHANNELS, LINEAR_EMBEDDINGS
    col = np.arange(C * E)[None, :] // E
    row = np.arange(C)[:, None]
    diag_mask = jnp.asarray((col == row).astype(np.float32))          # (C, C*E)
    fold = jnp.asarray(np.tile(np.eye(E, dtype=np.float32), (C, 1)))  # (C*E, E)
    return diag_mask, fold


# ----------------------------- parameters ------------------------------------
def init_params(key):
    ks = jax.random.split(key, 22)
    C, E, L = CNN_CHANNELS, LINEAR_EMBEDDINGS, SEQ_LEN

    def w_init(k, shape, fan_in):
        return jax.random.normal(k, shape, jnp.float32) / jnp.sqrt(float(fan_in))

    p = {}
    p["gcn0_w"] = w_init(ks[0], (9, EMBEDDING_SIZE), 9)
    p["gcn0_b"] = w_init(ks[1], (1, EMBEDDING_SIZE), EMBEDDING_SIZE)
    p["gcn2_w"] = w_init(ks[2], (EMBEDDING_SIZE, EMBEDDING_SIZE), EMBEDDING_SIZE)
    p["gcn2_b"] = w_init(ks[3], (1, EMBEDDING_SIZE), EMBEDDING_SIZE)
    p["out_w"] = w_init(ks[4], (2 * EMBEDDING_SIZE, L), 2 * EMBEDDING_SIZE)  # Linear(128,768).weight.T
    p["out_b"] = w_init(ks[5], (1, L), 2 * EMBEDDING_SIZE)

    def conv_cat(k, cin, fan_in):
        # torch Conv1d weight (Cout, Cin, 3) -> tap-folded (Cout, 3*Cin), column = tap*Cin + cin
        w = w_init(k, (C, cin, 3), fan_in)
        return jnp.transpose(w, (0, 2, 1)).reshape(C, 3 * cin).astype(jnp.bfloat16)

    p["cnn1_w"] = conv_cat(ks[6], 2, 2 * 3)
    p["cnn1_b"] = w_init(ks[7], (C, 1), 2 * 3)
    p["cnn2_w"] = conv_cat(ks[8], C, C * 3)
    p["cnn2_b"] = w_init(ks[9], (C, 1), C * 3)
    p["cnn3_w"] = conv_cat(ks[10], C, C * 3)
    p["cnn3_b"] = w_init(ks[11], (C, 1), C * 3)
    # CBAM channel-attention MLP (torch Linear weight layout, no bias)
    p["cbam_w1"] = w_init(ks[12], (16, C), C)
    p["cbam_w2"] = w_init(ks[13], (C, 16), 16)
    # SAM Conv1d(2 -> 1, k=3) packed as 7 SMEM scalars: [mean taps k0..k2, max taps k0..k2, bias]
    sam_w = w_init(ks[14], (2, 3), 6)
    sam_b = w_init(ks[15], (1,), 6)
    p["sam"] = jnp.concatenate([sam_w[0], sam_w[1], sam_b], axis=0)       # (7,)
    # CNN_linear l1 = Linear(12288, 32) stored as W.T (12288, 32), then folded with the
    # MaxPool1d(2) even-lane selection: w_wide[2t, c*E + j] = WT[c*384 + t, j], odd rows 0.
    l1_wt = w_init(ks[16], (C * (L // 2), E), C * (L // 2))               # (12288, 32)
    w_r = jnp.transpose(l1_wt.reshape(C, L // 2, E), (1, 0, 2)).reshape(L // 2, C * E)
    p["l1_wwide"] = (jnp.zeros((L, C * E), jnp.float32).at[0::2, :].set(w_r)
                     .astype(jnp.bfloat16))                               # (768, 1024) bf16
    p["l1_b"] = w_init(ks[17], (1, E), C * (L // 2))
    p["l2_w"] = w_init(ks[18], (E, E), E)
    p["l2_b"] = w_init(ks[19], (1, E), E)
    p["l3_w"] = w_init(ks[20], (E, 1), E)
    p["l3_b"] = w_init(ks[21], (1, 1), E)
    return p


# ----------------------------- full forward ----------------------------------
def gcn_forward(params, drug, edge_index, batch_index, protein, num_graphs):
    n_nodes = drug.shape[0]
    B = num_graphs
    L = SEQ_LEN
    C = CNN_CHANNELS
    E = LINEAR_EMBEDDINGS

    # tiny XLA glue: data-dependent scatter for A_hat and graph-membership masks
    a_norm = gcn_norm_dense(edge_index, n_nodes)
    member = jnp.transpose(jax.nn.one_hot(batch_index, B, dtype=jnp.float32))  # (B, N)
    neg_mask = jnp.where(member > 0.5, 0.0, _NEG)[:, :, None]                  # (B, N, 1)

    # --- kernel 1: GCN x3 + gmp/gap pooling + GCN_output_layer (fused, VMEM-resident) ---
    gcn_out = pl.pallas_call(
        _gcn_branch_kernel,
        out_shape=jax.ShapeDtypeStruct((B, 1, L), jnp.float32),
        in_specs=[_VMEM] * 10,
        out_specs=_VMEM,
    )(a_norm, drug, params["gcn0_w"], params["gcn0_b"],
      params["gcn2_w"], params["gcn2_b"], member, neg_mask,
      params["out_w"], params["out_b"])

    diag_mask, fold = _head_selectors()

    def _wspec(shape):          # constant-index (resident) weight block
        return pl.BlockSpec(shape, lambda b: (0, 0))

    # --- kernel 2: conv1/2/3 + CBAM + SAM + MaxPool1d(2) + CNN_linear head, per batch ---
    out = pl.pallas_call(
        _cnn_cbam_head_kernel,
        out_shape=jax.ShapeDtypeStruct((B, 1, 1), jnp.float32),
        grid=(B,),
        in_specs=[
            pl.BlockSpec((1, 1, L), lambda b: (b, 0, 0)),     # gcn_out (channel 0)
            pl.BlockSpec((1, 1, L), lambda b: (b, 0, 0)),     # protein (channel 1)
            _wspec((C, 6)),                                   # cnn1_w (tap-folded, bf16)
            _wspec((C, 1)),                                   # cnn1_b
            _wspec((C, 3 * C)),                               # cnn2_w
            _wspec((C, 1)),                                   # cnn2_b
            _wspec((C, 3 * C)),                               # cnn3_w
            _wspec((C, 1)),                                   # cnn3_b
            _wspec((16, C)),                                  # cbam_w1
            _wspec((C, 16)),                                  # cbam_w2
            _SMEM,                                            # sam scalars (7,)
            _wspec((L, C * E)),                               # l1_wwide (pool-folded, bf16)
            _wspec((C, C * E)),                               # diag_mask
            _wspec((C * E, E)),                               # fold
            _wspec((1, E)),                                   # l1_b
            _wspec((E, E)),                                   # l2_w
            _wspec((1, E)),                                   # l2_b
            _wspec((E, 1)),                                   # l3_w
            _wspec((1, 1)),                                   # l3_b
        ],
        out_specs=pl.BlockSpec((1, 1, 1), lambda b: (b, 0, 0)),
        scratch_shapes=[pltpu.VMEM((3 * C, L), jnp.float32)],  # tap-stacking scratch
        compiler_params=pltpu.CompilerParams(dimension_semantics=("parallel",)),
    )(gcn_out, protein,
      params["cnn1_w"], params["cnn1_b"], params["cnn2_w"], params["cnn2_b"],
      params["cnn3_w"], params["cnn3_b"], params["cbam_w1"], params["cbam_w2"],
      params["sam"], params["l1_wwide"], diag_mask, fold,
      params["l1_b"], params["l2_w"], params["l2_b"], params["l3_w"], params["l3_b"])

    return out.reshape(B, 1)                                  # (B, 1)


# ----------------------------- demo -------------------------------------------
if __name__ == "__main__":
    key = jax.random.PRNGKey(0)
    k_param, k_drug, k_prot = jax.random.split(key, 3)

    params = init_params(k_param)

    num_graphs = 2
    nodes_per_graph = 8
    num_nodes = num_graphs * nodes_per_graph

    drug = jax.random.normal(k_drug, (num_nodes, 9), jnp.float32)

    # undirected chain inside each graph (both edge directions)
    src, dst = [], []
    for g in range(num_graphs):
        base = g * nodes_per_graph
        for i in range(nodes_per_graph - 1):
            src += [base + i, base + i + 1]
            dst += [base + i + 1, base + i]
    edge_index = jnp.array([src, dst], dtype=jnp.int32)                  # (2, 28)
    batch_index = jnp.array([0] * nodes_per_graph + [1] * nodes_per_graph,
                            dtype=jnp.int32)                             # (16,)
    protein = jax.random.normal(k_prot, (num_graphs, 1, SEQ_LEN), jnp.float32)

    fwd = jax.jit(gcn_forward, static_argnums=(5,))
    out = jax.block_until_ready(
        fwd(params, drug, edge_index, batch_index, protein, num_graphs))
    assert out.shape == (num_graphs, 1)
    assert bool(jnp.all(jnp.isfinite(out)))
    print("KERNEL_OK")
</pallas_src>

<mosaic_0001>
module attributes {stable_mosaic.version = 11 : i64} {
  func.func @_gcn_branch_kernel(%arg0: memref<16x16xf32, #tpu.memory_space<vmem>>, %arg1: memref<16x9xf32, #tpu.memory_space<vmem>>, %arg2: memref<9x64xf32, #tpu.memory_space<vmem>>, %arg3: memref<1x64xf32, #tpu.memory_space<vmem>>, %arg4: memref<64x64xf32, #tpu.memory_space<vmem>>, %arg5: memref<1x64xf32, #tpu.memory_space<vmem>>, %arg6: memref<2x16xf32, #tpu.memory_space<vmem>>, %arg7: memref<2x16x1xf32, #tpu.memory_space<vmem>>, %arg8: memref<128x768xf32, #tpu.memory_space<vmem>>, %arg9: memref<1x768xf32, #tpu.memory_space<vmem>>, %arg10: memref<2x1x768xf32, #tpu.memory_space<vmem>>) attributes {dimension_semantics = [], scalar_prefetch = 0 : i64, scratch_operands = 0 : i64, tpu.core_type = #tpu.core_type<tc>} {
    %c0 = arith.constant 0 : index
    %c0_0 = arith.constant 0 : index
    %0 = vector.load %arg0[%c0, %c0_0] : memref<16x16xf32, #tpu.memory_space<vmem>>, vector<16x16xf32>
    %c0_1 = arith.constant 0 : index
    %c0_2 = arith.constant 0 : index
    %1 = vector.load %arg1[%c0_1, %c0_2] : memref<16x9xf32, #tpu.memory_space<vmem>>, vector<16x9xf32>
    %c0_3 = arith.constant 0 : index
    %c0_4 = arith.constant 0 : index
    %2 = vector.load %arg2[%c0_3, %c0_4] : memref<9x64xf32, #tpu.memory_space<vmem>>, vector<9x64xf32>
    %cst = arith.constant dense<0.000000e+00> : vector<16x64xf32>
    %3 = tpu.matmul %1, %2, %cst {dimension_numbers = #tpu.dot_dimension_numbers<[1], [0], [0], [1], [0, 0, 1, 1], [], []>} : vector<16x9xf32>, vector<9x64xf32>, vector<16x64xf32> -> vector<16x64xf32>
    %cst_5 = arith.constant dense<0.000000e+00> : vector<16x64xf32>
    %4 = tpu.matmul %0, %3, %cst_5 {dimension_numbers = #tpu.dot_dimension_numbers<[1], [0], [0], [1], [0, 0, 1, 1], [], []>} : vector<16x16xf32>, vector<16x64xf32>, vector<16x64xf32> -> vector<16x64xf32>
    %c0_6 = arith.constant 0 : index
    %c0_7 = arith.constant 0 : index
    %5 = vector.load %arg3[%c0_6, %c0_7] : memref<1x64xf32, #tpu.memory_space<vmem>>, vector<1x64xf32>
    %6 = vector.broadcast %5 : vector<1x64xf32> to vector<16x64xf32>
    %7 = arith.addf %4, %6 : vector<16x64xf32>
    %8 = math.tanh %7 : vector<16x64xf32>
    %c0_8 = arith.constant 0 : index
    %c0_9 = arith.constant 0 : index
    %9 = vector.load %arg4[%c0_8, %c0_9] : memref<64x64xf32, #tpu.memory_space<vmem>>, vector<64x64xf32>
    %cst_10 = arith.constant dense<0.000000e+00> : vector<16x64xf32>
    %10 = tpu.matmul %8, %9, %cst_10 {dimension_numbers = #tpu.dot_dimension_numbers<[1], [0], [0], [1], [0, 0, 1, 1], [], []>} : vector<16x64xf32>, vector<64x64xf32>, vector<16x64xf32> -> vector<16x64xf32>
    %cst_11 = arith.constant dense<0.000000e+00> : vector<16x64xf32>
    %11 = tpu.matmul %0, %10, %cst_11 {dimension_numbers = #tpu.dot_dimension_numbers<[1], [0], [0], [1], [0, 0, 1, 1], [], []>} : vector<16x16xf32>, vector<16x64xf32>, vector<16x64xf32> -> vector<16x64xf32>
    %c0_12 = arith.constant 0 : index
    %c0_13 = arith.constant 0 : index
    %12 = vector.load %arg5[%c0_12, %c0_13] : memref<1x64xf32, #tpu.memory_space<vmem>>, vector<1x64xf32>
    %13 = vector.broadcast %12 : vector<1x64xf32> to vector<16x64xf32>
    %14 = arith.addf %11, %13 : vector<16x64xf32>
    %15 = math.tanh %14 : vector<16x64xf32>
    %c0_14 = arith.constant 0 : index
    %c0_15 = arith.constant 0 : index
    %16 = vector.load %arg4[%c0_14, %c0_15] : memref<64x64xf32, #tpu.memory_space<vmem>>, vector<64x64xf32>
    %cst_16 = arith.constant dense<0.000000e+00> : vector<16x64xf32>
    %17 = tpu.matmul %15, %16, %cst_16 {dimension_numbers = #tpu.dot_dimension_numbers<[1], [0], [0], [1], [0, 0, 1, 1], [], []>} : vector<16x64xf32>, vector<64x64xf32>, vector<16x64xf32> -> vector<16x64xf32>
    %cst_17 = arith.constant dense<0.000000e+00> : vector<16x64xf32>
    %18 = tpu.matmul %0, %17, %cst_17 {dimension_numbers = #tpu.dot_dimension_numbers<[1], [0], [0], [1], [0, 0, 1, 1], [], []>} : vector<16x16xf32>, vector<16x64xf32>, vector<16x64xf32> -> vector<16x64xf32>
    %c0_18 = arith.constant 0 : index
    %c0_19 = arith.constant 0 : index
    %19 = vector.load %arg5[%c0_18, %c0_19] : memref<1x64xf32, #tpu.memory_space<vmem>>, vector<1x64xf32>
    %20 = vector.broadcast %19 : vector<1x64xf32> to vector<16x64xf32>
    %21 = arith.addf %18, %20 : vector<16x64xf32>
    %c0_20 = arith.constant 0 : index
    %c0_21 = arith.constant 0 : index
    %22 = vector.load %arg6[%c0_20, %c0_21] : memref<2x16xf32, #tpu.memory_space<vmem>>, vector<2x16xf32>
    %cst_22 = arith.constant dense<0.000000e+00> : vector<2xf32>
    %23 = vector.multi_reduction <add>, %22, %cst_22 [1] : vector<2x16xf32> to vector<2xf32>
    %24 = vector.shape_cast %23 : vector<2xf32> to vector<2x1xf32>
    %cst_23 = arith.constant dense<0.000000e+00> : vector<2x64xf32>
    %25 = tpu.matmul %22, %21, %cst_23 {dimension_numbers = #tpu.dot_dimension_numbers<[1], [0], [0], [1], [0, 0, 1, 1], [], []>} : vector<2x16xf32>, vector<16x64xf32>, vector<2x64xf32> -> vector<2x64xf32>
    %cst_24 = arith.constant 1.000000e+00 : f32
    %26 = vector.broadcast %cst_24 : f32 to vector<2x1xf32>
    %27 = arith.maximumf %24, %26 : vector<2x1xf32>
    %28 = vector.broadcast %27 : vector<2x1xf32> to vector<2x64xf32>
    %29 = arith.divf %25, %28 : vector<2x64xf32>
    %30 = vector.shape_cast %21 : vector<16x64xf32> to vector<1x16x64xf32>
    %c0_25 = arith.constant 0 : index
    %c0_26 = arith.constant 0 : index
    %c0_27 = arith.constant 0 : index
    %31 = vector.load %arg7[%c0_25, %c0_26, %c0_27] : memref<2x16x1xf32, #tpu.memory_space<vmem>>, vector<2x16x1xf32>
    %32 = vector.shape_cast %31 : vector<2x16x1xf32> to vector<2x16x1xf32>
    %33 = vector.broadcast %30 : vector<1x16x64xf32> to vector<2x16x64xf32>
    %34 = vector.broadcast %32 : vector<2x16x1xf32> to vector<2x16x64xf32>
    %35 = arith.addf %33, %34 : vector<2x16x64xf32>
    %cst_28 = arith.constant dense<0xFF800000> : vector<2x64xf32>
    %36 = vector.multi_reduction <maximumf>, %35, %cst_28 [1] : vector<2x16x64xf32> to vector<2x64xf32>
    %cst_29 = arith.constant 0.000000e+00 : f32
    %37 = vector.broadcast %cst_29 : f32 to vector<2x1xf32>
    %38 = arith.cmpf ogt, %24, %37 : vector<2x1xf32>
    %cst_30 = arith.constant 0.000000e+00 : f32
    %39 = vector.shape_cast %38 : vector<2x1xi1> to vector<2x1xi1>
    %40 = vector.broadcast %39 : vector<2x1xi1> to vector<2x64xi1>
    %41 = vector.broadcast %cst_30 : f32 to vector<2x64xf32>
    %42 = arith.select %40, %36, %41 : vector<2x64xi1>, vector<2x64xf32>
    %c0_31 = arith.constant 0 : index
    %c0_32 = arith.constant 0 : index
    %43 = vector.load %arg8[%c0_31, %c0_32] : memref<128x768xf32, #tpu.memory_space<vmem>>, vector<64x768xf32>
    %cst_33 = arith.constant dense<0.000000e+00> : vector<2x768xf32>
    %44 = tpu.matmul %42, %43, %cst_33 {dimension_numbers = #tpu.dot_dimension_numbers<[1], [0], [0], [1], [0, 0, 1, 1], [], []>} : vector<2x64xf32>, vector<64x768xf32>, vector<2x768xf32> -> vector<2x768xf32>
    %c64 = arith.constant 64 : index
    %c0_34 = arith.constant 0 : index
    %45 = vector.load %arg8[%c64, %c0_34] : memref<128x768xf32, #tpu.memory_space<vmem>>, vector<64x768xf32>
    %cst_35 = arith.constant dense<0.000000e+00> : vector<2x768xf32>
    %46 = tpu.matmul %29, %45, %cst_35 {dimension_numbers = #tpu.dot_dimension_numbers<[1], [0], [0], [1], [0, 0, 1, 1], [], []>} : vector<2x64xf32>, vector<64x768xf32>, vector<2x768xf32> -> vector<2x768xf32>
    %47 = arith.addf %44, %46 : vector<2x768xf32>
    %c0_36 = arith.constant 0 : index
    %c0_37 = arith.constant 0 : index
    %48 = vector.load %arg9[%c0_36, %c0_37] : memref<1x768xf32, #tpu.memory_space<vmem>>, vector<1x768xf32>
    %49 = vector.broadcast %48 : vector<1x768xf32> to vector<2x768xf32>
    %50 = arith.addf %47, %49 : vector<2x768xf32>
    %c0_38 = arith.constant 0 : index
    %c0_39 = arith.constant 0 : index
    %c0_40 = arith.constant 0 : index
    %51 = vector.load %arg10[%c0_38, %c0_39, %c0_40] : memref<2x1x768xf32, #tpu.memory_space<vmem>>, vector<2x1x768xf32>
    %52 = vector.shape_cast %51 : vector<2x1x768xf32> to vector<2x768xf32>
    %53 = vector.shape_cast %50 : vector<2x768xf32> to vector<2x1x768xf32>
    tpu.vector_store %arg10[%c0_38, %c0_39, %c0_40], %53 {strides = array<i32>} : memref<2x1x768xf32, #tpu.memory_space<vmem>>, vector<2x1x768xf32>,
    return
  }
}

module attributes {stable_mosaic.version = 11 : i64} {
  func.func @_cnn_cbam_head_kernel(%arg0: i32, %arg1: memref<1x1x768xf32, #tpu.memory_space<vmem>>, %arg2: memref<1x1x768xf32, #tpu.memory_space<vmem>>, %arg3: memref<32x6xbf16, #tpu.memory_space<vmem>>, %arg4: memref<32x1xf32, #tpu.memory_space<vmem>>, %arg5: memref<32x96xbf16, #tpu.memory_space<vmem>>, %arg6: memref<32x1xf32, #tpu.memory_space<vmem>>, %arg7: memref<32x96xbf16, #tpu.memory_space<vmem>>, %arg8: memref<32x1xf32, #tpu.memory_space<vmem>>, %arg9: memref<16x32xf32, #tpu.memory_space<vmem>>, %arg10: memref<32x16xf32, #tpu.memory_space<vmem>>, %arg11: memref<7xf32, #tpu.memory_space<smem>>, %arg12: memref<768x1024xbf16, #tpu.memory_space<vmem>>, %arg13: memref<32x1024xf32, #tpu.memory_space<vmem>>, %arg14: memref<1024x32xf32, #tpu.memory_space<vmem>>, %arg15: memref<1x32xf32, #tpu.memory_space<vmem>>, %arg16: memref<32x32xf32, #tpu.memory_space<vmem>>, %arg17: memref<1x32xf32, #tpu.memory_space<vmem>>, %arg18: memref<32x1xf32, #tpu.memory_space<vmem>>, %arg19: memref<1x1xf32, #tpu.memory_space<vmem>>, %arg20: memref<1x1x1xf32, #tpu.memory_space<vmem>>, %arg21: memref<96x768xf32, #tpu.memory_space<vmem>>) attributes {dimension_semantics = [#tpu.dimension_semantics<parallel>], iteration_bounds = array<i64: 2>, scalar_prefetch = 0 : i64, scratch_operands = 1 : i64, tpu.core_type = #tpu.core_type<tc>, window_params = [{transform_indices = @transform_0, window_bounds = array<i64: 1, 1, 768>}, {transform_indices = @transform_1, window_bounds = array<i64: 1, 1, 768>}, {pipeline_mode = #tpu.pipeline_mode<synchronous>, transform_indices = @transform_2, window_bounds = array<i64: 32, 6>}, {pipeline_mode = #tpu.pipeline_mode<synchronous>, transform_indices = @transform_3, window_bounds = array<i64: 32, 1>}, {pipeline_mode = #tpu.pipeline_mode<synchronous>, transform_indices = @transform_4, window_bounds = array<i64: 32, 96>}, {pipeline_mode = #tpu.pipeline_mode<synchronous>, transform_indices = @transform_5, window_bounds = array<i64: 32, 1>}, {pipeline_mode = #tpu.pipeline_mode<synchronous>, transform_indices = @transform_6, window_bounds = array<i64: 32, 96>}, {pipeline_mode = #tpu.pipeline_mode<synchronous>, transform_indices = @transform_7, window_bounds = array<i64: 32, 1>}, {pipeline_mode = #tpu.pipeline_mode<synchronous>, transform_indices = @transform_8, window_bounds = array<i64: 16, 32>}, {pipeline_mode = #tpu.pipeline_mode<synchronous>, transform_indices = @transform_9, window_bounds = array<i64: 32, 16>}, {transform_indices = @transform_10, window_bounds = array<i64: 7>}, {pipeline_mode = #tpu.pipeline_mode<synchronous>, transform_indices = @transform_11, window_bounds = array<i64: 768, 1024>}, {pipeline_mode = #tpu.pipeline_mode<synchronous>, transform_indices = @transform_12, window_bounds = array<i64: 32, 1024>}, {pipeline_mode = #tpu.pipeline_mode<synchronous>, transform_indices = @transform_13, window_bounds = array<i64: 1024, 32>}, {pipeline_mode = #tpu.pipeline_mode<synchronous>, transform_indices = @transform_14, window_bounds = array<i64: 1, 32>}, {pipeline_mode = #tpu.pipeline_mode<synchronous>, transform_indices = @transform_15, window_bounds = array<i64: 32, 32>}, {pipeline_mode = #tpu.pipeline_mode<synchronous>, transform_indices = @transform_16, window_bounds = array<i64: 1, 32>}, {pipeline_mode = #tpu.pipeline_mode<synchronous>, transform_indices = @transform_17, window_bounds = array<i64: 32, 1>}, {pipeline_mode = #tpu.pipeline_mode<synchronous>, transform_indices = @transform_18, window_bounds = array<i64: 1, 1>}, {transform_indices = @transform_19, window_bounds = array<i64: 1, 1, 1>}]} {
    %0 = tpu.iota {dimensions = array<i32: 1>} : vector<1x768xi32>
    %c0_i32 = arith.constant 0 : i32
    %1 = vector.broadcast %c0_i32 : i32 to vector<1x768xi32>
    %2 = arith.cmpi sgt, %0, %1 : vector<1x768xi32>
    %3 = arith.extui %2 : vector<1x768xi1> to vector<1x768xi32>
    %4 = arith.sitofp %3 : vector<1x768xi32> to vector<1x768xf32>
    %c767_i32 = arith.constant 767 : i32
    %5 = vector.broadcast %c767_i32 : i32 to vector<1x768xi32>
    %6 = arith.cmpi slt, %0, %5 : vector<1x768xi32>
    %7 = arith.extui %6 : vector<1x768xi1> to vector<1x768xi32>
    %8 = arith.sitofp %7 : vector<1x768xi32> to vector<1x768xf32>
    %c0 = arith.constant 0 : index
    %c0_0 = arith.constant 0 : index
    %c0_1 = arith.constant 0 : index
    %9 = vector.load %arg1[%c0, %c0_0, %c0_1] : memref<1x1x768xf32, #tpu.memory_space<vmem>>, vector<1x1x768xf32>
    %10 = vector.shape_cast %9 : vector<1x1x768xf32> to vector<1x768xf32>
    %c0_2 = arith.constant 0 : index
    %c0_3 = arith.constant 0 : index
    %c0_4 = arith.constant 0 : index
    %11 = vector.load %arg2[%c0_2, %c0_3, %c0_4] : memref<1x1x768xf32, #tpu.memory_space<vmem>>, vector<1x1x768xf32>
    %12 = vector.shape_cast %11 : vector<1x1x768xf32> to vector<1x768xf32>
    %c1_i32 = arith.constant 1 : i32
    %13 = tpu.dynamic_rotate %10 by %c1_i32 dim 1 : vector<1x768xf32>, i32 -> vector<1x768xf32>
    %14 = arith.mulf %13, %4 : vector<1x768xf32>
    %c0_5 = arith.constant 0 : index
    %c0_6 = arith.constant 0 : index
    %15 = vector.load %arg21[%c0_5, %c0_6] : memref<96x768xf32, #tpu.memory_space<vmem>>, vector<1x768xf32>
    tpu.vector_store %arg21[%c0_5, %c0_6], %14 {strides = array<i32>} : memref<96x768xf32, #tpu.memory_space<vmem>>, vector<1x768xf32>,
    %c1_i32_7 = arith.constant 1 : i32
    %16 = tpu.dynamic_rotate %12 by %c1_i32_7 dim 1 : vector<1x768xf32>, i32 -> vector<1x768xf32>
    %17 = arith.mulf %16, %4 : vector<1x768xf32>
    %c1 = arith.constant 1 : index
    %c0_8 = arith.constant 0 : index
    %18 = vector.load %arg21[%c1, %c0_8] : memref<96x768xf32, #tpu.memory_space<vmem>>, vector<1x768xf32>
    tpu.vector_store %arg21[%c1, %c0_8], %17 {strides = array<i32>} : memref<96x768xf32, #tpu.memory_space<vmem>>, vector<1x768xf32>,
    %c2 = arith.constant 2 : index
    %c0_9 = arith.constant 0 : index
    %19 = vector.load %arg21[%c2, %c0_9] : memref<96x768xf32, #tpu.memory_space<vmem>>, vector<1x768xf32>
    tpu.vector_store %arg21[%c2, %c0_9], %10 {strides = array<i32>} : memref<96x768xf32, #tpu.memory_space<vmem>>, vector<1x768xf32>,
    %c3 = arith.constant 3 : index
    %c0_10 = arith.constant 0 : index
    %20 = vector.load %arg21[%c3, %c0_10] : memref<96x768xf32, #tpu.memory_space<vmem>>, vector<1x768xf32>
    tpu.vector_store %arg21[%c3, %c0_10], %12 {strides = array<i32>} : memref<96x768xf32, #tpu.memory_space<vmem>>, vector<1x768xf32>,
    %c767_i32_11 = arith.constant 767 : i32
    %21 = tpu.dynamic_rotate %10 by %c767_i32_11 dim 1 : vector<1x768xf32>, i32 -> vector<1x768xf32>
    %22 = arith.mulf %21, %8 : vector<1x768xf32>
    %c4 = arith.constant 4 : index
    %c0_12 = arith.constant 0 : index
    %23 = vector.load %arg21[%c4, %c0_12] : memref<96x768xf32, #tpu.memory_space<vmem>>, vector<1x768xf32>
    tpu.vector_store %arg21[%c4, %c0_12], %22 {strides = array<i32>} : memref<96x768xf32, #tpu.memory_space<vmem>>, vector<1x768xf32>,
    %c767_i32_13 = arith.constant 767 : i32
    %24 = tpu.dynamic_rotate %12 by %c767_i32_13 dim 1 : vector<1x768xf32>, i32 -> vector<1x768xf32>
    %25 = arith.mulf %24, %8 : vector<1x768xf32>
    %c5 = arith.constant 5 : index
    %c0_14 = arith.constant 0 : index
    %26 = vector.load %arg21[%c5, %c0_14] : memref<96x768xf32, #tpu.memory_space<vmem>>, vector<1x768xf32>
    tpu.vector_store %arg21[%c5, %c0_14], %25 {strides = array<i32>} : memref<96x768xf32, #tpu.memory_space<vmem>>, vector<1x768xf32>,
    %c0_15 = arith.constant 0 : index
    %c0_16 = arith.constant 0 : index
    %27 = vector.load %arg3[%c0_15, %c0_16] : memref<32x6xbf16, #tpu.memory_space<vmem>>, vector<32x6xbf16>
    %c0_17 = arith.constant 0 : index
    %c0_18 = arith.constant 0 : index
    %28 = vector.load %arg21[%c0_17, %c0_18] : memref<96x768xf32, #tpu.memory_space<vmem>>, vector<6x768xf32>
    %29 = arith.truncf %28 : vector<6x768xf32> to vector<6x768xbf16>
    %cst = arith.constant dense<0.000000e+00> : vector<32x768xf32>
    %30 = tpu.matmul %27, %29, %cst {dimension_numbers = #tpu.dot_dimension_numbers<[1], [0], [0], [1], [0, 0, 1, 1], [], []>} : vector<32x6xbf16>, vector<6x768xbf16>, vector<32x768xf32> -> vector<32x768xf32>
    %c0_19 = arith.constant 0 : index
    %c0_20 = arith.constant 0 : index
    %31 = vector.load %arg4[%c0_19, %c0_20] : memref<32x1xf32, #tpu.memory_space<vmem>>, vector<32x1xf32>
    %32 = vector.broadcast %31 : vector<32x1xf32> to vector<32x768xf32>
    %33 = arith.addf %30, %32 : vector<32x768xf32>
    %c1_i32_21 = arith.constant 1 : i32
    %34 = tpu.dynamic_rotate %33 by %c1_i32_21 dim 1 : vector<32x768xf32>, i32 -> vector<32x768xf32>
    %35 = vector.broadcast %4 : vector<1x768xf32> to vector<32x768xf32>
    %36 = arith.mulf %34, %35 : vector<32x768xf32>
    %c767_i32_22 = arith.constant 767 : i32
    %37 = tpu.dynamic_rotate %33 by %c767_i32_22 dim 1 : vector<32x768xf32>, i32 -> vector<32x768xf32>
    %38 = vector.broadcast %8 : vector<1x768xf32> to vector<32x768xf32>
    %39 = arith.mulf %37, %38 : vector<32x768xf32>
    %c0_23 = arith.constant 0 : index
    %c0_24 = arith.constant 0 : index
    %40 = vector.load %arg21[%c0_23, %c0_24] : memref<96x768xf32, #tpu.memory_space<vmem>>, vector<32x768xf32>
    tpu.vector_store %arg21[%c0_23, %c0_24], %36 {strides = array<i32>} : memref<96x768xf32, #tpu.memory_space<vmem>>, vector<32x768xf32>,
    %c32 = arith.constant 32 : index
    %c0_25 = arith.constant 0 : index
    %41 = vector.load %arg21[%c32, %c0_25] : memref<96x768xf32, #tpu.memory_space<vmem>>, vector<32x768xf32>
    tpu.vector_store %arg21[%c32, %c0_25], %33 {strides = array<i32>} : memref<96x768xf32, #tpu.memory_space<vmem>>, vector<32x768xf32>,
    %c64 = arith.constant 64 : index
    %c0_26 = arith.constant 0 : index
    %42 = vector.load %arg21[%c64, %c0_26] : memref<96x768xf32, #tpu.memory_space<vmem>>, vector<32x768xf32>
    tpu.vector_store %arg21[%c64, %c0_26], %39 {strides = array<i32>} : memref<96x768xf32, #tpu.memory_space<vmem>>, vector<32x768xf32>,
    %c0_27 = arith.constant 0 : index
    %c0_28 = arith.constant 0 : index
    %43 = vector.load %arg21[%c0_27, %c0_28] : memref<96x768xf32, #tpu.memory_space<vmem>>, vector<96x768xf32>
    %44 = arith.truncf %43 : vector<96x768xf32> to vector<96x768xbf16>
    %c0_29 = arith.constant 0 : index
    %c0_30 = arith.constant 0 : index
    %45 = vector.load %arg5[%c0_29, %c0_30] : memref<32x96xbf16, #tpu.memory_space<vmem>>, vector<32x96xbf16>
    %cst_31 = arith.constant dense<0.000000e+00> : vector<32x768xf32>
    %46 = tpu.matmul %45, %44, %cst_31 {dimension_numbers = #tpu.dot_dimension_numbers<[1], [0], [0], [1], [0, 0, 1, 1], [], []>} : vector<32x96xbf16>, vector<96x768xbf16>, vector<32x768xf32> -> vector<32x768xf32>
    %c0_32 = arith.constant 0 : index
    %c0_33 = arith.constant 0 : index
    %47 = vector.load %arg6[%c0_32, %c0_33] : memref<32x1xf32, #tpu.memory_space<vmem>>, vector<32x1xf32>
    %48 = vector.broadcast %47 : vector<32x1xf32> to vector<32x768xf32>
    %49 = arith.addf %46, %48 : vector<32x768xf32>
    %c1_i32_34 = arith.constant 1 : i32
    %50 = tpu.dynamic_rotate %49 by %c1_i32_34 dim 1 : vector<32x768xf32>, i32 -> vector<32x768xf32>
    %51 = vector.broadcast %4 : vector<1x768xf32> to vector<32x768xf32>
    %52 = arith.mulf %50, %51 : vector<32x768xf32>
    %c767_i32_35 = arith.constant 767 : i32
    %53 = tpu.dynamic_rotate %49 by %c767_i32_35 dim 1 : vector<32x768xf32>, i32 -> vector<32x768xf32>
    %54 = vector.broadcast %8 : vector<1x768xf32> to vector<32x768xf32>
    %55 = arith.mulf %53, %54 : vector<32x768xf32>
    %c0_36 = arith.constant 0 : index
    %c0_37 = arith.constant 0 : index
    %56 = vector.load %arg21[%c0_36, %c0_37] : memref<96x768xf32, #tpu.memory_space<vmem>>, vector<32x768xf32>
    tpu.vector_store %arg21[%c0_36, %c0_37], %52 {strides = array<i32>} : memref<96x768xf32, #tpu.memory_space<vmem>>, vector<32x768xf32>,
    %c32_38 = arith.constant 32 : index
    %c0_39 = arith.constant 0 : index
    %57 = vector.load %arg21[%c32_38, %c0_39] : memref<96x768xf32, #tpu.memory_space<vmem>>, vector<32x768xf32>
    tpu.vector_store %arg21[%c32_38, %c0_39], %49 {strides = array<i32>} : memref<96x768xf32, #tpu.memory_space<vmem>>, vector<32x768xf32>,
    %c64_40 = arith.constant 64 : index
    %c0_41 = arith.constant 0 : index
    %58 = vector.load %arg21[%c64_40, %c0_41] : memref<96x768xf32, #tpu.memory_space<vmem>>, vector<32x768xf32>
    tpu.vector_store %arg21[%c64_40, %c0_41], %55 {strides = array<i32>} : memref<96x768xf32, #tpu.memory_space<vmem>>, vector<32x768xf32>,
    %c0_42 = arith.constant 0 : index
    %c0_43 = arith.constant 0 : index
    %59 = vector.load %arg21[%c0_42, %c0_43] : memref<96x768xf32, #tpu.memory_space<vmem>>, vector<96x768xf32>
    %60 = arith.truncf %59 : vector<96x768xf32> to vector<96x768xbf16>
    %c0_44 = arith.constant 0 : index
    %c0_45 = arith.constant 0 : index
    %61 = vector.load %arg7[%c0_44, %c0_45] : memref<32x96xbf16, #tpu.memory_space<vmem>>, vector<32x96xbf16>
    %cst_46 = arith.constant dense<0.000000e+00> : vector<32x768xf32>
    %62 = tpu.matmul %61, %60, %cst_46 {dimension_numbers = #tpu.dot_dimension_numbers<[1], [0], [0], [1], [0, 0, 1, 1], [], []>} : vector<32x96xbf16>, vector<96x768xbf16>, vector<32x768xf32> -> vector<32x768xf32>
    %c0_47 = arith.constant 0 : index
    %c0_48 = arith.constant 0 : index
    %63 = vector.load %arg8[%c0_47, %c0_48] : memref<32x1xf32, #tpu.memory_space<vmem>>, vector<32x1xf32>
    %64 = vector.broadcast %63 : vector<32x1xf32> to vector<32x768xf32>
    %65 = arith.addf %62, %64 : vector<32x768xf32>
    %cst_49 = arith.constant dense<0xFF800000> : vector<32xf32>
    %66 = vector.multi_reduction <maximumf>, %65, %cst_49 [1] : vector<32x768xf32> to vector<32xf32>
    %67 = vector.shape_cast %66 : vector<32xf32> to vector<32x1xf32>
    %cst_50 = arith.constant dense<0.000000e+00> : vector<32xf32>
    %68 = vector.multi_reduction <add>, %65, %cst_50 [1] : vector<32x768xf32> to vector<32xf32>
    %69 = vector.shape_cast %68 : vector<32xf32> to vector<32x1xf32>
    %cst_51 = arith.constant 7.680000e+02 : f32
    %70 = vector.broadcast %cst_51 : f32 to vector<32x1xf32>
    %71 = arith.divf %69, %70 : vector<32x1xf32>
    %c0_52 = arith.constant 0 : index
    %c0_53 = arith.constant 0 : index
    %72 = vector.load %arg9[%c0_52, %c0_53] : memref<16x32xf32, #tpu.memory_space<vmem>>, vector<16x32xf32>
    %c0_54 = arith.constant 0 : index
    %c0_55 = arith.constant 0 : index
    %73 = vector.load %arg10[%c0_54, %c0_55] : memref<32x16xf32, #tpu.memory_space<vmem>>, vector<32x16xf32>
    %cst_56 = arith.constant dense<0.000000e+00> : vector<16x1xf32>
    %74 = tpu.matmul %72, %67, %cst_56 {dimension_numbers = #tpu.dot_dimension_numbers<[1], [0], [0], [1], [0, 0, 1, 1], [], []>} : vector<16x32xf32>, vector<32x1xf32>, vector<16x1xf32> -> vector<16x1xf32>
    %cst_57 = arith.constant dense<0.000000e+00> : vector<32x1xf32>
    %75 = tpu.matmul %73, %74, %cst_57 {dimension_numbers = #tpu.dot_dimension_numbers<[1], [0], [0], [1], [0, 0, 1, 1], [], []>} : vector<32x16xf32>, vector<16x1xf32>, vector<32x1xf32> -> vector<32x1xf32>
    %cst_58 = arith.constant 0.000000e+00 : f32
    %76 = vector.broadcast %cst_58 : f32 to vector<32x1xf32>
    %77 = arith.maximumf %75, %76 : vector<32x1xf32>
    %cst_59 = arith.constant dense<0.000000e+00> : vector<16x1xf32>
    %78 = tpu.matmul %72, %71, %cst_59 {dimension_numbers = #tpu.dot_dimension_numbers<[1], [0], [0], [1], [0, 0, 1, 1], [], []>} : vector<16x32xf32>, vector<32x1xf32>, vector<16x1xf32> -> vector<16x1xf32>
    %cst_60 = arith.constant dense<0.000000e+00> : vector<32x1xf32>
    %79 = tpu.matmul %73, %78, %cst_60 {dimension_numbers = #tpu.dot_dimension_numbers<[1], [0], [0], [1], [0, 0, 1, 1], [], []>} : vector<32x16xf32>, vector<16x1xf32>, vector<32x1xf32> -> vector<32x1xf32>
    %cst_61 = arith.constant 0.000000e+00 : f32
    %80 = vector.broadcast %cst_61 : f32 to vector<32x1xf32>
    %81 = arith.maximumf %79, %80 : vector<32x1xf32>
    %82 = arith.addf %77, %81 : vector<32x1xf32>
    %cst_62 = arith.constant 0.000000e+00 : f32
    %83 = vector.broadcast %cst_62 : f32 to vector<32x1xf32>
    %84 = arith.subf %83, %82 : vector<32x1xf32>
    %85 = math.exp %84 : vector<32x1xf32>
    %cst_63 = arith.constant 1.000000e+00 : f32
    %86 = vector.broadcast %cst_63 : f32 to vector<32x1xf32>
    %87 = arith.addf %86, %85 : vector<32x1xf32>
    %cst_64 = arith.constant 1.000000e+00 : f32
    %88 = vector.broadcast %cst_64 : f32 to vector<32x1xf32>
    %89 = arith.divf %88, %87 : vector<32x1xf32>
    %90 = vector.broadcast %89 : vector<32x1xf32> to vector<32x768xf32>
    %91 = arith.mulf %65, %90 : vector<32x768xf32>
    %cst_65 = arith.constant dense<0.000000e+00> : vector<768xf32>
    %92 = vector.multi_reduction <add>, %91, %cst_65 [0] : vector<32x768xf32> to vector<768xf32>
    %93 = vector.shape_cast %92 : vector<768xf32> to vector<1x768xf32>
    %cst_66 = arith.constant 3.200000e+01 : f32
    %94 = vector.broadcast %cst_66 : f32 to vector<1x768xf32>
    %95 = arith.divf %93, %94 : vector<1x768xf32>
    %cst_67 = arith.constant dense<0xFF800000> : vector<768xf32>
    %96 = vector.multi_reduction <maximumf>, %91, %cst_67 [0] : vector<32x768xf32> to vector<768xf32>
    %97 = vector.shape_cast %96 : vector<768xf32> to vector<1x768xf32>
    %c1_i32_68 = arith.constant 1 : i32
    %98 = tpu.dynamic_rotate %95 by %c1_i32_68 dim 1 : vector<1x768xf32>, i32 -> vector<1x768xf32>
    %99 = arith.mulf %98, %4 : vector<1x768xf32>
    %c767_i32_69 = arith.constant 767 : i32
    %100 = tpu.dynamic_rotate %95 by %c767_i32_69 dim 1 : vector<1x768xf32>, i32 -> vector<1x768xf32>
    %101 = arith.mulf %100, %8 : vector<1x768xf32>
    %c1_i32_70 = arith.constant 1 : i32
    %102 = tpu.dynamic_rotate %97 by %c1_i32_70 dim 1 : vector<1x768xf32>, i32 -> vector<1x768xf32>
    %103 = arith.mulf %102, %4 : vector<1x768xf32>
    %c767_i32_71 = arith.constant 767 : i32
    %104 = tpu.dynamic_rotate %97 by %c767_i32_71 dim 1 : vector<1x768xf32>, i32 -> vector<1x768xf32>
    %105 = arith.mulf %104, %8 : vector<1x768xf32>
    %c0_72 = arith.constant 0 : index
    %106 = memref.load %arg11[%c0_72] : memref<7xf32, #tpu.memory_space<smem>>
    %107 = vector.broadcast %106 : f32 to vector<1x768xf32>
    %108 = arith.mulf %107, %99 : vector<1x768xf32>
    %c1_73 = arith.constant 1 : index
    %109 = memref.load %arg11[%c1_73] : memref<7xf32, #tpu.memory_space<smem>>
    %110 = vector.broadcast %109 : f32 to vector<1x768xf32>
    %111 = arith.mulf %110, %95 : vector<1x768xf32>
    %112 = arith.addf %108, %111 : vector<1x768xf32>
    %c2_74 = arith.constant 2 : index
    %113 = memref.load %arg11[%c2_74] : memref<7xf32, #tpu.memory_space<smem>>
    %114 = vector.broadcast %113 : f32 to vector<1x768xf32>
    %115 = arith.mulf %114, %101 : vector<1x768xf32>
    %116 = arith.addf %112, %115 : vector<1x768xf32>
    %c3_75 = arith.constant 3 : index
    %117 = memref.load %arg11[%c3_75] : memref<7xf32, #tpu.memory_space<smem>>
    %118 = vector.broadcast %117 : f32 to vector<1x768xf32>
    %119 = arith.mulf %118, %103 : vector<1x768xf32>
    %120 = arith.addf %116, %119 : vector<1x768xf32>
    %c4_76 = arith.constant 4 : index
    %121 = memref.load %arg11[%c4_76] : memref<7xf32, #tpu.memory_space<smem>>
    %122 = vector.broadcast %121 : f32 to vector<1x768xf32>
    %123 = arith.mulf %122, %97 : vector<1x768xf32>
    %124 = arith.addf %120, %123 : vector<1x768xf32>
    %c5_77 = arith.constant 5 : index
    %125 = memref.load %arg11[%c5_77] : memref<7xf32, #tpu.memory_space<smem>>
    %126 = vector.broadcast %125 : f32 to vector<1x768xf32>
    %127 = arith.mulf %126, %105 : vector<1x768xf32>
    %128 = arith.addf %124, %127 : vector<1x768xf32>
    %c6 = arith.constant 6 : index
    %129 = memref.load %arg11[%c6] : memref<7xf32, #tpu.memory_space<smem>>
    %130 = vector.broadcast %129 : f32 to vector<1x768xf32>
    %131 = arith.addf %128, %130 : vector<1x768xf32>
    %cst_78 = arith.constant 0.000000e+00 : f32
    %132 = vector.broadcast %cst_78 : f32 to vector<1x768xf32>
    %133 = arith.subf %132, %131 : vector<1x768xf32>
    %134 = math.exp %133 : vector<1x768xf32>
    %cst_79 = arith.constant 1.000000e+00 : f32
    %135 = vector.broadcast %cst_79 : f32 to vector<1x768xf32>
    %136 = arith.addf %135, %134 : vector<1x768xf32>
    %cst_80 = arith.constant 1.000000e+00 : f32
    %137 = vector.broadcast %cst_80 : f32 to vector<1x768xf32>
    %138 = arith.divf %137, %136 : vector<1x768xf32>
    %139 = vector.broadcast %138 : vector<1x768xf32> to vector<32x768xf32>
    %140 = arith.mulf %91, %139 : vector<32x768xf32>
    %c767_i32_81 = arith.constant 767 : i32
    %141 = tpu.dynamic_rotate %140 by %c767_i32_81 dim 1 : vector<32x768xf32>, i32 -> vector<32x768xf32>
    %142 = arith.maximumf %140, %141 : vector<32x768xf32>
    %143 = arith.truncf %142 : vector<32x768xf32> to vector<32x768xbf16>
    %c0_82 = arith.constant 0 : index
    %c0_83 = arith.constant 0 : index
    %144 = vector.load %arg12[%c0_82, %c0_83] : memref<768x1024xbf16, #tpu.memory_space<vmem>>, vector<768x1024xbf16>
    %cst_84 = arith.constant dense<0.000000e+00> : vector<32x1024xf32>
    %145 = tpu.matmul %143, %144, %cst_84 {dimension_numbers = #tpu.dot_dimension_numbers<[1], [0], [0], [1], [0, 0, 1, 1], [], []>} : vector<32x768xbf16>, vector<768x1024xbf16>, vector<32x1024xf32> -> vector<32x1024xf32>
    %c0_85 = arith.constant 0 : index
    %c0_86 = arith.constant 0 : index
    %146 = vector.load %arg13[%c0_85, %c0_86] : memref<32x1024xf32, #tpu.memory_space<vmem>>, vector<32x1024xf32>
    %147 = arith.mulf %145, %146 : vector<32x1024xf32>
    %cst_87 = arith.constant dense<0.000000e+00> : vector<1024xf32>
    %148 = vector.multi_reduction <add>, %147, %cst_87 [0] : vector<32x1024xf32> to vector<1024xf32>
    %149 = vector.shape_cast %148 : vector<1024xf32> to vector<1x1024xf32>
    %c0_88 = arith.constant 0 : index
    %c0_89 = arith.constant 0 : index
    %150 = vector.load %arg14[%c0_88, %c0_89] : memref<1024x32xf32, #tpu.memory_space<vmem>>, vector<1024x32xf32>
    %cst_90 = arith.constant dense<0.000000e+00> : vector<1x32xf32>
    %151 = tpu.matmul %149, %150, %cst_90 {dimension_numbers = #tpu.dot_dimension_numbers<[1], [0], [0], [1], [0, 0, 1, 1], [], []>} : vector<1x1024xf32>, vector<1024x32xf32>, vector<1x32xf32> -> vector<1x32xf32>
    %c0_91 = arith.constant 0 : index
    %c0_92 = arith.constant 0 : index
    %152 = vector.load %arg15[%c0_91, %c0_92] : memref<1x32xf32, #tpu.memory_space<vmem>>, vector<1x32xf32>
    %153 = arith.addf %151, %152 : vector<1x32xf32>
    %cst_93 = arith.constant 0.000000e+00 : f32
    %154 = vector.broadcast %cst_93 : f32 to vector<1x32xf32>
    %155 = arith.maximumf %153, %154 : vector<1x32xf32>
    %156 = math.absf %153 : vector<1x32xf32>
    %cst_94 = arith.constant 0.000000e+00 : f32
    %157 = vector.broadcast %cst_94 : f32 to vector<1x32xf32>
    %158 = arith.subf %157, %156 : vector<1x32xf32>
    %159 = math.exp %158 : vector<1x32xf32>
    %cst_95 = arith.constant 1.000000e+00 : f32
    %160 = vector.broadcast %cst_95 : f32 to vector<1x32xf32>
    %161 = arith.addf %160, %159 : vector<1x32xf32>
    %162 = math.log %161 : vector<1x32xf32>
    %163 = arith.addf %155, %162 : vector<1x32xf32>
    %c0_96 = arith.constant 0 : index
    %c0_97 = arith.constant 0 : index
    %164 = vector.load %arg16[%c0_96, %c0_97] : memref<32x32xf32, #tpu.memory_space<vmem>>, vector<32x32xf32>
    %cst_98 = arith.constant dense<0.000000e+00> : vector<1x32xf32>
    %165 = tpu.matmul %163, %164, %cst_98 {dimension_numbers = #tpu.dot_dimension_numbers<[1], [0], [0], [1], [0, 0, 1, 1], [], []>} : vector<1x32xf32>, vector<32x32xf32>, vector<1x32xf32> -> vector<1x32xf32>
    %c0_99 = arith.constant 0 : index
    %c0_100 = arith.constant 0 : index
    %166 = vector.load %arg17[%c0_99, %c0_100] : memref<1x32xf32, #tpu.memory_space<vmem>>, vector<1x32xf32>
    %167 = arith.addf %165, %166 : vector<1x32xf32>
    %cst_101 = arith.constant 0.000000e+00 : f32
    %168 = vector.broadcast %cst_101 : f32 to vector<1x32xf32>
    %169 = arith.maximumf %167, %168 : vector<1x32xf32>
    %170 = math.absf %167 : vector<1x32xf32>
    %cst_102 = arith.constant 0.000000e+00 : f32
    %171 = vector.broadcast %cst_102 : f32 to vector<1x32xf32>
    %172 = arith.subf %171, %170 : vector<1x32xf32>
    %173 = math.exp %172 : vector<1x32xf32>
    %cst_103 = arith.constant 1.000000e+00 : f32
    %174 = vector.broadcast %cst_103 : f32 to vector<1x32xf32>
    %175 = arith.addf %174, %173 : vector<1x32xf32>
    %176 = math.log %175 : vector<1x32xf32>
    %177 = arith.addf %169, %176 : vector<1x32xf32>
    %c0_104 = arith.constant 0 : index
    %c0_105 = arith.constant 0 : index
    %178 = vector.load %arg18[%c0_104, %c0_105] : memref<32x1xf32, #tpu.memory_space<vmem>>, vector<32x1xf32>
    %cst_106 = arith.constant dense<0.000000e+00> : vector<1x1xf32>
    %179 = tpu.matmul %177, %178, %cst_106 {dimension_numbers = #tpu.dot_dimension_numbers<[1], [0], [0], [1], [0, 0, 1, 1], [], []>} : vector<1x32xf32>, vector<32x1xf32>, vector<1x1xf32> -> vector<1x1xf32>
    %c0_107 = arith.constant 0 : index
    %c0_108 = arith.constant 0 : index
    %180 = vector.load %arg19[%c0_107, %c0_108] : memref<1x1xf32, #tpu.memory_space<vmem>>, vector<1x1xf32>
    %181 = arith.addf %179, %180 : vector<1x1xf32>
    %cst_109 = arith.constant 0.000000e+00 : f32
    %182 = vector.broadcast %cst_109 : f32 to vector<1x1xf32>
    %183 = arith.maximumf %181, %182 : vector<1x1xf32>
    %184 = math.absf %181 : vector<1x1xf32>
    %cst_110 = arith.constant 0.000000e+00 : f32
    %185 = vector.broadcast %cst_110 : f32 to vector<1x1xf32>
    %186 = arith.subf %185, %184 : vector<1x1xf32>
    %187 = math.exp %186 : vector<1x1xf32>
    %cst_111 = arith.constant 1.000000e+00 : f32
    %188 = vector.broadcast %cst_111 : f32 to vector<1x1xf32>
    %189 = arith.addf %188, %187 : vector<1x1xf32>
    %190 = math.log %189 : vector<1x1xf32>
    %191 = arith.addf %183, %190 : vector<1x1xf32>
    %c0_112 = arith.constant 0 : index
    %c0_113 = arith.constant 0 : index
    %c0_114 = arith.constant 0 : index
    %192 = vector.load %arg20[%c0_112, %c0_113, %c0_114] : memref<1x1x1xf32, #tpu.memory_space<vmem>>, vector<1x1x1xf32>
    %193 = vector.shape_cast %192 : vector<1x1x1xf32> to vector<1x1xf32>
    %194 = vector.shape_cast %191 : vector<1x1xf32> to vector<1x1x1xf32>
    tpu.vector_store %arg20[%c0_112, %c0_113, %c0_114], %194 {strides = array<i32>} : memref<1x1x1xf32, #tpu.memory_space<vmem>>, vector<1x1x1xf32>,
    return
  }
  func.func @transform_0(%arg0: i32) -> (i32, i32, i32) {
    %c0_i32 = arith.constant 0 : i32
    %c0_i32_0 = arith.constant 0 : i32
    %c0_i32_1 = arith.constant 0 : i32
    return %arg0, %c0_i32, %c0_i32_0 : i32, i32, i32
  }
  func.func @transform_1(%arg0: i32) -> (i32, i32, i32) {
    %c0_i32 = arith.constant 0 : i32
    %c0_i32_0 = arith.constant 0 : i32
    %c0_i32_1 = arith.constant 0 : i32
    return %arg0, %c0_i32, %c0_i32_0 : i32, i32, i32
  }
  func.func @transform_2(%arg0: i32) -> (i32, i32) {
    %c0_i32 = arith.constant 0 : i32
    %c0_i32_0 = arith.constant 0 : i32
    %c0_i32_1 = arith.constant 0 : i32
    return %c0_i32, %c0_i32_0 : i32, i32
  }
  func.func @transform_3(%arg0: i32) -> (i32, i32) {
    %c0_i32 = arith.constant 0 : i32
    %c0_i32_0 = arith.constant 0 : i32
    %c0_i32_1 = arith.constant 0 : i32
    return %c0_i32, %c0_i32_0 : i32, i32
  }
  func.func @transform_4(%arg0: i32) -> (i32, i32) {
    %c0_i32 = arith.constant 0 : i32
    %c0_i32_0 = arith.constant 0 : i32
    %c0_i32_1 = arith.constant 0 : i32
    return %c0_i32, %c0_i32_0 : i32, i32
  }
  func.func @transform_5(%arg0: i32) -> (i32, i32) {
    %c0_i32 = arith.constant 0 : i32
    %c0_i32_0 = arith.constant 0 : i32
    %c0_i32_1 = arith.constant 0 : i32
    return %c0_i32, %c0_i32_0 : i32, i32
  }
  func.func @transform_6(%arg0: i32) -> (i32, i32) {
    %c0_i32 = arith.constant 0 : i32
    %c0_i32_0 = arith.constant 0 : i32
    %c0_i32_1 = arith.constant 0 : i32
    return %c0_i32, %c0_i32_0 : i32, i32
  }
  func.func @transform_7(%arg0: i32) -> (i32, i32) {
    %c0_i32 = arith.constant 0 : i32
    %c0_i32_0 = arith.constant 0 : i32
    %c0_i32_1 = arith.constant 0 : i32
    return %c0_i32, %c0_i32_0 : i32, i32
  }
  func.func @transform_8(%arg0: i32) -> (i32, i32) {
    %c0_i32 = arith.constant 0 : i32
    %c0_i32_0 = arith.constant 0 : i32
    %c0_i32_1 = arith.constant 0 : i32
    return %c0_i32, %c0_i32_0 : i32, i32
  }
  func.func @transform_9(%arg0: i32) -> (i32, i32) {
    %c0_i32 = arith.constant 0 : i32
    %c0_i32_0 = arith.constant 0 : i32
    %c0_i32_1 = arith.constant 0 : i32
    return %c0_i32, %c0_i32_0 : i32, i32
  }
  func.func @transform_10(%arg0: i32) -> i32 {
    %c0_i32 = arith.constant 0 : i32
    %c0_i32_0 = arith.constant 0 : i32
    return %c0_i32 : i32
  }
  func.func @transform_11(%arg0: i32) -> (i32, i32) {
    %c0_i32 = arith.constant 0 : i32
    %c0_i32_0 = arith.constant 0 : i32
    %c0_i32_1 = arith.constant 0 : i32
    return %c0_i32, %c0_i32_0 : i32, i32
  }
  func.func @transform_12(%arg0: i32) -> (i32, i32) {
    %c0_i32 = arith.constant 0 : i32
    %c0_i32_0 = arith.constant 0 : i32
    %c0_i32_1 = arith.constant 0 : i32
    return %c0_i32, %c0_i32_0 : i32, i32
  }
  func.func @transform_13(%arg0: i32) -> (i32, i32) {
    %c0_i32 = arith.constant 0 : i32
    %c0_i32_0 = arith.constant 0 : i32
    %c0_i32_1 = arith.constant 0 : i32
    return %c0_i32, %c0_i32_0 : i32, i32
  }
  func.func @transform_14(%arg0: i32) -> (i32, i32) {
    %c0_i32 = arith.constant 0 : i32
    %c0_i32_0 = arith.constant 0 : i32
    %c0_i32_1 = arith.constant 0 : i32
    return %c0_i32, %c0_i32_0 : i32, i32
  }
  func.func @transform_15(%arg0: i32) -> (i32, i32) {
    %c0_i32 = arith.constant 0 : i32
    %c0_i32_0 = arith.constant 0 : i32
    %c0_i32_1 = arith.constant 0 : i32
    return %c0_i32, %c0_i32_0 : i32, i32
  }
  func.func @transform_16(%arg0: i32) -> (i32, i32) {
    %c0_i32 = arith.constant 0 : i32
    %c0_i32_0 = arith.constant 0 : i32
    %c0_i32_1 = arith.constant 0 : i32
    return %c0_i32, %c0_i32_0 : i32, i32
  }
  func.func @transform_17(%arg0: i32) -> (i32, i32) {
    %c0_i32 = arith.constant 0 : i32
    %c0_i32_0 = arith.constant 0 : i32
    %c0_i32_1 = arith.constant 0 : i32
    return %c0_i32, %c0_i32_0 : i32, i32
  }
  func.func @transform_18(%arg0: i32) -> (i32, i32) {
    %c0_i32 = arith.constant 0 : i32
    %c0_i32_0 = arith.constant 0 : i32
    %c0_i32_1 = arith.constant 0 : i32
    return %c0_i32, %c0_i32_0 : i32, i32
  }
  func.func @transform_19(%arg0: i32) -> (i32, i32, i32) {
    %c0_i32 = arith.constant 0 : i32
    %c0_i32_0 = arith.constant 0 : i32
    %c0_i32_1 = arith.constant 0 : i32
    return %arg0, %c0_i32, %c0_i32_0 : i32, i32, i32
  }
}

</mosaic_0001>

<bundles_post_ra>
// kernel: gcn_forward.2
= control target key start
LH: loop header
LB: loop body
LE: loop exit
PB: predicated region body
PF: predicated region fallthrough
CT: control target
= control target key end

     0   :  { %15 = vsyncpa [#allocation3], 0  ;;  %s1916_s0 = inlined_call_operand.vmem [shape: f32[16,16], index: 0, kind: input, shape index: {}]   ;;  %s1917_s1 = inlined_call_operand.hbm [shape: f32[16,9], index: 1, kind: input, shape index: {}]   ;;  %s1918_s2 = inlined_call_operand.hbm [shape: f32[9,64], index: 2, kind: input, shape index: {}]   ;;  %s1919_s3 = inlined_call_operand.hbm [shape: f32[1,64], index: 3, kind: input, shape index: {}]   ;;  %s1920_s4 = inlined_call_operand.hbm [shape: f32[64,64], index: 4, kind: input, shape index: {}]   ;;  %s1921_s5 = inlined_call_operand.hbm [shape: f32[1,64], index: 5, kind: input, shape index: {}]   ;;  %s1922_s6 = inlined_call_operand.vmem [shape: f32[2,16], index: 6, kind: input, shape index: {}]   ;;  %s1923_s7 = inlined_call_operand.vmem [shape: f32[2,16,1], index: 7, kind: input, shape index: {}]   ;;  %s1924_s8 = inlined_call_operand.hbm [shape: f32[128,768], index: 8, kind: input, shape index: {}]   ;;  %s1925_s9 = inlined_call_operand.hbm [shape: f32[1,768], index: 9, kind: input, shape index: {}]   ;;  %s1926_s10 = inlined_call_operand.vmem [shape: f32[2,1,768], index: 10, kind: output, shape index: {}]  }
   0x1   :  { %16 = vsyncpa [#allocation5], 0 }
   0x2   :  { %17 = vsyncpa [#allocation8], 0 }
   0x3   :  { %18 = vsyncpa [#allocation11], 0  ;;  %s1727_s13 = smov [#allocation4]   ;;  %s1728_s15 = smov [#allocation7]  }
   0x4   :  { %s38_s14 = sshll.u32 %s1727_s13, 4  ;;  %s60_s16 = sshll.u32 %s1728_s15, 4  ;;  %s39_s14 = int_to_ptr.vmem [resolvable:$true] %s38_s14  ;;  %s61_s16 = int_to_ptr.vmem [resolvable:$true] %s60_s16 }
   0x5   :  { %s1587_s17 = scalar_lea.vmem %s39_s14, 256  ;;  %p1592_p1 = scmp.lt.s32.totalorder %s39_s14, %s39_s14 }
   0x6   :  { %p1588_p0 = scmp.ne.s32.totalorder %s39_s14, %s1587_s17  ;;  %p1593_p2 = scmp.lt.s32.totalorder %s1587_s17, %s1587_s17 }
   0x8   :  { %p1594_p3 = por %p1593_p2, %p1592_p1 }
   0xa   :  { %p1595_p4 = pnand %p1594_p3, %p1588_p0 }
   0xc   :  { %1598 = shalt.err (!%p1595_p4)
}
   0xd   :  { %s1729_s18 = smov 128   ;;  %s1730_s19 = smov 8  }
   0xe   :  { %44 = dma.hbm_to_vmem [thread:$0]  %s1918_s2, 256, %s39_s14, [#allocation5], %s1729_s18, %s1729_s18, %s1730_s19  }
   0xf   :  { %s1607_s22 = scalar_lea.vmem %s61_s16, 1024  ;;  %p1612_p6 = scmp.lt.s32.totalorder %s61_s16, %s61_s16 }
  0x10   :  { %p1608_p5 = scmp.ne.s32.totalorder %s61_s16, %s1607_s22  ;;  %p1613_p7 = scmp.lt.s32.totalorder %s1607_s22, %s1607_s22 }
  0x12   :  { %p1614_p8 = por %p1613_p7, %p1612_p6 }
  0x14   :  { %p1615_p9 = pnand %p1614_p8, %p1608_p5 }
  0x16   :  { %1618 = shalt.err (!%p1615_p9)
}
  0x17   :  { %66 = dma.hbm_to_vmem [thread:$0]  %s1920_s4, 1024, %s61_s16, [#allocation8], %s1729_s18, %s1729_s18, %s1730_s19  }
  0x18   :  { %s1731_s25 = smov [#allocation10]  }
  0x19   :  { %s86_s26 = sshll.u32 %s1731_s25, 4  ;;  %s87_s26 = int_to_ptr.vmem [resolvable:$true] %s86_s26 }
  0x1a   :  { %s1627_s27 = scalar_lea.vmem %s87_s26, 12288  ;;  %p1632_p11 = scmp.lt.s32.totalorder %s87_s26, %s87_s26 }
  0x1b   :  { %p1628_p10 = scmp.ne.s32.totalorder %s87_s26, %s1627_s27  ;;  %p1633_p12 = scmp.lt.s32.totalorder %s1627_s27, %s1627_s27 }
  0x1d   :  { %p1634_p13 = por %p1633_p12, %p1632_p11 }
  0x1f   :  { %p1635_p0 = pnand %p1634_p13, %p1628_p10 }
  0x21   :  { %1638 = shalt.err (!%p1635_p0)
}
  0x22   :  { %s1732_s2 = smov 768   ;;  %s1733_s28 = smov 48  }
  0x23   :  { %92 = dma.hbm_to_vmem [thread:$0]  %s1924_s8, 12288, %s87_s26, [#allocation11], %s1732_s2, %s1732_s2, %s1733_s28  }
  0x24   :  { %s1734_s11 = smov [#allocation2]   ;;  %s1735_s4 = smov [#allocation6]  }
  0x25   :  { %s26_s12 = sshll.u32 %s1734_s11, 4  ;;  %s51_s13 = sshll.u32 %s1735_s4, 4  ;;  %s27_s12 = int_to_ptr.vmem [resolvable:$true] %s26_s12  ;;  %s52_s13 = int_to_ptr.vmem [resolvable:$true] %s51_s13 }
  0x26   :  { %s1647_s14 = scalar_lea.vmem %s27_s12, 256  ;;  %p1652_p2 = scmp.lt.s32.totalorder %s27_s12, %s27_s12 }
  0x27   :  { %p1648_p1 = scmp.ne.s32.totalorder %s27_s12, %s1647_s14  ;;  %p1653_p3 = scmp.lt.s32.totalorder %s1647_s14, %s1647_s14 }
  0x29   :  { %p1654_p4 = por %p1653_p3, %p1652_p2 }
  0x2b   :  { %p1655_p5 = pnand %p1654_p4, %p1648_p1 }
  0x2d   :  { %1658 = shalt.err (!%p1655_p5)
}
  0x2e   :  { %32 = dma.hbm_to_vmem [thread:$0]  %s1917_s1, 256, %s27_s12, [#allocation3], %s1729_s18, %s1729_s18, %s1730_s19  }
  0x2f   :  { %s1667_s8 = scalar_lea.vmem %s52_s13, 16  ;;  %s1671_s17 = scalar_lea.vmem %s52_s13, 32 }
  0x30   :  { %p1668_p6 = scmp.ne.s32.totalorder %s52_s13, %s1667_s8  ;;  %p1672_p7 = scmp.lt.s32.totalorder %s52_s13, %s52_s13 }
  0x31   :  { %p1673_p8 = scmp.lt.s32.totalorder %s1671_s17, %s1667_s8 }
  0x33   :  { %p1674_p9 = por %p1673_p8, %p1672_p7 }
  0x35   :  { %p1675_p10 = pnand %p1674_p9, %p1668_p6 }
  0x37   :  { %1678 = shalt.err (!%p1675_p10)
}
  0x38   :  { %54 = dma.hbm_to_vmem [thread:$0]  %s1919_s3, 16, %s52_s13, [#allocation5]  }
  0x39   :  { %s1736_s22 = smov [#allocation9]   ;;  %s1737_s24 = smov [#allocation12]  }
  0x3a   :  { %s73_s23 = sshll.u32 %s1736_s22, 4  ;;  %s99_s25 = sshll.u32 %s1737_s24, 4  ;;  %s74_s23 = int_to_ptr.vmem [resolvable:$true] %s73_s23  ;;  %s100_s25 = int_to_ptr.vmem [resolvable:$true] %s99_s25 }
  0x3b   :  { %s1687_s26 = scalar_lea.vmem %s74_s23, 16  ;;  %s1691_s1 = scalar_lea.vmem %s74_s23, 32 }
  0x3c   :  { %p1688_p11 = scmp.ne.s32.totalorder %s74_s23, %s1687_s26  ;;  %p1692_p12 = scmp.lt.s32.totalorder %s74_s23, %s74_s23 }
  0x3d   :  { %p1693_p13 = scmp.lt.s32.totalorder %s1691_s1, %s1687_s26 }
  0x3f   :  { %p1694_p0 = por %p1693_p13, %p1692_p12 }
  0x41   :  { %p1695_p1 = pnand %p1694_p0, %p1688_p11 }
  0x43   :  { %1698 = shalt.err (!%p1695_p1)
}
  0x44   :  { %76 = dma.hbm_to_vmem [thread:$0]  %s1921_s5, 16, %s74_s23, [#allocation8]  }
  0x45   :  { %s1707_s27 = scalar_lea.vmem %s100_s25, 96  ;;  %p1712_p3 = scmp.lt.s32.totalorder %s100_s25, %s100_s25 }
  0x46   :  { %p1708_p2 = scmp.ne.s32.totalorder %s100_s25, %s1707_s27  ;;  %p1713_p4 = scmp.lt.s32.totalorder %s1707_s27, %s1707_s27 }
  0x48   :  { %p1714_p5 = por %p1713_p4, %p1712_p3 }
  0x4a   :  { %p1715_p6 = pnand %p1714_p5, %p1708_p2 }
  0x4c   :  { %1718 = shalt.err (!%p1715_p6)
}
  0x4d   :  { %102 = dma.hbm_to_vmem [thread:$0]  %s1925_s9, 96, %s100_s25, [#allocation11]  }
  0x4e   :  { %1719 = dma.done.wait [#allocation3], 256  }
  0x4f   :  { %1720 = vsyncadd [#allocation3], 4294967040 }
  0x50   :  { %1721 = dma.done.wait [#allocation5], 272  }
  0x51   :  { %1722 = vsyncadd [#allocation5], 4294967024 }
  0x52   :  { %1723 = dma.done.wait [#allocation8], 1040  }
  0x53   :  { %1724 = vsyncadd [#allocation8], 4294966256 }
  0x54   :  { %1725 = dma.done.wait [#allocation11], 12384  }
  0x55   :  { %1726 = vsyncadd [#allocation11], 4294954912  ;;  %vm137_vm0 = vcmask 1040384   ;;  %vm130_vm1 = vcmask 72704   ;;  %v129_v0 = vld [vmem:[#allocation4 + $0x8] sm:$0x1] }
  0x56   :  { %v128_v1 = vld [vmem:[#allocation4] sm:$0xff]  ;;  %v126_v2 = vld [vmem:[#allocation2] sm:$0xff]  ;;  %1479 = vmatprep.subr.msk.mxu0 %vm137_vm0, %v129_v0  ;;  %v127_v3 = vld [vmem:[#allocation2 + $0x8] sm:$0xff]  ;;  %vm223_vm2 = vcmask 130048   ;;  %vm315_vm3 = vcmask 523264   ;;  %vm638_vm4 = vcmask 123904  }
  0x57   :  { %1483 = vmatprep.mubr.msk.f32.mxu0 %vm130_vm1, %v126_v2  ;;  %1480 = vmatpush3.msk.msra.mxu0 %vm137_vm0, %v129_v0  ;;  %v124_v4 = vld [vmem:[%s1916_s0] sm:$0xff]  ;;  %v1834_v7 = vld [vmem:[%s1916_s0 + $0x8] sm:$0xff]  ;;  %v313_v9 = vld [vmem:[#allocation7 + $0x30] sm:$0xff]  ;;  %v1738_v35 = vmov 0   ;;  %v1739_v41 = vmov 0.0   ;;  %vm1740_vm5 = vmmov 0  }
  0x58   :  { %1481 = vmatprep.subr.mxu0 %v128_v1  ;;  %1490 = vmatprep.mubr.msk.f32.mxu1 %vm223_vm2, %v124_v4  ;;  %v314_v8 = vld [vmem:[#allocation7 + $0x38] sm:$0xff]  ;;  %v312_v10 = vld [vmem:[#allocation7 + $0x28] sm:$0xff]  ;;  %v311_v11 = vld [vmem:[#allocation7 + $0x20] sm:$0xff]  ;;  %vm769_vm6 = vcmask 1041409  }
  0x59   :  { %1482 = vmatpush3.msra.mxu0 %v128_v1  ;;  %v310_v12 = vld [vmem:[#allocation7 + $0x18] sm:$0xff]  ;;  %v309_v13 = vld [vmem:[#allocation7 + $0x10] sm:$0xff]  ;;  %v308_v14 = vld [vmem:[#allocation7 + $0x8] sm:$0xff]  ;;  %1568 = vset.pattern.permute.xlu1 %v1738_v35 }
  0x5a   :  { %1484 = vmatmul.mubr.msk.f32.vlgmr.msra.gmra.mxu0 %vm130_vm1, %v127_v3  ;;  %1493 = vmatprep.subr.mxu0 %v314_v8  ;;  %v307_v15 = vld [vmem:[#allocation7] sm:$0xff]  ;;  %v1421_v16 = vld [vmem:[#allocation6] ss:$0 sm:$0xff]  ;;  %v720_v36 = vld [vmem:[%s1923_s7 + $0x10] sm:$0xff] }
  0x5b   :  { %1494 = vmatpush3.msra.mxu0 %v314_v8  ;;  %v1844_v25 = vld [vmem:[#allocation9] ss:$0 sm:$0xff]  ;;  %v1853_v32 = vld [vmem:[%s1922_s6] sm:$0x3]  ;;  %v719_v33 = vld [vmem:[%s1923_s7 + $0x8] sm:$0xff]  ;;  %1567 = vset.pattern.permute.xlu0 %v1738_v35 }
  0x5c   :  { %1495 = vmatprep.subr.mxu0 %v313_v9  ;;  %v639_v34 = vsel %vm638_vm4, %v1853_v32, 0.0  ;;  %729 = vperm.xlu1 %1568, %v719_v33   ;;  %v721_v37 = vld [vmem:[%s1923_s7 + $0x18] sm:$0xff]  ;;  %v718_v38 = vld [vmem:[%s1923_s7] sm:$0xff]  ;;  %v858_v44 = vld [vmem:[#allocation10 + $0x2a8] sm:$0xff] }
  0x5d   :  { %1496 = vmatpush3.msra.mxu0 %v313_v9  ;;  %640 = vadd.xlane.f32.xlu0 %v639_v34  ;;  %v864_v42 = vld [vmem:[#allocation10 + $0x2d8] sm:$0xff]  ;;  %v863_v43 = vld [vmem:[#allocation10 + $0x2d0] sm:$0xff]  ;;  %v857_v45 = vld [vmem:[#allocation10 + $0x2a0] sm:$0xff] }
  0x5e   :  { %1497 = vmatprep.subr.mxu0 %v312_v10  ;;  %v852_v46 = vld [vmem:[#allocation10 + $0x278] sm:$0xff]  ;;  %v851_v47 = vld [vmem:[#allocation10 + $0x270] sm:$0xff]  ;;  %v846_v48 = vld [vmem:[#allocation10 + $0x248] sm:$0xff] }
  0x5f   :  { %1498 = vmatpush3.msra.mxu0 %v312_v10  ;;  %v845_v49 = vld [vmem:[#allocation10 + $0x240] sm:$0xff]  ;;  %v840_v50 = vld [vmem:[#allocation10 + $0x218] sm:$0xff]  ;;  %v839_v51 = vld [vmem:[#allocation10 + $0x210] sm:$0xff] }
  0x60   :  { %1499 = vmatprep.subr.mxu0 %v311_v11  ;;  %734 = vperm.xlu1 %1568, %v720_v36   ;;  %v834_v52 = vld [vmem:[#allocation10 + $0x1e8] sm:$0xff]  ;;  %v833_v53 = vld [vmem:[#allocation10 + $0x1e0] sm:$0xff]  ;;  %v828_v54 = vld [vmem:[#allocation10 + $0x1b8] sm:$0xff] }
  0x61   :  { %1500 = vmatpush3.msra.mxu0 %v311_v11  ;;  %v827_v55 = vld [vmem:[#allocation10 + $0x1b0] sm:$0xff]  ;;  %v866_v3 = vld [vmem:[#allocation10 + $0x2e8] sm:$0xff] }
  0x62   :  { %1501 = vmatprep.subr.mxu0 %v310_v12 }
  0x63   :  { %1502 = vmatpush3.msra.mxu0 %v310_v12 }
  0x64   :  { %1503 = vmatprep.subr.mxu0 %v309_v13  ;;  %739 = vperm.xlu1 %1568, %v721_v37  }
  0x65   :  { %1504 = vmatpush3.msra.mxu0 %v309_v13 }
  0x66   :  { %1505 = vmatprep.subr.mxu0 %v308_v14 }
  0x67   :  { %1506 = vmatpush3.msra.mxu0 %v308_v14 }
  0x68   :  { %1507 = vmatprep.subr.mxu0 %v307_v15 }
  0x69   :  { %1508 = vmatpush3.msra.mxu0 %v307_v15 }
  0x73   :  { %724 = vperm.xlu0 %1567, %v718_v38   ;;  %v822_v38 = vld [vmem:[#allocation10 + $0x188] sm:$0xff] }
  0xd7   :  { %v730_v56 = vpop.permute.xlu1 %729 }
  0xdb   :  { %v735_v57 = vpop.permute.xlu1 %734 }
  0xdf   :  { %v740_v60 = vpop.permute.xlu1 %739 }
  0xe6   :  { %v1873_v58 = vpop.xlane.xlu0 %640 }
  0xe7   :  { %vm764_vm7 = vcmp.gt.f32.partialorder %v1873_v58, 0.0 }
  0xee   :  { %v725_v63 = vpop.permute.xlu0 %724 }
 0x11a   :  { %v1485_v5 = vpop.f32.mrf.mxu0 }
 0x11b   :  { %1486 = vmatprep.subr.mxu1 %v1485_v5 }
 0x11c   :  { %v207_v6 = vpop.f32.mrf.mxu0  ;;  %1487 = vmatpush3.msra.mxu1 %v1485_v5 }
 0x11d   :  { %1488 = vmatprep.subr.mxu1 %v207_v6 }
 0x11e   :  { %1489 = vmatpush3.msra.mxu1 %v207_v6 }
 0x11f   :  { %1491 = vmatmul.mubr.msk.f32.vlgmr.msra.gmra.mxu1 %vm223_vm2, %v1834_v7 }
 0x120   :  { %1516 = vmatprep.mubr.msk.f32.mxu1 %vm223_vm2, %v124_v4 }
 0x1df   :  { %v1492_v17 = vpop.f32.mrf.mxu1 }
 0x1e0   :  { %v302_v18 = vadd.f32 %v1492_v17, %v1421_v16  ;;  %v848_v17 = vld [vmem:[#allocation10 + $0x258] sm:$0xff] }
 0x1e1   :  { %v296_v19 = vpop.f32.mrf.mxu1 }
 0x1e2   :  { %v297_v20 = vadd.f32 %v1421_v16, %v296_v19  ;;  %v853_v16 = vld [vmem:[#allocation10 + $0x280] sm:$0xff] }
 0x1e4   :  { %1569 = vtanh.f32 %v297_v20  ;;  %v847_v20 = vld [vmem:[#allocation10 + $0x250] sm:$0xff] }
 0x1e5   :  { %1571 = vtanh.f32 %v302_v18 }
 0x1f1   :  { %v1570_v21 = vpop.eup %1569 }
 0x1f2   :  { %v1572_v22 = vpop.eup %1571  ;;  %1509 = vmatprep.mubr.msk.f32.mxu0 %vm315_vm3, %v1570_v21  ;;  %v842_v21 = vld [vmem:[#allocation10 + $0x228] sm:$0xff] }
 0x1f3   :  { %1510 = vmatmul.mubr.msk.f32.vlgmr.msra.gmra.mxu0 %vm315_vm3, %v1572_v22 }
 0x1f4   :  { %1542 = vmatprep.mubr.msk.f32.mxu0 %vm223_vm2, %v124_v4  ;;  %v865_v4 = vld [vmem:[#allocation10 + $0x2e0] sm:$0xff] }
 0x2b3   :  { %v1511_v23 = vpop.f32.mrf.mxu0 }
 0x2b4   :  { %1512 = vmatprep.subr.mxu1 %v1511_v23 }
 0x2b5   :  { %v388_v24 = vpop.f32.mrf.mxu0  ;;  %1513 = vmatpush3.msra.mxu1 %v1511_v23 }
 0x2b6   :  { %1514 = vmatprep.subr.mxu1 %v388_v24 }
 0x2b7   :  { %1515 = vmatpush3.msra.mxu1 %v388_v24  ;;  %v841_v24 = vld [vmem:[#allocation10 + $0x220] sm:$0xff] }
 0x2b8   :  { %1517 = vmatmul.mubr.msk.f32.vlgmr.msra.gmra.mxu1 %vm223_vm2, %v1834_v7  ;;  %1519 = vmatprep.subr.mxu1 %v314_v8 }
 0x2b9   :  { %1520 = vmatpush3.msra.mxu1 %v314_v8  ;;  %v859_v8 = vld [vmem:[#allocation10 + $0x2b0] sm:$0xff] }
 0x2ba   :  { %1521 = vmatprep.subr.mxu1 %v313_v9 }
 0x2bb   :  { %1522 = vmatpush3.msra.mxu1 %v313_v9 }
 0x2bc   :  { %1523 = vmatprep.subr.mxu1 %v312_v10 }
 0x2bd   :  { %1524 = vmatpush3.msra.mxu1 %v312_v10 }
 0x2be   :  { %1525 = vmatprep.subr.mxu1 %v311_v11 }
 0x2bf   :  { %1526 = vmatpush3.msra.mxu1 %v311_v11 }
 0x2c0   :  { %1527 = vmatprep.subr.mxu1 %v310_v12 }
 0x2c1   :  { %1528 = vmatpush3.msra.mxu1 %v310_v12 }
 0x2c2   :  { %1529 = vmatprep.subr.mxu1 %v309_v13 }
 0x2c3   :  { %1530 = vmatpush3.msra.mxu1 %v309_v13  ;;  %v854_v13 = vld [vmem:[#allocation10 + $0x288] sm:$0xff] }
 0x2c4   :  { %1531 = vmatprep.subr.mxu1 %v308_v14 }
 0x2c5   :  { %1532 = vmatpush3.msra.mxu1 %v308_v14 }
 0x2c6   :  { %1533 = vmatprep.subr.mxu1 %v307_v15 }
 0x2c7   :  { %1534 = vmatpush3.msra.mxu1 %v307_v15 }
 0x2c8   :  { %888 = vmatprep.subr.mxu1 %v864_v42  ;;  %v823_v42 = vld [vmem:[#allocation10 + $0x190] sm:$0xff] }
 0x378   :  { %v1518_v26 = vpop.f32.mrf.mxu1 }
 0x379   :  { %v476_v27 = vadd.f32 %v1518_v26, %v1844_v25 }
 0x37a   :  { %v470_v28 = vpop.f32.mrf.mxu1 }
 0x37b   :  { %v471_v29 = vadd.f32 %v1844_v25, %v470_v28  ;;  %v835_v28 = vld [vmem:[#allocation10 + $0x1f0] sm:$0xff] }
 0x37d   :  { %1573 = vtanh.f32 %v471_v29  ;;  %v830_v29 = vld [vmem:[#allocation10 + $0x1c8] sm:$0xff] }
 0x37e   :  { %1575 = vtanh.f32 %v476_v27 }
 0x38a   :  { %v1574_v30 = vpop.eup %1573 }
 0x38b   :  { %v1576_v31 = vpop.eup %1575  ;;  %1535 = vmatprep.mubr.msk.f32.mxu1 %vm315_vm3, %v1574_v30 }
 0x38c   :  { %1536 = vmatmul.mubr.msk.f32.vlgmr.msra.gmra.mxu1 %vm315_vm3, %v1576_v31 }
 0x38d   :  { %936 = vmatprep.mubr.f32.mxu1 %v1739_v41  ;;  %889 = vmatpush1.msra.mxu1 %v863_v43  ;;  %v868_v43 = vld [vmem:[#allocation10 + $0x2f8] sm:$0xff] }
 0x38e   :  { %890 = vmatprep.subr.mxu1 %v858_v44  ;;  %v816_v44 = vld [vmem:[#allocation10 + $0x158] sm:$0xff] }
 0x38f   :  { %891 = vmatpush1.msra.mxu1 %v857_v45  ;;  %v715_v45 = vmax.f32 %v1873_v58, 1.0  ;;  %v812_v58 = vld [vmem:[#allocation10 + $0x138] sm:$0xff] }
 0x390   :  { %892 = vmatprep.subr.mxu1 %v852_v46 }
 0x391   :  { %893 = vmatpush1.msra.mxu1 %v851_v47  ;;  %1577 = vrcp.f32 %v715_v45  ;;  %v783_v45 = vld [vmem:[#allocation10 + $0x50] sm:$0xff] }
 0x392   :  { %894 = vmatprep.subr.mxu1 %v846_v48 }
 0x393   :  { %895 = vmatpush1.msra.mxu1 %v845_v49  ;;  %v867_v49 = vld [vmem:[#allocation10 + $0x2f0] sm:$0xff] }
 0x394   :  { %896 = vmatprep.subr.mxu1 %v840_v50  ;;  %v815_v50 = vld [vmem:[#allocation10 + $0x150] sm:$0xff] }
 0x395   :  { %897 = vmatpush1.msra.mxu1 %v839_v51 }
 0x396   :  { %898 = vmatprep.subr.mxu1 %v834_v52  ;;  %v862_v52 = vld [vmem:[#allocation10 + $0x2c8] sm:$0xff] }
 0x397   :  { %899 = vmatpush1.msra.mxu1 %v833_v53  ;;  %v810_v53 = vld [vmem:[#allocation10 + $0x128] sm:$0xff] }
 0x398   :  { %900 = vmatprep.subr.mxu1 %v828_v54  ;;  %v861_v54 = vld [vmem:[#allocation10 + $0x2c0] sm:$0xff] }
 0x399   :  { %901 = vmatpush1.msra.mxu1 %v827_v55  ;;  %v809_v55 = vld [vmem:[#allocation10 + $0x120] sm:$0xff] }
 0x39a   :  { %902 = vmatprep.subr.mxu1 %v822_v38  ;;  %v790_v38 = vld [vmem:[#allocation10 + $0x88] sm:$0xff] }
 0x39e   :  { %v1578_v46 = vpop.eup %1577 }
 0x44c   :  { %v1537_v39 = vpop.f32.mrf.mxu1 }
 0x44d   :  { %1538 = vmatprep.subr.mxu0 %v1537_v39 }
 0x44e   :  { %v553_v40 = vpop.f32.mrf.mxu1  ;;  %1539 = vmatpush3.msra.mxu0 %v1537_v39  ;;  %v824_v39 = vld [vmem:[#allocation10 + $0x198] sm:$0xff] }
 0x44f   :  { %1540 = vmatprep.subr.mxu0 %v553_v40 }
 0x450   :  { %1541 = vmatpush3.msra.mxu0 %v553_v40  ;;  %v821_v40 = vld [vmem:[#allocation10 + $0x180] sm:$0xff] }
 0x451   :  { %1543 = vmatmul.mubr.msk.f32.vlgmr.msra.gmra.mxu0 %vm223_vm2, %v1834_v7  ;;  %1545 = vmatprep.subr.mxu0 %v1739_v41  ;;  %v860_v7 = vld [vmem:[#allocation10 + $0x2b8] sm:$0xff] }
 0x452   :  { %1549 = vmatprep.mubr.msk.f32.mxu0 %vm1740_vm5, %v1739_v41  ;;  %903 = vmatpush1.msra.mxu1 %v821_v40  ;;  %v789_v40 = vld [vmem:[#allocation10 + $0x80] sm:$0xff] }
 0x453   :  { %1030 = vmatprep.subr.mxu1 %v868_v43  ;;  %v784_v43 = vld [vmem:[#allocation10 + $0x58] sm:$0xff] }
 0x511   :  { %v1544_v59 = vpop.f32.mrf.mxu0 }
 0x512   :  { %v634_v61 = vadd.f32 %v1544_v59, %v1844_v25  ;;  %v855_v59 = vld [vmem:[#allocation10 + $0x290] sm:$0xff] }
 0x513   :  { %v628_v62 = vpop.f32.mrf.mxu0 }
 0x514   :  { %v743_v0 = vadd.f32 %v730_v56, %v634_v61  ;;  %v745_v1 = vadd.f32 %v740_v60, %v634_v61  ;;  %v629_v2 = vadd.f32 %v1844_v25, %v628_v62  ;;  %1546 = vmatpush3.msra.mxu0 %v634_v61  ;;  %v836_v25 = vld [vmem:[#allocation10 + $0x1f8] sm:$0xff]  ;;  %v803_v60 = vld [vmem:[#allocation10 + $0xf0] sm:$0xff]  ;;  %v850_v61 = vld [vmem:[#allocation10 + $0x268] sm:$0xff] }
 0x515   :  { %1547 = vmatprep.subr.mxu0 %v1739_v41  ;;  %v856_v56 = vld [vmem:[#allocation10 + $0x298] sm:$0xff]  ;;  %v798_v62 = vld [vmem:[#allocation10 + $0xc8] sm:$0xff] }
 0x516   :  { %v744_v5 = vadd.f32 %v735_v57, %v629_v2  ;;  %v742_v6 = vadd.f32 %v725_v63, %v629_v2  ;;  %1548 = vmatpush3.msra.mxu0 %v629_v2  ;;  %v756_v9 = vsel %vm315_vm3, %v745_v1, -inf  ;;  %v747_v12 = vsel %vm315_vm3, %v743_v0, -inf  ;;  %v804_v57 = vld [vmem:[#allocation10 + $0xf8] sm:$0xff]  ;;  %v849_v63 = vld [vmem:[#allocation10 + $0x260] sm:$0xff] }
 0x517   :  { %1550 = vmatmul.mubr.msk.f32.vlgmr.msra.gmra.mxu0 %vm223_vm2, %v1853_v32  ;;  %959 = vmatprep.subr.mxu0 %v866_v3  ;;  %v829_v32 = vld [vmem:[#allocation10 + $0x1c0] sm:$0xff]  ;;  %v844_v1 = vld [vmem:[#allocation10 + $0x238] sm:$0xff]  ;;  %v843_v3 = vld [vmem:[#allocation10 + $0x230] sm:$0xff] }
 0x518   :  { %v755_v10 = vsel %vm315_vm3, %v744_v5, -inf  ;;  %v746_v11 = vsel %vm315_vm3, %v742_v6, -inf  ;;  %960 = vmatpush1.msra.mxu0 %v865_v4  ;;  %1007 = vmatprep.mubr.f32.mxu0 %v1739_v41  ;;  %v797_v0 = vld [vmem:[#allocation10 + $0xc0] sm:$0xff]  ;;  %v792_v2 = vld [vmem:[#allocation10 + $0x98] sm:$0xff]  ;;  %v791_v4 = vld [vmem:[#allocation10 + $0x90] sm:$0xff] }
 0x519   :  { %v757_v14 = vmax.f32 %v755_v10, %v756_v9  ;;  %v748_v15 = vmax.f32 %v746_v11, %v747_v12  ;;  %961 = vmatprep.subr.mxu0 %v860_v7  ;;  %v838_v5 = vld [vmem:[#allocation10 + $0x208] sm:$0xff]  ;;  %v837_v7 = vld [vmem:[#allocation10 + $0x200] sm:$0xff]  ;;  %v832_v9 = vld [vmem:[#allocation10 + $0x1d8] sm:$0xff] }
 0x51a   :  { %962 = vmatpush1.msra.mxu0 %v859_v8  ;;  %v786_v6 = vld [vmem:[#allocation10 + $0x68] sm:$0xff]  ;;  %v785_v8 = vld [vmem:[#allocation10 + $0x60] sm:$0xff]  ;;  %v780_v10 = vld [vmem:[#allocation10 + $0x38] sm:$0xff] }
 0x51b   :  { %v758_v18 = vrot.slane %v757_v14, 4  ;;  %v749_v19 = vrot.slane %v748_v15, 4  ;;  %963 = vmatprep.subr.mxu0 %v854_v13  ;;  %v831_v11 = vld [vmem:[#allocation10 + $0x1d0] sm:$0xff]  ;;  %v826_v13 = vld [vmem:[#allocation10 + $0x1a8] sm:$0xff] }
 0x51c   :  { %964 = vmatpush1.msra.mxu0 %v853_v16  ;;  %v779_v12 = vld [vmem:[#allocation10 + $0x30] sm:$0xff]  ;;  %v773_v16 = vld [vmem:[#allocation10] sm:$0xff] }
 0x51d   :  { %v759_v22 = vmax.f32 %v757_v14, %v758_v18  ;;  %v750_v23 = vmax.f32 %v748_v15, %v749_v19  ;;  %965 = vmatprep.subr.mxu0 %v848_v17  ;;  %v774_v14 = vld [vmem:[#allocation10 + $0x8] sm:$0xff]  ;;  %v825_v15 = vld [vmem:[#allocation10 + $0x1a0] sm:$0xff]  ;;  %v820_v18 = vld [vmem:[#allocation10 + $0x178] sm:$0xff] }
 0x51e   :  { %966 = vmatpush1.msra.mxu0 %v847_v20  ;;  %v818_v17 = vld [vmem:[#allocation10 + $0x168] sm:$0xff]  ;;  %v817_v20 = vld [vmem:[#allocation10 + $0x160] sm:$0xff] }
 0x51f   :  { %v760_v26 = vrot.slane %v759_v22, 2  ;;  %v751_v27 = vrot.slane %v750_v23, 2  ;;  %967 = vmatprep.subr.mxu0 %v842_v21  ;;  %v819_v21 = vld [vmem:[#allocation10 + $0x170] sm:$0xff] }
 0x520   :  { %968 = vmatpush1.msra.mxu0 %v841_v24  ;;  %v813_v24 = vld [vmem:[#allocation10 + $0x140] sm:$0xff] }
 0x521   :  { %v761_v30 = vmax.f32 %v759_v22, %v760_v26  ;;  %v752_v31 = vmax.f32 %v750_v23, %v751_v27  ;;  %969 = vmatprep.subr.mxu0 %v836_v25  ;;  %v814_v22 = vld [vmem:[#allocation10 + $0x148] sm:$0xff]  ;;  %v811_v23 = vld [vmem:[#allocation10 + $0x130] sm:$0xff]  ;;  %v808_v26 = vld [vmem:[#allocation10 + $0x118] sm:$0xff] }
 0x522   :  { %970 = vmatpush1.msra.mxu0 %v835_v28  ;;  %v806_v25 = vld [vmem:[#allocation10 + $0x108] sm:$0xff]  ;;  %v805_v27 = vld [vmem:[#allocation10 + $0x100] sm:$0xff]  ;;  %v807_v28 = vld [vmem:[#allocation10 + $0x110] sm:$0xff] }
 0x523   :  { %v753_v33 = vrot.slane %v752_v31, 1  ;;  %971 = vmatprep.subr.mxu0 %v830_v29  ;;  %v762_v34 = vrot.slane %v761_v30, 1  ;;  %v800_v29 = vld [vmem:[#allocation10 + $0xd8] sm:$0xff] }
 0x524   :  { %972 = vmatpush1.msra.mxu0 %v829_v32  ;;  %v801_v32 = vld [vmem:[#allocation10 + $0xe0] sm:$0xff] }
 0x525   :  { %v754_v35 = vmax.f32 %v752_v31, %v753_v33  ;;  %v763_v36 = vmax.f32 %v761_v30, %v762_v34  ;;  %973 = vmatprep.subr.mxu0 %v824_v39  ;;  %v802_v30 = vld [vmem:[#allocation10 + $0xe8] sm:$0xff]  ;;  %v799_v31 = vld [vmem:[#allocation10 + $0xd0] sm:$0xff]  ;;  %v796_v34 = vld [vmem:[#allocation10 + $0xb8] sm:$0xff] }
 0x526   :  { %974 = vmatpush1.msra.mxu0 %v823_v42  ;;  %v794_v33 = vld [vmem:[#allocation10 + $0xa8] sm:$0xff]  ;;  %v787_v39 = vld [vmem:[#allocation10 + $0x70] sm:$0xff] }
 0x527   :  { %v1885_v37 = vsel %vm769_vm6, %v763_v36, %v754_v35  ;;  %1104 = vmatprep.subr.mxu0 %v816_v44  ;;  %v793_v35 = vld [vmem:[#allocation10 + $0xa0] sm:$0xff]  ;;  %v795_v36 = vld [vmem:[#allocation10 + $0xb0] sm:$0xff]  ;;  %v782_v42 = vld [vmem:[#allocation10 + $0x48] sm:$0xff] }
 0x528   :  { %v1898_v19 = vsel %vm764_vm7, %v1885_v37, 0.0  ;;  %v788_v37 = vld [vmem:[#allocation10 + $0x78] sm:$0xff]  ;;  %v781_v44 = vld [vmem:[#allocation10 + $0x40] sm:$0xff] }
 0x5d7   :  { %v711_v47 = vpop.f32.mrf.mxu0 }
 0x5d8   :  { %v1888_v48 = vmul.f32 %v1578_v46, %v711_v47  ;;  %v776_v46 = vld [vmem:[#allocation10 + $0x18] sm:$0xff]  ;;  %v778_v47 = vld [vmem:[#allocation10 + $0x28] sm:$0xff] }
 0x5d9   :  { %v1551_v51 = vpop.f32.mrf.mxu0 }
 0x5da   :  { %1434 = vmatmul.mubr.msk.f32.vlgmr.msra.gmra.mxu1 %vm315_vm3, %v1888_v48  ;;  %1435 = vmatmul.mubr.msk.f32.vlgmr.msra.gmra.mxu0 %vm315_vm3, %v1888_v48  ;;  %v1303_v51 = vlaneseq }
 0x5db   :  { %1031 = vmatpush1.msra.mxu1 %v867_v49  ;;  %1105 = vmatpush1.msra.mxu0 %v815_v50  ;;  %v777_v49 = vld [vmem:[#allocation10 + $0x20] sm:$0xff] }
 0x5dc   :  { %1032 = vmatprep.subr.mxu1 %v862_v52  ;;  %1106 = vmatprep.subr.mxu0 %v810_v53  ;;  %vm1406_vm8 = vcmp.lt.s32.totalorder %v1303_v51, 768 }
 0x5dd   :  { %1033 = vmatpush1.msra.mxu1 %v861_v54  ;;  %1107 = vmatpush1.msra.mxu0 %v809_v55  ;;  %v1304_v55 = vshrl.u32 %v1303_v51, 7 }
 0x5de   :  { %1034 = vmatprep.subr.mxu1 %v856_v56  ;;  %1108 = vmatprep.subr.mxu0 %v804_v57 }
 0x5df   :  { %1035 = vmatpush1.msra.mxu1 %v855_v59  ;;  %1109 = vmatpush1.msra.mxu0 %v803_v60  ;;  %v1309_v56 = vsub.s32 1, %v1304_v55 }
 0x5e0   :  { %1036 = vmatprep.subr.mxu1 %v850_v61  ;;  %1110 = vmatprep.subr.mxu0 %v798_v62  ;;  %v1301_v61 = vld [vmem:[#allocation12] sm:$0x3f]  ;;  %v1305_v62 = vsub.s32 0, %v1304_v55 }
 0x5e1   :  { %1037 = vmatpush1.msra.mxu1 %v849_v63  ;;  %1111 = vmatpush1.msra.mxu0 %v797_v0  ;;  %v1310_v63 = vrot.slane %v1301_v61, %v1309_v56  ;;  %v1741_v0 = vmov 1966171168  }
 0x5e2   :  { %1038 = vmatprep.subr.mxu1 %v844_v1  ;;  %1112 = vmatprep.subr.mxu0 %v792_v2  ;;  %v1349_v1 = vunpack.c.l.s4 %v1741_v0  ;;  %v1313_v2 = vsub.s32 2, %v1304_v55 }
 0x5e3   :  { %1039 = vmatpush1.msra.mxu1 %v843_v3  ;;  %1113 = vmatpush1.msra.mxu0 %v791_v4  ;;  %v1321_v3 = vsub.s32 4, %v1304_v55  ;;  %v1317_v4 = vsub.s32 3, %v1304_v55 }
 0x5e4   :  { %1040 = vmatprep.subr.mxu1 %v838_v5  ;;  %1114 = vmatprep.subr.mxu0 %v786_v6  ;;  %v1325_v5 = vsub.s32 5, %v1304_v55 }
 0x5e5   :  { %1041 = vmatpush1.msra.mxu1 %v837_v7  ;;  %1115 = vmatpush1.msra.mxu0 %v785_v8  ;;  %v1306_v7 = vrot.slane %v1301_v61, %v1305_v62 }
 0x5e6   :  { %1042 = vmatprep.subr.mxu1 %v832_v9  ;;  %1116 = vmatprep.subr.mxu0 %v780_v10  ;;  %v1350_v10 = vunpack.c.0.s8 %v1349_v1 }
 0x5e7   :  { %1043 = vmatpush1.msra.mxu1 %v831_v11  ;;  %1117 = vmatpush1.msra.mxu0 %v779_v12  ;;  %v1314_v12 = vrot.slane %v1301_v61, %v1313_v2 }
 0x5e8   :  { %1044 = vmatprep.subr.mxu1 %v826_v13  ;;  %1118 = vmatprep.subr.mxu0 %v774_v14  ;;  %v1322_v14 = vrot.slane %v1301_v61, %v1321_v3 }
 0x5e9   :  { %1045 = vmatpush1.msra.mxu1 %v825_v15  ;;  %1078 = vmatprep.mubr.f32.mxu1 %v1739_v41 }
 0x5ea   :  { %1119 = vmatpush1.msra.mxu0 %v773_v16  ;;  %1152 = vmatprep.mubr.f32.mxu0 %v1739_v41 }
 0x5eb   :  { %1436 = vmatmul.mubr.msk.f32.vlgmr.msra.gmra.mxu1 %vm315_vm3, %v1888_v48  ;;  %1437 = vmatmul.mubr.msk.f32.vlgmr.msra.gmra.mxu0 %vm315_vm3, %v1898_v19  ;;  %v775_v48 = vld [vmem:[#allocation10 + $0x10] sm:$0xff] }
 0x5ec   :  { %1175 = vmatprep.subr.mxu1 %v818_v17  ;;  %1246 = vmatprep.subr.mxu0 %v820_v18  ;;  %v1318_v17 = vrot.slane %v1301_v61, %v1317_v4  ;;  %v1326_v18 = vrot.slane %v1301_v61, %v1325_v5 }
 0x5ed   :  { %1176 = vmatpush1.msra.mxu1 %v817_v20  ;;  %1247 = vmatpush1.msra.mxu0 %v819_v21 }
 0x5ee   :  { %1177 = vmatprep.subr.mxu1 %v812_v58  ;;  %1248 = vmatprep.subr.mxu0 %v814_v22 }
 0x5ef   :  { %1178 = vmatpush1.msra.mxu1 %v811_v23  ;;  %1249 = vmatpush1.msra.mxu0 %v813_v24  ;;  %v1353_v24 = vsub.s32 %v1350_v10, %v1304_v55 }
 0x5f0   :  { %1179 = vmatprep.subr.mxu1 %v806_v25  ;;  %1250 = vmatprep.subr.mxu0 %v808_v26 }
 0x5f1   :  { %1180 = vmatpush1.msra.mxu1 %v805_v27  ;;  %1251 = vmatpush1.msra.mxu0 %v807_v28 }
 0x5f2   :  { %1181 = vmatprep.subr.mxu1 %v800_v29  ;;  %1252 = vmatprep.subr.mxu0 %v802_v30 }
 0x5f3   :  { %1182 = vmatpush1.msra.mxu1 %v799_v31  ;;  %1253 = vmatpush1.msra.mxu0 %v801_v32 }
 0x5f4   :  { %1183 = vmatprep.subr.mxu1 %v794_v33  ;;  %1254 = vmatprep.subr.mxu0 %v796_v34 }
 0x5f5   :  { %1184 = vmatpush1.msra.mxu1 %v793_v35  ;;  %1255 = vmatpush1.msra.mxu0 %v795_v36 }
 0x5f6   :  { %1185 = vmatprep.subr.mxu1 %v788_v37  ;;  %1256 = vmatprep.subr.mxu0 %v790_v38 }
 0x5f7   :  { %1186 = vmatpush1.msra.mxu1 %v787_v39  ;;  %1257 = vmatpush1.msra.mxu0 %v789_v40 }
 0x5f8   :  { %1187 = vmatprep.subr.mxu1 %v782_v42  ;;  %1258 = vmatprep.subr.mxu0 %v784_v43 }
 0x5f9   :  { %1188 = vmatpush1.msra.mxu1 %v781_v44  ;;  %1259 = vmatpush1.msra.mxu0 %v783_v45 }
 0x5fa   :  { %1189 = vmatprep.subr.mxu1 %v776_v46  ;;  %1260 = vmatprep.subr.mxu0 %v778_v47 }
 0x5fb   :  { %1190 = vmatpush1.msra.mxu1 %v775_v48  ;;  %1223 = vmatprep.mubr.f32.mxu1 %v1739_v41 }
 0x5fc   :  { %1261 = vmatpush1.msra.mxu0 %v777_v49  ;;  %1294 = vmatprep.mubr.f32.mxu0 %v1739_v41 }
 0x5fd   :  { %1438 = vmatmul.mubr.msk.f32.vlgmr.msra.gmra.mxu1 %vm315_vm3, %v1898_v19  ;;  %1439 = vmatmul.mubr.msk.f32.vlgmr.msra.gmra.mxu0 %vm315_vm3, %v1898_v19 }
 0x69a   :  { %v1009_v50 = vpop.f32.mrf.mxu0  ;;  %v938_v53 = vpop.f32.mrf.mxu1 }
 0x69c   :  { %v1011_v52 = vpop.f32.mrf.mxu0  ;;  %v940_v57 = vpop.f32.mrf.mxu1 }
 0x6ab   :  { %v1154_v54 = vpop.f32.mrf.mxu0  ;;  %v1080_v60 = vpop.f32.mrf.mxu1 }
 0x6ac   :  { %v1155_v6 = vadd.f32 %v1154_v54, %v938_v53 }
 0x6ad   :  { %v1156_v59 = vpop.f32.mrf.mxu0  ;;  %v1082_v8 = vpop.f32.mrf.mxu1 }
 0x6ae   :  { %v1157_v41 = vadd.f32 %v1156_v59, %v940_v57  ;;  %v1333_v19 = vadd.f32 %v1306_v7, %v1155_v6 }
 0x6b0   :  { %v1334_v9 = vadd.f32 %v1310_v63, %v1157_v41 }
 0x6b2   :  { %v1345_v23 = vcombine.low %v1333_v19, %v1334_v9 }
 0x6b4   :  { %v1354_v31 = vrot.slane %v1345_v23, %v1353_v24 }
 0x6bd   :  { %v1225_v11 = vpop.f32.mrf.mxu1  ;;  %v1296_v13 = vpop.f32.mrf.mxu0 }
 0x6be   :  { %v1226_v15 = vadd.f32 %v1225_v11, %v1009_v50  ;;  %v1297_v16 = vadd.f32 %v1296_v13, %v1080_v60 }
 0x6bf   :  { %v1227_v20 = vpop.f32.mrf.mxu1  ;;  %v1298_v21 = vpop.f32.mrf.mxu0 }
 0x6c0   :  { %v1228_v58 = vadd.f32 %v1227_v20, %v1011_v52  ;;  %v1299_v22 = vadd.f32 %v1298_v21, %v1082_v8  ;;  %v1335_v25 = vadd.f32 %v1314_v12, %v1226_v15  ;;  %v1337_v26 = vadd.f32 %v1322_v14, %v1297_v16 }
 0x6c2   :  { %v1336_v27 = vadd.f32 %v1318_v17, %v1228_v58  ;;  %v1338_v28 = vadd.f32 %v1326_v18, %v1299_v22 }
 0x6c4   :  { %v1346_v29 = vcombine.low %v1335_v25, %v1336_v27  ;;  %v1347_v30 = vcombine.low %v1337_v26, %v1338_v28 }
 0x6c6   :  { %v1361_v32 = vrot.slane %v1346_v29, %v1353_v24  ;;  %v1368_v33 = vrot.slane %v1347_v30, %v1353_v24 }
 0x6c8   :  { %v1369_v34 = vcombine.low %v1354_v31, %v1361_v32  ;;  %v1370_v35 = vcombine.high %v1354_v31, %v1361_v32  ;;  %v1371_v36 = vcombine.high %v1368_v33, %v1368_v33  ;;  %v1392_v39 = vrot.slane %v1368_v33, %v1353_v24 }
 0x6ca   :  { %v1378_v37 = vrot.slane %v1369_v34, %v1353_v24  ;;  %v1385_v38 = vrot.slane %v1370_v35, %v1353_v24  ;;  %v1399_v40 = vrot.slane %v1371_v36, %v1353_v24 }
 0x6cc   :  { %v1400_v42 = vcombine.low %v1378_v37, %v1392_v39  ;;  %v1401_v43 = vcombine.low %v1385_v38, %v1399_v40 }
 0x6ce   :  { %1408 = vst.msk [vmem:[%s1926_s10] sm:$0x3f] %vm1406_vm8, %v1400_v42  ;;  %1409 = vst.msk [vmem:[%s1926_s10 + $0x6] sm:$0x3f] %vm1406_vm8, %v1401_v43 }
 0x6cf   :  { %1414 = vsyncpa [#allocation3], 1 }
 0x6d0   :  { %1415 = vsyncpa [#allocation5], 1 }
 0x6d1   :  { %1416 = vsyncpa [#allocation8], 1 }
 0x6d2   :  { %1417 = vsyncpa [#allocation11], 1 }

// kernel: gcn_forward.3
= control target key start
LH: loop header
LB: loop body
LE: loop exit
PB: predicated region body
PF: predicated region fallthrough
CT: control target
= control target key end

     0   :  { %s12041_s0 = inlined_call_operand.vmem [shape: f32[2,1,768], index: 0, kind: input, shape index: {}]   ;;  %s12042_s1 = inlined_call_operand.hbm [shape: f32[2,1,768], index: 1, kind: input, shape index: {}]   ;;  %s12043_s2 = inlined_call_operand.vmem [shape: bf16[32,6], index: 2, kind: input, shape index: {}]   ;;  %s12044_s3 = inlined_call_operand.vmem [shape: f32[32,1], index: 3, kind: input, shape index: {}]   ;;  %s12045_s4 = inlined_call_operand.vmem [shape: bf16[32,96], index: 4, kind: input, shape index: {}]   ;;  %s12046_s5 = inlined_call_operand.vmem [shape: f32[32,1], index: 5, kind: input, shape index: {}]   ;;  %s12047_s6 = inlined_call_operand.hbm [shape: bf16[32,96], index: 6, kind: input, shape index: {}]   ;;  %s12048_s7 = inlined_call_operand.vmem [shape: f32[32,1], index: 7, kind: input, shape index: {}]   ;;  %s12049_s8 = inlined_call_operand.hbm [shape: f32[16,32], index: 8, kind: input, shape index: {}]   ;;  %s12050_s9 = inlined_call_operand.vmem [shape: f32[32,16], index: 9, kind: input, shape index: {}]   ;;  %s12051_s10 = inlined_call_operand.vmem [shape: f32[7], index: 10, kind: input, shape index: {}]   ;;  %s12052_s11 = inlined_call_operand.vmem [shape: bf16[768,1024], index: 11, kind: input, shape index: {}]   ;;  %s12053_s12 = inlined_call_operand.vmem [shape: f32[32,1024], index: 12, kind: input, shape index: {}]   ;;  %s12054_s13 = inlined_call_operand.hbm [shape: f32[1024,32], index: 13, kind: input, shape index: {}]   ;;  %s12055_s14 = inlined_call_operand.hbm [shape: f32[1,32], index: 14, kind: input, shape index: {}]   ;;  %s12056_s15 = inlined_call_operand.vmem [shape: f32[32,32], index: 15, kind: input, shape index: {}]   ;;  %s12057_s16 = inlined_call_operand.hbm [shape: f32[1,32], index: 16, kind: input, shape index: {}]   ;;  %s12058_s17 = inlined_call_operand.vmem [shape: f32[32,1], index: 17, kind: input, shape index: {}]   ;;  %s12059_s18 = inlined_call_operand.<no memory space> [shape: f32[1,1], index: 18, kind: input, shape index: {}]   ;;  %s12060_s19 = inlined_call_operand.vmem [shape: f32[2,1,1], index: 19, kind: output, shape index: {}]  }
   0x1   :  { %12095 = sst [smem:[#allocation37_spill]] %s12041_s0  ;;  %v24_v0 = vstv %s12059_s18 }
   0x2   :  { %12096 = sst [smem:[#allocation38_spill]] %s12042_s1  ;;  %25 = vst [vmem:[#allocation3] sm:$0x1] %v24_v0 }
   0x3   :  { %12097 = sst [smem:[#allocation39_spill]] %s12043_s2 }
   0x4   :  { %12098 = sst [smem:[#allocation40_spill]] %s12044_s3 }
   0x5   :  { %12099 = sst [smem:[#allocation41_spill]] %s12047_s6 }
   0x6   :  { %12100 = sst [smem:[#allocation42_spill]] %s12049_s8 }
   0x7   :  { %12101 = sst [smem:[#allocation43_spill]] %s12051_s10 }
   0x8   :  { %12102 = sst [smem:[#allocation44_spill]] %s12054_s13 }
   0x9   :  { %12103 = sst [smem:[#allocation45_spill]] %s12058_s17 }
   0xa   :  { %12104 = sst [smem:[#allocation46_spill]] %s12060_s19 }
   0xb   :  { %26 = vsyncpa [#allocation5], 0 }
   0xc   :  { %28 = vsyncpa [#allocation5 + $0x1], 0 }
   0xd   :  { %29 = vsyncpa [#allocation8], 0 }
   0xe   :  { %30 = vsyncpa [#allocation6], 0 }
   0xf   :  { %31 = vsyncpa [#allocation12], 0 }
  0x10   :  { %32 = vsyncpa [#allocation15], 0  ;;  %s8566_s20 = smov 0   ;;  %s8568_s21 = smov 0  }
  0x11   :  { %s8570_s1 = smov 0   ;;  %s8572_s22 = smov 0  }
  0x12 LB: > { %s8446_s18 = smov [#allocation7]   ;;  %s8587_s23 = sadd.s32 4294967295, %s8444_s22   ;;  %s8444_s22 = sphi %s8572_s22, %s12196_s22   ;;  %s8440_s1 = sphi %s8570_s1, %s12195_s1   ;;  %s8436_s21 = sphi %s8568_s21, %s12194_s21   ;;  %s8432_s20 = sphi %s8566_s20, %s12193_s20  }
  0x13   : > { %s502_s2 = sshll.u32 %s8446_s18, 4  ;;  %p7298_p0 = scmp.ge.s32.totalorder %s8444_s22, 1  ;;  %s503_s2 = int_to_ptr.vmem [resolvable:$true] %s502_s2 }
  0x14   : > { %p12065_p1 = scmp.eq.s32.totalorder %s8587_s23, 0  ;;  %p478_p2 = scmp.lt.s32.totalorder %s8444_s22, 3 }
  0x15   : > { %s8447_s3 = smov [#allocation11]   ;;  %s8448_s27 = smov [#allocation9]  }
  0x16   : > { %p8592_p3 = pnand %p7298_p0, %p478_p2  ;;  %s551_s26 = sshll.u32 %s8447_s3, 4  ;;  %s8604_s26 = int_to_ptr.vmem [resolvable:$true] %s551_s26 }
  0x17   : > { %s8606_s28 = sshll.u32 %s8448_s27, 4  ;;  %s8232_s0 = scalar_lea.vmem %s503_s2, 256  ;;  %s519_s28 = int_to_ptr.vmem [resolvable:$true] %s8606_s28 }
  0x18   : > { %s12105_s24 = scalar_select %p8592_p3, 1, 0 }
  0x19   : > { %p8017_p4 = pneg %p8592_p3  ;;  %p8233_p7 = scmp.ne.s32.totalorder %s503_s2, %s8232_s0 }
  0x1a   : > { %p8240_p10 = scmp.lt.s32.totalorder %s503_s2, %s503_s2  ;;  %p8241_p11 = scmp.lt.s32.totalorder %s8232_s0, %s8232_s0 }
  0x1b   : > { %p8600_p5 = pnand %p8017_p4, %p12065_p1 }
  0x1c   : > { %p8242_p12 = por %p8241_p11, %p8240_p10 }
  0x1d   : > { %p8610_p6 = pneg %p8600_p5 }
  0x1f   : > { %p8235_p8 = pnand %p8233_p7, %p8610_p6 }
  0x21   : > { %p8236_p9 = pneg %p8235_p8 }
  0x23   : > { %p8243_p13 = pnand %p8242_p12, %p8236_p9 }
  0x25   : > { %8246 = shalt.err (!%p8243_p13)
}
  0x26   : > { %s8449_s30 = smov 64   ;;  %s8450_s18 = smov 4  }
  0x27   : > { %s12108_s6 = sld [smem:[#allocation41_spill]]  ;;  %s8258_s19 = scalar_lea.vmem %s8604_s26, 16384 }
  0x28   : > { %p8259_p0 = scmp.ne.s32.totalorder %s8604_s26, %s8258_s19  ;;  %p8266_p7 = scmp.lt.s32.totalorder %s8604_s26, %s8604_s26 }
  0x29   : > { %p8267_p8 = scmp.lt.s32.totalorder %s8258_s19, %s8258_s19 }
  0x2a   : > { %p8261_p2 = pnand %p8259_p0, %p8610_p6 }
  0x2b   : > { %p8268_p9 = por %p8267_p8, %p8266_p7 }
  0x2c   : > { %p8262_p4 = pneg %p8261_p2 }
  0x2d   : > { %8020 = dma.hbm_to_vmem [thread:$0]  (!%p8600_p5), %s12108_s6, 256, %s503_s2, [#allocation8], %s8449_s30, %s8449_s30, %s8450_s18  }
  0x2e   : > { %p8269_p10 = pnand %p8268_p9, %p8262_p4 }
  0x30   : > { %8272 = shalt.err (!%p8269_p10)
}
  0x31   : > { %s8451_s0 = smov 128   ;;  %s8452_s17 = smov 8  }
  0x32   : > { %s12109_s13 = sld [smem:[#allocation44_spill]]  ;;  %s8284_s19 = scalar_lea.vmem %s519_s28, 256 }
  0x33   : > { %s12110_s10 = sld [smem:[#allocation43_spill]]  ;;  %p8285_p11 = scmp.ne.s32.totalorder %s519_s28, %s8284_s19 }
  0x34   : > { %p8292_p0 = scmp.lt.s32.totalorder %s519_s28, %s519_s28  ;;  %p8293_p2 = scmp.lt.s32.totalorder %s8284_s19, %s8284_s19 }
  0x35   : > { %p8287_p12 = pnand %p8285_p11, %p8610_p6 }
  0x36   : > { %p8294_p4 = por %p8293_p2, %p8292_p0 }
  0x37   : > { %p8288_p13 = pneg %p8287_p12 }
  0x38   : > { %8029 = dma.hbm_to_vmem [thread:$0]  (!%p8600_p5), %s12109_s13, 16384, %s8604_s26, [#allocation12], %s8451_s0, %s8451_s0, %s8452_s17  }
  0x39   : > { %s535_s27 = sshll.u32 %s12110_s10, 4  ;;  %p8295_p7 = pnand %p8294_p4, %p8288_p13  ;;  %s536_s27 = int_to_ptr.vmem [resolvable:$true] %s535_s27 }
  0x3b   : > { %8298 = shalt.err (!%p8295_p7)
}
  0x3c   : > { %s12111_s8 = sld [smem:[#allocation42_spill]]  ;;  %s8299_s26 = scalar_lea.vmem %s536_s27, 16 }
  0x3d   : > { %p8300_p8 = scmp.ne.s32.totalorder %s536_s27, %s8299_s26  ;;  %p8307_p11 = scmp.lt.s32.totalorder %s536_s27, %s536_s27 }
  0x3e   : > { %p8308_p12 = scmp.lt.s32.totalorder %s8299_s26, %s8299_s26 }
  0x3f   : > { %p8302_p9 = pnand %p8300_p8, %p8610_p6 }
  0x40   : > { %p8309_p1 = por %p8308_p12, %p8307_p11 }
  0x41   : > { %p8303_p10 = pneg %p8302_p9 }
  0x42   : > { %8023 = dma.hbm_to_vmem [thread:$0]  (!%p8600_p5), %s12111_s8, 256, %s519_s28, [#allocation8], %s8451_s0, %s8451_s0, %s8452_s17  }
  0x43   : > { %p8310_p3 = pnand %p8309_p1, %p8303_p10 }
  0x45   : > { %8313 = shalt.err (!%p8310_p3)
}
  0x46   : > { %s8453_s2 = smov [#allocation10]   ;;  %s8454_s30 = smov [#allocation13]  }
  0x47   : > { %8026 = dma.vmem_to_smem (!%p8600_p5), %s536_s27, 16, %s8453_s2, [#allocation6]  }
  0x48   : > { %s565_s6 = sshll.u32 %s8454_s30, 4  ;;  %s8455_s18 = smov [#allocation14]   ;;  %s566_s6 = int_to_ptr.vmem [resolvable:$true] %s565_s6 }
  0x49   : > { %s579_s17 = sshll.u32 %s8455_s18, 4  ;;  %s8325_s28 = scalar_lea.vmem %s566_s6, 16  ;;  %s580_s17 = int_to_ptr.vmem [resolvable:$true] %s579_s17 }
  0x4a   : > { %p8326_p13 = scmp.ne.s32.totalorder %s566_s6, %s8325_s28  ;;  %s8332_s0 = scalar_lea.vmem %s566_s6, 32 }
  0x4b   : > { %p8333_p4 = scmp.lt.s32.totalorder %s566_s6, %s566_s6  ;;  %p8334_p1 = scmp.lt.s32.totalorder %s8332_s0, %s8325_s28 }
  0x4c   : > { %p8328_p0 = pnand %p8326_p13, %p8610_p6 }
  0x4d   : > { %p8335_p3 = por %p8334_p1, %p8333_p4 }
  0x4e   : > { %p8329_p2 = pneg %p8328_p0 }
  0x50   : > { %p8336_p7 = pnand %p8335_p3, %p8329_p2 }
  0x52   : > { %8339 = shalt.err (!%p8336_p7)
}
  0x53   : > { %8032 = dma.hbm_to_vmem [thread:$0]  (!%p8600_p5), %s12055_s14, 16, %s566_s6, [#allocation12]  }
  0x54   : > { %s8351_s3 = scalar_lea.vmem %s580_s17, 16  ;;  %s8358_s26 = scalar_lea.vmem %s580_s17, 32 }
  0x55   : > { %p8352_p8 = scmp.ne.s32.totalorder %s580_s17, %s8351_s3  ;;  %p8359_p11 = scmp.lt.s32.totalorder %s580_s17, %s580_s17 }
  0x56   : > { %p8360_p12 = scmp.lt.s32.totalorder %s8358_s26, %s8351_s3 }
  0x57   : > { %p8354_p9 = pnand %p8352_p8, %p8610_p6 }
  0x58   : > { %p8361_p13 = por %p8360_p12, %p8359_p11 }
  0x59   : > { %p8355_p10 = pneg %p8354_p9 }
  0x5b   : > { %p8362_p0 = pnand %p8361_p13, %p8355_p10 }
  0x5d   : > { %8365 = shalt.err (!%p8362_p0)
}
  0x5e   : > { %8035 = dma.hbm_to_vmem [thread:$0]  (!%p8600_p5), %s12057_s16, 16, %s580_s17, [#allocation15]  }
  0x5f   : > { %s8663_s29 = sadd.s32 1, %s8444_s22   ;;  %s71_s25 = sadd.s32 1, %s8440_s1 }
  0x60   : > { %s68_s6 = ssub.s32 %s8444_s22, %s8663_s29  ;;  %p78_p6 = scmp.ne.s32.totalorder %s8440_s1, %s8436_s21 }
  0x61   : > { %p69_p2 = scmp.eq.s32.totalorder %s68_s6, 0  ;;  %p79_p4 = scmp.eq.s32.totalorder %s8444_s22, 0 }
  0x62   : > { %p84_p1 = scmp.ne.s32.totalorder %s8436_s21, %s8432_s20  ;;  %p8046_p3 = scmp.lt.s32.totalorder %s8444_s22, 2 }
  0x63   : > { %s8675_s18 = scalar_select %p69_p2, %s8440_s1, %s71_s25  }
  0x64   : > { %p80_p7 = por %p79_p4, %p78_p6  ;;  %p12112_p8 = scmp.eq.s32.totalorder %s8587_s23, 0 }
  0x65   : > { %s603_s0 = sand.u32 1, %s8440_s1   ;;  %s7988_s17 = smul.u32 96, %s8444_s22 }
  0x66   : > { %p8679_p9 = por %p12112_p8, %p84_p1  ;;  %s7987_s27 = smul.u32 6, %s603_s0 }
  0x67   : > { %p8685_p5 = pnand %p8046_p3, %p80_p7  ;;  %s12115_s2 = sld [smem:[#allocation38_spill]] }
  0x68   : > { %s12113_s28 = scalar_select %p8679_p9, 1, 0 }
  0x69   : > { %s607_s30 = scalar_lea.vmem [#allocation4], %s7987_s27  ;;  %s604_s6 = scalar_lea.sflag [#allocation5], %s603_s0 }
  0x6a   : > { %s615_s25 = sshll.u32 %s607_s30, 4  ;;  %p8368_p11 = pneg %p8685_p5  ;;  %s616_s25 = int_to_ptr.vmem [resolvable:$true] %s615_s25 }
  0x6d   : > { %s8692_s20 = scalar_lea.hbm %s12115_s2, %s7988_s17  ;;  %s8371_s3 = scalar_lea.hbm %s12115_s2, 192 }
  0x6e   : > { %s8366_s8 = scalar_lea.hbm %s8692_s20, 96  ;;  %p8372_p0 = scmp.lt.s32.totalorder %s8692_s20, %s12115_s2 }
  0x6f   : > { %p8367_p10 = scmp.ne.s32.totalorder %s8692_s20, %s8366_s8  ;;  %p8373_p6 = scmp.lt.s32.totalorder %s8371_s3, %s8366_s8 }
  0x71   : > { %p8369_p12 = pnand %p8368_p11, %p8367_p10  ;;  %p8374_p2 = por %p8373_p6, %p8372_p0 }
  0x73   : > { %p8370_p13 = pneg %p8369_p12 }
  0x75   : > { %p8375_p4 = pnand %p8374_p2, %p8370_p13 }
  0x77   : > { %8378 = shalt.err (!%p8375_p4)
}
  0x78   : > { %s8379_s27 = scalar_lea.vmem %s616_s25, 96  ;;  %s8456_s0 = smov [#allocation4]  }
  0x79   : > { %p8380_p1 = scmp.ne.s32.totalorder %s616_s25, %s8379_s27  ;;  %s8384_s30 = sshll.u32 %s8456_s0, 4  ;;  %s8385_s30 = int_to_ptr.vmem [resolvable:$false] %s8384_s30 }
  0x7a   : > { %s8386_s13 = scalar_lea.vmem %s8385_s30, 192  ;;  %p8387_p8 = scmp.lt.s32.totalorder %s616_s25, %s8385_s30 }
  0x7b   : > { %p8382_p3 = pnand %p8380_p1, %p8368_p11  ;;  %p8388_p10 = scmp.lt.s32.totalorder %s8386_s13, %s8379_s27 }
  0x7d   : > { %p8383_p7 = pneg %p8382_p3  ;;  %p8389_p12 = por %p8388_p10, %p8387_p8 }
  0x7f   : > { %p8390_p9 = pnand %p8389_p12, %p8383_p7 }
  0x81   : > { %8393 = shalt.err (!%p8390_p9)
}
  0x82   : > { %8039 = dma.hbm_to_vmem [thread:$0]  (!%p8685_p5), %s8692_s20, 96, %s616_s25, %s604_s6  }
  0x83   : > { %p12116_p13 = scmp.ne.s32.totalorder %s12105_s24, 0 }
  0x85   : > { %624 = sbr.rel (%p12116_p13) target bundleno = 3886 (0xf2e), region = 96 }
  0x8a   : > { %s626_s8 = sand.u32 1, %s8436_s21   ;;  %p12117_p11 = scmp.ne.s32.totalorder %s12113_s28, 0 }
  0x8b   : > { %s7989_s10 = smul.u32 6, %s626_s8  ;;  %s627_s22 = scalar_lea.sflag [#allocation5], %s626_s8 }
  0x8d   : > { %s630_s3 = scalar_lea.vmem [#allocation4], %s7989_s10 }
  0x8e   : > { %8411 = dma.done.wait (%p12117_p11), %s627_s22, 96  }
  0x8f   : > { %8413 = vsyncadd (%p12117_p11), %s627_s22, 4294967200  ;;  %p12118_p9 = scmp.eq.s32.totalorder %s8587_s23, 0 }
  0x91   : > { %8415 = dma.done.wait (%p12118_p9), [#allocation8], 512   ;;  %p12119_p0 = pmov %p12118_p9 }
  0x93   : > { %8417 = vsyncadd (%p12119_p0), [#allocation8], 4294966784  ;;  %p12120_p5 = pmov %p12119_p0 }
  0x94   : > { %p12121_p6 = pmov %p12119_p0 }
  0x95   : > { %8419 = dma.done.wait (%p12120_p5), [#allocation6], 16  }
  0x96   : > { %8421 = vsyncadd (%p12121_p6), [#allocation6], 4294967280  ;;  %p12122_p2 = pmov %p12119_p0 }
  0x97   : > { %p12123_p4 = pmov %p12119_p0 }
  0x98   : > { %8423 = dma.done.wait (%p12122_p2), [#allocation12], 16400  }
  0x99   : > { %8425 = vsyncadd (%p12123_p4), [#allocation12], 4294950896  ;;  %p12124_p1 = pmov %p12119_p0 }
  0x9a   : > { %p12125_p3 = pmov %p12119_p0 }
  0x9b   : > { %8427 = dma.done.wait (%p12124_p1), [#allocation15], 16  }
  0x9c   : > { %8429 = vsyncadd (%p12125_p3), [#allocation15], 4294967280 }
  0x9d   : > { %659 = sfence }
  0x9e   : > { %v720_v1 = vlaneseq  ;;  %p712_p7 = scmp.lt.s32.totalorder %s8587_s23, 1  ;;  %v764_v2 = vld [vmem:[%s630_s3] sm:$0x3f]  ;;  %s12129_s19 = sld [smem:[#allocation37_spill]]  ;;  %v12070_v24 = vmov 0   ;;  %v12068_v48 = vmov 0.0  }
  0x9f   : > { %s8457_s25 = smov 1   ;;  %s8458_s6 = smov 127   ;;  %1242 = vmatprep.mubr.bf16.mxu0 %v12070_v24  ;;  %1295 = vmatprep.mubr.bf16.mxu1 %v12070_v24  ;;  %v8460_v43 = vmov 1966171168   ;;  %vm1191_vm5 = vcmask 1042432   ;;  %vm1184_vm6 = vcmask 48128  }
  0xa0   : > { %v8733_v3 = vshrl.u32 %v720_v1, 7  ;;  %vm8736_vm0 = vcmp.lt.s32.totalorder %v720_v1, 768  ;;  %s12198_s23 = smov (!%p712_p7, %s8587_s23), 1  ;;  %8102 = vset.pattern.permute.xlu1 %v12070_v24  ;;  %8101 = vset.pattern.permute.xlu0 %v12070_v24  ;;  %s12130_s27 = sld [smem:[#allocation40_spill]]  ;;  %v8814_v38 = vand.u32 127, %v720_v1  ;;  %v831_v44 = vunpack.c.l.s4 %v8460_v43 }
  0xa1   : > { %983 = vst.msk [vmem:[#allocation2 + $0x3] ss:$8 sm:$0xf] %vm8736_vm0, %v764_v2  ;;  %984 = vst.msk [vmem:[#allocation2 + $0x3] ss:$8 sm:$0x30] %vm8736_vm0, %v764_v2 }
  0xa2   : > { %v8748_v5 = vsub.s32 0, %v8733_v3  ;;  %s7990_s13 = smul.u32 6, %s12198_s23  ;;  %v788_v6 = vsub.s32 5, %v8733_v3  ;;  %v776_v11 = vsub.s32 2, %v8733_v3  ;;  %v772_v13 = vsub.s32 1, %v8733_v3  ;;  %s12131_s28 = sld [smem:[#allocation39_spill]] }
  0xa3   : > { %v780_v16 = vsub.s32 3, %v8733_v3  ;;  %v784_v21 = vsub.s32 4, %v8733_v3  ;;  %v726_v41 = vadd.s32 640, %v8814_v38  ;;  %vm997_vm2 = vcmp.lt.s32.totalorder %v8814_v38, 127  ;;  %s10246_s22 = sld [smem:[#allocation10 + $0x4]] }
  0xa4   : > { %12128 = vst [vmem:[#allocation21_spill] sm:$0xff] %v8748_v5  ;;  %v878_v7 = vrot.slane %v764_v2, %v8748_v5  ;;  %s715_s20 = scalar_lea.vmem %s12129_s19, %s7990_s13  ;;  %v898_v10 = vrot.slane %v764_v2, %v788_v6  ;;  %v882_v17 = vrot.slane %v764_v2, %v772_v13  ;;  %v886_v20 = vrot.slane %v764_v2, %v776_v11  ;;  %s10272_s13 = sld [smem:[#allocation10 + $0x3]] }
  0xa5   : > { %v763_v8 = vld [vmem:[%s715_s20] sm:$0x3f]  ;;  %v890_v19 = vrot.slane %v764_v2, %v780_v16  ;;  %v894_v23 = vrot.slane %v764_v2, %v784_v21  ;;  %vm750_vm1 = vcmp.lt.s32.totalorder %v726_v41, 767  ;;  %v832_v50 = vunpack.c.0.s8 %v831_v44  ;;  %s10254_s20 = sld [smem:[#allocation10 + $0x1]] }
  0xa6   : > { %905 = vrot.lane.b32.xlu1 %v878_v7, %s8457_s25  ;;  %v769_v9 = vrot.slane %v763_v8, %v8748_v5  ;;  %980 = vst.msk [vmem:[#allocation2 + $0x2] ss:$8 sm:$0xf] %vm8736_vm0, %v763_v8  ;;  %981 = vst.msk [vmem:[#allocation2 + $0x2] ss:$8 sm:$0x30] %vm8736_vm0, %v763_v8  ;;  %v789_v12 = vrot.slane %v763_v8, %v788_v6  ;;  %v777_v14 = vrot.slane %v763_v8, %v776_v11 }
  0xa7   : > { %v773_v15 = vrot.slane %v763_v8, %v772_v13  ;;  %v781_v18 = vrot.slane %v763_v8, %v780_v16  ;;  %v785_v22 = vrot.slane %v763_v8, %v784_v21  ;;  %v1153_v25 = vld [vmem:[%s12130_s27 + $0x18] sm:$0xff]  ;;  %v1152_v26 = vld [vmem:[%s12130_s27 + $0x10] sm:$0xff]  ;;  %v1150_v27 = vld [vmem:[%s12130_s27] sm:$0xff]  ;;  %v8821_v49 = vsel %vm750_vm1, 1.0, %v12068_v48  ;;  %s10282_s0 = sld [smem:[#allocation10]] }
  0xa8   : > { %796 = vrot.lane.b32.xlu0 %v769_v9, %s8457_s25  ;;  %v1151_v28 = vld [vmem:[%s12130_s27 + $0x8] sm:$0xff]  ;;  %vm727_vm3 = vcmp.gt.s32.totalorder %v8814_v38, 0  ;;  %vm808_vm4 = vcmp.lt.s32.totalorder %v8814_v38, 1  ;;  %v8837_v60 = vsub.s32 %v832_v50, %v8733_v3  ;;  %v8163_v4 = vld [vmem:[%s12131_s28] sm:$0xff]   ;;  %vm1779_vm7 = vcmask 785408   ;;  %s10294_s3 = sld [smem:[#allocation10 + $0x5]] }
  0xa9   : > { %v8840_v0 = vsel %vm727_vm3, 1.0, %v12068_v48  ;;  %vm2587_vm8 = vcmask 261120   ;;  %vm2669_vm9 = vcmask 130048   ;;  %s10296_s24 = sld [smem:[#allocation10 + $0x2]]  ;;  %v3669_v38 = vld [vmem:[%s12052_s11 + $0x568] sm:$0xff]  ;;  %vm8462_vm10 = vmmov 0  }
  0xaa   : > { %915 = vrot.lane.b32.xlu1 %v898_v10, %s8457_s25  ;;  %s10335_s10 = sld [smem:[#allocation10 + $0x6]]  ;;  %vm7164_vm11 = vcmask 0  }
  0xab   : > { %s12192_s26 = sld [smem:[#allocation46_spill]] }
  0xac   : > { %806 = vrot.lane.b32.xlu0 %v789_v12, %s8457_s25 }
  0xae   : > { %800 = vrot.lane.b32.xlu1 %v777_v14, %s8457_s25 }
  0xb0   : > { %798 = vrot.lane.b32.xlu0 %v773_v15, %s8457_s25 }
  0xb2   : > { %907 = vrot.lane.b32.xlu1 %v882_v17, %s8457_s25 }
  0xb4   : > { %802 = vrot.lane.b32.xlu0 %v781_v18, %s8457_s25 }
  0xb6   : > { %911 = vrot.lane.b32.xlu1 %v890_v19, %s8457_s25 }
  0xb8   : > { %909 = vrot.lane.b32.xlu0 %v886_v20, %s8457_s25 }
  0xba   : > { %987 = vrot.lane.b32.xlu1 %v773_v15, %s8458_s6 }
  0xbc   : > { %985 = vrot.lane.b32.xlu0 %v769_v9, %s8458_s6 }
  0xbe   : > { %991 = vrot.lane.b32.xlu1 %v781_v18, %s8458_s6 }
  0xc0   : > { %989 = vrot.lane.b32.xlu0 %v777_v14, %s8458_s6 }
  0xc2   : > { %995 = vrot.lane.b32.xlu1 %v789_v12, %s8458_s6 }
  0xc4   : > { %993 = vrot.lane.b32.xlu0 %v785_v22, %s8458_s6 }
  0xc6   : > { %1062 = vrot.lane.b32.xlu1 %v882_v17, %s8458_s6 }
  0xc8   : > { %1060 = vrot.lane.b32.xlu0 %v878_v7, %s8458_s6 }
  0xca   : > { %1066 = vrot.lane.b32.xlu1 %v890_v19, %s8458_s6 }
  0xcc   : > { %1064 = vrot.lane.b32.xlu0 %v886_v20, %s8458_s6 }
  0xce   : > { %1070 = vrot.lane.b32.xlu1 %v898_v10, %s8458_s6 }
  0xd0   : > { %1068 = vrot.lane.b32.xlu0 %v894_v23, %s8458_s6 }
  0xd2   : > { %913 = vrot.lane.b32.xlu1 %v894_v23, %s8457_s25 }
  0xd4   : > { %804 = vrot.lane.b32.xlu0 %v785_v22, %s8457_s25 }
  0xd6   : > { %1171 = vperm.xlu1 %8102, %v1153_v25  }
  0xd8   : > { %1166 = vperm.xlu0 %8101, %v1152_v26  }
  0xda   : > { %1156 = vperm.xlu1 %8102, %v1150_v27  }
  0xdc   : > { %1161 = vperm.xlu0 %8101, %v1151_v28  }
 0x118   : > { %v906_v29 = vpop.permute.xlu1 %905 }
 0x11a   : > { %v797_v30 = vpop.permute.xlu0 %796 }
 0x11c   : > { %v8805_v31 = vpop.permute.xlu1 %915 }
 0x11d   : > { %v922_v1 = vsel %vm808_vm4, %v8805_v31, %v906_v29 }
 0x11e   : > { %v8807_v32 = vpop.permute.xlu0 %806  ;;  %v923_v14 = vmul.f32 %v8840_v0, %v922_v1 }
 0x11f   : > { %v814_v10 = vsel %vm808_vm4, %v8807_v32, %v797_v30 }
 0x120   : > { %v801_v33 = vpop.permute.xlu1 %800  ;;  %v815_v21 = vmul.f32 %v8840_v0, %v814_v10 }
 0x122   : > { %v799_v34 = vpop.permute.xlu0 %798 }
 0x123   : > { %v813_v17 = vsel %vm808_vm4, %v797_v30, %v799_v34  ;;  %v812_v22 = vsel %vm808_vm4, %v799_v34, %v801_v33 }
 0x124   : > { %v908_v35 = vpop.permute.xlu1 %907 }
 0x125   : > { %v921_v11 = vsel %vm808_vm4, %v906_v29, %v908_v35  ;;  %v827_v29 = vcombine.low %v815_v21, %v813_v17 }
 0x126   : > { %v8809_v36 = vpop.permute.xlu0 %802  ;;  %v935_v23 = vcombine.low %v923_v14, %v921_v11 }
 0x127   : > { %v811_v15 = vsel %vm808_vm4, %v801_v33, %v8809_v36 }
 0x128   : > { %v8811_v37 = vpop.permute.xlu1 %911  ;;  %v828_v26 = vcombine.low %v812_v22, %v811_v15  ;;  %v944_v41 = vrot.slane %v935_v23, %v8837_v60 }
 0x12a   : > { %v910_v39 = vpop.permute.xlu0 %909 }
 0x12b   : > { %v919_v2 = vsel %vm808_vm4, %v910_v39, %v8811_v37  ;;  %v920_v6 = vsel %vm808_vm4, %v908_v35, %v910_v39 }
 0x12c   : > { %v988_v40 = vpop.permute.xlu1 %987  ;;  %v936_v16 = vcombine.low %v920_v6, %v919_v2 }
 0x12e   : > { %v986_v42 = vpop.permute.xlu0 %985  ;;  %v951_v30 = vrot.slane %v936_v16, %v8837_v60 }
 0x12f   : > { %v1002_v52 = vsel %vm997_vm2, %v986_v42, %v988_v40 }
 0x130   : > { %v992_v45 = vpop.permute.xlu1 %991 }
 0x132   : > { %v990_v46 = vpop.permute.xlu0 %989 }
 0x133   : > { %v1001_v47 = vsel %vm997_vm2, %v988_v40, %v990_v46  ;;  %v1000_v57 = vsel %vm997_vm2, %v990_v46, %v992_v45 }
 0x134   : > { %v996_v51 = vpop.permute.xlu1 %995  ;;  %v1016_v54 = vcombine.low %v1002_v52, %v1001_v47  ;;  %v959_v52 = vcombine.low %v944_v41, %v951_v30 }
 0x135   : > { %v1003_v53 = vsel %vm997_vm2, %v996_v51, %v986_v42 }
 0x136   : > { %v1009_v55 = vmul.f32 %v8821_v49, %v1003_v53  ;;  %v994_v56 = vpop.permute.xlu0 %993  ;;  %v1025_v3 = vrot.slane %v1016_v54, %v8837_v60  ;;  %v966_v2 = vrot.slane %v959_v52, %v8837_v60 }
 0x137   : > { %v998_v58 = vsel %vm997_vm2, %v994_v56, %v996_v51  ;;  %v999_v59 = vsel %vm997_vm2, %v992_v45, %v994_v56  ;;  %v843_v45 = vrot.slane %v828_v26, %v8837_v60  ;;  %v836_v51 = vrot.slane %v827_v29, %v8837_v60 }
 0x138   : > { %v1017_v61 = vcombine.low %v1000_v57, %v999_v59  ;;  %v1018_v62 = vcombine.low %v998_v58, %v1009_v55  ;;  %v1063_v63 = vpop.permute.xlu1 %1062 }
 0x13a   : > { %v1032_v7 = vrot.slane %v1017_v61, %v8837_v60  ;;  %v1039_v8 = vrot.slane %v1018_v62, %v8837_v60  ;;  %v1061_v9 = vpop.permute.xlu0 %1060  ;;  %v851_v62 = vcombine.low %v836_v51, %v843_v45 }
 0x13b   : > { %v1076_v35 = vsel %vm997_vm2, %v1061_v9, %v1063_v63 }
 0x13c   : > { %v1040_v12 = vcombine.low %v1025_v3, %v1032_v7  ;;  %v1067_v13 = vpop.permute.xlu1 %1066  ;;  %v1054_v19 = vrot.slane %v1039_v8, %v8837_v60 }
 0x13e   : > { %v1047_v18 = vrot.slane %v1040_v12, %v8837_v60  ;;  %v1065_v20 = vpop.permute.xlu0 %1064 }
 0x13f   : > { %v1075_v25 = vsel %vm997_vm2, %v1063_v63, %v1065_v20  ;;  %v1074_v42 = vsel %vm997_vm2, %v1065_v20, %v1067_v13 }
 0x140   : > { %v1055_v27 = vcombine.low %v1047_v18, %v1054_v19  ;;  %v1071_v28 = vpop.permute.xlu1 %1070  ;;  %v1090_v33 = vcombine.low %v1076_v35, %v1075_v25 }
 0x141   : > { %v1077_v39 = vsel %vm997_vm2, %v1071_v28, %v1061_v9 }
 0x142   : > { %1058 = vst.msk [vmem:[#allocation2 + $0x4] ss:$8 sm:$0xf] %vm8736_vm0, %v1055_v27  ;;  %1059 = vst.msk [vmem:[#allocation2 + $0x4] ss:$8 sm:$0x30] %vm8736_vm0, %v1055_v27  ;;  %v1083_v34 = vmul.f32 %v8821_v49, %v1077_v39  ;;  %v1069_v40 = vpop.permute.xlu0 %1068  ;;  %v1099_v55 = vrot.slane %v1090_v33, %v8837_v60 }
 0x143   : > { %v1072_v43 = vsel %vm997_vm2, %v1069_v40, %v1071_v28  ;;  %v1073_v44 = vsel %vm997_vm2, %v1067_v13, %v1069_v40  ;;  %v8164_v27 = vld [vmem:[%s12131_s28 + $0x8] sm:$0xff]  }
 0x144   : > { %v1091_v46 = vcombine.low %v1074_v42, %v1073_v44  ;;  %v1092_v47 = vcombine.low %v1072_v43, %v1083_v34  ;;  %v914_v50 = vpop.permute.xlu1 %913 }
 0x145   : > { %v917_v53 = vsel %vm808_vm4, %v914_v50, %v8805_v31  ;;  %v918_v54 = vsel %vm808_vm4, %v8811_v37, %v914_v50 }
 0x146   : > { %v1106_v56 = vrot.slane %v1091_v46, %v8837_v60  ;;  %v1113_v57 = vrot.slane %v1092_v47, %v8837_v60  ;;  %v937_v58 = vcombine.low %v918_v54, %v917_v53  ;;  %v805_v59 = vpop.permute.xlu0 %804 }
 0x147   : > { %v809_v61 = vsel %vm808_vm4, %v805_v59, %v8807_v32  ;;  %v810_v31 = vsel %vm808_vm4, %v8809_v36, %v805_v59  ;;  %v858_v32 = vrot.slane %v851_v62, %v8837_v60 }
 0x148   : > { %v1114_v63 = vcombine.low %v1099_v55, %v1106_v56  ;;  %v958_v37 = vrot.slane %v937_v58, %v8837_v60  ;;  %v829_v1 = vcombine.low %v810_v31, %v809_v61  ;;  %v1128_v3 = vrot.slane %v1113_v57, %v8837_v60 }
 0x14a   : > { %v1121_v6 = vrot.slane %v1114_v63, %v8837_v60  ;;  %v973_v7 = vrot.slane %v958_v37, %v8837_v60  ;;  %v850_v8 = vrot.slane %v829_v1, %v8837_v60 }
 0x14c   : > { %v1129_v9 = vcombine.low %v1121_v6, %v1128_v3  ;;  %v974_v10 = vcombine.low %v966_v2, %v973_v7  ;;  %v865_v36 = vrot.slane %v850_v8, %v8837_v60 }
 0x14e   : > { %1132 = vst.msk [vmem:[#allocation2 + $0x5] ss:$8 sm:$0xf] %vm8736_vm0, %v1129_v9  ;;  %1133 = vst.msk [vmem:[#allocation2 + $0x5] ss:$8 sm:$0x30] %vm8736_vm0, %v1129_v9  ;;  %v866_v11 = vcombine.low %v858_v32, %v865_v36 }
 0x14f   : > { %977 = vst.msk [vmem:[#allocation2 + $0x1] ss:$8 sm:$0xf] %vm8736_vm0, %v974_v10  ;;  %978 = vst.msk [vmem:[#allocation2 + $0x1] ss:$8 sm:$0x30] %vm8736_vm0, %v974_v10 }
 0x150   : > { %872 = vst.msk [vmem:[#allocation2] ss:$8 sm:$0xf] %vm8736_vm0, %v866_v11  ;;  %873 = vst.msk [vmem:[#allocation2] ss:$8 sm:$0x30] %vm8736_vm0, %v866_v11 }
 0x151   : > { %v8949_v28 = vpop.permute.xlu1 %1171 }
 0x153   : > { %v8951_v29 = vpop.permute.xlu0 %1166 }
 0x155   : > { %v8953_v30 = vpop.permute.xlu1 %1156 }
 0x157   : > { %v1139_v60 = vld [vmem:[#allocation2 + $0x8] sm:$0x3f]  ;;  %v1141_v12 = vld [vmem:[#allocation2 + $0x18] sm:$0x3f]  ;;  %v1138_v13 = vld [vmem:[#allocation2] sm:$0x3f]  ;;  %v8958_v41 = vpop.permute.xlu0 %1161 }
 0x158   : > { %v1145_v14 = vpack.c.bf16 %v1139_v60, %v1139_v60  ;;  %v1147_v15 = vpack.c.bf16 %v1141_v12, %v1141_v12  ;;  %v1144_v16 = vpack.c.bf16 %v1138_v13, %v1138_v13  ;;  %v1140_v17 = vld [vmem:[#allocation2 + $0x10] sm:$0x3f]  ;;  %v1143_v18 = vld [vmem:[#allocation2 + $0x28] sm:$0x3f]  ;;  %v1142_v19 = vld [vmem:[#allocation2 + $0x20] sm:$0x3f] }
 0x159   : > { %v1146_v20 = vpack.c.bf16 %v1140_v17, %v1140_v17  ;;  %v1149_v22 = vpack.c.bf16 %v1143_v18, %v1143_v18  ;;  %v1148_v23 = vpack.c.bf16 %v1142_v19, %v1142_v19 }
 0x15a   : > { %7318 = vmatprep.subr.msk.bf16.mxu0 %vm1191_vm5, %v1145_v14  ;;  %7321 = vmatprep.subr.msk.bf16.mxu1 %vm1191_vm5, %v1147_v15  ;;  %v1193_v21 = vsel %vm1191_vm5, %v1144_v16, 0 }
 0x15b   : > { %1225 = vmatpush1.bf16.msra.mxu0 %v1193_v21  ;;  %v1199_v25 = vsel %vm1191_vm5, %v1146_v20, 0  ;;  %v1205_v26 = vsel %vm1191_vm5, %v1148_v23, 0 }
 0x15c   : > { %1278 = vmatpush1.bf16.msra.mxu1 %v1199_v25  ;;  %7324 = vmatprep.subr.msk.bf16.mxu0 %vm1191_vm5, %v1149_v22 }
 0x15e   : > { %7319 = vmatmul.mubr.msk.bf16.vlgmr.msra.gmra.mxu0 %vm1184_vm6, %v8163_v4 }
 0x15f   : > { %7322 = vmatmul.mubr.msk.bf16.vlgmr.msra.gmra.mxu1 %vm1184_vm6, %v8163_v4  ;;  %1331 = vmatpush1.bf16.msra.mxu0 %v1205_v26 }
 0x160   : > { %1252 = vmatprep.mubr.bf16.mxu0 %v12070_v24  ;;  %1305 = vmatprep.mubr.bf16.mxu1 %v12070_v24 }
 0x166   : > { %7320 = vmatmul.mubr.msk.bf16.gmra.mxu0 %vm1184_vm6, %v8164_v27 }
 0x167   : > { %7323 = vmatmul.mubr.msk.bf16.gmra.mxu1 %vm1184_vm6, %v8164_v27  ;;  %1348 = vmatprep.mubr.bf16.mxu0 %v12070_v24 }
 0x168   : > { %1818 = vmatprep.mubr.bf16.mxu1 %v12070_v24 }
 0x16e   : > { %7325 = vmatmul.mubr.msk.bf16.vlgmr.msra.gmra.mxu0 %vm1184_vm6, %v8163_v4 }
 0x16f   : > { %1358 = vmatprep.mubr.bf16.mxu0 %v12070_v24 }
 0x176   : > { %7326 = vmatmul.mubr.msk.bf16.gmra.mxu0 %vm1184_vm6, %v8164_v27 }
 0x177   : > { %1871 = vmatprep.mubr.bf16.mxu0 %v12070_v24 }
 0x21e   : > { %v1244_v35 = vpop.f32.mrf.mxu0 }
 0x21f   : > { %v1297_v39 = vpop.f32.mrf.mxu1  ;;  %v8963_v43 = vadd.f32 %v1244_v35, %v8953_v30  ;;  %v1748_v35 = vld [vmem:[%s12046_s5 + $0x18] sm:$0xff] }
 0x220   : > { %v8956_v33 = vadd.f32 %v1297_v39, %v8953_v30  ;;  %v1246_v34 = vpop.f32.mrf.mxu0  ;;  %v1746_v39 = vld [vmem:[%s12046_s5 + $0x8] sm:$0xff] }
 0x221   : > { %v1299_v40 = vpop.f32.mrf.mxu1  ;;  %v8972_v50 = vadd.f32 %v1246_v34, %v8953_v30 }
 0x222   : > { %1481 = vrot.lane.b32.xlu1 %v8956_v33, %s8458_s6  ;;  %v1248_v42 = vpop.f32.mrf.mxu0  ;;  %v9018_v9 = vadd.f32 %v1299_v40, %v8953_v30 }
 0x223   : > { %v8966_v44 = vadd.f32 %v1248_v42, %v8958_v41  ;;  %v1301_v45 = vpop.f32.mrf.mxu1 }
 0x224   : > { %v8969_v46 = vadd.f32 %v1301_v45, %v8958_v41  ;;  %v1250_v47 = vpop.f32.mrf.mxu0 }
 0x225   : > { %v8975_v51 = vadd.f32 %v1250_v47, %v8958_v41  ;;  %v1303_v52 = vpop.f32.mrf.mxu1 }
 0x226   : > { %1465 = vrot.lane.b32.xlu1 %v8963_v43, %s8458_s6  ;;  %1483 = vrot.lane.b32.xlu0 %v8969_v46, %s8458_s6  ;;  %v1254_v54 = vpop.f32.mrf.mxu0  ;;  %v9025_v11 = vadd.f32 %v1303_v52, %v8958_v41 }
 0x227   : > { %v1307_v55 = vpop.f32.mrf.mxu1  ;;  %v8990_v61 = vadd.f32 %v1254_v54, %v8951_v29 }
 0x228   : > { %v1256_v57 = vpop.f32.mrf.mxu0  ;;  %v8996_v63 = vadd.f32 %v1307_v55, %v8951_v29 }
 0x229   : > { %v1309_v58 = vpop.f32.mrf.mxu1  ;;  %v9002_v2 = vadd.f32 %v1256_v57, %v8951_v29 }
 0x22a   : > { %1369 = vrot.lane.b32.xlu1 %v8963_v43, %s8457_s25  ;;  %1467 = vrot.lane.b32.xlu0 %v8966_v44, %s8458_s6  ;;  %v1258_v59 = vpop.f32.mrf.mxu0  ;;  %v9068_v22 = vadd.f32 %v1309_v58, %v8951_v29 }
 0x22b   : > { %v8993_v31 = vadd.f32 %v1258_v59, %v8949_v28  ;;  %v1311_v62 = vpop.f32.mrf.mxu1 }
 0x22c   : > { %v8999_v37 = vadd.f32 %v1311_v62, %v8949_v28  ;;  %v1260_v1 = vpop.f32.mrf.mxu0 }
 0x22d   : > { %v9005_v6 = vadd.f32 %v1260_v1, %v8949_v28  ;;  %v1723_v3 = vpack.c.bf16 %v8993_v31, %v8990_v61  ;;  %v1313_v4 = vpop.f32.mrf.mxu1 }
 0x22e   : > { %1473 = vrot.lane.b32.xlu1 %v8972_v50, %s8458_s6  ;;  %1371 = vrot.lane.b32.xlu0 %v8966_v44, %s8457_s25  ;;  %v1350_v7 = vpop.f32.mrf.mxu0  ;;  %v9075_v23 = vadd.f32 %v1313_v4, %v8949_v28 }
 0x22f   : > { %v1724_v32 = vpack.c.bf16 %v9005_v6, %v9002_v2  ;;  %v9082_v25 = vadd.f32 %v1350_v7, %v8953_v30 }
 0x230   : > { %v1352_v10 = vpop.f32.mrf.mxu0 }
 0x231   : > { %v9028_v12 = vadd.f32 %v1352_v10, %v8953_v30 }
 0x232   : > { %1489 = vrot.lane.b32.xlu1 %v9018_v9, %s8458_s6  ;;  %1475 = vrot.lane.b32.xlu0 %v8975_v51, %s8458_s6  ;;  %v1354_v36 = vpop.f32.mrf.mxu0 }
 0x233   : > { %v9089_v26 = vadd.f32 %v1354_v36, %v8958_v41 }
 0x234   : > { %v1356_v60 = vpop.f32.mrf.mxu0 }
 0x235   : > { %v9031_v13 = vadd.f32 %v1356_v60, %v8958_v41 }
 0x236   : > { %1377 = vrot.lane.b32.xlu1 %v8972_v50, %s8457_s25  ;;  %1491 = vrot.lane.b32.xlu0 %v9025_v11, %s8458_s6  ;;  %v1360_v14 = vpop.f32.mrf.mxu0 }
 0x237   : > { %v9100_v27 = vadd.f32 %v1360_v14, %v8951_v29 }
 0x238   : > { %v1362_v16 = vpop.f32.mrf.mxu0 }
 0x239   : > { %v9044_v19 = vadd.f32 %v1362_v16, %v8951_v29  ;;  %v1745_v29 = vld [vmem:[%s12046_s5] sm:$0xff] }
 0x23a   : > { %1485 = vrot.lane.b32.xlu1 %v8996_v63, %s8458_s6  ;;  %1379 = vrot.lane.b32.xlu0 %v8975_v51, %s8457_s25  ;;  %v1364_v17 = vpop.f32.mrf.mxu0 }
 0x23b   : > { %v9107_v30 = vadd.f32 %v1364_v17, %v8949_v28 }
 0x23c   : > { %v1366_v18 = vpop.f32.mrf.mxu0 }
 0x23d   : > { %v9047_v20 = vadd.f32 %v1366_v18, %v8949_v28  ;;  %v1747_v28 = vld [vmem:[%s12046_s5 + $0x10] sm:$0xff] }
 0x23e   : > { %1469 = vrot.lane.b32.xlu1 %v8990_v61, %s8458_s6  ;;  %1487 = vrot.lane.b32.xlu0 %v8999_v37, %s8458_s6 }
 0x242   : > { %1373 = vrot.lane.b32.xlu1 %v8990_v61, %s8457_s25  ;;  %1471 = vrot.lane.b32.xlu0 %v8993_v31, %s8458_s6 }
 0x246   : > { %1389 = vrot.lane.b32.xlu1 %v8996_v63, %s8457_s25  ;;  %1375 = vrot.lane.b32.xlu0 %v8993_v31, %s8457_s25 }
 0x24a   : > { %1477 = vrot.lane.b32.xlu1 %v9002_v2, %s8458_s6  ;;  %1391 = vrot.lane.b32.xlu0 %v8999_v37, %s8457_s25 }
 0x24e   : > { %1493 = vrot.lane.b32.xlu1 %v9068_v22, %s8458_s6  ;;  %1479 = vrot.lane.b32.xlu0 %v9005_v6, %s8458_s6 }
 0x252   : > { %1381 = vrot.lane.b32.xlu1 %v9002_v2, %s8457_s25  ;;  %1495 = vrot.lane.b32.xlu0 %v9075_v23, %s8458_s6 }
 0x256   : > { %1497 = vrot.lane.b32.xlu1 %v9082_v25, %s8458_s6  ;;  %1383 = vrot.lane.b32.xlu0 %v9005_v6, %s8457_s25 }
 0x25a   : > { %1409 = vrot.lane.b32.xlu1 %v9028_v12, %s8457_s25  ;;  %1499 = vrot.lane.b32.xlu0 %v9089_v26, %s8458_s6 }
 0x25e   : > { %1505 = vrot.lane.b32.xlu1 %v9028_v12, %s8458_s6  ;;  %1411 = vrot.lane.b32.xlu0 %v9031_v13, %s8457_s25 }
 0x262   : > { %1501 = vrot.lane.b32.xlu1 %v9100_v27, %s8458_s6  ;;  %1507 = vrot.lane.b32.xlu0 %v9031_v13, %s8458_s6 }
 0x266   : > { %1413 = vrot.lane.b32.xlu1 %v9044_v19, %s8457_s25  ;;  %1503 = vrot.lane.b32.xlu0 %v9107_v30, %s8458_s6 }
 0x26a   : > { %1509 = vrot.lane.b32.xlu1 %v9044_v19, %s8458_s6  ;;  %1415 = vrot.lane.b32.xlu0 %v9047_v20, %s8457_s25 }
 0x26e   : > { %1397 = vrot.lane.b32.xlu1 %v9068_v22, %s8457_s25  ;;  %1511 = vrot.lane.b32.xlu0 %v9047_v20, %s8458_s6 }
 0x272   : > { %1385 = vrot.lane.b32.xlu1 %v8956_v33, %s8457_s25  ;;  %1399 = vrot.lane.b32.xlu0 %v9075_v23, %s8457_s25 }
 0x276   : > { %1393 = vrot.lane.b32.xlu1 %v9018_v9, %s8457_s25  ;;  %1387 = vrot.lane.b32.xlu0 %v8969_v46, %s8457_s25 }
 0x27a   : > { %1405 = vrot.lane.b32.xlu1 %v9100_v27, %s8457_s25  ;;  %1395 = vrot.lane.b32.xlu0 %v9025_v11, %s8457_s25 }
 0x27e   : > { %1401 = vrot.lane.b32.xlu1 %v9082_v25, %s8457_s25  ;;  %1407 = vrot.lane.b32.xlu0 %v9107_v30, %s8457_s25 }
 0x282   : > { %1761 = vperm.xlu1 %8102, %v1747_v28   ;;  %1403 = vrot.lane.b32.xlu0 %v9089_v26, %s8457_s25 }
 0x286   : > { %1751 = vperm.xlu1 %8102, %v1745_v29   ;;  %1766 = vperm.xlu0 %8101, %v1748_v35  }
 0x28a   : > { %1756 = vperm.xlu0 %8101, %v1746_v39  }
 0x294   : > { %v9151_v34 = vpop.permute.xlu1 %1481 }
 0x298   : > { %v9153_v40 = vpop.permute.xlu1 %1465  ;;  %v9155_v41 = vpop.permute.xlu0 %1483 }
 0x29c   : > { %v9157_v42 = vpop.permute.xlu1 %1369  ;;  %v9159_v45 = vpop.permute.xlu0 %1467 }
 0x2a0   : > { %v1474_v47 = vpop.permute.xlu1 %1473  ;;  %v9161_v52 = vpop.permute.xlu0 %1371 }
 0x2a1   : > { %v1525_v24 = vsel %vm997_vm2, %v1474_v47, %v9151_v34 }
 0x2a4   : > { %v9163_v54 = vpop.permute.xlu1 %1489  ;;  %v1476_v55 = vpop.permute.xlu0 %1475 }
 0x2a5   : > { %v1526_v18 = vsel %vm997_vm2, %v1476_v55, %v9155_v41  ;;  %v1530_v8 = vsel %vm997_vm2, %v9159_v45, %v1476_v55 }
 0x2a6   : > { %v1730_v56 = vpack.c.bf16 %v1526_v18, %v1525_v24 }
 0x2a8   : > { %v9165_v57 = vpop.permute.xlu1 %1377  ;;  %v1492_v58 = vpop.permute.xlu0 %1491 }
 0x2ac   : > { %v1486_v59 = vpop.permute.xlu1 %1485  ;;  %v9167_v62 = vpop.permute.xlu0 %1379 }
 0x2b0   : > { %v9169_v1 = vpop.permute.xlu1 %1469  ;;  %v1488_v7 = vpop.permute.xlu0 %1487 }
 0x2b4   : > { %v1374_v10 = vpop.permute.xlu1 %1373  ;;  %v9171_v36 = vpop.permute.xlu0 %1471 }
 0x2b8   : > { %v9173_v60 = vpop.permute.xlu1 %1389  ;;  %v1376_v14 = vpop.permute.xlu0 %1375 }
 0x2bc   : > { %v1478_v16 = vpop.permute.xlu1 %1477  ;;  %v9175_v17 = vpop.permute.xlu0 %1391 }
 0x2bd   : > { %v1527_v29 = vsel %vm997_vm2, %v1478_v16, %v1486_v59  ;;  %v1531_v35 = vsel %vm997_vm2, %v9169_v1, %v1478_v16 }
 0x2c0   : > { %v1494_v4 = vpop.permute.xlu1 %1493  ;;  %v1480_v28 = vpop.permute.xlu0 %1479 }
 0x2c1   : > { %v1528_v39 = vsel %vm997_vm2, %v1480_v28, %v1488_v7  ;;  %v1532_v48 = vsel %vm997_vm2, %v9171_v36, %v1480_v28  ;;  %v1529_v28 = vsel %vm997_vm2, %v9153_v40, %v1474_v47 }
 0x2c2   : > { %v1736_v15 = vpack.c.bf16 %v1528_v39, %v1527_v29  ;;  %v1735_v21 = vpack.c.bf16 %v1532_v48, %v1531_v35  ;;  %v1729_v48 = vpack.c.bf16 %v1530_v8, %v1529_v28 }
 0x2c4   : > { %v9196_v53 = vpop.permute.xlu1 %1381  ;;  %v1496_v16 = vpop.permute.xlu0 %1495  ;;  %1790 = vmatprep.subr.bf16.mxu1 %v1736_v15 }
 0x2c5   : > { %1791 = vmatpush1.bf16.msra.mxu1 %v1735_v21  ;;  %v1435_v2 = vsel %vm808_vm4, %v1374_v10, %v9196_v53  ;;  %v12133_v21 = vpack.c.bf16 %v8966_v44, %v8963_v43  ;;  %v1523_v44 = vsel %vm997_vm2, %v1486_v59, %v1494_v4 }
 0x2c6   : > { %1792 = vmatprep.subr.bf16.mxu1 %v1730_v56  ;;  %v12132_v56 = vpack.c.bf16 %v8975_v51, %v8972_v50  ;;  %v1524_v50 = vsel %vm997_vm2, %v1488_v7, %v1496_v16 }
 0x2c8   : > { %v9201_v29 = vpop.permute.xlu1 %1497  ;;  %v9203_v35 = vpop.permute.xlu0 %1383 }
 0x2c9   : > { %1793 = vmatpush1.bf16.msra.mxu1 %v1729_v48  ;;  %v1436_v24 = vsel %vm808_vm4, %v1376_v14, %v9203_v35  ;;  %v1517_v7 = vsel %vm997_vm2, %v9163_v54, %v9201_v29  ;;  %v1737_v48 = vpack.c.bf16 %v1524_v50, %v1523_v44 }
 0x2ca   : > { %1794 = vmatprep.subr.bf16.mxu1 %v1724_v32  ;;  %v1712_v32 = vpack.c.bf16 %v1436_v24, %v1435_v2  ;;  %v1522_v24 = vsel %vm997_vm2, %v9155_v41, %v1492_v58  ;;  %v1434_v41 = vsel %vm808_vm4, %v9161_v52, %v9167_v62 }
 0x2cc   : > { %v9208_v55 = vpop.permute.xlu1 %1409  ;;  %v9210_v15 = vpop.permute.xlu0 %1499 }
 0x2cd   : > { %1795 = vmatpush1.bf16.msra.mxu1 %v1723_v3  ;;  %v1518_v47 = vsel %vm997_vm2, %v1492_v58, %v9210_v15 }
 0x2ce   : > { %1796 = vmatprep.subr.bf16.mxu1 %v12132_v56  ;;  %v1732_v59 = vpack.c.bf16 %v1518_v47, %v1517_v7 }
 0x2d0   : > { %v9224_v6 = vpop.permute.xlu1 %1505  ;;  %v9226_v8 = vpop.permute.xlu0 %1411 }
 0x2d1   : > { %1797 = vmatpush1.bf16.msra.mxu1 %v12133_v21 }
 0x2d2   : > { %1798 = vmatprep.subr.bf16.mxu1 %v1712_v32 }
 0x2d4   : > { %v1502_v61 = vpop.permute.xlu1 %1501  ;;  %v9231_v31 = vpop.permute.xlu0 %1507 }
 0x2d5   : > { %v1519_v18 = vsel %vm997_vm2, %v1494_v4, %v1502_v61  ;;  %v1521_v4 = vsel %vm997_vm2, %v9151_v34, %v9163_v54  ;;  %v1437_v34 = vsel %vm808_vm4, %v9208_v55, %v9157_v42 }
 0x2d6   : > { %v1731_v32 = vpack.c.bf16 %v1522_v24, %v1521_v4  ;;  %v1441_v44 = vmul.f32 %v8840_v0, %v1437_v34  ;;  %v1720_v24 = vpack.c.bf16 %v9025_v11, %v9018_v9 }
 0x2d8   : > { %v9235_v51 = vpop.permute.xlu1 %1413  ;;  %v1504_v3 = vpop.permute.xlu0 %1503 }
 0x2d9   : > { %v1520_v43 = vsel %vm997_vm2, %v1496_v16, %v1504_v3  ;;  %v1439_v28 = vsel %vm808_vm4, %v9235_v51, %v1374_v10  ;;  %v1438_v10 = vsel %vm808_vm4, %v9226_v8, %v9161_v52  ;;  %v1433_v52 = vsel %vm808_vm4, %v9157_v42, %v9165_v57 }
 0x2da   : > { %v1738_v39 = vpack.c.bf16 %v1520_v43, %v1519_v18  ;;  %v1453_v54 = vmul.f32 %v8840_v0, %v1439_v28  ;;  %v1447_v21 = vmul.f32 %v8840_v0, %v1438_v10  ;;  %v1726_v43 = vpack.c.bf16 %v9075_v23, %v9068_v22 }
 0x2db   : > { %v1534_v42 = vsel %vm997_vm2, %v9231_v31, %v9159_v45  ;;  %v1533_v22 = vsel %vm997_vm2, %v9224_v6, %v9153_v40  ;;  %v9319_v40 = vld [vmem:[%s12045_s4] sm:$0xff]  }
 0x2dc   : > { %v1510_v56 = vpop.permute.xlu1 %1509  ;;  %v9256_v16 = vpop.permute.xlu0 %1415  ;;  %1843 = vmatprep.subr.bf16.mxu0 %v1738_v39  ;;  %v1706_v39 = vpack.c.bf16 %v1434_v41, %v1433_v52  ;;  %v1548_v45 = vmul.f32 %v8821_v49, %v1534_v42  ;;  %v1542_v9 = vmul.f32 %v8821_v49, %v1533_v22 }
 0x2dd   : > { %v1440_v2 = vsel %vm808_vm4, %v9256_v16, %v1376_v14  ;;  %1844 = vmatpush1.bf16.msra.mxu0 %v1737_v48  ;;  %v1535_v14 = vsel %vm997_vm2, %v1510_v56, %v9169_v1  ;;  %v1705_v48 = vpack.c.bf16 %v1447_v21, %v1441_v44  ;;  %v1515_v11 = vsel %vm997_vm2, %v1502_v61, %v1510_v56 }
 0x2de   : > { %v1459_v58 = vmul.f32 %v8840_v0, %v1440_v2  ;;  %1845 = vmatprep.subr.bf16.mxu0 %v1732_v59  ;;  %v1554_v7 = vmul.f32 %v8821_v49, %v1535_v14  ;;  %v12134_v2 = vpack.c.bf16 %v8999_v37, %v8996_v63  ;;  %v1719_v63 = vpack.c.bf16 %v8969_v46, %v8956_v33 }
 0x2df   : > { %v1432_v37 = vsel %vm808_vm4, %v9203_v35, %v9175_v17  ;;  %v1514_v61 = vsel %vm997_vm2, %v9210_v15, %v9231_v31  ;;  %v1431_v33 = vsel %vm808_vm4, %v9196_v53, %v9173_v60  ;;  %v1513_v46 = vsel %vm997_vm2, %v9201_v29, %v9224_v6  ;;  %v8166_v29 = vld [vmem:[%s12045_s4 + $0x8] sm:$0xff]  }
 0x2e0   : > { %v9287_v50 = vpop.permute.xlu1 %1397  ;;  %v1512_v47 = vpop.permute.xlu0 %1511  ;;  %v1711_v18 = vpack.c.bf16 %v1459_v58, %v1453_v54  ;;  %v1734_v58 = vpack.c.bf16 %v1548_v45, %v1542_v9  ;;  %v12135_v35 = vmov 0   ;;  %v1733_v31 = vpack.c.bf16 %v1514_v61, %v1513_v46 }
 0x2e1   : > { %v1536_v1 = vsel %vm997_vm2, %v1512_v47, %v9171_v36  ;;  %1846 = vmatpush1.bf16.msra.mxu0 %v1731_v32  ;;  %v1516_v4 = vsel %vm997_vm2, %v1504_v3, %v1512_v47  ;;  %v1427_v3 = vsel %vm808_vm4, %v9173_v60, %v9287_v50  ;;  %v12136_v21 = vpack.c.bf16 %v9047_v20, %v9044_v19 }
 0x2e2   : > { %v1560_v28 = vmul.f32 %v8821_v49, %v1536_v1  ;;  %1799 = vmatpush1.bf16.msra.mxu1 %v1711_v18  ;;  %1847 = vmatprep.subr.bf16.mxu0 %v1726_v43  ;;  %v1739_v54 = vpack.c.bf16 %v1516_v4, %v1515_v11  ;;  %v1727_v18 = vpack.c.bf16 %v9107_v30, %v9100_v27 }
 0x2e3   : > { %1800 = vmatprep.subr.bf16.mxu1 %v1706_v39  ;;  %v1721_v27 = vpack.c.bf16 %v9089_v26, %v9082_v25 }
 0x2e4   : > { %v1386_v23 = vpop.permute.xlu1 %1385  ;;  %v1400_v36 = vpop.permute.xlu0 %1399  ;;  %v1740_v59 = vpack.c.bf16 %v1560_v28, %v1554_v7 }
 0x2e5   : > { %v1428_v10 = vsel %vm808_vm4, %v9175_v17, %v1400_v36  ;;  %1848 = vmatpush1.bf16.msra.mxu0 %v12134_v2  ;;  %v1713_v17 = vpack.c.bf16 %v1432_v37, %v1431_v33  ;;  %v1429_v32 = vsel %vm808_vm4, %v9165_v57, %v1386_v23  ;;  %v12137_v57 = vpack.c.bf16 %v9031_v13, %v9028_v12 }
 0x2e6   : > { %1801 = vmatpush1.bf16.msra.mxu1 %v1705_v48  ;;  %1849 = vmatprep.subr.bf16.mxu0 %v1720_v24  ;;  %v1714_v34 = vpack.c.bf16 %v1428_v10, %v1427_v3 }
 0x2e7   : > { %1896 = vmatprep.subr.bf16.mxu1 %v1740_v59 }
 0x2e8   : > { %v1388_v41 = vpop.permute.xlu0 %1387  ;;  %v1394_v56 = vpop.permute.xlu1 %1393 }
 0x2e9   : > { %7329 = vmatmul.mubr.msk.bf16.vlgmr.msra.gmra.mxu1 %vm1779_vm7, %v9319_v40  ;;  %1850 = vmatpush1.bf16.msra.mxu0 %v1719_v63  ;;  %v1425_v14 = vsel %vm808_vm4, %v1386_v23, %v1394_v56  ;;  %v1430_v53 = vsel %vm808_vm4, %v9167_v62, %v1388_v41 }
 0x2ea   : > { %1851 = vmatprep.subr.bf16.mxu0 %v1714_v34  ;;  %1897 = vmatpush1.bf16.msra.mxu1 %v1739_v54  ;;  %v1707_v47 = vpack.c.bf16 %v1430_v53, %v1429_v32 }
 0x2eb   : > { %1898 = vmatprep.subr.bf16.mxu1 %v1734_v58  ;;  %1828 = vmatprep.mubr.bf16.mxu1 %v12135_v35 }
 0x2ec   : > { %v1396_v15 = vpop.permute.xlu0 %1395  ;;  %v1406_v52 = vpop.permute.xlu1 %1405 }
 0x2ed   : > { %v1426_v60 = vsel %vm808_vm4, %v1388_v41, %v1396_v15  ;;  %1852 = vmatpush1.bf16.msra.mxu0 %v1713_v17  ;;  %v1419_v19 = vsel %vm808_vm4, %v1406_v52, %v9235_v51  ;;  %v1423_v13 = vsel %vm808_vm4, %v9287_v50, %v1406_v52 }
 0x2ee   : > { %1899 = vmatpush1.bf16.msra.mxu1 %v1733_v31  ;;  %v1708_v6 = vpack.c.bf16 %v1426_v60, %v1425_v14 }
 0x2ef   : > { %1900 = vmatprep.subr.bf16.mxu1 %v12136_v21 }
 0x2f0   : > { %v1408_v62 = vpop.permute.xlu0 %1407  ;;  %1853 = vmatprep.subr.bf16.mxu0 %v1708_v6  ;;  %v1402_v30 = vpop.permute.xlu1 %1401 }
 0x2f1   : > { %7330 = vmatmul.mubr.msk.bf16.gmra.mxu1 %vm1779_vm7, %v8166_v29  ;;  %v1420_v43 = vsel %vm808_vm4, %v1408_v62, %v9256_v16  ;;  %1854 = vmatpush1.bf16.msra.mxu0 %v1707_v47  ;;  %v1424_v16 = vsel %vm808_vm4, %v1400_v36, %v1408_v62  ;;  %v1417_v25 = vsel %vm808_vm4, %v1402_v30, %v9208_v55 }
 0x2f2   : > { %1901 = vmatpush1.bf16.msra.mxu1 %v1727_v18  ;;  %1924 = vmatprep.mubr.bf16.mxu1 %v12135_v35  ;;  %v1716_v44 = vpack.c.bf16 %v1420_v43, %v1419_v19  ;;  %v1715_v26 = vpack.c.bf16 %v1424_v16, %v1423_v13 }
 0x2f3   : > { %1902 = vmatprep.subr.bf16.mxu1 %v12137_v57 }
 0x2f4   : > { %v1404_v20 = vpop.permute.xlu0 %1403  ;;  %7331 = vmatmul.mubr.msk.bf16.vlgmr.msra.gmra.mxu0 %vm1779_vm7, %v9319_v40 }
 0x2f5   : > { %v1418_v12 = vsel %vm808_vm4, %v1404_v20, %v9226_v8  ;;  %1881 = vmatprep.mubr.bf16.mxu0 %v12135_v35  ;;  %v1422_v51 = vsel %vm808_vm4, %v1396_v15, %v1404_v20  ;;  %v1421_v8 = vsel %vm808_vm4, %v1394_v56, %v1402_v30 }
 0x2f6   : > { %1903 = vmatpush1.bf16.msra.mxu1 %v1721_v27  ;;  %v1710_v1 = vpack.c.bf16 %v1418_v12, %v1417_v25  ;;  %v1709_v39 = vpack.c.bf16 %v1422_v51, %v1421_v8 }
 0x2f7   : > { %1904 = vmatprep.subr.bf16.mxu1 %v1716_v44 }
 0x2fa   : > { %1905 = vmatpush1.bf16.msra.mxu1 %v1715_v26 }
 0x2fb   : > { %1906 = vmatprep.subr.bf16.mxu1 %v1710_v1 }
 0x2fc   : > { %7332 = vmatmul.mubr.msk.bf16.gmra.mxu0 %vm1779_vm7, %v8166_v29 }
 0x2fd   : > { %2393 = vmatprep.mubr.bf16.mxu0 %v12135_v35  ;;  %v9405_v55 = vpop.permute.xlu1 %1761 }
 0x2fe   : > { %1907 = vmatpush1.bf16.msra.mxu1 %v1709_v39 }
 0x301   : > { %7333 = vmatmul.mubr.msk.bf16.vlgmr.msra.gmra.mxu1 %vm1779_vm7, %v9319_v40  ;;  %v9407_v50 = vpop.permute.xlu0 %1766  ;;  %v1752_v42 = vpop.permute.xlu1 %1751 }
 0x302   : > { %1934 = vmatprep.mubr.bf16.mxu1 %v12135_v35 }
 0x305   : > { %v1757_v36 = vpop.permute.xlu0 %1756 }
 0x309   : > { %7334 = vmatmul.mubr.msk.bf16.gmra.mxu1 %vm1779_vm7, %v8166_v29 }
 0x30a   : > { %2446 = vmatprep.mubr.bf16.mxu1 %v12135_v35 }
 0x3a9   : > { %v1820_v7 = vpop.f32.mrf.mxu1 }
 0x3aa   : > { %v9409_v28 = vadd.f32 %v1820_v7, %v1752_v42  ;;  %v2323_v7 = vld [vmem:[%s12048_s7 + $0x10] sm:$0xff] }
 0x3ab   : > { %v1822_v22 = vpop.f32.mrf.mxu1 }
 0x3ac   : > { %v9411_v23 = vadd.f32 %v1822_v22, %v1752_v42  ;;  %2041 = vrot.lane.b32.xlu1 %v9409_v28, %s8458_s6  ;;  %v2322_v22 = vld [vmem:[%s12048_s7 + $0x8] sm:$0xff] }
 0x3ad   : > { %v1824_v48 = vpop.f32.mrf.mxu1 }
 0x3ae   : > { %v9415_v24 = vadd.f32 %v1824_v48, %v1757_v36 }
 0x3af   : > { %v1826_v59 = vpop.f32.mrf.mxu1 }
 0x3b0   : > { %v9417_v45 = vadd.f32 %v1826_v59, %v1757_v36  ;;  %2043 = vrot.lane.b32.xlu0 %v9415_v24, %s8458_s6  ;;  %1945 = vrot.lane.b32.xlu1 %v9409_v28, %s8457_s25 }
 0x3b1   : > { %v1830_v10 = vpop.f32.mrf.mxu1 }
 0x3b2   : > { %v9426_v2 = vadd.f32 %v1830_v10, %v9405_v55 }
 0x3b3   : > { %v1832_v9 = vpop.f32.mrf.mxu1 }
 0x3b4   : > { %v9431_v11 = vadd.f32 %v1832_v9, %v9405_v55  ;;  %1947 = vrot.lane.b32.xlu0 %v9415_v24, %s8457_s25  ;;  %2049 = vrot.lane.b32.xlu1 %v9411_v23, %s8458_s6  ;;  %v1873_v3 = vpop.f32.mrf.mxu0 }
 0x3b5   : > { %v1834_v63 = vpop.f32.mrf.mxu1  ;;  %v9437_v37 = vadd.f32 %v1873_v3, %v1752_v42 }
 0x3b6   : > { %v9440_v41 = vadd.f32 %v1834_v63, %v9407_v50  ;;  %v1875_v34 = vpop.f32.mrf.mxu0 }
 0x3b7   : > { %v1836_v54 = vpop.f32.mrf.mxu1  ;;  %v9442_v61 = vadd.f32 %v1875_v34, %v1752_v42 }
 0x3b8   : > { %v9445_v56 = vadd.f32 %v1836_v54, %v9407_v50  ;;  %2051 = vrot.lane.b32.xlu0 %v9417_v45, %s8458_s6  ;;  %1953 = vrot.lane.b32.xlu1 %v9411_v23, %s8457_s25  ;;  %v1877_v33 = vpop.f32.mrf.mxu0 }
 0x3b9   : > { %v9453_v46 = vadd.f32 %v1877_v33, %v1757_v36 }
 0x3ba   : > { %v1879_v15 = vpop.f32.mrf.mxu0 }
 0x3bb   : > { %v9457_v31 = vadd.f32 %v1879_v15, %v1757_v36 }
 0x3bc   : > { %1955 = vrot.lane.b32.xlu0 %v9417_v45, %s8457_s25  ;;  %2045 = vrot.lane.b32.xlu1 %v9426_v2, %s8458_s6  ;;  %v1883_v14 = vpop.f32.mrf.mxu0 }
 0x3bd   : > { %v9464_v53 = vadd.f32 %v1883_v14, %v9405_v55 }
 0x3be   : > { %v1885_v60 = vpop.f32.mrf.mxu0 }
 0x3bf   : > { %v9467_v29 = vadd.f32 %v1885_v60, %v9405_v55 }
 0x3c0   : > { %2047 = vrot.lane.b32.xlu0 %v9440_v41, %s8458_s6  ;;  %1949 = vrot.lane.b32.xlu1 %v9426_v2, %s8457_s25  ;;  %v1887_v6 = vpop.f32.mrf.mxu0 }
 0x3c1   : > { %v1926_v32 = vpop.f32.mrf.mxu1  ;;  %v9474_v52 = vadd.f32 %v1887_v6, %v9407_v50 }
 0x3c2   : > { %v9476_v21 = vadd.f32 %v1926_v32, %v1752_v42  ;;  %v1889_v62 = vpop.f32.mrf.mxu0 }
 0x3c3   : > { %v1928_v47 = vpop.f32.mrf.mxu1  ;;  %v9479_v18 = vadd.f32 %v1889_v62, %v9407_v50 }
 0x3c4   : > { %12138 = vst [vmem:[#allocation22_spill] sm:$0xff] %v9476_v21  ;;  %v9481_v43 = vadd.f32 %v1928_v47, %v1752_v42  ;;  %1951 = vrot.lane.b32.xlu0 %v9440_v41, %s8457_s25  ;;  %2053 = vrot.lane.b32.xlu1 %v9431_v11, %s8458_s6 }
 0x3c5   : > { %v1930_v19 = vpop.f32.mrf.mxu1 }
 0x3c6   : > { %12139 = vst [vmem:[#allocation23_spill] sm:$0xff] %v9481_v43  ;;  %v9489_v20 = vadd.f32 %v1930_v19, %v1757_v36 }
 0x3c7   : > { %v1932_v30 = vpop.f32.mrf.mxu1 }
 0x3c8   : > { %12140 = vst [vmem:[#allocation24_spill] sm:$0xff] %v9489_v20  ;;  %v9493_v16 = vadd.f32 %v1932_v30, %v1757_v36  ;;  %2055 = vrot.lane.b32.xlu0 %v9445_v56, %s8458_s6  ;;  %1957 = vrot.lane.b32.xlu1 %v9431_v11, %s8457_s25  ;;  %v2321_v36 = vld [vmem:[%s12048_s7] sm:$0xff] }
 0x3c9   : > { %v1936_v44 = vpop.f32.mrf.mxu1 }
 0x3ca   : > { %12141 = vst [vmem:[#allocation25_spill] sm:$0xff] %v9493_v16  ;;  %v9500_v12 = vadd.f32 %v1936_v44, %v9405_v55 }
 0x3cb   : > { %v1938_v25 = vpop.f32.mrf.mxu1 }
 0x3cc   : > { %12142 = vst [vmem:[#allocation26_spill] sm:$0xff] %v9500_v12  ;;  %v9505_v26 = vadd.f32 %v1938_v25, %v9405_v55  ;;  %1959 = vrot.lane.b32.xlu0 %v9445_v56, %s8457_s25  ;;  %2057 = vrot.lane.b32.xlu1 %v9437_v37, %s8458_s6 }
 0x3cd   : > { %v1940_v51 = vpop.f32.mrf.mxu1 }
 0x3ce   : > { %v9512_v1 = vadd.f32 %v1940_v51, %v9407_v50 }
 0x3cf   : > { %v1942_v8 = vpop.f32.mrf.mxu1 }
 0x3d0   : > { %12143 = vst [vmem:[#allocation27_spill] sm:$0xff] %v9512_v1  ;;  %v9515_v39 = vadd.f32 %v1942_v8, %v9407_v50  ;;  %2059 = vrot.lane.b32.xlu0 %v9453_v46, %s8458_s6  ;;  %2065 = vrot.lane.b32.xlu1 %v9442_v61, %s8458_s6  ;;  %v2324_v50 = vld [vmem:[%s12048_s7 + $0x18] sm:$0xff] }
 0x3d4   : > { %2067 = vrot.lane.b32.xlu0 %v9457_v31, %s8458_s6  ;;  %2061 = vrot.lane.b32.xlu1 %v9464_v53, %s8458_s6 }
 0x3d8   : > { %2063 = vrot.lane.b32.xlu0 %v9474_v52, %s8458_s6  ;;  %2069 = vrot.lane.b32.xlu1 %v9467_v29, %s8458_s6 }
 0x3dc   : > { %2071 = vrot.lane.b32.xlu0 %v9479_v18, %s8458_s6  ;;  %2073 = vrot.lane.b32.xlu1 %v9476_v21, %s8458_s6 }
 0x3e0   : > { %2075 = vrot.lane.b32.xlu0 %v9489_v20, %s8458_s6  ;;  %1985 = vrot.lane.b32.xlu1 %v9481_v43, %s8457_s25 }
 0x3e4   : > { %1987 = vrot.lane.b32.xlu0 %v9493_v16, %s8457_s25  ;;  %2077 = vrot.lane.b32.xlu1 %v9500_v12, %s8458_s6 }
 0x3e8   : > { %2079 = vrot.lane.b32.xlu0 %v9512_v1, %s8458_s6  ;;  %1989 = vrot.lane.b32.xlu1 %v9505_v26, %s8457_s25 }
 0x3ec   : > { %1991 = vrot.lane.b32.xlu0 %v9515_v39, %s8457_s25  ;;  %2081 = vrot.lane.b32.xlu1 %v9481_v43, %s8458_s6 }
 0x3f0   : > { %2083 = vrot.lane.b32.xlu0 %v9493_v16, %s8458_s6  ;;  %2085 = vrot.lane.b32.xlu1 %v9505_v26, %s8458_s6 }
 0x3f4   : > { %2087 = vrot.lane.b32.xlu0 %v9515_v39, %s8458_s6  ;;  %1965 = vrot.lane.b32.xlu1 %v9464_v53, %s8457_s25 }
 0x3f8   : > { %1967 = vrot.lane.b32.xlu0 %v9474_v52, %s8457_s25  ;;  %1973 = vrot.lane.b32.xlu1 %v9467_v29, %s8457_s25 }
 0x3fc   : > { %1975 = vrot.lane.b32.xlu0 %v9479_v18, %s8457_s25  ;;  %1961 = vrot.lane.b32.xlu1 %v9437_v37, %s8457_s25 }
 0x400   : > { %1963 = vrot.lane.b32.xlu0 %v9453_v46, %s8457_s25  ;;  %1969 = vrot.lane.b32.xlu1 %v9442_v61, %s8457_s25 }
 0x404   : > { %1971 = vrot.lane.b32.xlu0 %v9457_v31, %s8457_s25  ;;  %1981 = vrot.lane.b32.xlu1 %v9500_v12, %s8457_s25 }
 0x408   : > { %1983 = vrot.lane.b32.xlu0 %v9512_v1, %s8457_s25  ;;  %1977 = vrot.lane.b32.xlu1 %v9476_v21, %s8457_s25 }
 0x40c   : > { %1979 = vrot.lane.b32.xlu0 %v9489_v20, %s8457_s25  ;;  %2342 = vperm.xlu1 %8102, %v2324_v50  }
 0x410   : > { %2337 = vperm.xlu0 %8101, %v2323_v7   ;;  %2332 = vperm.xlu1 %8102, %v2322_v22  }
 0x414   : > { %2327 = vperm.xlu0 %8101, %v2321_v36  }
 0x41e   : > { %v9595_v48 = vpop.permute.xlu1 %2041 }
 0x422   : > { %v9597_v59 = vpop.permute.xlu0 %2043  ;;  %v1946_v10 = vpop.permute.xlu1 %1945 }
 0x426   : > { %v1948_v9 = vpop.permute.xlu0 %1947  ;;  %v2050_v3 = vpop.permute.xlu1 %2049 }
 0x427   : > { %v2105_v63 = vsel %vm997_vm2, %v9595_v48, %v2050_v3 }
 0x42a   : > { %v2052_v34 = vpop.permute.xlu0 %2051  ;;  %v9602_v54 = vpop.permute.xlu1 %1953 }
 0x42b   : > { %v2106_v33 = vsel %vm997_vm2, %v9597_v59, %v2052_v34  ;;  %v9610_v15 = vsel %vm808_vm4, %v1946_v10, %v9602_v54 }
 0x42c   : > { %2138 = vst [vmem:[#allocation2 + $0x8] sm:$0xff] %v9610_v15  ;;  %v2305_v12 = vpack.c.bf16 %v2106_v33, %v2105_v63 }
 0x42e   : > { %v9613_v14 = vpop.permute.xlu0 %1955  ;;  %v9615_v60 = vpop.permute.xlu1 %2045 }
 0x42f   : > { %v9620_v6 = vsel %vm808_vm4, %v1948_v9, %v9613_v14 }
 0x432   : > { %v9622_v32 = vpop.permute.xlu0 %2047  ;;  %v1950_v62 = vpop.permute.xlu1 %1949 }
 0x436   : > { %v9624_v47 = vpop.permute.xlu0 %1951  ;;  %v2054_v19 = vpop.permute.xlu1 %2053 }
 0x437   : > { %v2107_v30 = vsel %vm997_vm2, %v9615_v60, %v2054_v19 }
 0x43a   : > { %v2056_v44 = vpop.permute.xlu0 %2055  ;;  %v9629_v25 = vpop.permute.xlu1 %1957 }
 0x43b   : > { %v2108_v51 = vsel %vm997_vm2, %v9622_v32, %v2056_v44  ;;  %v2011_v8 = vsel %vm808_vm4, %v1950_v62, %v9629_v25 }
 0x43e   : > { %v9637_v50 = vpop.permute.xlu0 %1959  ;;  %v2058_v7 = vpop.permute.xlu1 %2057 }
 0x43f   : > { %v2012_v22 = vsel %vm808_vm4, %v9624_v47, %v9637_v50  ;;  %v2101_v36 = vsel %vm997_vm2, %v2050_v3, %v2058_v7 }
 0x440   : > { %v2288_v63 = vpack.c.bf16 %v2012_v22, %v2011_v8 }
 0x442   : > { %v2060_v13 = vpop.permute.xlu0 %2059  ;;  %v2066_v55 = vpop.permute.xlu1 %2065 }
 0x443   : > { %v2102_v42 = vsel %vm997_vm2, %v2052_v34, %v2060_v13  ;;  %v9649_v57 = vsel %vm997_vm2, %v2058_v7, %v2066_v55  ;;  %v2311_v7 = vpack.c.bf16 %v2108_v51, %v2107_v30 }
 0x444   : > { %v2306_v16 = vpack.c.bf16 %v2102_v42, %v2101_v36 }
 0x446   : > { %v2068_v27 = vpop.permute.xlu0 %2067  ;;  %v2062_v4 = vpop.permute.xlu1 %2061 }
 0x447   : > { %v9653_v40 = vsel %vm997_vm2, %v2060_v13, %v2068_v27  ;;  %v2103_v58 = vsel %vm997_vm2, %v2054_v19, %v2062_v4 }
 0x448   : > { %v2307_v36 = vpack.c.bf16 %v9653_v40, %v9649_v57 }
 0x44a   : > { %v2064_v17 = vpop.permute.xlu0 %2063  ;;  %v2070_v3 = vpop.permute.xlu1 %2069 }
 0x44b   : > { %v2104_v5 = vsel %vm997_vm2, %v2056_v44, %v2064_v17  ;;  %v2099_v34 = vsel %vm997_vm2, %v2062_v4, %v2070_v3 }
 0x44c   : > { %v2312_v20 = vpack.c.bf16 %v2104_v5, %v2103_v58 }
 0x44e   : > { %v2072_v21 = vpop.permute.xlu0 %2071  ;;  %v2074_v43 = vpop.permute.xlu1 %2073  ;;  %2365 = vmatprep.subr.bf16.mxu0 %v2312_v20 }
 0x44f   : > { %v2100_v13 = vsel %vm997_vm2, %v2064_v17, %v2072_v21  ;;  %v2093_v19 = vsel %vm997_vm2, %v2066_v55, %v2074_v43  ;;  %2366 = vmatpush1.bf16.msra.mxu0 %v2311_v7  ;;  %v12144_v17 = vpack.c.bf16 %v9445_v56, %v9431_v11  ;;  %v12146_v11 = vpack.c.bf16 %v9417_v45, %v9411_v23 }
 0x450   : > { %2367 = vmatprep.subr.bf16.mxu0 %v2306_v16  ;;  %v2313_v45 = vpack.c.bf16 %v2100_v13, %v2099_v34 }
 0x452   : > { %v2076_v1 = vpop.permute.xlu0 %2075  ;;  %v9665_v44 = vpop.permute.xlu1 %1985 }
 0x453   : > { %v2094_v5 = vsel %vm997_vm2, %v2068_v27, %v2076_v1  ;;  %v2013_v4 = vsel %vm808_vm4, %v9665_v44, %v1946_v10  ;;  %2368 = vmatpush1.bf16.msra.mxu0 %v2305_v12  ;;  %v12145_v12 = vpack.c.bf16 %v9440_v41, %v9426_v2  ;;  %v12147_v2 = vpack.c.bf16 %v9415_v24, %v9409_v28 }
 0x454   : > { %v2017_v58 = vmul.f32 %v8840_v0, %v2013_v4  ;;  %2369 = vmatprep.subr.bf16.mxu0 %v12144_v17  ;;  %v2308_v8 = vpack.c.bf16 %v2094_v5, %v2093_v19  ;;  %v2296_v5 = vpack.c.bf16 %v9457_v31, %v9442_v61  ;;  %v2295_v61 = vpack.c.bf16 %v9453_v46, %v9437_v37 }
 0x456   : > { %2137 = vst [vmem:[#allocation2] sm:$0xff] %v2017_v58  ;;  %v9676_v20 = vpop.permute.xlu0 %1987  ;;  %v2078_v16 = vpop.permute.xlu1 %2077 }
 0x457   : > { %v2014_v55 = vsel %vm808_vm4, %v9676_v20, %v1948_v9  ;;  %v2095_v27 = vsel %vm997_vm2, %v2070_v3, %v2078_v16  ;;  %2370 = vmatpush1.bf16.msra.mxu0 %v12145_v12 }
 0x458   : > { %v2023_v42 = vmul.f32 %v8840_v0, %v2014_v55  ;;  %2371 = vmatprep.subr.bf16.mxu0 %v12146_v11 }
 0x45a   : > { %v2080_v56 = vpop.permute.xlu0 %2079  ;;  %v9690_v10 = vpop.permute.xlu1 %1989 }
 0x45b   : > { %v2096_v9 = vsel %vm997_vm2, %v2072_v21, %v2080_v56  ;;  %v2015_v33 = vsel %vm808_vm4, %v9690_v10, %v1950_v62  ;;  %2372 = vmatpush1.bf16.msra.mxu0 %v12147_v2 }
 0x45c   : > { %v2029_v41 = vmul.f32 %v8840_v0, %v2015_v33  ;;  %2373 = vmatprep.subr.bf16.mxu0 %v2288_v63  ;;  %v2314_v23 = vpack.c.bf16 %v2096_v9, %v2095_v27  ;;  %v12150_v33 = vpack.c.bf16 %v9515_v39, %v9505_v26  ;;  %v12154_v39 = vld [vmem:[#allocation25_spill] sm:$0xff] }
 0x45e   : > { %v9701_v30 = vpop.permute.xlu0 %1991  ;;  %v2082_v51 = vpop.permute.xlu1 %2081  ;;  %2418 = vmatprep.subr.bf16.mxu1 %v2314_v23  ;;  %v12152_v23 = vld [vmem:[#allocation26_spill] sm:$0xff] }
 0x45f   : > { %v2016_v21 = vsel %vm808_vm4, %v9701_v30, %v9624_v47  ;;  %v2089_v62 = vsel %vm997_vm2, %v2074_v43, %v2082_v51  ;;  %v2109_v28 = vsel %vm997_vm2, %v2082_v51, %v9595_v48  ;;  %2419 = vmatpush1.bf16.msra.mxu1 %v2313_v45  ;;  %v2282_v47 = vpack.c.bf16 %v9620_v6, %v9610_v15 }
 0x460   : > { %v2035_v24 = vmul.f32 %v8840_v0, %v2016_v21  ;;  %v2118_v22 = vmul.f32 %v8821_v49, %v2109_v28  ;;  %2420 = vmatprep.subr.bf16.mxu1 %v2308_v8  ;;  %v2281_v6 = vpack.c.bf16 %v2023_v42, %v2017_v58  ;;  %v8168_v42 = vld [vmem:[#allocation7 + $0x8] sm:$0xff]   ;;  %v12155_v8 = vld [vmem:[#allocation23_spill] sm:$0xff] }
 0x461   : > { %v12156_v21 = vpack.c.bf16 %v12154_v39, %v12155_v8 }
 0x462   : > { %v2084_v3 = vpop.permute.xlu0 %2083  ;;  %v2086_v34 = vpop.permute.xlu1 %2085  ;;  %v2287_v7 = vpack.c.bf16 %v2035_v24, %v2029_v41  ;;  %v12151_v41 = vld [vmem:[#allocation27_spill] sm:$0xff]  ;;  %v12157_v24 = vld [vmem:[#allocation22_spill] sm:$0xff] }
 0x463   : > { %v2090_v43 = vsel %vm997_vm2, %v2076_v1, %v2084_v3  ;;  %v2110_v48 = vsel %vm997_vm2, %v2084_v3, %v9597_v59  ;;  %v2091_v13 = vsel %vm997_vm2, %v2078_v16, %v2086_v34  ;;  %v2111_v40 = vsel %vm997_vm2, %v2086_v34, %v9615_v60  ;;  %2421 = vmatpush1.bf16.msra.mxu1 %v2307_v36 }
 0x464   : > { %v2124_v57 = vmul.f32 %v8821_v49, %v2110_v48  ;;  %v2130_v19 = vmul.f32 %v8821_v49, %v2111_v40  ;;  %2374 = vmatpush1.bf16.msra.mxu0 %v2287_v7  ;;  %v12148_v1 = vpack.c.bf16 %v9479_v18, %v9467_v29  ;;  %v12149_v29 = vpack.c.bf16 %v9474_v52, %v9464_v53  ;;  %v9746_v18 = vld [vmem:[#allocation7] sm:$0xff]  }
 0x465   : > { %2375 = vmatprep.subr.bf16.mxu0 %v2282_v47  ;;  %v2309_v12 = vpack.c.bf16 %v2090_v43, %v2089_v62  ;;  %v12153_v45 = vpack.c.bf16 %v12151_v41, %v12152_v23 }
 0x466   : > { %2422 = vmatprep.subr.bf16.mxu1 %v12148_v1  ;;  %v2088_v15 = vpop.permute.xlu0 %2087  ;;  %v1966_v59 = vpop.permute.xlu1 %1965  ;;  %v2310_v55 = vpack.c.bf16 %v2124_v57, %v2118_v22  ;;  %v12158_v22 = vld [vmem:[#allocation24_spill] sm:$0xff] }
 0x467   : > { %v2092_v60 = vsel %vm997_vm2, %v2080_v56, %v2088_v15  ;;  %v2112_v4 = vsel %vm997_vm2, %v2088_v15, %v9622_v32  ;;  %v2007_v17 = vsel %vm808_vm4, %v9629_v25, %v1966_v59  ;;  %2423 = vmatpush1.bf16.msra.mxu1 %v12149_v29  ;;  %v2297_v36 = vpack.c.bf16 %v12158_v22, %v12157_v24 }
 0x468   : > { %v2136_v58 = vmul.f32 %v8821_v49, %v2112_v4  ;;  %2376 = vmatpush1.bf16.msra.mxu0 %v2281_v6  ;;  %2424 = vmatprep.subr.bf16.mxu1 %v2296_v5  ;;  %v2315_v52 = vpack.c.bf16 %v2092_v60, %v2091_v13 }
 0x46a   : > { %v1968_v31 = vpop.permute.xlu0 %1967  ;;  %v1974_v16 = vpop.permute.xlu1 %1973  ;;  %v2316_v32 = vpack.c.bf16 %v2136_v58, %v2130_v19 }
 0x46b   : > { %v2008_v25 = vsel %vm808_vm4, %v9637_v50, %v1968_v31  ;;  %v2003_v53 = vsel %vm808_vm4, %v1966_v59, %v1974_v16  ;;  %7337 = vmatmul.mubr.msk.bf16.vlgmr.msra.gmra.mxu0 %vm1779_vm7, %v9746_v18  ;;  %2425 = vmatpush1.bf16.msra.mxu1 %v2295_v61 }
 0x46c   : > { %2471 = vmatprep.subr.bf16.mxu0 %v2316_v32  ;;  %2403 = vmatprep.mubr.bf16.mxu0 %v12135_v35  ;;  %v2289_v56 = vpack.c.bf16 %v2008_v25, %v2007_v17 }
 0x46d   : > { %2472 = vmatpush1.bf16.msra.mxu0 %v2315_v52 }
 0x46e   : > { %v1976_v37 = vpop.permute.xlu0 %1975  ;;  %v1962_v46 = vpop.permute.xlu1 %1961  ;;  %2473 = vmatprep.subr.bf16.mxu0 %v2310_v55 }
 0x46f   : > { %v2004_v27 = vsel %vm808_vm4, %v1968_v31, %v1976_v37  ;;  %v2005_v50 = vsel %vm808_vm4, %v9602_v54, %v1962_v46 }
 0x470   : > { %2139 = vst [vmem:[#allocation2 + $0x10] sm:$0xff] %v2005_v50  ;;  %v2290_v11 = vpack.c.bf16 %v2004_v27, %v2003_v53 }
 0x471   : > { %2474 = vmatpush1.bf16.msra.mxu0 %v2309_v12 }
 0x472   : > { %v1964_v63 = vpop.permute.xlu0 %1963  ;;  %v1970_v9 = vpop.permute.xlu1 %1969  ;;  %2426 = vmatprep.subr.bf16.mxu1 %v2290_v11  ;;  %2475 = vmatprep.subr.bf16.mxu0 %v12150_v33 }
 0x473   : > { %v2006_v2 = vsel %vm808_vm4, %v9613_v14, %v1964_v63  ;;  %v2001_v54 = vsel %vm808_vm4, %v1962_v46, %v1970_v9  ;;  %7338 = vmatmul.mubr.msk.bf16.gmra.mxu0 %vm1779_vm7, %v8168_v42  ;;  %2427 = vmatpush1.bf16.msra.mxu1 %v2289_v56 }
 0x474   : > { %2140 = vst [vmem:[#allocation2 + $0x18] sm:$0xff] %v2001_v54  ;;  %2499 = vmatprep.mubr.bf16.mxu0 %v12135_v35  ;;  %v2283_v34 = vpack.c.bf16 %v2006_v2, %v2005_v50 }
 0x475   : > { %2476 = vmatpush1.bf16.msra.mxu0 %v12153_v45 }
 0x476   : > { %v1972_v51 = vpop.permute.xlu0 %1971  ;;  %v1982_v26 = vpop.permute.xlu1 %1981  ;;  %2477 = vmatprep.subr.bf16.mxu0 %v12156_v21 }
 0x477   : > { %v2002_v14 = vsel %vm808_vm4, %v1964_v63, %v1972_v51  ;;  %v1995_v62 = vsel %vm808_vm4, %v1982_v26, %v9690_v10  ;;  %v1999_v28 = vsel %vm808_vm4, %v1974_v16, %v1982_v26 }
 0x478   : > { %v2284_v3 = vpack.c.bf16 %v2002_v14, %v2001_v54 }
 0x479   : > { %2478 = vmatpush1.bf16.msra.mxu0 %v2297_v36 }
 0x47a   : > { %v1984_v7 = vpop.permute.xlu0 %1983  ;;  %v1978_v47 = vpop.permute.xlu1 %1977  ;;  %2428 = vmatprep.subr.bf16.mxu1 %v2284_v3 }
 0x47b   : > { %v1996_v43 = vsel %vm808_vm4, %v1984_v7, %v9701_v30  ;;  %v2000_v48 = vsel %vm808_vm4, %v1976_v37, %v1984_v7  ;;  %v1993_v10 = vsel %vm808_vm4, %v1978_v47, %v9665_v44  ;;  %v1997_v13 = vsel %vm808_vm4, %v1970_v9, %v1978_v47  ;;  %2429 = vmatpush1.bf16.msra.mxu1 %v2283_v34 }
 0x47c   : > { %2141 = vst [vmem:[#allocation2 + $0x20] sm:$0xff] %v1997_v13  ;;  %2142 = vst [vmem:[#allocation2 + $0x28] sm:$0xff] %v1993_v10  ;;  %v2292_v40 = vpack.c.bf16 %v1996_v43, %v1995_v62  ;;  %v2291_v57 = vpack.c.bf16 %v2000_v48, %v1999_v28 }
 0x47e   : > { %v1980_v19 = vpop.permute.xlu0 %1979  ;;  %7339 = vmatmul.mubr.msk.bf16.vlgmr.msra.gmra.mxu1 %vm1779_vm7, %v9746_v18  ;;  %2479 = vmatprep.subr.bf16.mxu0 %v2292_v40 }
 0x47f   : > { %v1994_v30 = vsel %vm808_vm4, %v1980_v19, %v9676_v20  ;;  %v1998_v44 = vsel %vm808_vm4, %v1972_v51, %v1980_v19  ;;  %2480 = vmatpush1.bf16.msra.mxu0 %v2291_v57  ;;  %2456 = vmatprep.mubr.bf16.mxu1 %v12135_v35 }
 0x480   : > { %v2286_v1 = vpack.c.bf16 %v1994_v30, %v1993_v10  ;;  %v2285_v15 = vpack.c.bf16 %v1998_v44, %v1997_v13 }
 0x482   : > { %2481 = vmatprep.subr.bf16.mxu0 %v2286_v1 }
 0x483   : > { %2482 = vmatpush1.bf16.msra.mxu0 %v2285_v15 }
 0x486   : > { %7340 = vmatmul.mubr.msk.bf16.gmra.mxu1 %vm1779_vm7, %v8168_v42  ;;  %7341 = vmatmul.mubr.msk.bf16.vlgmr.msra.gmra.mxu0 %vm1779_vm7, %v9746_v18 }
 0x487   : > { %2509 = vmatprep.mubr.bf16.mxu0 %v12135_v35  ;;  %v9812_v29 = vpop.permute.xlu1 %2342 }
 0x48b   : > { %v2338_v16 = vpop.permute.xlu0 %2337  ;;  %v2333_v18 = vpop.permute.xlu1 %2332 }
 0x48e   : > { %7342 = vmatmul.mubr.msk.bf16.gmra.mxu0 %vm1779_vm7, %v8168_v42 }
 0x48f   : > { %v2328_v11 = vpop.permute.xlu0 %2327 }
 0x52b   : > { %v2395_v20 = vpop.f32.mrf.mxu0 }
 0x52c   : > { %v9844_v26 = vadd.f32 %v2395_v20, %v2328_v11 }
 0x52d   : > { %v2397_v59 = vpop.f32.mrf.mxu0 }
 0x52e   : > { %v9831_v9 = vadd.f32 %v2397_v59, %v2328_v11 }
 0x52f   : > { %v2399_v6 = vpop.f32.mrf.mxu0 }
 0x530   : > { %v9822_v27 = vadd.f32 %v2399_v6, %v2333_v18  ;;  %v2520_v24 = vmax.f32 %v9844_v26, %v9831_v9 }
 0x531   : > { %v2401_v5 = vpop.f32.mrf.mxu0 }
 0x532   : > { %v9816_v35 = vadd.f32 %v2401_v5, %v2333_v18 }
 0x533   : > { %v2405_v60 = vpop.f32.mrf.mxu0 }
 0x534   : > { %v9818_v37 = vadd.f32 %v2405_v60, %v2338_v16  ;;  %v2527_v33 = vmax.f32 %v9822_v27, %v9816_v35  ;;  %v2555_v44 = vadd.f32 %v9816_v35, %v9822_v27 }
 0x535   : > { %v2407_v4 = vpop.f32.mrf.mxu0 }
 0x536   : > { %v9814_v53 = vadd.f32 %v2407_v4, %v2338_v16 }
 0x537   : > { %v2409_v58 = vpop.f32.mrf.mxu0 }
 0x538   : > { %v2534_v56 = vmax.f32 %v9818_v37, %v9814_v53  ;;  %v9836_v41 = vadd.f32 %v2409_v58, %v9812_v29  ;;  %v2562_v1 = vadd.f32 %v9814_v53, %v9818_v37 }
 0x539   : > { %v2411_v32 = vpop.f32.mrf.mxu0 }
 0x53a   : > { %v9829_v63 = vadd.f32 %v2411_v32, %v9812_v29 }
 0x53c   : > { %v2541_v28 = vmax.f32 %v9836_v41, %v9829_v63  ;;  %v2569_v22 = vadd.f32 %v9829_v63, %v9836_v41 }
 0x53e   : > { %v2448_v17 = vpop.f32.mrf.mxu1 }
 0x53f   : > { %v9846_v39 = vadd.f32 %v2448_v17, %v2328_v11 }
 0x540   : > { %v2450_v61 = vpop.f32.mrf.mxu1 }
 0x541   : > { %v2521_v48 = vmax.f32 %v2520_v24, %v9846_v39  ;;  %v9867_v10 = vadd.f32 %v2450_v61, %v2328_v11 }
 0x542   : > { %v2452_v31 = vpop.f32.mrf.mxu1 }
 0x543   : > { %v9824_v50 = vadd.f32 %v2452_v31, %v2333_v18  ;;  %v2522_v17 = vmax.f32 %v2521_v48, %v9867_v10 }
 0x544   : > { %v2454_v25 = vpop.f32.mrf.mxu1 }
 0x545   : > { %v2528_v8 = vmax.f32 %v2527_v33, %v9824_v50  ;;  %v9849_v21 = vadd.f32 %v2454_v25, %v2333_v18  ;;  %v2556_v58 = vadd.f32 %v2555_v44, %v9824_v50 }
 0x546   : > { %v2458_v52 = vpop.f32.mrf.mxu1  ;;  %v2501_v55 = vpop.f32.mrf.mxu0 }
 0x547   : > { %v9820_v46 = vadd.f32 %v2458_v52, %v2338_v16  ;;  %v2529_v13 = vmax.f32 %v2528_v8, %v9849_v21  ;;  %v9878_v15 = vadd.f32 %v2501_v55, %v2328_v11 }
 0x548   : > { %v2460_v12 = vpop.f32.mrf.mxu1  ;;  %v2503_v42 = vpop.f32.mrf.mxu0 }
 0x549   : > { %v2535_v23 = vmax.f32 %v2534_v56, %v9820_v46  ;;  %v9839_v45 = vadd.f32 %v2460_v12, %v2338_v16  ;;  %v2563_v31 = vadd.f32 %v2562_v1, %v9820_v46  ;;  %v2523_v52 = vmax.f32 %v2522_v17, %v9878_v15 }
 0x54a   : > { %v2462_v2 = vpop.f32.mrf.mxu1  ;;  %v2505_v54 = vpop.f32.mrf.mxu0  ;;  %v9899_v55 = vadd.f32 %v2503_v42, %v2328_v11 }
 0x54b   : > { %v9842_v51 = vadd.f32 %v2462_v2, %v9812_v29  ;;  %v9857_v36 = vadd.f32 %v2505_v54, %v2333_v18  ;;  %v2536_v34 = vmax.f32 %v2535_v23, %v9839_v45  ;;  %v2557_v54 = vadd.f32 %v2556_v58, %v9849_v21 }
 0x54c   : > { %v2464_v14 = vpop.f32.mrf.mxu1  ;;  %v2507_v62 = vpop.f32.mrf.mxu0  ;;  %v2524_v11 = vmax.f32 %v2523_v52, %v9899_v55 }
 0x54d   : > { %v2542_v7 = vmax.f32 %v2541_v28, %v9842_v51  ;;  %v9862_v47 = vadd.f32 %v2464_v14, %v9812_v29  ;;  %v2570_v57 = vadd.f32 %v2569_v22, %v9842_v51  ;;  %v2530_v20 = vmax.f32 %v2529_v13, %v9857_v36 }
 0x54e   : > { %v2511_v3 = vpop.f32.mrf.mxu0  ;;  %v9882_v5 = vadd.f32 %v2507_v62, %v2333_v18  ;;  %v2548_v18 = vadd.f32 %v9831_v9, %v9844_v26  ;;  %v2558_v23 = vadd.f32 %v2557_v54, %v9857_v36 }
 0x54f   : > { %v9864_v43 = vadd.f32 %v2511_v3, %v2338_v16  ;;  %v2543_v6 = vmax.f32 %v2542_v7, %v9862_v47  ;;  %v2581_v3 = vld [vmem:[#allocation9] sm:$0xff] }
 0x550   : > { %v2513_v40 = vpop.f32.mrf.mxu0  ;;  %v2531_v33 = vmax.f32 %v2530_v20, %v9882_v5  ;;  %v2549_v2 = vadd.f32 %v2548_v18, %v9846_v39  ;;  %v2559_v28 = vadd.f32 %v2558_v23, %v9882_v5  ;;  %7931 = vmatprep.mubr.msk.f32.mxu1 %vm2587_vm8, %v2581_v3 }
 0x551   : > { %v2537_v19 = vmax.f32 %v2536_v34, %v9864_v43  ;;  %v9872_v30 = vadd.f32 %v2513_v40, %v2338_v16  ;;  %v2571_v16 = vadd.f32 %v2570_v57, %v9862_v47  ;;  %v2582_v40 = vld [vmem:[#allocation9 + $0x8] sm:$0xff] }
 0x552   : > { %v2515_v59 = vpop.f32.mrf.mxu0  ;;  %v2550_v14 = vadd.f32 %v2549_v2, %v9867_v10  ;;  %v2583_v57 = vld [vmem:[%s12050_s9] sm:$0xff] }
 0x553   : > { %v9885_v60 = vadd.f32 %v2515_v59, %v9812_v29  ;;  %v2538_v4 = vmax.f32 %v2537_v19, %v9872_v30  ;;  %7959 = vmatprep.mubr.msk.f32.mxu0 %vm2669_vm9, %v2583_v57  ;;  %v2584_v59 = vld [vmem:[%s12050_s9 + $0x8] sm:$0xff] }
 0x554   : > { %v2517_v61 = vpop.f32.mrf.mxu0  ;;  %v2551_v62 = vadd.f32 %v2550_v14, %v9878_v15 }
 0x555   : > { %v2544_v32 = vmax.f32 %v2543_v6, %v9885_v60  ;;  %v9894_v25 = vadd.f32 %v2517_v61, %v9812_v29  ;;  %2539 = vmax.xlane.f32.xlu0 %v2538_v4  ;;  %v2572_v12 = vadd.f32 %v2571_v16, %v9885_v60  ;;  %v2564_v29 = vadd.f32 %v2563_v31, %v9839_v45  ;;  %v2585_v4 = vld [vmem:[%s12050_s9 + $0x10] sm:$0xff]  ;;  %v2586_v31 = vld [vmem:[%s12050_s9 + $0x18] sm:$0xff] }
 0x556   : > { %v2552_v22 = vadd.f32 %v2551_v62, %v9899_v55 }
 0x557   : > { %v2545_v56 = vmax.f32 %v2544_v32, %v9894_v25  ;;  %v2565_v8 = vadd.f32 %v2564_v29, %v9864_v43  ;;  %v2573_v42 = vadd.f32 %v2572_v12, %v9894_v25 }
 0x559   : > { %2546 = vmax.xlane.f32.xlu1 %v2545_v56  ;;  %2532 = vmax.xlane.f32.xlu0 %v2531_v33  ;;  %v2566_v24 = vadd.f32 %v2565_v8, %v9872_v30 }
 0x55d   : > { %2574 = vadd.xlane.f32.xlu0 %v2573_v42  ;;  %2525 = vmax.xlane.f32.xlu1 %v2524_v11 }
 0x561   : > { %2560 = vadd.xlane.f32.xlu0 %v2559_v28  ;;  %2567 = vadd.xlane.f32.xlu1 %v2566_v24 }
 0x565   : > { %2553 = vadd.xlane.f32.xlu1 %v2552_v22 }
 0x5de   : > { %v2540_v34 = vpop.xlane.xlu0 %2539 }
 0x5e2   : > { %v2547_v7 = vpop.xlane.xlu1 %2546  ;;  %v2533_v48 = vpop.xlane.xlu0 %2532 }
 0x5e3   : > { %7923 = vmatprep.subr.mxu1 %v2547_v7 }
 0x5e4   : > { %7924 = vmatpush3.msra.mxu1 %v2547_v7 }
 0x5e5   : > { %7925 = vmatprep.subr.mxu1 %v2540_v34 }
 0x5e6   : > { %7926 = vmatpush3.msra.mxu1 %v2540_v34  ;;  %v2526_v13 = vpop.xlane.xlu1 %2525  ;;  %v2575_v19 = vpop.xlane.xlu0 %2574 }
 0x5e7   : > { %7927 = vmatprep.subr.mxu1 %v2533_v48  ;;  %v2580_v6 = vmul.f32 0.0013020834, %v2575_v19 }
 0x5e8   : > { %7928 = vmatpush3.msra.mxu1 %v2533_v48 }
 0x5e9   : > { %7929 = vmatprep.subr.mxu1 %v2526_v13 }
 0x5ea   : > { %7930 = vmatpush3.msra.mxu1 %v2526_v13  ;;  %v2568_v44 = vpop.xlane.xlu1 %2567  ;;  %v2561_v17 = vpop.xlane.xlu0 %2560 }
 0x5eb   : > { %7932 = vmatmul.mubr.msk.f32.vlgmr.msra.gmra.mxu1 %vm2587_vm8, %v2582_v40  ;;  %v2579_v58 = vmul.f32 0.0013020834, %v2568_v44  ;;  %v2578_v16 = vmul.f32 0.0013020834, %v2561_v17 }
 0x5ec   : > { %7938 = vmatprep.mubr.msk.f32.mxu1 %vm2669_vm9, %v2583_v57 }
 0x5ee   : > { %v2554_v61 = vpop.xlane.xlu1 %2553 }
 0x5ef   : > { %v2577_v32 = vmul.f32 0.0013020834, %v2554_v61 }
 0x6ab   : > { %v7933_v1 = vpop.f32.mrf.mxu1 }
 0x6ac   : > { %7934 = vmatprep.subr.mxu1 %v7933_v1 }
 0x6ad   : > { %v2660_v20 = vpop.f32.mrf.mxu1  ;;  %7935 = vmatpush3.msra.mxu1 %v7933_v1 }
 0x6ae   : > { %7936 = vmatprep.subr.mxu1 %v2660_v20 }
 0x6af   : > { %7937 = vmatpush3.msra.mxu1 %v2660_v20 }
 0x6b0   : > { %7939 = vmatmul.mubr.msk.f32.vlgmr.msra.gmra.mxu1 %vm2669_vm9, %v2584_v59  ;;  %7944 = vmatprep.subr.mxu1 %v2580_v6 }
 0x6b1   : > { %7945 = vmatpush3.msra.mxu1 %v2580_v6  ;;  %7941 = vmatprep.mubr.msk.f32.mxu1 %vm2669_vm9, %v2585_v4 }
 0x6b2   : > { %7946 = vmatprep.subr.mxu1 %v2579_v58 }
 0x6b3   : > { %7947 = vmatpush3.msra.mxu1 %v2579_v58 }
 0x6b4   : > { %7942 = vmatmul.mubr.msk.f32.gmra.mxu1 %vm2669_vm9, %v2586_v31  ;;  %7948 = vmatprep.subr.mxu1 %v2578_v16 }
 0x6b5   : > { %7949 = vmatpush3.msra.mxu1 %v2578_v16  ;;  %7952 = vmatprep.mubr.msk.f32.mxu1 %vm2587_vm8, %v2581_v3 }
 0x6b6   : > { %7950 = vmatprep.subr.mxu1 %v2577_v32 }
 0x6b7   : > { %7951 = vmatpush3.msra.mxu1 %v2577_v32 }
 0x6b8   : > { %7953 = vmatmul.mubr.msk.f32.vlgmr.msra.gmra.mxu1 %vm2587_vm8, %v2582_v40 }
 0x770   : > { %v7940_v18 = vpop.f32.mrf.mxu1 }
 0x771   : > { %v2768_v29 = vmax.f32 %v7940_v18, 0.0 }
 0x772   : > { %v2748_v52 = vpop.f32.mrf.mxu1 }
 0x773   : > { %v2767_v42 = vmax.f32 %v2748_v52, 0.0 }
 0x774   : > { %v7943_v12 = vpop.f32.mrf.mxu1 }
 0x775   : > { %v2770_v28 = vmax.f32 %v7943_v12, 0.0 }
 0x776   : > { %v2758_v56 = vpop.f32.mrf.mxu1 }
 0x777   : > { %v2769_v34 = vmax.f32 %v2758_v56, 0.0 }
 0x778   : > { %v7954_v33 = vpop.f32.mrf.mxu1 }
 0x779   : > { %7955 = vmatprep.subr.mxu0 %v7954_v33 }
 0x77a   : > { %v2837_v2 = vpop.f32.mrf.mxu1  ;;  %7956 = vmatpush3.msra.mxu0 %v7954_v33 }
 0x77b   : > { %7957 = vmatprep.subr.mxu0 %v2837_v2 }
 0x77c   : > { %7958 = vmatpush3.msra.mxu0 %v2837_v2 }
 0x77d   : > { %7960 = vmatmul.mubr.msk.f32.vlgmr.msra.gmra.mxu0 %vm2669_vm9, %v2584_v59 }
 0x77e   : > { %7962 = vmatprep.mubr.msk.f32.mxu0 %vm2669_vm9, %v2585_v4 }
 0x781   : > { %7963 = vmatmul.mubr.msk.f32.gmra.mxu0 %vm2669_vm9, %v2586_v31 }
 0x83d   : > { %v7961_v54 = vpop.f32.mrf.mxu0 }
 0x83e   : > { %v2932_v23 = vmax.f32 %v7961_v54, 0.0 }
 0x83f   : > { %v2912_v8 = vpop.f32.mrf.mxu0 }
 0x840   : > { %v2936_v11 = vadd.f32 %v2932_v23, %v2768_v29  ;;  %v2931_v14 = vmax.f32 %v2912_v8, 0.0 }
 0x841   : > { %v7964_v62 = vpop.f32.mrf.mxu0 }
 0x842   : > { %v2940_v24 = vsub.f32 0.0, %v2936_v11  ;;  %v2935_v22 = vadd.f32 %v2931_v14, %v2767_v42  ;;  %v2934_v3 = vmax.f32 %v7964_v62, 0.0 }
 0x843   : > { %v2922_v7 = vpop.f32.mrf.mxu0 }
 0x844   : > { %v2945_v48 = vmul.f32 1.442695, %v2940_v24  ;;  %v2939_v13 = vsub.f32 0.0, %v2935_v22  ;;  %v2938_v40 = vadd.f32 %v2934_v3, %v2770_v28  ;;  %v2933_v57 = vmax.f32 %v2922_v7, 0.0 }
 0x846   : > { %8169 = vpow2.f32 %v2945_v48  ;;  %v2943_v19 = vmul.f32 1.442695, %v2939_v13  ;;  %v2942_v44 = vsub.f32 0.0, %v2938_v40  ;;  %v2937_v1 = vadd.f32 %v2933_v57, %v2769_v34 }
 0x848   : > { %8171 = vpow2.f32 %v2943_v19  ;;  %v2949_v20 = vmul.f32 1.442695, %v2942_v44  ;;  %v2941_v59 = vsub.f32 0.0, %v2937_v1 }
 0x84a   : > { %8173 = vpow2.f32 %v2949_v20  ;;  %v2947_v6 = vmul.f32 1.442695, %v2941_v59 }
 0x84c   : > { %8175 = vpow2.f32 %v2947_v6 }
 0x853   : > { %v8170_v4 = vpop.eup %8169 }
 0x854   : > { %v2952_v17 = vadd.f32 1.0, %v8170_v4 }
 0x855   : > { %v8172_v58 = vpop.eup %8171 }
 0x856   : > { %8177 = vrcp.f32 %v2952_v17  ;;  %v2951_v61 = vadd.f32 1.0, %v8172_v58 }
 0x857   : > { %v8174_v31 = vpop.eup %8173 }
 0x858   : > { %8179 = vrcp.f32 %v2951_v61  ;;  %v2954_v16 = vadd.f32 1.0, %v8174_v31 }
 0x859   : > { %v8176_v32 = vpop.eup %8175 }
 0x85a   : > { %v2953_v18 = vadd.f32 1.0, %v8176_v32  ;;  %8181 = vrcp.f32 %v2954_v16 }
 0x85c   : > { %8183 = vrcp.f32 %v2953_v18 }
 0x863   : > { %v8178_v52 = vpop.eup %8177 }
 0x864   : > { %2970 = vperm.xlu1 %8102, %v8178_v52  }
 0x865   : > { %v8180_v12 = vpop.eup %8179 }
 0x866   : > { %2965 = vperm.xlu0 %8101, %v8180_v12  }
 0x867   : > { %v8182_v56 = vpop.eup %8181 }
 0x869   : > { %v8184_v33 = vpop.eup %8183 }
 0x86a   : > { %2980 = vperm.xlu0 %8101, %v8182_v56   ;;  %2975 = vperm.xlu1 %8102, %v8184_v33  }
 0x8df   : > { %v2971_v2 = vpop.permute.xlu1 %2970 }
 0x8e0   : > { %v9953_v11 = vmul.f32 %v2971_v2, %v9822_v27  ;;  %v9956_v14 = vmul.f32 %v2971_v2, %v9882_v5  ;;  %v9974_v27 = vmul.f32 %v2971_v2, %v9857_v36 }
 0x8e1   : > { %v2966_v54 = vpop.permute.xlu0 %2965 }
 0x8e2   : > { %v9941_v29 = vmul.f32 %v2966_v54, %v9844_v26  ;;  %v9944_v23 = vmul.f32 %v2966_v54, %v9831_v9  ;;  %v9947_v8 = vmul.f32 %v2966_v54, %v9846_v39  ;;  %v9950_v42 = vmul.f32 %v2966_v54, %v9867_v10  ;;  %12159 = vst [vmem:[#allocation27_spill] sm:$0xff] %v9956_v14 }
 0x8e3   : > { %v9959_v62 = vmul.f32 %v2966_v54, %v9878_v15  ;;  %v9962_v26 = vmul.f32 %v2966_v54, %v9899_v55  ;;  %v9965_v9 = vmul.f32 %v2971_v2, %v9816_v35  ;;  %v9968_v39 = vmul.f32 %v2971_v2, %v9824_v50  ;;  %12162 = vst [vmem:[#allocation23_spill] sm:$0xff] %v9974_v27 }
 0x8e4   : > { %v9971_v10 = vmul.f32 %v2971_v2, %v9849_v21  ;;  %v3007_v5 = vadd.f32 %v9953_v11, %v9941_v29  ;;  %v3068_v55 = vmax.f32 %v9941_v29, %v9953_v11 }
 0x8e5   : > { %12160 = vst [vmem:[#allocation26_spill] sm:$0xff] %v9959_v62  ;;  %12161 = vst [vmem:[#allocation25_spill] sm:$0xff] %v9962_v26  ;;  %v3052_v15 = vadd.f32 %v9956_v14, %v9962_v26  ;;  %v2981_v35 = vpop.permute.xlu0 %2980  ;;  %v2976_v28 = vpop.permute.xlu1 %2975  ;;  %v3077_v50 = vmax.f32 %v9944_v23, %v9965_v9  ;;  %v3086_v21 = vmax.f32 %v9947_v8, %v9968_v39 }
 0x8e6   : > { %v3095_v36 = vmax.f32 %v9950_v42, %v9971_v10  ;;  %v3104_v24 = vmax.f32 %v9959_v62, %v9974_v27  ;;  %v3113_v22 = vmax.f32 %v9962_v26, %v9956_v14  ;;  %v9993_v3 = vmul.f32 %v2981_v35, %v9836_v41  ;;  %v3592_v26 = vld [vmem:[%s12052_s11 + $0x300] sm:$0xff] }
 0x8e7   : > { %v9996_v34 = vmul.f32 %v2981_v35, %v9829_v63  ;;  %v9999_v7 = vmul.f32 %v2981_v35, %v9842_v51  ;;  %v10002_v48 = vmul.f32 %v2981_v35, %v9862_v47  ;;  %v10005_v13 = vmul.f32 %v2981_v35, %v9885_v60 }
 0x8e8   : > { %12163 = vst [vmem:[#allocation22_spill] sm:$0xff] %v9993_v3  ;;  %v10008_v40 = vmul.f32 %v2976_v28, %v9818_v37  ;;  %v10011_v57 = vmul.f32 %v2976_v28, %v9814_v53  ;;  %v10014_v41 = vmul.f32 %v2976_v28, %v9820_v46  ;;  %v10017_v63 = vmul.f32 %v2976_v28, %v9839_v45 }
 0x8e9   : > { %12164 = vst [vmem:[#allocation24_spill] sm:$0xff] %v9996_v34  ;;  %12165 = vst [vmem:[#allocation28_spill] sm:$0xff] %v9999_v7  ;;  %v10020_v51 = vmul.f32 %v2976_v28, %v9864_v43  ;;  %v10023_v47 = vmul.f32 %v2976_v28, %v9872_v30  ;;  %v10026_v60 = vmul.f32 %v2981_v35, %v9894_v25 }
 0x8ea   : > { %12166 = vst [vmem:[#allocation29_spill] sm:$0xff] %v10002_v48  ;;  %12167 = vst [vmem:[#allocation30_spill] sm:$0xff] %v10005_v13  ;;  %v3069_v37 = vmax.f32 %v3068_v55, %v10008_v40  ;;  %v3078_v53 = vmax.f32 %v3077_v50, %v10011_v57  ;;  %v3008_v19 = vadd.f32 %v3007_v5, %v10008_v40 }
 0x8eb   : > { %12168 = vst [vmem:[#allocation31_spill] sm:$0xff] %v10008_v40  ;;  %12169 = vst [vmem:[#allocation32_spill] sm:$0xff] %v10014_v41  ;;  %v3114_v46 = vmax.f32 %v3113_v22, %v10023_v47  ;;  %v3087_v45 = vmax.f32 %v3086_v21, %v10014_v41  ;;  %v3105_v44 = vmax.f32 %v3104_v24, %v10020_v51 }
 0x8ec   : > { %12170 = vst [vmem:[#allocation33_spill] sm:$0xff] %v10017_v63  ;;  %12171 = vst [vmem:[#allocation34_spill] sm:$0xff] %v10020_v51  ;;  %v3096_v43 = vmax.f32 %v3095_v36, %v10017_v63  ;;  %v3070_v30 = vmax.f32 %v3069_v37, %v9993_v3  ;;  %v3079_v1 = vmax.f32 %v3078_v53, %v9996_v34 }
 0x8ed   : > { %12172 = vst [vmem:[#allocation35_spill] sm:$0xff] %v10023_v47  ;;  %12173 = vst [vmem:[#allocation36_spill] sm:$0xff] %v10026_v60  ;;  %v3053_v25 = vadd.f32 %v3052_v15, %v10023_v47  ;;  %v3009_v20 = vadd.f32 %v3008_v19, %v9993_v3  ;;  %v3115_v59 = vmax.f32 %v3114_v46, %v10026_v60 }
 0x8ee   : > { %v3088_v6 = vmax.f32 %v3087_v45, %v9999_v7  ;;  %v3106_v4 = vmax.f32 %v3105_v44, %v10005_v13  ;;  %v3097_v17 = vmax.f32 %v3096_v43, %v10002_v48  ;;  %v3071_v58 = vrot.slane %v3070_v30, 4 }
 0x8ef   : > { %v3080_v61 = vrot.slane %v3079_v1, 4  ;;  %v3054_v31 = vadd.f32 %v3053_v25, %v10026_v60  ;;  %v3010_v16 = vrot.slane %v3009_v20, 4  ;;  %v3116_v32 = vrot.slane %v3115_v59, 4 }
 0x8f0   : > { %v3089_v18 = vrot.slane %v3088_v6, 4  ;;  %v3107_v52 = vrot.slane %v3106_v4, 4  ;;  %v3098_v12 = vrot.slane %v3097_v17, 4  ;;  %v3072_v56 = vmax.f32 %v3070_v30, %v3071_v58 }
 0x8f1   : > { %v3081_v33 = vmax.f32 %v3079_v1, %v3080_v61  ;;  %v3055_v2 = vrot.slane %v3054_v31, 4  ;;  %v3117_v54 = vmax.f32 %v3115_v59, %v3116_v32  ;;  %v3011_v24 = vadd.f32 %v3010_v16, %v3009_v20 }
 0x8f2   : > { %v3090_v5 = vmax.f32 %v3088_v6, %v3089_v18  ;;  %v3108_v15 = vmax.f32 %v3106_v4, %v3107_v52  ;;  %v3099_v55 = vmax.f32 %v3097_v17, %v3098_v12  ;;  %v3073_v35 = vrot.slane %v3072_v56, 2 }
 0x8f3   : > { %v3082_v28 = vrot.slane %v3081_v33, 2  ;;  %v3118_v50 = vrot.slane %v3117_v54, 2  ;;  %v3056_v36 = vadd.f32 %v3055_v2, %v3054_v31  ;;  %v3016_v22 = vadd.f32 %v9965_v9, %v9944_v23 }
 0x8f4   : > { %v3091_v21 = vrot.slane %v3090_v5, 2  ;;  %v3074_v37 = vmax.f32 %v3072_v56, %v3073_v35  ;;  %v3100_v19 = vrot.slane %v3099_v55, 2  ;;  %v3109_v44 = vrot.slane %v3108_v15, 2 }
 0x8f5   : > { %v3083_v53 = vmax.f32 %v3081_v33, %v3082_v28  ;;  %v3119_v46 = vmax.f32 %v3117_v54, %v3118_v50  ;;  %v3017_v30 = vadd.f32 %v3016_v22, %v10011_v57  ;;  %v3025_v1 = vadd.f32 %v9968_v39, %v9947_v8 }
 0x8f6   : > { %v3092_v45 = vmax.f32 %v3090_v5, %v3091_v21  ;;  %v3075_v43 = vrot.slane %v3074_v37, 1  ;;  %v3057_v59 = vrot.slane %v3056_v36, 2  ;;  %v3012_v6 = vrot.slane %v3011_v24, 2 }
 0x8f7   : > { %v3120_v25 = vrot.slane %v3119_v46, 1  ;;  %v3034_v20 = vadd.f32 %v9971_v10, %v9950_v42  ;;  %v3084_v17 = vrot.slane %v3083_v53, 1  ;;  %v3101_v58 = vmax.f32 %v3099_v55, %v3100_v19 }
 0x8f8   : > { %v10051_v4 = vmax.f32 %v3074_v37, %v3075_v43  ;;  %v3043_v61 = vadd.f32 %v9974_v27, %v9959_v62  ;;  %v3093_v16 = vrot.slane %v3092_v45, 1  ;;  %v3110_v32 = vmax.f32 %v3108_v15, %v3109_v44 }
 0x8f9   : > { %v10055_v31 = vmax.f32 %v3119_v46, %v3120_v25  ;;  %v3026_v18 = vadd.f32 %v3025_v1, %v10014_v41  ;;  %v3018_v52 = vadd.f32 %v3017_v30, %v9996_v34  ;;  %v3058_v12 = vadd.f32 %v3057_v59, %v3056_v36 }
 0x8fa   : > { %3170 = vrot.lane.b32.xlu1 %v10051_v4, %s8457_s25  ;;  %v3013_v56 = vadd.f32 %v3012_v6, %v3011_v24  ;;  %v3044_v33 = vadd.f32 %v3043_v61, %v10020_v51  ;;  %v3035_v2 = vadd.f32 %v3034_v20, %v10017_v63  ;;  %v10065_v54 = vmax.f32 %v3083_v53, %v3084_v17 }
 0x8fb   : > { %3180 = vrot.lane.b32.xlu0 %v10055_v31, %s8457_s25  ;;  %v3102_v5 = vrot.slane %v3101_v58, 1  ;;  %v3027_v15 = vadd.f32 %v3026_v18, %v9999_v7  ;;  %v3019_v55 = vrot.slane %v3018_v52, 4  ;;  %v10068_v35 = vmax.f32 %v3092_v45, %v3093_v16 }
 0x8fc   : > { %v3111_v28 = vrot.slane %v3110_v32, 1  ;;  %v3045_v50 = vadd.f32 %v3044_v33, %v10005_v13  ;;  %v3036_v21 = vadd.f32 %v3035_v2, %v10002_v48  ;;  %v3014_v19 = vrot.slane %v3013_v56, 1 }
 0x8fd   : > { %v3028_v36 = vrot.slane %v3027_v15, 4  ;;  %v3020_v24 = vadd.f32 %v3019_v55, %v3018_v52  ;;  %v10076_v53 = vmax.f32 %v3101_v58, %v3102_v5  ;;  %v3059_v43 = vrot.slane %v3058_v12, 1 }
 0x8fe   : > { %3172 = vrot.lane.b32.xlu1 %v10065_v54, %s8457_s25  ;;  %v3046_v22 = vrot.slane %v3045_v50, 4  ;;  %v3037_v37 = vrot.slane %v3036_v21, 4  ;;  %v10078_v44 = vmax.f32 %v3110_v32, %v3111_v28  ;;  %v3015_v17 = vadd.f32 %v3014_v19, %v3013_v56  ;;  %v3544_v19 = vld [vmem:[%s12052_s11 + $0x180] sm:$0xff] }
 0x8ff   : > { %3174 = vrot.lane.b32.xlu0 %v10068_v35, %s8457_s25  ;;  %v3029_v46 = vadd.f32 %v3028_v36, %v3027_v15  ;;  %v3021_v45 = vrot.slane %v3020_v24, 2  ;;  %v3060_v16 = vadd.f32 %v3059_v43, %v3058_v12  ;;  %v3548_v43 = vld [vmem:[%s12052_s11 + $0x1a0] sm:$0xff]  ;;  %v10333_v51 = vstv %s10272_s13 }
 0x900   : > { %v3047_v30 = vadd.f32 %v3046_v22, %v3045_v50  ;;  %v3038_v1 = vadd.f32 %v3037_v37, %v3036_v21  ;;  %v10088_v33 = vmul.f32 0.03125, %v3015_v17  ;;  %v3552_v22 = vld [vmem:[%s12052_s11 + $0x1c0] sm:$0xff] }
 0x901   : > { %v3030_v25 = vrot.slane %v3029_v46, 2  ;;  %v3022_v59 = vadd.f32 %v3021_v45, %v3020_v24  ;;  %v10090_v15 = vmul.f32 0.03125, %v3060_v16  ;;  %v3556_v37 = vld [vmem:[%s12052_s11 + $0x1e0] sm:$0xff]  ;;  %v7409_v16 = vcombine.low %v3544_v19, %v3548_v43 }
 0x902   : > { %3176 = vrot.lane.b32.xlu1 %v10076_v53, %s8457_s25  ;;  %v3048_v6 = vrot.slane %v3047_v30, 2  ;;  %v3039_v20 = vrot.slane %v3038_v1, 2  ;;  %v7418_v45 = vcombine.high %v3552_v22, %v3556_v37  ;;  %v3540_v17 = vld [vmem:[%s12052_s11 + $0x160] sm:$0xff] }
 0x903   : > { %3178 = vrot.lane.b32.xlu0 %v10078_v44, %s8457_s25  ;;  %v3031_v58 = vadd.f32 %v3030_v25, %v3029_v46  ;;  %v3023_v61 = vrot.slane %v3022_v59, 1  ;;  %v7417_v46 = vcombine.low %v3552_v22, %v3556_v37  ;;  %v7410_v25 = vcombine.high %v3544_v19, %v3548_v43  ;;  %v3660_v22 = vld [vmem:[%s12052_s11 + $0x520] sm:$0xff] }
 0x904   : > { %v3049_v18 = vadd.f32 %v3048_v6, %v3047_v30  ;;  %v3040_v32 = vadd.f32 %v3039_v20, %v3038_v1  ;;  %v3680_v30 = vld [vmem:[%s12052_s11 + $0x5c0] sm:$0xff]  ;;  %5800 = vmatprep.subr.bf16.mxu1 %v7418_v45 }
 0x905   : > { %v3032_v52 = vrot.slane %v3031_v58, 1  ;;  %v3024_v2 = vadd.f32 %v3023_v61, %v3022_v59  ;;  %v3684_v1 = vld [vmem:[%s12052_s11 + $0x5e0] sm:$0xff]  ;;  %5801 = vmatpush1.bf16.msra.mxu1 %v7417_v46 }
 0x906   : > { %3196 = vrot.lane.b32.xlu1 %v10065_v54, %s8458_s6  ;;  %v3041_v5 = vrot.slane %v3040_v32, 1  ;;  %v3050_v56 = vrot.slane %v3049_v18, 1  ;;  %v7545_v59 = vcombine.low %v3680_v30, %v3684_v1  ;;  %v7546_v6 = vcombine.high %v3680_v30, %v3684_v1  ;;  %v3536_v20 = vld [vmem:[%s12052_s11 + $0x140] sm:$0xff]  ;;  %5802 = vmatprep.subr.bf16.mxu1 %v7410_v25 }
 0x907   : > { %3198 = vrot.lane.b32.xlu0 %v10068_v35, %s8458_s6  ;;  %v3033_v55 = vadd.f32 %v3032_v52, %v3031_v58  ;;  %v10096_v12 = vmul.f32 0.03125, %v3024_v2  ;;  %v3672_v58 = vld [vmem:[%s12052_s11 + $0x580] sm:$0xff]  ;;  %v7402_v2 = vcombine.high %v3536_v20, %v3540_v17  ;;  %v7401_v37 = vcombine.low %v3536_v20, %v3540_v17 }
 0x908   : > { %v3042_v28 = vadd.f32 %v3041_v5, %v3040_v32  ;;  %v3051_v21 = vadd.f32 %v3050_v56, %v3049_v18  ;;  %v3676_v61 = vld [vmem:[%s12052_s11 + $0x5a0] sm:$0xff]  ;;  %5853 = vmatprep.subr.bf16.mxu0 %v7546_v6 }
 0x909   : > { %v10098_v50 = vmul.f32 0.03125, %v3033_v55  ;;  %v7538_v18 = vcombine.high %v3672_v58, %v3676_v61  ;;  %v3664_v32 = vld [vmem:[%s12052_s11 + $0x540] sm:$0xff]  ;;  %5854 = vmatpush1.bf16.msra.mxu0 %v7545_v59  ;;  %v7537_v5 = vcombine.low %v3672_v58, %v3676_v61  ;;  %5803 = vmatpush1.bf16.msra.mxu1 %v7409_v16 }
 0x90a   : > { %3122 = vrot.lane.b32.xlu1 %v10088_v33, %s8457_s25  ;;  %v10104_v36 = vmul.f32 0.03125, %v3042_v28  ;;  %v10106_v24 = vmul.f32 0.03125, %v3051_v21  ;;  %v3668_v52 = vld [vmem:[%s12052_s11 + $0x560] sm:$0xff]  ;;  %5804 = vmatprep.subr.bf16.mxu1 %v7402_v2 }
 0x90b   : > { %3132 = vrot.lane.b32.xlu0 %v10090_v15, %s8457_s25  ;;  %5855 = vmatprep.subr.bf16.mxu0 %v7538_v18  ;;  %v3528_v55 = vld [vmem:[%s12052_s11 + $0x100] sm:$0xff]  ;;  %v7530_v28 = vcombine.high %v3664_v32, %v3668_v52  ;;  %v7529_v46 = vcombine.low %v3664_v32, %v3668_v52 }
 0x90c   : > { %v3532_v56 = vld [vmem:[%s12052_s11 + $0x120] sm:$0xff] }
 0x90d   : > { %v3656_v21 = vld [vmem:[%s12052_s11 + $0x500] sm:$0xff]  ;;  %5856 = vmatpush1.bf16.msra.mxu0 %v7537_v5  ;;  %v7394_v19 = vcombine.high %v3528_v55, %v3532_v56  ;;  %5805 = vmatpush1.bf16.msra.mxu1 %v7401_v37  ;;  %v7393_v59 = vcombine.low %v3528_v55, %v3532_v56 }
 0x90e   : > { %3124 = vrot.lane.b32.xlu1 %v10096_v12, %s8457_s25  ;;  %5857 = vmatprep.subr.bf16.mxu0 %v7530_v28  ;;  %v3520_v45 = vld [vmem:[%s12052_s11 + $0xc0] sm:$0xff]  ;;  %v7522_v30 = vcombine.high %v3656_v21, %v3660_v22  ;;  %v7521_v20 = vcombine.low %v3656_v21, %v3660_v22 }
 0x90f   : > { %3126 = vrot.lane.b32.xlu0 %v10098_v50, %s8457_s25  ;;  %v3524_v43 = vld [vmem:[%s12052_s11 + $0xe0] sm:$0xff]  ;;  %5806 = vmatprep.subr.bf16.mxu1 %v7394_v19 }
 0x910   : > { %v3648_v1 = vld [vmem:[%s12052_s11 + $0x4c0] sm:$0xff]  ;;  %v7386_v6 = vcombine.high %v3520_v45, %v3524_v43  ;;  %v7385_v32 = vcombine.low %v3520_v45, %v3524_v43 }
 0x911   : > { %v3652_v25 = vld [vmem:[%s12052_s11 + $0x4e0] sm:$0xff]  ;;  %5858 = vmatpush1.bf16.msra.mxu0 %v7529_v46  ;;  %5807 = vmatpush1.bf16.msra.mxu1 %v7393_v59 }
 0x912   : > { %3128 = vrot.lane.b32.xlu1 %v10104_v36, %s8457_s25  ;;  %5859 = vmatprep.subr.bf16.mxu0 %v7522_v30  ;;  %v3512_v17 = vld [vmem:[%s12052_s11 + $0x80] sm:$0xff]  ;;  %v7514_v61 = vcombine.high %v3648_v1, %v3652_v25  ;;  %v7513_v2 = vcombine.low %v3648_v1, %v3652_v25 }
 0x913   : > { %3130 = vrot.lane.b32.xlu0 %v10106_v24, %s8457_s25  ;;  %v3516_v58 = vld [vmem:[%s12052_s11 + $0xa0] sm:$0xff]  ;;  %5808 = vmatprep.subr.bf16.mxu1 %v7386_v6 }
 0x914   : > { %v3640_v16 = vld [vmem:[%s12052_s11 + $0x480] sm:$0xff]  ;;  %v7378_v52 = vcombine.high %v3512_v17, %v3516_v58  ;;  %v7377_v19 = vcombine.low %v3512_v17, %v3516_v58 }
 0x915   : > { %v3644_v18 = vld [vmem:[%s12052_s11 + $0x4a0] sm:$0xff]  ;;  %5860 = vmatpush1.bf16.msra.mxu0 %v7521_v20  ;;  %5809 = vmatpush1.bf16.msra.mxu1 %v7385_v32 }
 0x916   : > { %3148 = vrot.lane.b32.xlu1 %v10096_v12, %s8458_s6  ;;  %5861 = vmatprep.subr.bf16.mxu0 %v7514_v61  ;;  %v3504_v55 = vld [vmem:[%s12052_s11 + $0x40] sm:$0xff]  ;;  %v7506_v28 = vcombine.high %v3640_v16, %v3644_v18  ;;  %v7505_v45 = vcombine.low %v3640_v16, %v3644_v18 }
 0x917   : > { %3150 = vrot.lane.b32.xlu0 %v10098_v50, %s8458_s6  ;;  %v3508_v56 = vld [vmem:[%s12052_s11 + $0x60] sm:$0xff]  ;;  %5810 = vmatprep.subr.bf16.mxu1 %v7378_v52 }
 0x918   : > { %v3632_v22 = vld [vmem:[%s12052_s11 + $0x440] sm:$0xff]  ;;  %v7370_v46 = vcombine.high %v3504_v55, %v3508_v56  ;;  %v7369_v17 = vcombine.low %v3504_v55, %v3508_v56 }
 0x919   : > { %v3636_v37 = vld [vmem:[%s12052_s11 + $0x460] sm:$0xff]  ;;  %5862 = vmatpush1.bf16.msra.mxu0 %v7513_v2  ;;  %5811 = vmatpush1.bf16.msra.mxu1 %v7377_v19 }
 0x91a   : > { %3152 = vrot.lane.b32.xlu1 %v10104_v36, %s8458_s6  ;;  %5863 = vmatprep.subr.bf16.mxu0 %v7506_v28  ;;  %v3496_v30 = vld [vmem:[%s12052_s11] sm:$0xff]  ;;  %v7498_v25 = vcombine.high %v3632_v22, %v3636_v37  ;;  %v7497_v61 = vcombine.low %v3632_v22, %v3636_v37 }
 0x91b   : > { %3146 = vrot.lane.b32.xlu0 %v10088_v33, %s8458_s6  ;;  %v3500_v1 = vld [vmem:[%s12052_s11 + $0x20] sm:$0xff]  ;;  %5812 = vmatprep.subr.bf16.mxu1 %v7370_v46 }
 0x91c   : > { %v3624_v6 = vld [vmem:[%s12052_s11 + $0x400] sm:$0xff]  ;;  %v7362_v58 = vcombine.high %v3496_v30, %v3500_v1  ;;  %v7361_v28 = vcombine.low %v3496_v30, %v3500_v1 }
 0x91d   : > { %v3628_v20 = vld [vmem:[%s12052_s11 + $0x420] sm:$0xff]  ;;  %5864 = vmatpush1.bf16.msra.mxu0 %v7505_v45  ;;  %5813 = vmatpush1.bf16.msra.mxu1 %v7369_v17 }
 0x91e   : > { %3154 = vrot.lane.b32.xlu1 %v10106_v24, %s8458_s6  ;;  %5865 = vmatprep.subr.bf16.mxu0 %v7498_v25  ;;  %v3616_v18 = vld [vmem:[%s12052_s11 + $0x3c0] sm:$0xff]  ;;  %v7490_v52 = vcombine.high %v3624_v6, %v3628_v20  ;;  %v7489_v37 = vcombine.low %v3624_v6, %v3628_v20 }
 0x91f   : > { %3156 = vrot.lane.b32.xlu0 %v10090_v15, %s8458_s6  ;;  %v3620_v32 = vld [vmem:[%s12052_s11 + $0x3e0] sm:$0xff]  ;;  %5814 = vmatprep.subr.bf16.mxu1 %v7362_v58 }
 0x920   : > { %v3744_v55 = vld [vmem:[%s12052_s11 + $0x7c0] sm:$0xff]  ;;  %v7482_v22 = vcombine.high %v3616_v18, %v3620_v32  ;;  %v7481_v6 = vcombine.low %v3616_v18, %v3620_v32 }
 0x921   : > { %v3748_v56 = vld [vmem:[%s12052_s11 + $0x7e0] sm:$0xff]  ;;  %5866 = vmatpush1.bf16.msra.mxu0 %v7497_v61  ;;  %5815 = vmatpush1.bf16.msra.mxu1 %v7361_v28 }
 0x922   : > { %3200 = vrot.lane.b32.xlu1 %v10076_v53, %s8458_s6  ;;  %5867 = vmatprep.subr.bf16.mxu0 %v7490_v52  ;;  %v3608_v46 = vld [vmem:[%s12052_s11 + $0x380] sm:$0xff]  ;;  %v7610_v25 = vcombine.high %v3744_v55, %v3748_v56  ;;  %v7609_v17 = vcombine.low %v3744_v55, %v3748_v56  ;;  %v3227_v55 = vstv %s10254_s20  ;;  %v10292_v56 = vstv %s10246_s22  ;;  %s718_s20 = scalar_lea.vmem %s12192_s26, %s12198_s23 }
 0x923   : > { %3194 = vrot.lane.b32.xlu0 %v10051_v4, %s8458_s6  ;;  %v3612_v45 = vld [vmem:[%s12052_s11 + $0x3a0] sm:$0xff]  ;;  %5816 = vmatprep.subr.bf16.mxu1 %v7482_v22  ;;  %v10339_v48 = vmul.f32 %v10292_v56, %v10076_v53  ;;  %v3229_v3 = vmul.f32 %v3227_v55, %v10096_v12  ;;  %v3230_v34 = vmul.f32 %v3227_v55, %v10098_v50 }
 0x924   : > { %v3736_v30 = vld [vmem:[%s12052_s11 + $0x780] sm:$0xff]  ;;  %v7474_v20 = vcombine.high %v3608_v46, %v3612_v45  ;;  %v7473_v22 = vcombine.low %v3608_v46, %v3612_v45  ;;  %v3231_v27 = vmul.f32 %v3227_v55, %v10104_v36  ;;  %v3232_v62 = vmul.f32 %v3227_v55, %v10106_v24 }
 0x925   : > { %v3740_v1 = vld [vmem:[%s12052_s11 + $0x7a0] sm:$0xff]  ;;  %5868 = vmatpush1.bf16.msra.mxu0 %v7489_v37  ;;  %5817 = vmatpush2.bf16.msra.mxu1 %v7481_v6 }
 0x926   : > { %3202 = vrot.lane.b32.xlu1 %v10078_v44, %s8458_s6  ;;  %5869 = vmatprep.subr.bf16.mxu0 %v7610_v25  ;;  %v3600_v61 = vld [vmem:[%s12052_s11 + $0x340] sm:$0xff]  ;;  %v7602_v28 = vcombine.high %v3736_v30, %v3740_v1  ;;  %v7601_v25 = vcombine.low %v3736_v30, %v3740_v1  ;;  %v10309_v30 = vmul.f32 %v3227_v55, %v10088_v33 }
 0x927   : > { %3204 = vrot.lane.b32.xlu0 %v10055_v31, %s8458_s6  ;;  %v3604_v52 = vld [vmem:[%s12052_s11 + $0x360] sm:$0xff]  ;;  %5818 = vmatprep.subr.bf16.mxu1 %v7474_v20  ;;  %v10306_v20 = vmul.f32 %v10292_v56, %v10065_v54  ;;  %v10313_v1 = vmul.f32 %v10292_v56, %v10051_v4  ;;  %v10326_v33 = vmul.f32 %v3227_v55, %v10090_v15 }
 0x928   : > { %v3728_v18 = vld [vmem:[%s12052_s11 + $0x740] sm:$0xff]  ;;  %v7466_v37 = vcombine.high %v3600_v61, %v3604_v52  ;;  %v10330_v4 = vmul.f32 %v10292_v56, %v10068_v35  ;;  %v7465_v13 = vcombine.low %v3600_v61, %v3604_v52 }
 0x929   : > { %v3732_v32 = vld [vmem:[%s12052_s11 + $0x760] sm:$0xff]  ;;  %5870 = vmatpush2.bf16.msra.mxu0 %v7609_v17  ;;  %5819 = vmatpush2.bf16.msra.mxu1 %v7473_v22 }
 0x92a   : > { %5871 = vmatprep.subr.bf16.mxu0 %v7602_v28  ;;  %v3596_v6 = vld [vmem:[%s12052_s11 + $0x320] sm:$0xff]  ;;  %v7594_v46 = vcombine.high %v3728_v18, %v3732_v32  ;;  %5820 = vmatprep.subr.bf16.mxu1 %v7466_v37  ;;  %v7593_v15 = vcombine.low %v3728_v18, %v3732_v32  ;;  %v10354_v18 = vmul.f32 %v10292_v56, %v10078_v44 }
 0x92b   : > { %v3720_v17 = vld [vmem:[%s12052_s11 + $0x700] sm:$0xff]  ;;  %v7458_v63 = vcombine.high %v3592_v26, %v3596_v6  ;;  %v7457_v7 = vcombine.low %v3592_v26, %v3596_v6 }
 0x92c   : > { %v3724_v28 = vld [vmem:[%s12052_s11 + $0x720] sm:$0xff] }
 0x92d   : > { %5872 = vmatpush2.bf16.msra.mxu0 %v7601_v25  ;;  %v3584_v35 = vld [vmem:[%s12052_s11 + $0x2c0] sm:$0xff]  ;;  %v7586_v32 = vcombine.high %v3720_v17, %v3724_v28  ;;  %v3219_v25 = vstv %s10282_s0  ;;  %5821 = vmatpush2.bf16.msra.mxu1 %v7465_v13  ;;  %v7585_v41 = vcombine.low %v3720_v17, %v3724_v28  ;;  %v3241_v13 = vstv %s10296_s24 }
 0x92e   : > { %v3588_v61 = vld [vmem:[%s12052_s11 + $0x2e0] sm:$0xff]  ;;  %5873 = vmatprep.subr.bf16.mxu0 %v7594_v46  ;;  %5822 = vmatprep.subr.bf16.mxu1 %v7458_v63 }
 0x92f   : > { %v7450_v46 = vcombine.high %v3584_v35, %v3588_v61  ;;  %v7449_v63 = vcombine.low %v3584_v35, %v3588_v61 }
 0x931   : > { %5874 = vmatpush2.bf16.msra.mxu0 %v7593_v15  ;;  %5823 = vmatpush2.bf16.msra.mxu1 %v7457_v7 }
 0x932   : > { %5875 = vmatprep.subr.bf16.mxu0 %v7586_v32  ;;  %5824 = vmatprep.subr.bf16.mxu1 %v7450_v46 }
 0x935   : > { %5876 = vmatpush2.bf16.msra.mxu0 %v7585_v41  ;;  %5825 = vmatpush2.bf16.msra.mxu1 %v7449_v63 }
 0x96c   : > { %v10204_v5 = vpop.permute.xlu1 %3170 }
 0x96d   : > { %v10212_v21 = vpop.permute.xlu0 %3180 }
 0x96e   : > { %v3187_v54 = vsel %vm808_vm4, %v10212_v21, %v10204_v5 }
 0x96f   : > { %v3188_v37 = vmul.f32 %v8840_v0, %v3187_v54  ;;  %v10368_v54 = vstv %s10294_s3  ;;  %s12191_s3 = sld [smem:[#allocation45_spill]] }
 0x970   : > { %v10220_v43 = vpop.permute.xlu1 %3172 }
 0x971   : > { %v10228_v59 = vpop.permute.xlu0 %3174  ;;  %v3186_v44 = vsel %vm808_vm4, %v10204_v5, %v10220_v43 }
 0x974   : > { %v10236_v16 = vpop.permute.xlu1 %3176 }
 0x975   : > { %v10244_v2 = vpop.permute.xlu0 %3178  ;;  %v3184_v35 = vsel %vm808_vm4, %v10228_v59, %v10236_v16 }
 0x978   : > { %v10256_v19 = vpop.permute.xlu1 %3196 }
 0x979   : > { %v10264_v60 = vpop.permute.xlu0 %3198 }
 0x97c   : > { %v3123_v58 = vpop.permute.xlu1 %3122 }
 0x97d   : > { %v10280_v47 = vpop.permute.xlu0 %3132 }
 0x97e   : > { %v3139_v52 = vsel %vm808_vm4, %v10280_v47, %v3123_v58 }
 0x97f   : > { %v3140_v12 = vmul.f32 %v8840_v0, %v3139_v52  ;;  %v3257_v0 = vmul.f32 %v10333_v51, %v3186_v44  ;;  %v10387_v52 = vstv %s10335_s10 }
 0x980   : > { %v3125_v14 = vpop.permute.xlu1 %3124 }
 0x981   : > { %v3127_v45 = vpop.permute.xlu0 %3126  ;;  %v3138_v53 = vsel %vm808_vm4, %v3123_v58, %v3125_v14  ;;  %v3185_v58 = vsel %vm808_vm4, %v10220_v43, %v10228_v59  ;;  %v3256_v43 = vmul.f32 %v10333_v51, %v3188_v37  ;;  %v3220_v55 = vmul.f32 %v3219_v25, %v3140_v12 }
 0x982   : > { %v3137_v26 = vsel %vm808_vm4, %v3125_v14, %v3127_v45  ;;  %v3221_v6 = vmul.f32 %v3219_v25, %v3138_v53  ;;  %v3258_v28 = vmul.f32 %v10333_v51, %v3185_v58  ;;  %v3183_v59 = vsel %vm808_vm4, %v10236_v16, %v10244_v2 }
 0x983   : > { %v3222_v50 = vmul.f32 %v3219_v25, %v3137_v26  ;;  %v3259_v12 = vmul.f32 %v10333_v51, %v3184_v35 }
 0x984   : > { %v3129_v22 = vpop.permute.xlu1 %3128  ;;  %v3235_v15 = vadd.f32 %v3229_v3, %v3221_v6  ;;  %v3209_v3 = vsel %vm997_vm2, %v10256_v19, %v10264_v60 }
 0x985   : > { %v3131_v40 = vpop.permute.xlu0 %3130  ;;  %v3136_v14 = vsel %vm808_vm4, %v3127_v45, %v3129_v22  ;;  %v3182_v45 = vsel %vm808_vm4, %v10244_v2, %v10212_v21  ;;  %v3236_v58 = vadd.f32 %v3230_v34, %v3222_v50  ;;  %v3285_v6 = vmul.f32 %v10368_v54, %v3209_v3 }
 0x986   : > { %v3135_v36 = vsel %vm808_vm4, %v3129_v22, %v3131_v40  ;;  %v3223_v7 = vmul.f32 %v3219_v25, %v3136_v14  ;;  %v3134_v41 = vsel %vm808_vm4, %v3131_v40, %v10280_v47  ;;  %v3234_v47 = vadd.f32 %v10309_v30, %v3220_v55 }
 0x987   : > { %v3224_v22 = vmul.f32 %v3219_v25, %v3135_v36  ;;  %v3225_v14 = vmul.f32 %v3219_v25, %v3134_v41 }
 0x988   : > { %v3149_v5 = vpop.permute.xlu1 %3148 }
 0x989   : > { %v3151_v17 = vpop.permute.xlu0 %3150 }
 0x98a   : > { %v3161_v24 = vsel %vm997_vm2, %v3149_v5, %v3151_v17 }
 0x98b   : > { %v3243_v53 = vmul.f32 %v3241_v13, %v3161_v24 }
 0x98c   : > { %v3153_v61 = vpop.permute.xlu1 %3152 }
 0x98d   : > { %v3249_v32 = vadd.f32 %v3243_v53, %v3235_v15  ;;  %v3147_v37 = vpop.permute.xlu0 %3146  ;;  %v3160_v21 = vsel %vm997_vm2, %v3151_v17, %v3153_v61  ;;  %v3237_v17 = vadd.f32 %v3231_v27, %v3223_v7  ;;  %v3238_v15 = vadd.f32 %v3232_v62, %v3224_v22 }
 0x98e   : > { %v3162_v44 = vsel %vm997_vm2, %v3147_v37, %v3149_v5  ;;  %v3244_v46 = vmul.f32 %v3241_v13, %v3160_v21  ;;  %v3239_v53 = vadd.f32 %v10326_v33, %v3225_v14 }
 0x98f   : > { %v3263_v40 = vadd.f32 %v3257_v0, %v3249_v32  ;;  %v3242_v26 = vmul.f32 %v3241_v13, %v3162_v44 }
 0x990   : > { %v3250_v36 = vadd.f32 %v3244_v46, %v3236_v58  ;;  %v3155_v24 = vpop.permute.xlu1 %3154 }
 0x991   : > { %v3277_v34 = vadd.f32 %v10306_v20, %v3263_v40  ;;  %v3248_v16 = vadd.f32 %v3242_v26, %v3234_v47  ;;  %v3157_v2 = vpop.permute.xlu0 %3156  ;;  %v3159_v5 = vsel %vm997_vm2, %v3153_v61, %v3155_v24  ;;  %v3260_v20 = vmul.f32 %v10333_v51, %v3183_v59 }
 0x992   : > { %v3264_v63 = vadd.f32 %v3258_v28, %v3250_v36  ;;  %v3163_v0 = vsel %vm997_vm2, %v3157_v2, %v3147_v37  ;;  %v3158_v30 = vsel %vm997_vm2, %v3155_v24, %v3157_v2  ;;  %v3245_v50 = vmul.f32 %v3241_v13, %v3159_v5 }
 0x993   : > { %v3291_v25 = vadd.f32 %v3285_v6, %v3277_v34  ;;  %v3262_v27 = vadd.f32 %v3256_v43, %v3248_v16  ;;  %v3169_v55 = vmul.f32 %v8821_v49, %v3163_v0  ;;  %v3246_v62 = vmul.f32 %v3241_v13, %v3158_v30 }
 0x994   : > { %v3251_v35 = vadd.f32 %v3245_v50, %v3237_v17  ;;  %v3278_v3 = vadd.f32 %v10330_v4, %v3264_v63  ;;  %v3201_v28 = vpop.permute.xlu1 %3200  ;;  %v3261_v43 = vmul.f32 %v10333_v51, %v3182_v45 }
 0x995   : > { %v3299_v7 = vadd.f32 %v10387_v52, %v3291_v25  ;;  %v3247_v61 = vmul.f32 %v3241_v13, %v3169_v55  ;;  %v3252_v41 = vadd.f32 %v3246_v62, %v3238_v15  ;;  %v3195_v22 = vpop.permute.xlu0 %3194  ;;  %v3276_v32 = vadd.f32 %v10313_v1, %v3262_v27 }
 0x996   : > { %v3265_v37 = vadd.f32 %v3259_v12, %v3251_v35  ;;  %v3210_v21 = vsel %vm997_vm2, %v3195_v22, %v10256_v19  ;;  %v3208_v33 = vsel %vm997_vm2, %v10264_v60, %v3201_v28  ;;  %v3275_v1 = vmul.f32 %v10292_v56, %v10055_v31 }
 0x997   : > { %v3305_v4 = vsub.f32 0.0, %v3299_v7  ;;  %v3253_v59 = vadd.f32 %v3247_v61, %v3239_v53  ;;  %v3266_v58 = vadd.f32 %v3260_v20, %v3252_v41  ;;  %v3284_v13 = vmul.f32 %v10368_v54, %v3210_v21  ;;  %v3580_v41 = vld [vmem:[%s12052_s11 + $0x2a0] sm:$0xff] }
 0x998   : > { %v3286_v44 = vmul.f32 %v10368_v54, %v3208_v33  ;;  %v3279_v51 = vadd.f32 %v10339_v48, %v3265_v37  ;;  %v3203_v45 = vpop.permute.xlu1 %3202  ;;  %v3716_v21 = vld [vmem:[%s12052_s11 + $0x6e0] sm:$0xff] }
 0x999   : > { %v3312_v46 = vmul.f32 1.442695, %v3305_v4  ;;  %v3267_v12 = vadd.f32 %v3261_v43, %v3253_v59  ;;  %v3290_v19 = vadd.f32 %v3284_v13, %v3276_v32  ;;  %v3205_v40 = vpop.permute.xlu0 %3204  ;;  %v3280_v47 = vadd.f32 %v10354_v18, %v3266_v58  ;;  %v3568_v33 = vld [vmem:[%s12052_s11 + $0x240] sm:$0xff] }
 0x99a   : > { %v3292_v60 = vadd.f32 %v3286_v44, %v3278_v3  ;;  %v3211_v26 = vsel %vm997_vm2, %v3205_v40, %v3195_v22  ;;  %v3206_v6 = vsel %vm997_vm2, %v3203_v45, %v3205_v40  ;;  %v3207_v14 = vsel %vm997_vm2, %v3201_v28, %v3203_v45  ;;  %v3712_v22 = vld [vmem:[%s12052_s11 + $0x6c0] sm:$0xff] }
 0x99b   : > { %8185 = vpow2.f32 %v3312_v46  ;;  %v3298_v48 = vadd.f32 %v10387_v52, %v3290_v19  ;;  %v3281_v31 = vadd.f32 %v3275_v1, %v3267_v12  ;;  %v3217_v56 = vmul.f32 %v8821_v49, %v3211_v26  ;;  %v3572_v4 = vld [vmem:[%s12052_s11 + $0x260] sm:$0xff]  ;;  %v12174_v26 = vld [vmem:[#allocation21_spill] sm:$0xff] }
 0x99c   : > { %v3300_v17 = vadd.f32 %v10387_v52, %v3292_v60  ;;  %v3287_v18 = vmul.f32 %v10368_v54, %v3207_v14  ;;  %v3288_v36 = vmul.f32 %v10368_v54, %v3206_v6  ;;  %v7577_v58 = vcombine.low %v3712_v22, %v3716_v21  ;;  %v3704_v44 = vld [vmem:[%s12052_s11 + $0x680] sm:$0xff] }
 0x99d   : > { %v3304_v24 = vsub.f32 0.0, %v3298_v48  ;;  %v3289_v15 = vmul.f32 %v10368_v54, %v3217_v56  ;;  %v7578_v13 = vcombine.high %v3712_v22, %v3716_v21  ;;  %v3708_v1 = vld [vmem:[%s12052_s11 + $0x6a0] sm:$0xff]  ;;  %v7434_v45 = vcombine.high %v3568_v33, %v3572_v4  ;;  %v10561_v22 = vld [vmem:[%s12052_s11 + $0x1e8] sm:$0xff] }
 0x99e   : > { %v3306_v34 = vsub.f32 0.0, %v3300_v17  ;;  %v3293_v16 = vadd.f32 %v3287_v18, %v3279_v51  ;;  %v3294_v2 = vadd.f32 %v3288_v36, %v3280_v47  ;;  %v7570_v46 = vcombine.high %v3704_v44, %v3708_v1  ;;  %v3560_v56 = vld [vmem:[%s12052_s11 + $0x200] sm:$0xff] }
 0x99f   : > { %v3310_v5 = vmul.f32 1.442695, %v3304_v24  ;;  %v3295_v63 = vadd.f32 %v3289_v15, %v3281_v31  ;;  %5877 = vmatprep.subr.bf16.mxu0 %v7578_v13  ;;  %v7433_v19 = vcombine.low %v3568_v33, %v3572_v4  ;;  %v7569_v47 = vcombine.low %v3704_v44, %v3708_v1  ;;  %v3564_v17 = vld [vmem:[%s12052_s11 + $0x220] sm:$0xff]  ;;  %v12178_v33 = vld [vmem:[#allocation32_spill] sm:$0xff] }
 0x9a0   : > { %v3314_v0 = vmul.f32 1.442695, %v3306_v34  ;;  %v3301_v30 = vadd.f32 %v10387_v52, %v3293_v16  ;;  %v3302_v50 = vadd.f32 %v10387_v52, %v3294_v2  ;;  %5878 = vmatpush2.bf16.msra.mxu0 %v7577_v58  ;;  %v3696_v18 = vld [vmem:[%s12052_s11 + $0x640] sm:$0xff]  ;;  %v7425_v36 = vcombine.low %v3560_v56, %v3564_v17  ;;  %v12179_v58 = vld [vmem:[#allocation28_spill] sm:$0xff] }
 0x9a1   : > { %8187 = vpow2.f32 %v3310_v5  ;;  %v3303_v49 = vadd.f32 %v10387_v52, %v3295_v63  ;;  %v3576_v52 = vld [vmem:[%s12052_s11 + $0x280] sm:$0xff]  ;;  %5879 = vmatprep.subr.bf16.mxu0 %v7570_v46  ;;  %v7426_v24 = vcombine.high %v3560_v56, %v3564_v17 }
 0x9a2   : > { %8189 = vpow2.f32 %v3314_v0  ;;  %v3307_v25 = vsub.f32 0.0, %v3301_v30  ;;  %v3308_v27 = vsub.f32 0.0, %v3302_v50  ;;  %v7441_v43 = vcombine.low %v3576_v52, %v3580_v41  ;;  %v12180_v46 = vld [vmem:[#allocation31_spill] sm:$0xff] }
 0x9a3   : > { %v3309_v55 = vsub.f32 0.0, %v3303_v49  ;;  %v7442_v37 = vcombine.high %v3576_v52, %v3580_v41  ;;  %v10556_v41 = vld [vmem:[%s12052_s11 + $0x1c8] sm:$0xff] }
 0x9a4   : > { %v3316_v62 = vmul.f32 1.442695, %v3307_v25  ;;  %v3318_v20 = vmul.f32 1.442695, %v3308_v27  ;;  %5880 = vmatpush2.bf16.msra.mxu0 %v7569_v47  ;;  %v3688_v25 = vld [vmem:[%s12052_s11 + $0x600] sm:$0xff]  ;;  %v7419_v44 = vcombine.low %v10556_v41, %v10561_v22  ;;  %v7420_v1 = vcombine.high %v10556_v41, %v10561_v22 }
 0x9a5   : > { %v3320_v54 = vmul.f32 1.442695, %v3309_v55  ;;  %5826 = vmatprep.subr.bf16.mxu1 %v7442_v37  ;;  %v3692_v27 = vld [vmem:[%s12052_s11 + $0x620] sm:$0xff]  ;;  %v12177_v37 = vld [vmem:[#allocation24_spill] sm:$0xff] }
 0x9a6   : > { %8191 = vpow2.f32 %v3316_v62  ;;  %5827 = vmatpush2.bf16.msra.mxu1 %v7441_v43  ;;  %v7554_v55 = vcombine.high %v3688_v25, %v3692_v27  ;;  %v12176_v43 = vld [vmem:[#allocation23_spill] sm:$0xff] }
 0x9a7   : > { %8193 = vpow2.f32 %v3318_v20  ;;  %5828 = vmatprep.subr.bf16.mxu1 %v7434_v45 }
 0x9a8   : > { %v8186_v53 = vpop.eup %8185  ;;  %8195 = vpow2.f32 %v3320_v54  ;;  %v7553_v54 = vcombine.low %v3688_v25, %v3692_v27  ;;  %v12189_v27 = vld [vmem:[#allocation36_spill] sm:$0xff] }
 0x9a9   : > { %v3323_v35 = vadd.f32 1.0, %v8186_v53 }
 0x9aa   : > { %5829 = vmatpush2.bf16.msra.mxu1 %v7433_v19  ;;  %v12181_v19 = vld [vmem:[#allocation22_spill] sm:$0xff] }
 0x9ab   : > { %8197 = vrcp.f32 %v3323_v35  ;;  %5830 = vmatprep.subr.bf16.mxu1 %v7426_v24  ;;  %v12185_v24 = vld [vmem:[#allocation30_spill] sm:$0xff] }
 0x9ae   : > { %v8188_v3 = vpop.eup %8187  ;;  %5831 = vmatpush2.bf16.msra.mxu1 %v7425_v36 }
 0x9af   : > { %v8190_v28 = vpop.eup %8189  ;;  %v3322_v7 = vadd.f32 1.0, %v8188_v3 }
 0x9b0   : > { %v3324_v61 = vadd.f32 1.0, %v8190_v28 }
 0x9b1   : > { %8199 = vrcp.f32 %v3322_v7 }
 0x9b2   : > { %8201 = vrcp.f32 %v3324_v61 }
 0x9b3   : > { %v8192_v32 = vpop.eup %8191 }
 0x9b4   : > { %v3325_v59 = vadd.f32 1.0, %v8192_v32  ;;  %v8194_v51 = vpop.eup %8193 }
 0x9b5   : > { %v3326_v12 = vadd.f32 1.0, %v8194_v51  ;;  %v8196_v40 = vpop.eup %8195 }
 0x9b6   : > { %8203 = vrcp.f32 %v3325_v59  ;;  %v3327_v14 = vadd.f32 1.0, %v8196_v40 }
 0x9b7   : > { %8205 = vrcp.f32 %v3326_v12 }
 0x9b8   : > { %v8198_v60 = vpop.eup %8197  ;;  %8207 = vrcp.f32 %v3327_v14  ;;  %v12183_v14 = vld [vmem:[#allocation29_spill] sm:$0xff] }
 0x9b9   : > { %v3347_v6 = vrot.slane %v8198_v60, %v12174_v26  ;;  %v12182_v60 = vld [vmem:[#allocation33_spill] sm:$0xff] }
 0x9bb   : > { %v10482_v48 = vmul.f32 %v3347_v6, %v9944_v23  ;;  %v10485_v31 = vmul.f32 %v3347_v6, %v9965_v9  ;;  %v3700_v9 = vld [vmem:[%s12052_s11 + $0x660] sm:$0xff]  ;;  %v10551_v52 = vmul.f32 %v3347_v6, %v10011_v57  ;;  %v10572_v21 = vmul.f32 %v3347_v6, %v12177_v37 }
 0x9bc   : > { %v7561_v34 = vcombine.low %v3696_v18, %v3700_v9  ;;  %v7562_v16 = vcombine.high %v3696_v18, %v3700_v9 }
 0x9bd   : > { %v8103_v23 = vpack.i.bf16 %v10485_v31, %v10482_v48  ;;  %v8128_v45 = vpack.i.bf16 %v10572_v21, %v10551_v52 }
 0x9be   : > { %v8200_v15 = vpop.eup %8199  ;;  %5881 = vmatprep.subr.bf16.mxu0 %v7562_v16 }
 0x9bf   : > { %v8202_v2 = vpop.eup %8201  ;;  %8104 = vrot.lane.b32.xlu1 %v8103_v23, %s8458_s6  ;;  %v3343_v5 = vrot.slane %v8200_v15, %v12174_v26  ;;  %5882 = vmatpush2.bf16.msra.mxu0 %v7561_v34  ;;  %v12184_v23 = vld [vmem:[#allocation34_spill] sm:$0xff]  ;;  %v12186_v34 = vld [vmem:[#allocation25_spill] sm:$0xff] }
 0x9c0   : > { %v3351_v63 = vrot.slane %v8202_v2, %v12174_v26  ;;  %5883 = vmatprep.subr.bf16.mxu0 %v7554_v55 }
 0x9c1   : > { %v10505_v0 = vmul.f32 %v3343_v5, %v9941_v29  ;;  %v10508_v30 = vmul.f32 %v3343_v5, %v9953_v11  ;;  %v10525_v29 = vld [vmem:[%s12052_s11 + $0x9c0] sm:$0xff]  ;;  %v10591_v12 = vmul.f32 %v3343_v5, %v12180_v46  ;;  %v10594_v40 = vmul.f32 %v3343_v5, %v12181_v19 }
 0x9c2   : > { %v10511_v50 = vmul.f32 %v3351_v63, %v9947_v8  ;;  %v10514_v49 = vmul.f32 %v3351_v63, %v9968_v39  ;;  %v10532_v39 = vld [vmem:[%s12052_s11 + $0x9e0] sm:$0xff]  ;;  %v10575_v4 = vmul.f32 %v3351_v63, %v12178_v33  ;;  %v10581_v13 = vmul.f32 %v3351_v63, %v12179_v58 }
 0x9c3   : > { %v8204_v11 = vpop.eup %8203  ;;  %v8118_v8 = vpack.i.bf16 %v10508_v30, %v10505_v0  ;;  %v7673_v53 = vcombine.low %v10525_v29, %v10532_v39  ;;  %v7674_v3 = vcombine.high %v10525_v29, %v10532_v39  ;;  %5884 = vmatpush2.bf16.msra.mxu0 %v7553_v54  ;;  %v8143_v18 = vpack.i.bf16 %v10594_v40, %v10591_v12  ;;  %v12188_v63 = vld [vmem:[#allocation35_spill] sm:$0xff] }
 0x9c4   : > { %v8108_v62 = vpack.i.bf16 %v10514_v49, %v10511_v50  ;;  %v3355_v20 = vrot.slane %v8204_v11, %v12174_v26  ;;  %v8206_v35 = vpop.eup %8205  ;;  %5959 = vmatprep.subr.bf16.mxu0 %v7420_v1  ;;  %v8133_v47 = vpack.i.bf16 %v10581_v13, %v10575_v4  ;;  %v3804_v46 = vld [vmem:[%s12052_s11 + $0x9a0] sm:$0xff] }
 0x9c5   : > { %8119 = vrot.lane.b32.xlu1 %v8118_v8, %s8458_s6  ;;  %v3359_v61 = vrot.slane %v8206_v35, %v12174_v26  ;;  %5906 = vmatprep.subr.bf16.mxu1 %v7674_v3  ;;  %v8208_v51 = vpop.eup %8207 }
 0x9c6   : > { %8109 = vrot.lane.b32.xlu0 %v8108_v62, %s8458_s6  ;;  %v10544_v28 = vmul.f32 %v3355_v20, %v9950_v42  ;;  %v10547_v7 = vmul.f32 %v3355_v20, %v9971_v10  ;;  %v12175_v10 = vld [vmem:[#allocation26_spill] sm:$0xff]  ;;  %v10600_v6 = vmul.f32 %v3355_v20, %v12182_v60  ;;  %v10603_v56 = vmul.f32 %v3355_v20, %v12183_v14 }
 0x9c7   : > { %v10566_v32 = vmul.f32 %v3359_v61, %v12175_v10  ;;  %v10569_v57 = vmul.f32 %v3359_v61, %v12176_v43  ;;  %v3363_v17 = vrot.slane %v8208_v51, %v12174_v26  ;;  %v10610_v36 = vmul.f32 %v3359_v61, %v12184_v23  ;;  %v12187_v26 = vld [vmem:[#allocation27_spill] sm:$0xff] }
 0x9c8   : > { %v8113_v42 = vpack.i.bf16 %v10547_v7, %v10544_v28  ;;  %v10613_v9 = vmul.f32 %v3359_v61, %v12185_v24  ;;  %v8138_v15 = vpack.i.bf16 %v10603_v56, %v10600_v6 }
 0x9c9   : > { %v8123_v59 = vpack.i.bf16 %v10569_v57, %v10566_v32  ;;  %v10619_v16 = vmul.f32 %v3363_v17, %v12186_v34  ;;  %v10622_v2 = vmul.f32 %v3363_v17, %v12187_v26  ;;  %v10628_v25 = vmul.f32 %v3363_v17, %v12188_v63  ;;  %v3792_v63 = vld [vmem:[%s12052_s11 + $0x940] sm:$0xff] }
 0x9ca   : > { %8114 = vrot.lane.b32.xlu0 %v8113_v42, %s8458_s6  ;;  %v8148_v5 = vpack.i.bf16 %v10613_v9, %v10610_v36  ;;  %v10631_v11 = vmul.f32 %v3363_v17, %v12189_v27  ;;  %v3796_v27 = vld [vmem:[%s12052_s11 + $0x960] sm:$0xff] }
 0x9cb   : > { %8124 = vrot.lane.b32.xlu1 %v8123_v59, %s8458_s6  ;;  %v8153_v8 = vpack.i.bf16 %v10622_v2, %v10619_v16  ;;  %v7657_v39 = vcombine.low %v3792_v63, %v3796_v27 }
 0x9cc   : > { %v8158_v55 = vpack.i.bf16 %v10631_v11, %v10628_v25 }
 0x9ce   : > { %8129 = vrot.lane.b32.xlu0 %v8128_v45, %s8458_s6  ;;  %v3800_v45 = vld [vmem:[%s12052_s11 + $0x980] sm:$0xff] }
 0x9cf   : > { %8134 = vrot.lane.b32.xlu1 %v8133_v47, %s8458_s6  ;;  %v7666_v23 = vcombine.high %v3800_v45, %v3804_v46 }
 0x9d2   : > { %8144 = vrot.lane.b32.xlu0 %v8143_v18, %s8458_s6 }
 0x9d3   : > { %8139 = vrot.lane.b32.xlu1 %v8138_v15, %s8458_s6 }
 0x9d6   : > { %8149 = vrot.lane.b32.xlu0 %v8148_v5, %s8458_s6 }
 0x9d7   : > { %8154 = vrot.lane.b32.xlu1 %v8153_v8, %s8458_s6 }
 0x9da   : > { %8159 = vrot.lane.b32.xlu0 %v8158_v55, %s8458_s6 }
 0xa31   : > { %v8105_v62 = vpop.permute.xlu1 %8104 }
 0xa32   : > { %v8107_v54 = vunpack.i.h.bf16 %v8105_v62  ;;  %v8106_v35 = vunpack.i.l.bf16 %v8105_v62  ;;  %v10699_v62 = vld [vmem:[%s12052_s11 + $0x188] sm:$0xff] }
 0xa37   : > { %v10640_v20 = vpop.permute.xlu1 %8119 }
 0xa38   : > { %v8110_v3 = vpop.permute.xlu0 %8109  ;;  %v8122_v61 = vunpack.i.h.bf16 %v10640_v20  ;;  %v8121_v42 = vunpack.i.l.bf16 %v10640_v20 }
 0xa39   : > { %v8112_v10 = vunpack.i.h.bf16 %v8110_v3  ;;  %v8111_v43 = vunpack.i.l.bf16 %v8110_v3 }
 0xa3a   : > { %v3453_v37 = vsel %vm997_vm2, %v8122_v61, %v8107_v54  ;;  %v3452_v33 = vsel %vm997_vm2, %v8121_v42, %v8106_v35 }
 0xa3b   : > { %v3448_v59 = vsel %vm997_vm2, %v8106_v35, %v8111_v43  ;;  %v3449_v58 = vsel %vm997_vm2, %v8107_v54, %v8112_v10  ;;  %v3466_v1 = vmax.f32 %v10508_v30, %v3453_v37  ;;  %v3460_v51 = vmax.f32 %v10505_v0, %v3452_v33  ;;  %v3549_v54 = vld [vmem:[%s12052_s11 + $0x1a8] sm:$0xff] }
 0xa3c   : > { %v3461_v19 = vmax.f32 %v10482_v48, %v3448_v59  ;;  %v3467_v47 = vmax.f32 %v10485_v31, %v3449_v58  ;;  %v8115_v60 = vpop.permute.xlu0 %8114  ;;  %v7658_v58 = vcombine.high %v3792_v63, %v3796_v27 }
 0xa3d   : > { %v8117_v14 = vunpack.i.h.bf16 %v8115_v60  ;;  %v8116_v17 = vunpack.i.l.bf16 %v8115_v60  ;;  %v10666_v18 = vpack.c.bf16 %v3466_v1, %v3460_v51  ;;  %v10668_v30 = vpop.permute.xlu1 %8124  ;;  %v10714_v1 = vld [vmem:[%s12052_s11 + $0x900] sm:$0xff]  ;;  %v7412_v51 = vcombine.high %v10699_v62, %v3549_v54  ;;  %v3537_v60 = vld [vmem:[%s12052_s11 + $0x148] sm:$0xff] }
 0xa3e   : > { %v10670_v0 = vpack.c.bf16 %v3467_v47, %v3461_v19  ;;  %v8127_v48 = vunpack.i.h.bf16 %v10668_v30  ;;  %v8126_v31 = vunpack.i.l.bf16 %v10668_v30 }
 0xa3f   : > { %v3445_v24 = vsel %vm997_vm2, %v8112_v10, %v8117_v14  ;;  %v3444_v15 = vsel %vm997_vm2, %v8111_v43, %v8116_v17  ;;  %v7665_v43 = vcombine.low %v3800_v45, %v3804_v46 }
 0xa40   : > { %v3468_v34 = vmax.f32 %v10514_v49, %v3445_v24  ;;  %v3462_v26 = vmax.f32 %v10511_v50, %v3444_v15  ;;  %v8130_v5 = vpop.permute.xlu0 %8129  ;;  %5832 = vmatprep.mubr.bf16.mxu1 %v10670_v0  ;;  %v3441_v8 = vsel %vm997_vm2, %v8117_v14, %v8127_v48  ;;  %v3440_v50 = vsel %vm997_vm2, %v8116_v17, %v8126_v31  ;;  %v3541_v15 = vld [vmem:[%s12052_s11 + $0x168] sm:$0xff] }
 0xa41   : > { %v8132_v49 = vunpack.i.h.bf16 %v8130_v5  ;;  %v8131_v55 = vunpack.i.l.bf16 %v8130_v5  ;;  %5833 = vmatmul.mubr.bf16.vlgmr.msra.gmra.mxu1 %v10666_v18  ;;  %v3469_v35 = vmax.f32 %v10547_v7, %v3441_v8  ;;  %v3463_v3 = vmax.f32 %v10544_v28, %v3440_v50  ;;  %v8135_v10 = vpop.permute.xlu1 %8134  ;;  %v3788_v28 = vld [vmem:[%s12052_s11 + $0x920] sm:$0xff] }
 0xa42   : > { %5907 = vmatpush1.bf16.msra.mxu1 %v7673_v53  ;;  %v10709_v37 = vpack.c.bf16 %v3468_v34, %v3462_v26  ;;  %v8137_v33 = vunpack.i.h.bf16 %v8135_v10  ;;  %v8136_v59 = vunpack.i.l.bf16 %v8135_v10  ;;  %v7411_v53 = vcombine.low %v10699_v62, %v3549_v54  ;;  %v10744_v34 = vld [vmem:[%s12052_s11 + $0x8c0] sm:$0xff] }
 0xa43   : > { %5908 = vmatprep.subr.bf16.mxu1 %v7666_v23  ;;  %v10721_v29 = vpack.c.bf16 %v3469_v35, %v3463_v3  ;;  %v7650_v24 = vcombine.high %v10714_v1, %v3788_v28  ;;  %v7649_v62 = vcombine.low %v10714_v1, %v3788_v28  ;;  %v7404_v35 = vcombine.high %v3537_v60, %v3541_v15  ;;  %v3529_v28 = vld [vmem:[%s12052_s11 + $0x108] sm:$0xff] }
 0xa44   : > { %v10719_v7 = vpop.permute.xlu0 %8144  ;;  %v3451_v45 = vsel %vm997_vm2, %v8132_v49, %v8137_v33  ;;  %v3450_v46 = vsel %vm997_vm2, %v8131_v55, %v8136_v59  ;;  %v7403_v1 = vcombine.low %v3537_v60, %v3541_v15 }
 0xa45   : > { %v8147_v19 = vunpack.i.h.bf16 %v10719_v7  ;;  %v8146_v47 = vunpack.i.l.bf16 %v10719_v7  ;;  %v3479_v14 = vmax.f32 %v10572_v21, %v3451_v45  ;;  %v3473_v17 = vmax.f32 %v10551_v52, %v3450_v46  ;;  %v8140_v23 = vpop.permute.xlu1 %8139  ;;  %5885 = vmatprep.mubr.bf16.mxu0 %v10721_v29  ;;  %v10749_v21 = vld [vmem:[%s12052_s11 + $0x8e0] sm:$0xff]  ;;  %v3809_v7 = vld [vmem:[%s12052_s11 + $0x9c8] sm:$0xff] }
 0xa46   : > { %5909 = vmatpush1.bf16.msra.mxu1 %v7665_v43  ;;  %v8142_v5 = vunpack.i.h.bf16 %v8140_v23  ;;  %v8141_v63 = vunpack.i.l.bf16 %v8140_v23  ;;  %5886 = vmatmul.mubr.bf16.vlgmr.msra.gmra.mxu0 %v10709_v37 }
 0xa47   : > { %v3455_v52 = vsel %vm997_vm2, %v8147_v19, %v8132_v49  ;;  %v3454_v26 = vsel %vm997_vm2, %v8146_v47, %v8131_v55  ;;  %5910 = vmatprep.subr.bf16.mxu1 %v7658_v58  ;;  %5960 = vmatpush1.bf16.msra.mxu0 %v7419_v44  ;;  %v10767_v49 = vpack.c.bf16 %v3479_v14, %v3473_v17 }
 0xa48   : > { %v3478_v27 = vmax.f32 %v10594_v40, %v3455_v52  ;;  %v3472_v8 = vmax.f32 %v10591_v12, %v3454_v26  ;;  %v10765_v50 = vpop.permute.xlu0 %8149  ;;  %5961 = vmatprep.subr.bf16.mxu0 %v7412_v51  ;;  %v7642_v40 = vcombine.high %v10744_v34, %v10749_v21  ;;  %v3446_v12 = vsel %vm997_vm2, %v8136_v59, %v8141_v63  ;;  %v3764_v52 = vld [vmem:[%s12052_s11 + $0x860] sm:$0xff] }
 0xa49   : > { %v8152_v55 = vunpack.i.h.bf16 %v10765_v50  ;;  %v8151_v54 = vunpack.i.l.bf16 %v10765_v50  ;;  %v3447_v41 = vsel %vm997_vm2, %v8137_v33, %v8142_v5  ;;  %v10778_v22 = vpop.permute.xlu1 %8154  ;;  %5842 = vmatprep.mubr.bf16.mxu1 %v10767_v49  ;;  %v3474_v51 = vmax.f32 %v10575_v4, %v3446_v12  ;;  %v3665_v50 = vld [vmem:[%s12052_s11 + $0x548] sm:$0xff] }
 0xa4a   : > { %5911 = vmatpush1.bf16.msra.mxu1 %v7657_v39  ;;  %v10781_v44 = vpack.c.bf16 %v3478_v27, %v3472_v8  ;;  %v8157_v43 = vunpack.i.h.bf16 %v10778_v22  ;;  %v8156_v33 = vunpack.i.l.bf16 %v10778_v22  ;;  %v3533_v39 = vld [vmem:[%s12052_s11 + $0x128] sm:$0xff]  ;;  %v3480_v45 = vmax.f32 %v10581_v13, %v3447_v41  ;;  %v3768_v13 = vld [vmem:[%s12052_s11 + $0x880] sm:$0xff] }
 0xa4b   : > { %v3442_v3 = vsel %vm997_vm2, %v8141_v63, %v8151_v54  ;;  %v3443_v10 = vsel %vm997_vm2, %v8142_v5, %v8152_v55  ;;  %5912 = vmatprep.subr.bf16.mxu1 %v7650_v24  ;;  %5962 = vmatpush1.bf16.msra.mxu0 %v7411_v53  ;;  %v7396_v46 = vcombine.high %v3529_v28, %v3533_v39  ;;  %v3760_v24 = vld [vmem:[%s12052_s11 + $0x840] sm:$0xff] }
 0xa4c   : > { %v3475_v59 = vmax.f32 %v10600_v6, %v3442_v3  ;;  %v3481_v58 = vmax.f32 %v10603_v56, %v3443_v10  ;;  %5843 = vmatmul.mubr.bf16.gmra.mxu1 %v10781_v44  ;;  %v3456_v6 = vsel %vm997_vm2, %v8156_v33, %v8121_v42  ;;  %v3457_v56 = vsel %vm997_vm2, %v8157_v43, %v8122_v61  ;;  %v3772_v42 = vld [vmem:[%s12052_s11 + $0x8a0] sm:$0xff]  ;;  %v3521_v61 = vld [vmem:[%s12052_s11 + $0xc8] sm:$0xff] }
 0xa4d   : > { %5963 = vmatprep.subr.bf16.mxu0 %v7404_v35  ;;  %v3465_v53 = vmax.f32 %v10619_v16, %v3456_v6  ;;  %v3471_v4 = vmax.f32 %v10622_v2, %v3457_v56  ;;  %v3525_v16 = vld [vmem:[%s12052_s11 + $0xe8] sm:$0xff]  ;;  %v7641_v2 = vcombine.low %v10744_v34, %v10749_v21  ;;  %v7395_v14 = vcombine.low %v3529_v28, %v3533_v39  ;;  %v3752_v8 = vld [vmem:[%s12052_s11 + $0x800] sm:$0xff] }
 0xa4e   : > { %5913 = vmatpush1.bf16.msra.mxu1 %v7649_v62  ;;  %v10824_v20 = vpack.c.bf16 %v3481_v58, %v3475_v59  ;;  %v10837_v17 = vpack.c.bf16 %v3480_v45, %v3474_v51  ;;  %v7634_v23 = vcombine.high %v3768_v13, %v3772_v42  ;;  %v7388_v15 = vcombine.high %v3521_v61, %v3525_v16  ;;  %v3513_v34 = vld [vmem:[%s12052_s11 + $0x88] sm:$0xff]  ;;  %v3756_v62 = vld [vmem:[%s12052_s11 + $0x820] sm:$0xff] }
 0xa4f   : > { %5914 = vmatprep.subr.bf16.mxu1 %v7642_v40  ;;  %5964 = vmatpush1.bf16.msra.mxu0 %v7403_v1  ;;  %v10834_v60 = vpack.c.bf16 %v3471_v4, %v3465_v53  ;;  %v3517_v21 = vld [vmem:[%s12052_s11 + $0xa8] sm:$0xff]  ;;  %v7633_v26 = vcombine.low %v3768_v13, %v3772_v42  ;;  %v7387_v5 = vcombine.low %v3521_v61, %v3525_v16  ;;  %v3872_v59 = vld [vmem:[%s12052_s11 + $0xbc0] sm:$0xff] }
 0xa50   : > { %5895 = vmatprep.mubr.bf16.mxu0 %v10824_v20  ;;  %5965 = vmatprep.subr.bf16.mxu0 %v7396_v46  ;;  %v7626_v63 = vcombine.high %v3760_v24, %v3764_v52  ;;  %v7380_v27 = vcombine.high %v3513_v34, %v3517_v21  ;;  %v3505_v35 = vld [vmem:[%s12052_s11 + $0x48] sm:$0xff]  ;;  %v7625_v12 = vcombine.low %v3760_v24, %v3764_v52  ;;  %v3876_v58 = vld [vmem:[%s12052_s11 + $0xbe0] sm:$0xff] }
 0xa51   : > { %5938 = vmatprep.mubr.bf16.mxu1 %v10834_v60  ;;  %5896 = vmatmul.mubr.bf16.gmra.mxu0 %v10837_v17  ;;  %v3509_v40 = vld [vmem:[%s12052_s11 + $0x68] sm:$0xff]  ;;  %v7379_v41 = vcombine.low %v3513_v34, %v3517_v21  ;;  %v7618_v3 = vcombine.high %v3752_v8, %v3756_v62  ;;  %v7617_v39 = vcombine.low %v3752_v8, %v3756_v62  ;;  %v3864_v56 = vld [vmem:[%s12052_s11 + $0xb80] sm:$0xff] }
 0xa52   : > { %5915 = vmatpush1.bf16.msra.mxu1 %v7641_v2  ;;  %5991 = vmatprep.mubr.bf16.mxu0 %v10670_v0  ;;  %v7372_v10 = vcombine.high %v3505_v35, %v3509_v40  ;;  %v3497_v1 = vld [vmem:[%s12052_s11 + $0x8] sm:$0xff]  ;;  %v7371_v51 = vcombine.low %v3505_v35, %v3509_v40  ;;  %v7738_v45 = vcombine.high %v3872_v59, %v3876_v58  ;;  %v3868_v53 = vld [vmem:[%s12052_s11 + $0xba0] sm:$0xff] }
 0xa53   : > { %5966 = vmatpush1.bf16.msra.mxu0 %v7395_v14  ;;  %5916 = vmatprep.subr.bf16.mxu1 %v7634_v23  ;;  %v3501_v28 = vld [vmem:[%s12052_s11 + $0x28] sm:$0xff]  ;;  %v7737_v42 = vcombine.low %v3872_v59, %v3876_v58  ;;  %v7730_v61 = vcombine.high %v3864_v56, %v3868_v53  ;;  %v3856_v2 = vld [vmem:[%s12052_s11 + $0xb40] sm:$0xff] }
 0xa54   : > { %5967 = vmatprep.subr.bf16.mxu0 %v7388_v15  ;;  %v7364_v6 = vcombine.high %v3497_v1, %v3501_v28  ;;  %v3617_v4 = vld [vmem:[%s12052_s11 + $0x3c8] sm:$0xff]  ;;  %v7363_v46 = vcombine.low %v3497_v1, %v3501_v28  ;;  %v3860_v14 = vld [vmem:[%s12052_s11 + $0xb60] sm:$0xff]  ;;  %v7729_v15 = vcombine.low %v3864_v56, %v3868_v53 }
 0xa55   : > { %v3621_v13 = vld [vmem:[%s12052_s11 + $0x3e8] sm:$0xff]  ;;  %v7722_v34 = vcombine.high %v3856_v2, %v3860_v14  ;;  %v7721_v8 = vcombine.low %v3856_v2, %v3860_v14  ;;  %v8160_v2 = vpop.permute.xlu0 %8159 }
 0xa56   : > { %5917 = vmatpush1.bf16.msra.mxu1 %v7633_v26  ;;  %v7484_v16 = vcombine.high %v3617_v4, %v3621_v13  ;;  %v3609_v23 = vld [vmem:[%s12052_s11 + $0x388] sm:$0xff]  ;;  %v7483_v52 = vcombine.low %v3617_v4, %v3621_v13  ;;  %v3848_v26 = vld [vmem:[%s12052_s11 + $0xb00] sm:$0xff] }
 0xa57   : > { %5968 = vmatpush1.bf16.msra.mxu0 %v7387_v5  ;;  %5918 = vmatprep.subr.bf16.mxu1 %v7626_v63  ;;  %v3613_v24 = vld [vmem:[%s12052_s11 + $0x3a8] sm:$0xff]  ;;  %v3852_v5 = vld [vmem:[%s12052_s11 + $0xb20] sm:$0xff] }
 0xa58   : > { %5969 = vmatprep.subr.bf16.mxu0 %v7380_v27  ;;  %v7476_v21 = vcombine.high %v3609_v23, %v3613_v24  ;;  %v3601_v63 = vld [vmem:[%s12052_s11 + $0x348] sm:$0xff]  ;;  %v7475_v62 = vcombine.low %v3609_v23, %v3613_v24  ;;  %v7714_v35 = vcombine.high %v3848_v26, %v3852_v5  ;;  %v7713_v59 = vcombine.low %v3848_v26, %v3852_v5 }
 0xa59   : > { %v3605_v27 = vld [vmem:[%s12052_s11 + $0x368] sm:$0xff]  ;;  %v8162_v5 = vunpack.i.h.bf16 %v8160_v2 }
 0xa5a   : > { %5919 = vmatpush1.bf16.msra.mxu1 %v7625_v12  ;;  %v7468_v40 = vcombine.high %v3601_v63, %v3605_v27  ;;  %v3840_v12 = vld [vmem:[%s12052_s11 + $0xac0] sm:$0xff]  ;;  %v7467_v58 = vcombine.low %v3601_v63, %v3605_v27  ;;  %v3573_v26 = vld [vmem:[%s12052_s11 + $0x268] sm:$0xff]  ;;  %v8161_v63 = vunpack.i.l.bf16 %v8160_v2 }
 0xa5b   : > { %5970 = vmatpush1.bf16.msra.mxu0 %v7379_v41  ;;  %5920 = vmatprep.subr.bf16.mxu1 %v7618_v3  ;;  %v3844_v41 = vld [vmem:[%s12052_s11 + $0xae0] sm:$0xff]  ;;  %v3593_v3 = vld [vmem:[%s12052_s11 + $0x308] sm:$0xff]  ;;  %v3459_v30 = vsel %vm997_vm2, %v8162_v5, %v8147_v19 }
 0xa5c   : > { %5971 = vmatprep.subr.bf16.mxu0 %v7372_v10  ;;  %v3597_v10 = vld [vmem:[%s12052_s11 + $0x328] sm:$0xff]  ;;  %v7706_v1 = vcombine.high %v3840_v12, %v3844_v41  ;;  %v7705_v56 = vcombine.low %v3840_v12, %v3844_v41  ;;  %v3436_v41 = vsel %vm997_vm2, %v8126_v31, %v8156_v33  ;;  %v3458_v31 = vsel %vm997_vm2, %v8161_v63, %v8146_v47 }
 0xa5d   : > { %v7460_v28 = vcombine.high %v3593_v3, %v3597_v10  ;;  %v7459_v53 = vcombine.low %v3593_v3, %v3597_v10  ;;  %v3565_v12 = vld [vmem:[%s12052_s11 + $0x228] sm:$0xff]  ;;  %v3437_v3 = vsel %vm997_vm2, %v8127_v48, %v8157_v43  ;;  %v3464_v33 = vmax.f32 %v10566_v32, %v3436_v41 }
 0xa5e   : > { %5921 = vmatpush1.bf16.msra.mxu1 %v7617_v39  ;;  %v3832_v39 = vld [vmem:[%s12052_s11 + $0xa80] sm:$0xff]  ;;  %v3681_v10 = vld [vmem:[%s12052_s11 + $0x5c8] sm:$0xff]  ;;  %v3483_v47 = vmax.f32 %v10631_v11, %v3459_v30 }
 0xa5f   : > { %5972 = vmatpush1.bf16.msra.mxu0 %v7371_v51  ;;  %5922 = vmatprep.subr.bf16.mxu1 %v7738_v45  ;;  %v3836_v51 = vld [vmem:[%s12052_s11 + $0xaa0] sm:$0xff]  ;;  %v3585_v45 = vld [vmem:[%s12052_s11 + $0x2c8] sm:$0xff] }
 0xa60   : > { %5973 = vmatprep.subr.bf16.mxu0 %v7364_v6  ;;  %v3589_v6 = vld [vmem:[%s12052_s11 + $0x2e8] sm:$0xff]  ;;  %v7698_v4 = vcombine.high %v3832_v39, %v3836_v51  ;;  %v7697_v14 = vcombine.low %v3832_v39, %v3836_v51 }
 0xa61   : > { %v7452_v13 = vcombine.high %v3585_v45, %v3589_v6  ;;  %v7451_v23 = vcombine.low %v3585_v45, %v3589_v6  ;;  %v3813_v19 = vld [vmem:[%s12052_s11 + $0x9e8] sm:$0xff]  ;;  %v3438_v45 = vsel %vm997_vm2, %v8151_v54, %v8161_v63  ;;  %v3439_v6 = vsel %vm997_vm2, %v8152_v55, %v8162_v5 }
 0xa62   : > { %5923 = vmatpush2.bf16.msra.mxu1 %v7737_v42  ;;  %v3824_v42 = vld [vmem:[%s12052_s11 + $0xa40] sm:$0xff]  ;;  %v3673_v32 = vld [vmem:[%s12052_s11 + $0x588] sm:$0xff]  ;;  %v7676_v51 = vcombine.high %v3809_v7, %v3813_v19  ;;  %v7675_v54 = vcombine.low %v3809_v7, %v3813_v19 }
 0xa63   : > { %5974 = vmatpush1.bf16.msra.mxu0 %v7363_v46  ;;  %5924 = vmatprep.subr.bf16.mxu1 %v7730_v61  ;;  %v3828_v46 = vld [vmem:[%s12052_s11 + $0xa60] sm:$0xff]  ;;  %v3577_v61 = vld [vmem:[%s12052_s11 + $0x288] sm:$0xff] }
 0xa64   : > { %5975 = vmatprep.subr.bf16.mxu0 %v7484_v16  ;;  %v3581_v16 = vld [vmem:[%s12052_s11 + $0x2a8] sm:$0xff]  ;;  %v7690_v24 = vcombine.high %v3824_v42, %v3828_v46  ;;  %v7689_v27 = vcombine.low %v3824_v42, %v3828_v46  ;;  %v3476_v42 = vmax.f32 %v10610_v36, %v3438_v45  ;;  %v3482_v46 = vmax.f32 %v10613_v9, %v3439_v6 }
 0xa65   : > { %v3793_v2 = vld [vmem:[%s12052_s11 + $0x948] sm:$0xff] }
 0xa66   : > { %5925 = vmatpush2.bf16.msra.mxu1 %v7729_v15  ;;  %v7444_v15 = vcombine.high %v3577_v61, %v3581_v16  ;;  %v3657_v36 = vld [vmem:[%s12052_s11 + $0x508] sm:$0xff] }
 0xa67   : > { %5976 = vmatpush2.bf16.msra.mxu0 %v7483_v52  ;;  %5926 = vmatprep.subr.bf16.mxu1 %v7722_v34  ;;  %v3816_v52 = vld [vmem:[%s12052_s11 + $0xa00] sm:$0xff]  ;;  %v3661_v9 = vld [vmem:[%s12052_s11 + $0x528] sm:$0xff] }
 0xa68   : > { %5977 = vmatprep.subr.bf16.mxu0 %v7476_v21  ;;  %v3820_v34 = vld [vmem:[%s12052_s11 + $0xa20] sm:$0xff]  ;;  %v3569_v21 = vld [vmem:[%s12052_s11 + $0x248] sm:$0xff] }
 0xa69   : > { %v7681_v48 = vcombine.low %v3816_v52, %v3820_v34  ;;  %v7435_v22 = vcombine.low %v3569_v21, %v3573_v26  ;;  %v3649_v5 = vld [vmem:[%s12052_s11 + $0x4c8] sm:$0xff] }
 0xa6a   : > { %5927 = vmatpush2.bf16.msra.mxu1 %v7721_v8  ;;  %v7443_v8 = vcombine.low %v3577_v61, %v3581_v16  ;;  %v7532_v16 = vcombine.high %v3665_v50, %v3669_v38  ;;  %v3653_v63 = vld [vmem:[%s12052_s11 + $0x4e8] sm:$0xff] }
 0xa6b   : > { %5978 = vmatpush2.bf16.msra.mxu0 %v7475_v62  ;;  %5928 = vmatprep.subr.bf16.mxu1 %v7714_v35  ;;  %v7682_v62 = vcombine.high %v3816_v52, %v3820_v34  ;;  %v7436_v35 = vcombine.high %v3569_v21, %v3573_v26  ;;  %v7524_v34 = vcombine.high %v3657_v36, %v3661_v9  ;;  %v3785_v21 = vld [vmem:[%s12052_s11 + $0x908] sm:$0xff] }
 0xa6c   : > { %5979 = vmatprep.subr.bf16.mxu0 %v7468_v40  ;;  %v3561_v40 = vld [vmem:[%s12052_s11 + $0x208] sm:$0xff] }
 0xa6d   : > { %v7428_v43 = vcombine.high %v3561_v40, %v3565_v12  ;;  %v3789_v26 = vld [vmem:[%s12052_s11 + $0x928] sm:$0xff] }
 0xa6e   : > { %5929 = vmatpush2.bf16.msra.mxu1 %v7713_v59  ;;  %v3685_v59 = vld [vmem:[%s12052_s11 + $0x5e8] sm:$0xff] }
 0xa6f   : > { %5980 = vmatpush2.bf16.msra.mxu0 %v7467_v58  ;;  %5930 = vmatprep.subr.bf16.mxu1 %v7706_v1  ;;  %v3470_v58 = vmax.f32 %v10569_v57, %v3437_v3  ;;  %v7548_v1 = vcombine.high %v3681_v10, %v3685_v59  ;;  %v3677_v57 = vld [vmem:[%s12052_s11 + $0x5a8] sm:$0xff]  ;;  %v7547_v39 = vcombine.low %v3681_v10, %v3685_v59 }
 0xa70   : > { %5981 = vmatprep.subr.bf16.mxu0 %v7460_v28  ;;  %v3477_v28 = vmax.f32 %v10628_v25, %v3458_v31  ;;  %v7427_v25 = vcombine.low %v3561_v40, %v3565_v12  ;;  %v7539_v55 = vcombine.low %v3673_v32, %v3677_v57  ;;  %v3777_v40 = vld [vmem:[%s12052_s11 + $0x8c8] sm:$0xff]  ;;  %v7651_v10 = vcombine.low %v3785_v21, %v3789_v26 }
 0xa71   : > { %v11010_v11 = vpack.c.bf16 %v3470_v58, %v3464_v33  ;;  %v3781_v12 = vld [vmem:[%s12052_s11 + $0x8e8] sm:$0xff]  ;;  %v7515_v59 = vcombine.low %v3649_v5, %v3653_v63 }
 0xa72   : > { %5931 = vmatpush2.bf16.msra.mxu1 %v7705_v56  ;;  %v11020_v56 = vpack.c.bf16 %v3483_v47, %v3477_v28  ;;  %v3641_v41 = vld [vmem:[%s12052_s11 + $0x488] sm:$0xff]  ;;  %v7644_v31 = vcombine.high %v3777_v40, %v3781_v12  ;;  %v7643_v58 = vcombine.low %v3777_v40, %v3781_v12 }
 0xa73   : > { %5982 = vmatpush2.bf16.msra.mxu0 %v7459_v53  ;;  %5932 = vmatprep.subr.bf16.mxu1 %v7698_v4  ;;  %v7540_v53 = vcombine.high %v3673_v32, %v3677_v57  ;;  %v3801_v4 = vld [vmem:[%s12052_s11 + $0x988] sm:$0xff] }
 0xa74   : > { %5983 = vmatprep.subr.bf16.mxu0 %v7452_v13  ;;  %v3805_v13 = vld [vmem:[%s12052_s11 + $0x9a8] sm:$0xff] }
 0xa75   : > { %v7668_v61 = vcombine.high %v3801_v4, %v3805_v13  ;;  %v3645_v3 = vld [vmem:[%s12052_s11 + $0x4a8] sm:$0xff] }
 0xa76   : > { %5933 = vmatpush2.bf16.msra.mxu1 %v7697_v14  ;;  %v3797_v14 = vld [vmem:[%s12052_s11 + $0x968] sm:$0xff]  ;;  %v7508_v30 = vcombine.high %v3641_v41, %v3645_v3 }
 0xa77   : > { %5984 = vmatpush2.bf16.msra.mxu0 %v7451_v23  ;;  %5934 = vmatprep.subr.bf16.mxu1 %v7690_v24  ;;  %v7667_v23 = vcombine.low %v3801_v4, %v3805_v13  ;;  %v11052_v24 = vpack.c.bf16 %v3482_v46, %v3476_v42  ;;  %v7660_v52 = vcombine.high %v3793_v2, %v3797_v14  ;;  %v3637_v33 = vld [vmem:[%s12052_s11 + $0x468] sm:$0xff] }
 0xa78   : > { %5985 = vmatprep.subr.bf16.mxu0 %v7444_v15  ;;  %v7531_v15 = vcombine.low %v3665_v50, %v3669_v38  ;;  %v3761_v7 = vld [vmem:[%s12052_s11 + $0x848] sm:$0xff] }
 0xa79   : > { %v3765_v19 = vld [vmem:[%s12052_s11 + $0x868] sm:$0xff] }
 0xa7a   : > { %5935 = vmatpush2.bf16.msra.mxu1 %v7689_v27  ;;  %v7659_v27 = vcombine.low %v3793_v2, %v3797_v14  ;;  %v3625_v32 = vld [vmem:[%s12052_s11 + $0x408] sm:$0xff]  ;;  %v7627_v50 = vcombine.low %v3761_v7, %v3765_v19 }
 0xa7b   : > { %5986 = vmatpush2.bf16.msra.mxu0 %v7443_v8  ;;  %5936 = vmatprep.subr.bf16.mxu1 %v7682_v62  ;;  %v7523_v8 = vcombine.low %v3657_v36, %v3661_v9  ;;  %v7652_v62 = vcombine.high %v3785_v21, %v3789_v26  ;;  %v3629_v57 = vld [vmem:[%s12052_s11 + $0x428] sm:$0xff] }
 0xa7c   : > { %5987 = vmatprep.subr.bf16.mxu0 %v7436_v35  ;;  %v7516_v35 = vcombine.high %v3649_v5, %v3653_v63  ;;  %v7492_v45 = vcombine.high %v3625_v32, %v3629_v57  ;;  %v3753_v6 = vld [vmem:[%s12052_s11 + $0x808] sm:$0xff]  ;;  %v7491_v38 = vcombine.low %v3625_v32, %v3629_v57 }
 0xa7d   : > { %v3745_v4 = vld [vmem:[%s12052_s11 + $0x7c8] sm:$0xff] }
 0xa7e   : > { %5937 = vmatpush2.bf16.msra.mxu1 %v7681_v48  ;;  %v3769_v48 = vld [vmem:[%s12052_s11 + $0x888] sm:$0xff] }
 0xa7f   : > { %5988 = vmatpush2.bf16.msra.mxu0 %v7435_v22  ;;  %6012 = vmatprep.subr.bf16.mxu1 %v7548_v1  ;;  %v3773_v22 = vld [vmem:[%s12052_s11 + $0x8a8] sm:$0xff]  ;;  %v7507_v1 = vcombine.low %v3641_v41, %v3645_v3 }
 0xa80   : > { %5989 = vmatprep.subr.bf16.mxu0 %v7428_v43  ;;  %v3633_v43 = vld [vmem:[%s12052_s11 + $0x448] sm:$0xff]  ;;  %v7636_v28 = vcombine.high %v3769_v48, %v3773_v22 }
 0xa81   : > { %5939 = vmatmul.mubr.bf16.vlgmr.msra.gmra.mxu1 %v11010_v11  ;;  %v7500_v47 = vcombine.high %v3633_v43, %v3637_v33  ;;  %v3749_v13 = vld [vmem:[%s12052_s11 + $0x7e8] sm:$0xff] }
 0xa82   : > { %5948 = vmatprep.mubr.bf16.mxu1 %v11020_v56  ;;  %6013 = vmatpush1.bf16.msra.mxu1 %v7547_v39  ;;  %v7499_v39 = vcombine.low %v3633_v43, %v3637_v33  ;;  %v3873_v42 = vld [vmem:[%s12052_s11 + $0xbc8] sm:$0xff]  ;;  %v7611_v14 = vcombine.low %v3745_v4, %v3749_v13 }
 0xa83   : > { %5990 = vmatpush2.bf16.msra.mxu0 %v7427_v25  ;;  %6014 = vmatprep.subr.bf16.mxu1 %v7540_v53  ;;  %v7635_v25 = vcombine.low %v3769_v48, %v3773_v22  ;;  %v3757_v53 = vld [vmem:[%s12052_s11 + $0x828] sm:$0xff] }
 0xa84   : > { %6065 = vmatprep.subr.bf16.mxu0 %v7676_v51  ;;  %v7628_v51 = vcombine.high %v3761_v7, %v3765_v19  ;;  %v3877_v46 = vld [vmem:[%s12052_s11 + $0xbe8] sm:$0xff]  ;;  %v7619_v2 = vcombine.low %v3753_v6, %v3757_v53 }
 0xa85   : > { %v7740_v36 = vcombine.high %v3873_v42, %v3877_v46  ;;  %v7739_v21 = vcombine.low %v3873_v42, %v3877_v46 }
 0xa86   : > { %5992 = vmatmul.mubr.bf16.vlgmr.msra.gmra.mxu0 %v10666_v18  ;;  %6015 = vmatpush1.bf16.msra.mxu1 %v7539_v55  ;;  %v7620_v55 = vcombine.high %v3753_v6, %v3757_v53 }
 0xa87   : > { %6001 = vmatprep.mubr.bf16.mxu0 %v10767_v49  ;;  %6066 = vmatpush1.bf16.msra.mxu0 %v7675_v54  ;;  %v7612_v54 = vcombine.high %v3745_v4, %v3749_v13 }
 0xa88   : > { %6067 = vmatprep.subr.bf16.mxu0 %v7668_v61  ;;  %6016 = vmatprep.subr.bf16.mxu1 %v7532_v16  ;;  %v3737_v61 = vld [vmem:[%s12052_s11 + $0x788] sm:$0xff] }
 0xa89   : > { %5949 = vmatmul.mubr.bf16.gmra.mxu1 %v11052_v24  ;;  %v3741_v16 = vld [vmem:[%s12052_s11 + $0x7a8] sm:$0xff] }
 0xa8a   : > { %6044 = vmatprep.mubr.bf16.mxu1 %v10721_v29  ;;  %6017 = vmatpush1.bf16.msra.mxu1 %v7531_v15  ;;  %v7604_v9 = vcombine.high %v3737_v61, %v3741_v16  ;;  %v3869_v15 = vld [vmem:[%s12052_s11 + $0xba8] sm:$0xff]  ;;  %v7603_v26 = vcombine.low %v3737_v61, %v3741_v16 }
 0xa8b   : > { %6068 = vmatpush1.bf16.msra.mxu0 %v7667_v23  ;;  %6018 = vmatprep.subr.bf16.mxu1 %v7524_v34  ;;  %v3865_v23 = vld [vmem:[%s12052_s11 + $0xb88] sm:$0xff] }
 0xa8c   : > { %6069 = vmatprep.subr.bf16.mxu0 %v7660_v52  ;;  %v3729_v52 = vld [vmem:[%s12052_s11 + $0x748] sm:$0xff]  ;;  %v7732_v5 = vcombine.high %v3865_v23, %v3869_v15  ;;  %v7731_v40 = vcombine.low %v3865_v23, %v3869_v15 }
 0xa8d   : > { %v3733_v34 = vld [vmem:[%s12052_s11 + $0x768] sm:$0xff] }
 0xa8e   : > { %6002 = vmatmul.mubr.bf16.gmra.mxu0 %v10781_v44  ;;  %6019 = vmatpush1.bf16.msra.mxu1 %v7523_v8  ;;  %v7596_v63 = vcombine.high %v3729_v52, %v3733_v34  ;;  %v3861_v8 = vld [vmem:[%s12052_s11 + $0xb68] sm:$0xff]  ;;  %v7595_v12 = vcombine.low %v3729_v52, %v3733_v34 }
 0xa8f   : > { %6070 = vmatpush1.bf16.msra.mxu0 %v7659_v27  ;;  %6097 = vmatprep.mubr.bf16.mxu0 %v10834_v60  ;;  %v3857_v27 = vld [vmem:[%s12052_s11 + $0xb48] sm:$0xff] }
 0xa90   : > { %6071 = vmatprep.subr.bf16.mxu0 %v7652_v62  ;;  %6020 = vmatprep.subr.bf16.mxu1 %v7516_v35  ;;  %v3721_v62 = vld [vmem:[%s12052_s11 + $0x708] sm:$0xff]  ;;  %v7724_v41 = vcombine.high %v3857_v27, %v3861_v8  ;;  %v7723_v48 = vcombine.low %v3857_v27, %v3861_v8 }
 0xa91   : > { %v3725_v35 = vld [vmem:[%s12052_s11 + $0x728] sm:$0xff] }
 0xa92   : > { %6021 = vmatpush1.bf16.msra.mxu1 %v7515_v59  ;;  %v7588_v3 = vcombine.high %v3721_v62, %v3725_v35  ;;  %v3853_v59 = vld [vmem:[%s12052_s11 + $0xb28] sm:$0xff]  ;;  %v7587_v22 = vcombine.low %v3721_v62, %v3725_v35 }
 0xa93   : > { %6072 = vmatpush1.bf16.msra.mxu0 %v7651_v10  ;;  %6022 = vmatprep.subr.bf16.mxu1 %v7508_v30  ;;  %v3849_v10 = vld [vmem:[%s12052_s11 + $0xb08] sm:$0xff] }
 0xa94   : > { %6073 = vmatprep.subr.bf16.mxu0 %v7644_v31  ;;  %v3713_v31 = vld [vmem:[%s12052_s11 + $0x6c8] sm:$0xff]  ;;  %v7716_v43 = vcombine.high %v3849_v10, %v3853_v59  ;;  %v7715_v7 = vcombine.low %v3849_v10, %v3853_v59 }
 0xa95   : > { %v3717_v30 = vld [vmem:[%s12052_s11 + $0x6e8] sm:$0xff] }
 0xa96   : > { %6023 = vmatpush1.bf16.msra.mxu1 %v7507_v1  ;;  %v7580_v33 = vcombine.high %v3713_v31, %v3717_v30  ;;  %v3845_v1 = vld [vmem:[%s12052_s11 + $0xae8] sm:$0xff]  ;;  %v7579_v19 = vcombine.low %v3713_v31, %v3717_v30 }
 0xa97   : > { %6074 = vmatpush1.bf16.msra.mxu0 %v7643_v58  ;;  %6024 = vmatprep.subr.bf16.mxu1 %v7500_v47  ;;  %v3841_v58 = vld [vmem:[%s12052_s11 + $0xac8] sm:$0xff] }
 0xa98   : > { %6075 = vmatprep.subr.bf16.mxu0 %v7636_v28  ;;  %v3705_v28 = vld [vmem:[%s12052_s11 + $0x688] sm:$0xff]  ;;  %v7708_v32 = vcombine.high %v3841_v58, %v3845_v1  ;;  %v7707_v6 = vcombine.low %v3841_v58, %v3845_v1 }
 0xa99   : > { %v3709_v47 = vld [vmem:[%s12052_s11 + $0x6a8] sm:$0xff] }
 0xa9a   : > { %6025 = vmatpush1.bf16.msra.mxu1 %v7499_v39  ;;  %v7572_v57 = vcombine.high %v3705_v28, %v3709_v47  ;;  %v3837_v39 = vld [vmem:[%s12052_s11 + $0xaa8] sm:$0xff]  ;;  %v7571_v53 = vcombine.low %v3705_v28, %v3709_v47 }
 0xa9b   : > { %6076 = vmatpush1.bf16.msra.mxu0 %v7635_v25  ;;  %6026 = vmatprep.subr.bf16.mxu1 %v7492_v45  ;;  %v3833_v25 = vld [vmem:[%s12052_s11 + $0xa88] sm:$0xff] }
 0xa9c   : > { %6077 = vmatprep.subr.bf16.mxu0 %v7628_v51  ;;  %v3697_v51 = vld [vmem:[%s12052_s11 + $0x648] sm:$0xff]  ;;  %v7700_v4 = vcombine.high %v3833_v25, %v3837_v39  ;;  %v7699_v42 = vcombine.low %v3833_v25, %v3837_v39 }
 0xa9d   : > { %v3701_v45 = vld [vmem:[%s12052_s11 + $0x668] sm:$0xff] }
 0xa9e   : > { %6027 = vmatpush1.bf16.msra.mxu1 %v7491_v38  ;;  %v7564_v13 = vcombine.high %v3697_v51, %v3701_v45  ;;  %v3829_v38 = vld [vmem:[%s12052_s11 + $0xa68] sm:$0xff]  ;;  %v7563_v46 = vcombine.low %v3697_v51, %v3701_v45 }
 0xa9f   : > { %6078 = vmatpush1.bf16.msra.mxu0 %v7627_v50  ;;  %6028 = vmatprep.subr.bf16.mxu1 %v7612_v54  ;;  %v3825_v50 = vld [vmem:[%s12052_s11 + $0xa48] sm:$0xff] }
 0xaa0   : > { %6079 = vmatprep.subr.bf16.mxu0 %v7620_v55  ;;  %v3689_v55 = vld [vmem:[%s12052_s11 + $0x608] sm:$0xff]  ;;  %v7692_v61 = vcombine.high %v3825_v50, %v3829_v38  ;;  %v7691_v23 = vcombine.low %v3825_v50, %v3829_v38 }
 0xaa1   : > { %v3693_v54 = vld [vmem:[%s12052_s11 + $0x628] sm:$0xff] }
 0xaa2   : > { %6029 = vmatpush2.bf16.msra.mxu1 %v7611_v14  ;;  %v7556_v16 = vcombine.high %v3689_v55, %v3693_v54  ;;  %v3821_v14 = vld [vmem:[%s12052_s11 + $0xa28] sm:$0xff]  ;;  %v7555_v15 = vcombine.low %v3689_v55, %v3693_v54 }
 0xaa3   : > { %6080 = vmatpush1.bf16.msra.mxu0 %v7619_v2  ;;  %6030 = vmatprep.subr.bf16.mxu1 %v7604_v9  ;;  %v3817_v2 = vld [vmem:[%s12052_s11 + $0xa08] sm:$0xff]  ;;  %v3558_v9 = vld [vmem:[%s12052_s11 + $0x1f0] sm:$0xff] }
 0xaa4   : > { %6081 = vmatprep.subr.bf16.mxu0 %v7740_v36  ;;  %v3554_v36 = vld [vmem:[%s12052_s11 + $0x1d0] sm:$0xff]  ;;  %v7684_v52 = vcombine.high %v3817_v2, %v3821_v14  ;;  %v7683_v27 = vcombine.low %v3817_v2, %v3821_v14 }
 0xaa5   : > { %v7422_v34 = vcombine.high %v3554_v36, %v3558_v9  ;;  %v7421_v8 = vcombine.low %v3554_v36, %v3558_v9 }
 0xaa6   : > { %6031 = vmatpush2.bf16.msra.mxu1 %v7603_v26  ;;  %v3550_v26 = vld [vmem:[%s12052_s11 + $0x1b0] sm:$0xff] }
 0xaa7   : > { %6082 = vmatpush2.bf16.msra.mxu0 %v7739_v21  ;;  %6032 = vmatprep.subr.bf16.mxu1 %v7596_v63  ;;  %v3546_v21 = vld [vmem:[%s12052_s11 + $0x190] sm:$0xff] }
 0xaa8   : > { %6083 = vmatprep.subr.bf16.mxu0 %v7732_v5  ;;  %v3682_v5 = vld [vmem:[%s12052_s11 + $0x5d0] sm:$0xff]  ;;  %v7414_v62 = vcombine.high %v3546_v21, %v3550_v26  ;;  %v7413_v59 = vcombine.low %v3546_v21, %v3550_v26 }
 0xaa9   : > { %v3686_v63 = vld [vmem:[%s12052_s11 + $0x5f0] sm:$0xff] }
 0xaaa   : > { %6033 = vmatpush2.bf16.msra.mxu1 %v7595_v12  ;;  %v7550_v35 = vcombine.high %v3682_v5, %v3686_v63  ;;  %v3678_v12 = vld [vmem:[%s12052_s11 + $0x5b0] sm:$0xff]  ;;  %v7549_v10 = vcombine.low %v3682_v5, %v3686_v63 }
 0xaab   : > { %6084 = vmatpush2.bf16.msra.mxu0 %v7731_v40  ;;  %6034 = vmatprep.subr.bf16.mxu1 %v7588_v3  ;;  %v3674_v40 = vld [vmem:[%s12052_s11 + $0x590] sm:$0xff] }
 0xaac   : > { %6085 = vmatprep.subr.bf16.mxu0 %v7724_v41  ;;  %v3538_v41 = vld [vmem:[%s12052_s11 + $0x150] sm:$0xff]  ;;  %v7542_v31 = vcombine.high %v3674_v40, %v3678_v12  ;;  %v7541_v58 = vcombine.low %v3674_v40, %v3678_v12 }
 0xaad   : > { %v3542_v3 = vld [vmem:[%s12052_s11 + $0x170] sm:$0xff] }
 0xaae   : > { %6035 = vmatpush2.bf16.msra.mxu1 %v7587_v22  ;;  %v7406_v30 = vcombine.high %v3538_v41, %v3542_v3  ;;  %v3534_v22 = vld [vmem:[%s12052_s11 + $0x130] sm:$0xff]  ;;  %v7405_v1 = vcombine.low %v3538_v41, %v3542_v3 }
 0xaaf   : > { %6086 = vmatpush2.bf16.msra.mxu0 %v7723_v48  ;;  %6036 = vmatprep.subr.bf16.mxu1 %v7580_v33  ;;  %v3530_v48 = vld [vmem:[%s12052_s11 + $0x110] sm:$0xff] }
 0xab0   : > { %6087 = vmatprep.subr.bf16.mxu0 %v7716_v43  ;;  %v3666_v43 = vld [vmem:[%s12052_s11 + $0x550] sm:$0xff]  ;;  %v7398_v28 = vcombine.high %v3530_v48, %v3534_v22  ;;  %v7397_v39 = vcombine.low %v3530_v48, %v3534_v22 }
 0xab1   : > { %v3670_v33 = vld [vmem:[%s12052_s11 + $0x570] sm:$0xff] }
 0xab2   : > { %6037 = vmatpush2.bf16.msra.mxu1 %v7579_v19  ;;  %v7534_v47 = vcombine.high %v3666_v43, %v3670_v33  ;;  %v3662_v19 = vld [vmem:[%s12052_s11 + $0x530] sm:$0xff]  ;;  %v7533_v25 = vcombine.low %v3666_v43, %v3670_v33 }
 0xab3   : > { %6088 = vmatpush2.bf16.msra.mxu0 %v7715_v7  ;;  %6038 = vmatprep.subr.bf16.mxu1 %v7572_v57  ;;  %v3658_v7 = vld [vmem:[%s12052_s11 + $0x510] sm:$0xff] }
 0xab4   : > { %6089 = vmatprep.subr.bf16.mxu0 %v7708_v32  ;;  %v3522_v32 = vld [vmem:[%s12052_s11 + $0xd0] sm:$0xff]  ;;  %v7526_v51 = vcombine.high %v3658_v7, %v3662_v19  ;;  %v7525_v50 = vcombine.low %v3658_v7, %v3662_v19 }
 0xab5   : > { %v3526_v57 = vld [vmem:[%s12052_s11 + $0xf0] sm:$0xff] }
 0xab6   : > { %6039 = vmatpush2.bf16.msra.mxu1 %v7571_v53  ;;  %v7390_v45 = vcombine.high %v3522_v32, %v3526_v57  ;;  %v3654_v53 = vld [vmem:[%s12052_s11 + $0x4f0] sm:$0xff]  ;;  %v7389_v38 = vcombine.low %v3522_v32, %v3526_v57 }
 0xab7   : > { %6090 = vmatpush2.bf16.msra.mxu0 %v7707_v6  ;;  %6040 = vmatprep.subr.bf16.mxu1 %v7564_v13  ;;  %v3650_v6 = vld [vmem:[%s12052_s11 + $0x4d0] sm:$0xff] }
 0xab8   : > { %6091 = vmatprep.subr.bf16.mxu0 %v7700_v4  ;;  %v3514_v4 = vld [vmem:[%s12052_s11 + $0x90] sm:$0xff]  ;;  %v7518_v55 = vcombine.high %v3650_v6, %v3654_v53  ;;  %v7517_v2 = vcombine.low %v3650_v6, %v3654_v53 }
 0xab9   : > { %v3518_v13 = vld [vmem:[%s12052_s11 + $0xb0] sm:$0xff] }
 0xaba   : > { %6041 = vmatpush2.bf16.msra.mxu1 %v7563_v46  ;;  %v7382_v54 = vcombine.high %v3514_v4, %v3518_v13  ;;  %v3646_v46 = vld [vmem:[%s12052_s11 + $0x4b0] sm:$0xff]  ;;  %v7381_v14 = vcombine.low %v3514_v4, %v3518_v13 }
 0xabb   : > { %6092 = vmatpush2.bf16.msra.mxu0 %v7699_v42  ;;  %6042 = vmatprep.subr.bf16.mxu1 %v7556_v16  ;;  %v3642_v42 = vld [vmem:[%s12052_s11 + $0x490] sm:$0xff] }
 0xabc   : > { %6093 = vmatprep.subr.bf16.mxu0 %v7692_v61  ;;  %v3506_v61 = vld [vmem:[%s12052_s11 + $0x50] sm:$0xff]  ;;  %v7510_v36 = vcombine.high %v3642_v42, %v3646_v46  ;;  %v7509_v21 = vcombine.low %v3642_v42, %v3646_v46 }
 0xabd   : > { %v3510_v16 = vld [vmem:[%s12052_s11 + $0x70] sm:$0xff] }
 0xabe   : > { %6043 = vmatpush2.bf16.msra.mxu1 %v7555_v15  ;;  %v7374_v9 = vcombine.high %v3506_v61, %v3510_v16  ;;  %v3638_v15 = vld [vmem:[%s12052_s11 + $0x470] sm:$0xff]  ;;  %v7373_v26 = vcombine.low %v3506_v61, %v3510_v16 }
 0xabf   : > { %6094 = vmatpush2.bf16.msra.mxu0 %v7691_v23  ;;  %6118 = vmatprep.subr.bf16.mxu1 %v7422_v34  ;;  %v3634_v23 = vld [vmem:[%s12052_s11 + $0x450] sm:$0xff] }
 0xac0   : > { %6095 = vmatprep.subr.bf16.mxu0 %v7684_v52  ;;  %v3498_v52 = vld [vmem:[%s12052_s11 + $0x10] sm:$0xff]  ;;  %v7502_v5 = vcombine.high %v3634_v23, %v3638_v15  ;;  %v7501_v40 = vcombine.low %v3634_v23, %v3638_v15 }
 0xac1   : > { %6045 = vmatmul.mubr.bf16.vlgmr.msra.gmra.mxu1 %v10709_v37  ;;  %v3502_v34 = vld [vmem:[%s12052_s11 + $0x30] sm:$0xff] }
 0xac2   : > { %6054 = vmatprep.mubr.bf16.mxu1 %v10824_v20  ;;  %6119 = vmatpush1.bf16.msra.mxu1 %v7421_v8  ;;  %v7366_v63 = vcombine.high %v3498_v52, %v3502_v34  ;;  %v3630_v8 = vld [vmem:[%s12052_s11 + $0x430] sm:$0xff]  ;;  %v7365_v12 = vcombine.low %v3498_v52, %v3502_v34 }
 0xac3   : > { %6096 = vmatpush2.bf16.msra.mxu0 %v7683_v27  ;;  %6120 = vmatprep.subr.bf16.mxu1 %v7414_v62  ;;  %v3626_v27 = vld [vmem:[%s12052_s11 + $0x410] sm:$0xff] }
 0xac4   : > { %6171 = vmatprep.subr.bf16.mxu0 %v7550_v35  ;;  %v3618_v62 = vld [vmem:[%s12052_s11 + $0x3d0] sm:$0xff]  ;;  %v7494_v41 = vcombine.high %v3626_v27, %v3630_v8  ;;  %v7493_v48 = vcombine.low %v3626_v27, %v3630_v8 }
 0xac5   : > { %v3622_v35 = vld [vmem:[%s12052_s11 + $0x3f0] sm:$0xff] }
 0xac6   : > { %6098 = vmatmul.mubr.bf16.vlgmr.msra.gmra.mxu0 %v11010_v11  ;;  %6121 = vmatpush1.bf16.msra.mxu1 %v7413_v59  ;;  %v7486_v3 = vcombine.high %v3618_v62, %v3622_v35  ;;  %v3750_v59 = vld [vmem:[%s12052_s11 + $0x7f0] sm:$0xff]  ;;  %v7485_v22 = vcombine.low %v3618_v62, %v3622_v35 }
 0xac7   : > { %6107 = vmatprep.mubr.bf16.mxu0 %v11020_v56  ;;  %6172 = vmatpush1.bf16.msra.mxu0 %v7549_v10  ;;  %v3746_v10 = vld [vmem:[%s12052_s11 + $0x7d0] sm:$0xff] }
 0xac8   : > { %6173 = vmatprep.subr.bf16.mxu0 %v7542_v31  ;;  %6122 = vmatprep.subr.bf16.mxu1 %v7406_v30  ;;  %v3610_v31 = vld [vmem:[%s12052_s11 + $0x390] sm:$0xff]  ;;  %v7614_v43 = vcombine.high %v3746_v10, %v3750_v59  ;;  %v7613_v7 = vcombine.low %v3746_v10, %v3750_v59 }
 0xac9   : > { %6055 = vmatmul.mubr.bf16.gmra.mxu1 %v10837_v17  ;;  %v3614_v30 = vld [vmem:[%s12052_s11 + $0x3b0] sm:$0xff] }
 0xaca   : > { %6123 = vmatpush1.bf16.msra.mxu1 %v7405_v1  ;;  %6150 = vmatprep.mubr.bf16.mxu1 %v10670_v0  ;;  %v7478_v33 = vcombine.high %v3610_v31, %v3614_v30  ;;  %v3742_v1 = vld [vmem:[%s12052_s11 + $0x7b0] sm:$0xff]  ;;  %v7477_v19 = vcombine.low %v3610_v31, %v3614_v30 }
 0xacb   : > { %6174 = vmatpush1.bf16.msra.mxu0 %v7541_v58  ;;  %6124 = vmatprep.subr.bf16.mxu1 %v7398_v28  ;;  %v3738_v58 = vld [vmem:[%s12052_s11 + $0x790] sm:$0xff] }
 0xacc   : > { %6175 = vmatprep.subr.bf16.mxu0 %v7534_v47  ;;  %v3602_v28 = vld [vmem:[%s12052_s11 + $0x350] sm:$0xff]  ;;  %v7606_v32 = vcombine.high %v3738_v58, %v3742_v1  ;;  %v7605_v6 = vcombine.low %v3738_v58, %v3742_v1 }
 0xacd   : > { %v3606_v47 = vld [vmem:[%s12052_s11 + $0x370] sm:$0xff] }
 0xace   : > { %6108 = vmatmul.mubr.bf16.gmra.mxu0 %v11052_v24  ;;  %6125 = vmatpush1.bf16.msra.mxu1 %v7397_v39  ;;  %v7470_v57 = vcombine.high %v3602_v28, %v3606_v47  ;;  %v3734_v39 = vld [vmem:[%s12052_s11 + $0x770] sm:$0xff]  ;;  %v7469_v53 = vcombine.low %v3602_v28, %v3606_v47 }
 0xacf   : > { %6176 = vmatpush1.bf16.msra.mxu0 %v7533_v25  ;;  %6203 = vmatprep.mubr.bf16.mxu0 %v10721_v29  ;;  %v3730_v25 = vld [vmem:[%s12052_s11 + $0x750] sm:$0xff] }
 0xad0   : > { %6177 = vmatprep.subr.bf16.mxu0 %v7526_v51  ;;  %6126 = vmatprep.subr.bf16.mxu1 %v7390_v45  ;;  %v3594_v51 = vld [vmem:[%s12052_s11 + $0x310] sm:$0xff]  ;;  %v7598_v4 = vcombine.high %v3730_v25, %v3734_v39  ;;  %v7597_v42 = vcombine.low %v3730_v25, %v3734_v39 }
 0xad1   : > { %v3598_v45 = vld [vmem:[%s12052_s11 + $0x330] sm:$0xff] }
 0xad2   : > { %6127 = vmatpush1.bf16.msra.mxu1 %v7389_v38  ;;  %v7462_v13 = vcombine.high %v3594_v51, %v3598_v45  ;;  %v3726_v38 = vld [vmem:[%s12052_s11 + $0x730] sm:$0xff]  ;;  %v7461_v46 = vcombine.low %v3594_v51, %v3598_v45 }
 0xad3   : > { %6178 = vmatpush1.bf16.msra.mxu0 %v7525_v50  ;;  %6128 = vmatprep.subr.bf16.mxu1 %v7382_v54  ;;  %v3722_v50 = vld [vmem:[%s12052_s11 + $0x710] sm:$0xff] }
 0xad4   : > { %6179 = vmatprep.subr.bf16.mxu0 %v7518_v55  ;;  %v3586_v55 = vld [vmem:[%s12052_s11 + $0x2d0] sm:$0xff]  ;;  %v7590_v61 = vcombine.high %v3722_v50, %v3726_v38  ;;  %v7589_v23 = vcombine.low %v3722_v50, %v3726_v38 }
 0xad5   : > { %v3590_v54 = vld [vmem:[%s12052_s11 + $0x2f0] sm:$0xff] }
 0xad6   : > { %6129 = vmatpush1.bf16.msra.mxu1 %v7381_v14  ;;  %v7454_v16 = vcombine.high %v3586_v55, %v3590_v54  ;;  %v3718_v14 = vld [vmem:[%s12052_s11 + $0x6f0] sm:$0xff]  ;;  %v7453_v15 = vcombine.low %v3586_v55, %v3590_v54 }
 0xad7   : > { %6180 = vmatpush1.bf16.msra.mxu0 %v7517_v2  ;;  %6130 = vmatprep.subr.bf16.mxu1 %v7374_v9  ;;  %v3714_v2 = vld [vmem:[%s12052_s11 + $0x6d0] sm:$0xff] }
 0xad8   : > { %6181 = vmatprep.subr.bf16.mxu0 %v7510_v36  ;;  %v3578_v36 = vld [vmem:[%s12052_s11 + $0x290] sm:$0xff]  ;;  %v7582_v52 = vcombine.high %v3714_v2, %v3718_v14  ;;  %v7581_v27 = vcombine.low %v3714_v2, %v3718_v14 }
 0xad9   : > { %v3582_v9 = vld [vmem:[%s12052_s11 + $0x2b0] sm:$0xff] }
 0xada   : > { %6131 = vmatpush1.bf16.msra.mxu1 %v7373_v26  ;;  %v7446_v34 = vcombine.high %v3578_v36, %v3582_v9  ;;  %v3710_v26 = vld [vmem:[%s12052_s11 + $0x6b0] sm:$0xff]  ;;  %v7445_v8 = vcombine.low %v3578_v36, %v3582_v9 }
 0xadb   : > { %6182 = vmatpush1.bf16.msra.mxu0 %v7509_v21  ;;  %6132 = vmatprep.subr.bf16.mxu1 %v7366_v63  ;;  %v3706_v21 = vld [vmem:[%s12052_s11 + $0x690] sm:$0xff] }
 0xadc   : > { %6183 = vmatprep.subr.bf16.mxu0 %v7502_v5  ;;  %v3570_v5 = vld [vmem:[%s12052_s11 + $0x250] sm:$0xff]  ;;  %v7574_v62 = vcombine.high %v3706_v21, %v3710_v26  ;;  %v7573_v10 = vcombine.low %v3706_v21, %v3710_v26 }
 0xadd   : > { %v3574_v63 = vld [vmem:[%s12052_s11 + $0x270] sm:$0xff] }
 0xade   : > { %6133 = vmatpush1.bf16.msra.mxu1 %v7365_v12  ;;  %v7438_v35 = vcombine.high %v3570_v5, %v3574_v63  ;;  %v3702_v12 = vld [vmem:[%s12052_s11 + $0x670] sm:$0xff]  ;;  %v7437_v59 = vcombine.low %v3570_v5, %v3574_v63 }
 0xadf   : > { %6184 = vmatpush1.bf16.msra.mxu0 %v7501_v40  ;;  %6134 = vmatprep.subr.bf16.mxu1 %v7486_v3  ;;  %v3698_v40 = vld [vmem:[%s12052_s11 + $0x650] sm:$0xff] }
 0xae0   : > { %6185 = vmatprep.subr.bf16.mxu0 %v7494_v41  ;;  %v3562_v41 = vld [vmem:[%s12052_s11 + $0x210] sm:$0xff]  ;;  %v7566_v31 = vcombine.high %v3698_v40, %v3702_v12  ;;  %v7565_v58 = vcombine.low %v3698_v40, %v3702_v12 }
 0xae1   : > { %v3566_v3 = vld [vmem:[%s12052_s11 + $0x230] sm:$0xff] }
 0xae2   : > { %6135 = vmatpush2.bf16.msra.mxu1 %v7485_v22  ;;  %v7430_v30 = vcombine.high %v3562_v41, %v3566_v3  ;;  %v3694_v22 = vld [vmem:[%s12052_s11 + $0x630] sm:$0xff]  ;;  %v7429_v1 = vcombine.low %v3562_v41, %v3566_v3 }
 0xae3   : > { %6186 = vmatpush1.bf16.msra.mxu0 %v7493_v48  ;;  %6136 = vmatprep.subr.bf16.mxu1 %v7478_v33  ;;  %v3690_v48 = vld [vmem:[%s12052_s11 + $0x610] sm:$0xff] }
 0xae4   : > { %6187 = vmatprep.subr.bf16.mxu0 %v7614_v43  ;;  %v3810_v43 = vld [vmem:[%s12052_s11 + $0x9d0] sm:$0xff]  ;;  %v7558_v28 = vcombine.high %v3690_v48, %v3694_v22  ;;  %v7557_v25 = vcombine.low %v3690_v48, %v3694_v22 }
 0xae5   : > { %v3814_v33 = vld [vmem:[%s12052_s11 + $0x9f0] sm:$0xff] }
 0xae6   : > { %6137 = vmatpush2.bf16.msra.mxu1 %v7477_v19  ;;  %v7678_v47 = vcombine.high %v3810_v43, %v3814_v33  ;;  %v3806_v19 = vld [vmem:[%s12052_s11 + $0x9b0] sm:$0xff]  ;;  %v7677_v39 = vcombine.low %v3810_v43, %v3814_v33  ;;  %v3507_v33 = vld [vmem:[%s12052_s11 + $0x58] sm:$0xff] }
 0xae7   : > { %6188 = vmatpush2.bf16.msra.mxu0 %v7613_v7  ;;  %6138 = vmatprep.subr.bf16.mxu1 %v7470_v57  ;;  %v3802_v7 = vld [vmem:[%s12052_s11 + $0x990] sm:$0xff]  ;;  %v3559_v57 = vld [vmem:[%s12052_s11 + $0x1f8] sm:$0xff] }
 0xae8   : > { %6189 = vmatprep.subr.bf16.mxu0 %v7606_v32  ;;  %v3555_v32 = vld [vmem:[%s12052_s11 + $0x1d8] sm:$0xff]  ;;  %v7670_v51 = vcombine.high %v3802_v7, %v3806_v19  ;;  %v7669_v38 = vcombine.low %v3802_v7, %v3806_v19 }
 0xae9   : > { %v7424_v45 = vcombine.high %v3555_v32, %v3559_v57  ;;  %v7423_v50 = vcombine.low %v3555_v32, %v3559_v57  ;;  %v3499_v57 = vld [vmem:[%s12052_s11 + $0x18] sm:$0xff] }
 0xaea   : > { %6139 = vmatpush2.bf16.msra.mxu1 %v7469_v53  ;;  %v3551_v53 = vld [vmem:[%s12052_s11 + $0x1b8] sm:$0xff] }
 0xaeb   : > { %6190 = vmatpush2.bf16.msra.mxu0 %v7605_v6  ;;  %6140 = vmatprep.subr.bf16.mxu1 %v7462_v13  ;;  %v3547_v6 = vld [vmem:[%s12052_s11 + $0x198] sm:$0xff]  ;;  %v3798_v13 = vld [vmem:[%s12052_s11 + $0x970] sm:$0xff] }
 0xaec   : > { %6191 = vmatprep.subr.bf16.mxu0 %v7598_v4  ;;  %v3794_v4 = vld [vmem:[%s12052_s11 + $0x950] sm:$0xff]  ;;  %v7416_v55 = vcombine.high %v3547_v6, %v3551_v53  ;;  %v7415_v2 = vcombine.low %v3547_v6, %v3551_v53 }
 0xaed   : > { %v7662_v54 = vcombine.high %v3794_v4, %v3798_v13  ;;  %v7661_v14 = vcombine.low %v3794_v4, %v3798_v13  ;;  %v3619_v13 = vld [vmem:[%s12052_s11 + $0x3d8] sm:$0xff] }
 0xaee   : > { %6141 = vmatpush2.bf16.msra.mxu1 %v7461_v46  ;;  %v3790_v46 = vld [vmem:[%s12052_s11 + $0x930] sm:$0xff] }
 0xaef   : > { %6192 = vmatpush2.bf16.msra.mxu0 %v7597_v42  ;;  %6142 = vmatprep.subr.bf16.mxu1 %v7454_v16  ;;  %v3786_v42 = vld [vmem:[%s12052_s11 + $0x910] sm:$0xff]  ;;  %v3543_v16 = vld [vmem:[%s12052_s11 + $0x178] sm:$0xff] }
 0xaf0   : > { %6193 = vmatprep.subr.bf16.mxu0 %v7590_v61  ;;  %v3539_v61 = vld [vmem:[%s12052_s11 + $0x158] sm:$0xff]  ;;  %v7654_v36 = vcombine.high %v3786_v42, %v3790_v46  ;;  %v7653_v26 = vcombine.low %v3786_v42, %v3790_v46 }
 0xaf1   : > { %v7408_v9 = vcombine.high %v3539_v61, %v3543_v16  ;;  %v7407_v21 = vcombine.low %v3539_v61, %v3543_v16  ;;  %v3611_v16 = vld [vmem:[%s12052_s11 + $0x398] sm:$0xff] }
 0xaf2   : > { %6143 = vmatpush2.bf16.msra.mxu1 %v7453_v15  ;;  %v3535_v15 = vld [vmem:[%s12052_s11 + $0x138] sm:$0xff] }
 0xaf3   : > { %6194 = vmatpush2.bf16.msra.mxu0 %v7589_v23  ;;  %6144 = vmatprep.subr.bf16.mxu1 %v7446_v34  ;;  %v3531_v23 = vld [vmem:[%s12052_s11 + $0x118] sm:$0xff]  ;;  %v3782_v34 = vld [vmem:[%s12052_s11 + $0x8f0] sm:$0xff] }
 0xaf4   : > { %6195 = vmatprep.subr.bf16.mxu0 %v7582_v52  ;;  %v3778_v52 = vld [vmem:[%s12052_s11 + $0x8d0] sm:$0xff]  ;;  %v7400_v5 = vcombine.high %v3531_v23, %v3535_v15  ;;  %v7399_v40 = vcombine.low %v3531_v23, %v3535_v15 }
 0xaf5   : > { %v7646_v63 = vcombine.high %v3778_v52, %v3782_v34  ;;  %v7645_v12 = vcombine.low %v3778_v52, %v3782_v34  ;;  %v3603_v34 = vld [vmem:[%s12052_s11 + $0x358] sm:$0xff] }
 0xaf6   : > { %6145 = vmatpush2.bf16.msra.mxu1 %v7445_v8  ;;  %v3527_v8 = vld [vmem:[%s12052_s11 + $0xf8] sm:$0xff] }
 0xaf7   : > { %6196 = vmatpush2.bf16.msra.mxu0 %v7581_v27  ;;  %6146 = vmatprep.subr.bf16.mxu1 %v7438_v35  ;;  %v3523_v27 = vld [vmem:[%s12052_s11 + $0xd8] sm:$0xff]  ;;  %v3774_v35 = vld [vmem:[%s12052_s11 + $0x8b0] sm:$0xff] }
 0xaf8   : > { %6197 = vmatprep.subr.bf16.mxu0 %v7574_v62  ;;  %v3770_v62 = vld [vmem:[%s12052_s11 + $0x890] sm:$0xff]  ;;  %v7392_v41 = vcombine.high %v3523_v27, %v3527_v8 }
 0xaf9   : > { %v7638_v3 = vcombine.high %v3770_v62, %v3774_v35  ;;  %v7637_v48 = vcombine.low %v3770_v62, %v3774_v35  ;;  %v3595_v35 = vld [vmem:[%s12052_s11 + $0x318] sm:$0xff] }
 0xafa   : > { %6147 = vmatpush2.bf16.msra.mxu1 %v7437_v59  ;;  %v3519_v59 = vld [vmem:[%s12052_s11 + $0xb8] sm:$0xff] }
 0xafb   : > { %6198 = vmatpush2.bf16.msra.mxu0 %v7573_v10  ;;  %6148 = vmatprep.subr.bf16.mxu1 %v7430_v30  ;;  %v3515_v10 = vld [vmem:[%s12052_s11 + $0x98] sm:$0xff]  ;;  %v7391_v30 = vcombine.low %v3523_v27, %v3527_v8 }
 0xafc   : > { %6199 = vmatprep.subr.bf16.mxu0 %v7566_v31  ;;  %v3762_v31 = vld [vmem:[%s12052_s11 + $0x850] sm:$0xff]  ;;  %v7384_v22 = vcombine.high %v3515_v10, %v3519_v59 }
 0xafe   : > { %6149 = vmatpush2.bf16.msra.mxu1 %v7429_v1  ;;  %v3754_v1 = vld [vmem:[%s12052_s11 + $0x810] sm:$0xff] }
 0xaff   : > { %6200 = vmatpush2.bf16.msra.mxu0 %v7565_v58  ;;  %6224 = vmatprep.subr.bf16.mxu1 %v7678_v47  ;;  %v3511_v58 = vld [vmem:[%s12052_s11 + $0x78] sm:$0xff]  ;;  %v7383_v47 = vcombine.low %v3515_v10, %v3519_v59 }
 0xb00   : > { %6201 = vmatprep.subr.bf16.mxu0 %v7558_v28  ;;  %v3758_v28 = vld [vmem:[%s12052_s11 + $0x830] sm:$0xff]  ;;  %v7376_v19 = vcombine.high %v3507_v33, %v3511_v58 }
 0xb01   : > { %6151 = vmatmul.mubr.bf16.vlgmr.msra.gmra.mxu1 %v10666_v18  ;;  %v7622_v32 = vcombine.high %v3754_v1, %v3758_v28  ;;  %v7621_v6 = vcombine.low %v3754_v1, %v3758_v28 }
 0xb02   : > { %6160 = vmatprep.mubr.bf16.mxu1 %v10767_v49  ;;  %6225 = vmatpush1.bf16.msra.mxu1 %v7677_v39  ;;  %v3874_v39 = vld [vmem:[%s12052_s11 + $0xbd0] sm:$0xff] }
 0xb03   : > { %6202 = vmatpush2.bf16.msra.mxu0 %v7557_v25  ;;  %6226 = vmatprep.subr.bf16.mxu1 %v7670_v51  ;;  %v3503_v25 = vld [vmem:[%s12052_s11 + $0x38] sm:$0xff]  ;;  %v3878_v51 = vld [vmem:[%s12052_s11 + $0xbf0] sm:$0xff] }
 0xb04   : > { %6277 = vmatprep.subr.bf16.mxu0 %v7424_v45  ;;  %v7375_v45 = vcombine.low %v3507_v33, %v3511_v58  ;;  %v7368_v53 = vcombine.high %v3499_v57, %v3503_v25  ;;  %v7742_v4 = vcombine.high %v3874_v39, %v3878_v51  ;;  %v7741_v42 = vcombine.low %v3874_v39, %v3878_v51 }
 0xb06   : > { %6204 = vmatmul.mubr.bf16.vlgmr.msra.gmra.mxu0 %v10709_v37  ;;  %6227 = vmatpush1.bf16.msra.mxu1 %v7669_v38  ;;  %v3866_v38 = vld [vmem:[%s12052_s11 + $0xb90] sm:$0xff] }
 0xb07   : > { %6213 = vmatprep.mubr.bf16.mxu0 %v10824_v20  ;;  %6278 = vmatpush1.bf16.msra.mxu0 %v7423_v50  ;;  %v3623_v50 = vld [vmem:[%s12052_s11 + $0x3f8] sm:$0xff] }
 0xb08   : > { %6279 = vmatprep.subr.bf16.mxu0 %v7416_v55  ;;  %6228 = vmatprep.subr.bf16.mxu1 %v7662_v54  ;;  %v3870_v55 = vld [vmem:[%s12052_s11 + $0xbb0] sm:$0xff]  ;;  %v7367_v54 = vcombine.low %v3499_v57, %v3503_v25  ;;  %v7488_v46 = vcombine.high %v3619_v13, %v3623_v50 }
 0xb09   : > { %6161 = vmatmul.mubr.bf16.gmra.mxu1 %v10781_v44  ;;  %v7734_v61 = vcombine.high %v3866_v38, %v3870_v55  ;;  %v7733_v23 = vcombine.low %v3866_v38, %v3870_v55 }
 0xb0a   : > { %6229 = vmatpush1.bf16.msra.mxu1 %v7661_v14  ;;  %6256 = vmatprep.mubr.bf16.mxu1 %v10834_v60  ;;  %v3858_v14 = vld [vmem:[%s12052_s11 + $0xb50] sm:$0xff] }
 0xb0b   : > { %6280 = vmatpush1.bf16.msra.mxu0 %v7415_v2  ;;  %6230 = vmatprep.subr.bf16.mxu1 %v7654_v36  ;;  %v3615_v2 = vld [vmem:[%s12052_s11 + $0x3b8] sm:$0xff]  ;;  %v3862_v36 = vld [vmem:[%s12052_s11 + $0xb70] sm:$0xff] }
 0xb0c   : > { %6281 = vmatprep.subr.bf16.mxu0 %v7408_v9  ;;  %v7487_v9 = vcombine.low %v3619_v13, %v3623_v50  ;;  %v7480_v15 = vcombine.high %v3611_v16, %v3615_v2  ;;  %v7726_v52 = vcombine.high %v3858_v14, %v3862_v36  ;;  %v7725_v27 = vcombine.low %v3858_v14, %v3862_v36  ;;  %v3822_v13 = vld [vmem:[%s12052_s11 + $0xa30] sm:$0xff] }
 0xb0e   : > { %6214 = vmatmul.mubr.bf16.gmra.mxu0 %v10837_v17  ;;  %6231 = vmatpush1.bf16.msra.mxu1 %v7653_v26  ;;  %v3850_v26 = vld [vmem:[%s12052_s11 + $0xb10] sm:$0xff] }
 0xb0f   : > { %6282 = vmatpush1.bf16.msra.mxu0 %v7407_v21  ;;  %6309 = vmatprep.mubr.bf16.mxu0 %v10670_v0  ;;  %v3766_v0 = vld [vmem:[%s12052_s11 + $0x870] sm:$0xff]  ;;  %v3607_v21 = vld [vmem:[%s12052_s11 + $0x378] sm:$0xff] }
 0xb10   : > { %6283 = vmatprep.subr.bf16.mxu0 %v7400_v5  ;;  %6232 = vmatprep.subr.bf16.mxu1 %v7646_v63  ;;  %v7630_v43 = vcombine.high %v3762_v31, %v3766_v0  ;;  %v7629_v7 = vcombine.low %v3762_v31, %v3766_v0  ;;  %v3854_v5 = vld [vmem:[%s12052_s11 + $0xb30] sm:$0xff]  ;;  %v7479_v63 = vcombine.low %v3611_v16, %v3615_v2  ;;  %v3587_v0 = vld [vmem:[%s12052_s11 + $0x2d8] sm:$0xff] }
 0xb11   : > { %v7472_v8 = vcombine.high %v3603_v34, %v3607_v21  ;;  %v7718_v62 = vcombine.high %v3850_v26, %v3854_v5  ;;  %v7717_v10 = vcombine.low %v3850_v26, %v3854_v5  ;;  %v3683_v16 = vld [vmem:[%s12052_s11 + $0x5d8] sm:$0xff] }
 0xb12   : > { %6233 = vmatpush1.bf16.msra.mxu1 %v7645_v12  ;;  %v3842_v12 = vld [vmem:[%s12052_s11 + $0xad0] sm:$0xff]  ;;  %v3687_v2 = vld [vmem:[%s12052_s11 + $0x5f8] sm:$0xff] }
 0xb13   : > { %6284 = vmatpush1.bf16.msra.mxu0 %v7399_v40  ;;  %6234 = vmatprep.subr.bf16.mxu1 %v7638_v3  ;;  %v3599_v40 = vld [vmem:[%s12052_s11 + $0x338] sm:$0xff]  ;;  %v7471_v3 = vcombine.low %v3603_v34, %v3607_v21 }
 0xb14   : > { %6285 = vmatprep.subr.bf16.mxu0 %v7392_v41  ;;  %v3846_v41 = vld [vmem:[%s12052_s11 + $0xaf0] sm:$0xff]  ;;  %v7464_v59 = vcombine.high %v3595_v35, %v3599_v40  ;;  %v7463_v33 = vcombine.low %v3595_v35, %v3599_v40  ;;  %v3675_v34 = vld [vmem:[%s12052_s11 + $0x598] sm:$0xff] }
 0xb15   : > { %v7710_v31 = vcombine.high %v3842_v12, %v3846_v41  ;;  %v7709_v58 = vcombine.low %v3842_v12, %v3846_v41  ;;  %v3679_v21 = vld [vmem:[%s12052_s11 + $0x5b8] sm:$0xff] }
 0xb16   : > { %6235 = vmatpush1.bf16.msra.mxu1 %v7637_v48  ;;  %v3834_v48 = vld [vmem:[%s12052_s11 + $0xa90] sm:$0xff]  ;;  %v3811_v26 = vld [vmem:[%s12052_s11 + $0x9d8] sm:$0xff] }
 0xb17   : > { %6286 = vmatpush1.bf16.msra.mxu0 %v7391_v30  ;;  %6236 = vmatprep.subr.bf16.mxu1 %v7630_v43  ;;  %v3591_v30 = vld [vmem:[%s12052_s11 + $0x2f8] sm:$0xff]  ;;  %v11578_v43 = vpop.f32.mrf.mxu1 }
 0xb18   : > { %6287 = vmatprep.subr.bf16.mxu0 %v7384_v22  ;;  %v3838_v22 = vld [vmem:[%s12052_s11 + $0xab0] sm:$0xff]  ;;  %v7456_v1 = vcombine.high %v3587_v0, %v3591_v30  ;;  %v7455_v25 = vcombine.low %v3587_v0, %v3591_v30  ;;  %v3815_v5 = vld [vmem:[%s12052_s11 + $0x9f8] sm:$0xff] }
 0xb19   : > { %v7702_v28 = vcombine.high %v3834_v48, %v3838_v22  ;;  %v11592_v57 = vpop.f32.mrf.mxu1  ;;  %v7701_v39 = vcombine.low %v3834_v48, %v3838_v22  ;;  %v7680_v35 = vcombine.high %v3811_v26, %v3815_v5  ;;  %v3803_v40 = vld [vmem:[%s12052_s11 + $0x998] sm:$0xff] }
 0xb1a   : > { %6237 = vmatpush1.bf16.msra.mxu1 %v7629_v7  ;;  %v3583_v7 = vld [vmem:[%s12052_s11 + $0x2b8] sm:$0xff] }
 0xb1b   : > { %6288 = vmatpush1.bf16.msra.mxu0 %v7383_v47  ;;  %6238 = vmatprep.subr.bf16.mxu1 %v7622_v32  ;;  %v3579_v47 = vld [vmem:[%s12052_s11 + $0x298] sm:$0xff]  ;;  %v3830_v32 = vld [vmem:[%s12052_s11 + $0xa70] sm:$0xff]  ;;  %v11606_v50 = vpop.f32.mrf.mxu1 }
 0xb1c   : > { %6289 = vmatprep.subr.bf16.mxu0 %v7376_v19  ;;  %v3826_v19 = vld [vmem:[%s12052_s11 + $0xa50] sm:$0xff]  ;;  %v7448_v51 = vcombine.high %v3579_v47, %v3583_v7  ;;  %v7447_v38 = vcombine.low %v3579_v47, %v3583_v7  ;;  %v3807_v12 = vld [vmem:[%s12052_s11 + $0x9b8] sm:$0xff] }
 0xb1d   : > { %v7693_v55 = vcombine.low %v3826_v19, %v3830_v32  ;;  %v11620_v14 = vpop.f32.mrf.mxu1  ;;  %v3667_v41 = vld [vmem:[%s12052_s11 + $0x558] sm:$0xff] }
 0xb1e   : > { %6239 = vmatpush1.bf16.msra.mxu1 %v7621_v6  ;;  %v3571_v6 = vld [vmem:[%s12052_s11 + $0x258] sm:$0xff] }
 0xb1f   : > { %6290 = vmatpush1.bf16.msra.mxu0 %v7375_v45  ;;  %6240 = vmatprep.subr.bf16.mxu1 %v7742_v4  ;;  %v7694_v45 = vcombine.high %v3826_v19, %v3830_v32  ;;  %v3818_v4 = vld [vmem:[%s12052_s11 + $0xa10] sm:$0xff]  ;;  %v3659_v48 = vld [vmem:[%s12052_s11 + $0x518] sm:$0xff] }
 0xb20   : > { %6291 = vmatprep.subr.bf16.mxu0 %v7368_v53  ;;  %v3575_v53 = vld [vmem:[%s12052_s11 + $0x278] sm:$0xff] }
 0xb21   : > { %v7439_v36 = vcombine.low %v3571_v6, %v3575_v53  ;;  %v3663_v22 = vld [vmem:[%s12052_s11 + $0x538] sm:$0xff] }
 0xb22   : > { %6241 = vmatpush2.bf16.msra.mxu1 %v7741_v42  ;;  %v7686_v42 = vcombine.high %v3818_v4, %v3822_v13  ;;  %v7528_v47 = vcombine.high %v3659_v48, %v3663_v22  ;;  %v3787_v19 = vld [vmem:[%s12052_s11 + $0x918] sm:$0xff] }
 0xb23   : > { %6292 = vmatpush1.bf16.msra.mxu0 %v7367_v54  ;;  %6242 = vmatprep.subr.bf16.mxu1 %v7734_v61  ;;  %v7440_v54 = vcombine.high %v3571_v6, %v3575_v53  ;;  %v3567_v61 = vld [vmem:[%s12052_s11 + $0x238] sm:$0xff]  ;;  %v7527_v6 = vcombine.low %v3659_v48, %v3663_v22 }
 0xb24   : > { %6293 = vmatprep.subr.bf16.mxu0 %v7488_v46  ;;  %v3563_v46 = vld [vmem:[%s12052_s11 + $0x218] sm:$0xff] }
 0xb25   : > { %v3791_v32 = vld [vmem:[%s12052_s11 + $0x938] sm:$0xff] }
 0xb26   : > { %6243 = vmatpush2.bf16.msra.mxu1 %v7733_v23  ;;  %v7432_v23 = vcombine.high %v3563_v46, %v3567_v61  ;;  %v7656_v53 = vcombine.high %v3787_v19, %v3791_v32  ;;  %v3759_v48 = vld [vmem:[%s12052_s11 + $0x838] sm:$0xff] }
 0xb27   : > { %6294 = vmatpush2.bf16.msra.mxu0 %v7487_v9  ;;  %6244 = vmatprep.subr.bf16.mxu1 %v7726_v52  ;;  %v7685_v9 = vcombine.low %v3818_v4, %v3822_v13  ;;  %v7552_v52 = vcombine.high %v3683_v16, %v3687_v2  ;;  %v3779_v13 = vld [vmem:[%s12052_s11 + $0x8d8] sm:$0xff] }
 0xb28   : > { %6295 = vmatprep.subr.bf16.mxu0 %v7480_v15  ;;  %v11622_v15 = vpop.f32.mrf.mxu1  ;;  %v3747_v22 = vld [vmem:[%s12052_s11 + $0x7d8] sm:$0xff] }
 0xb2a   : > { %6245 = vmatpush2.bf16.msra.mxu1 %v7725_v27  ;;  %v7551_v27 = vcombine.low %v3683_v16, %v3687_v2  ;;  %v3771_v2 = vld [vmem:[%s12052_s11 + $0x898] sm:$0xff] }
 0xb2b   : > { %6296 = vmatpush2.bf16.msra.mxu0 %v7479_v63  ;;  %6246 = vmatprep.subr.bf16.mxu1 %v7718_v62  ;;  %v7431_v63 = vcombine.low %v3563_v46, %v3567_v61  ;;  %v7544_v62 = vcombine.high %v3675_v34, %v3679_v21  ;;  %v7655_v46 = vcombine.low %v3787_v19, %v3791_v32  ;;  %v3875_v32 = vld [vmem:[%s12052_s11 + $0xbd8] sm:$0xff] }
 0xb2c   : > { %6297 = vmatprep.subr.bf16.mxu0 %v7472_v8  ;;  %v11636_v8 = vpop.f32.mrf.mxu1 }
 0xb2e   : > { %6247 = vmatpush2.bf16.msra.mxu1 %v7717_v10  ;;  %v7679_v10 = vcombine.low %v3811_v26, %v3815_v5  ;;  %v11652_v0 = vpop.f32.mrf.mxu1 }
 0xb2f   : > { %6298 = vmatpush2.bf16.msra.mxu0 %v7471_v3  ;;  %6248 = vmatprep.subr.bf16.mxu1 %v7710_v31  ;;  %v3671_v3 = vld [vmem:[%s12052_s11 + $0x578] sm:$0xff]  ;;  %v7672_v31 = vcombine.high %v3803_v40, %v3807_v12 }
 0xb30   : > { %6299 = vmatprep.subr.bf16.mxu0 %v7464_v59  ;;  %v7543_v59 = vcombine.low %v3675_v34, %v3679_v21  ;;  %v7536_v30 = vcombine.high %v3667_v41, %v3671_v3 }
 0xb32   : > { %6249 = vmatpush2.bf16.msra.mxu1 %v7709_v58  ;;  %v3799_v58 = vld [vmem:[%s12052_s11 + $0x978] sm:$0xff] }
 0xb33   : > { %6300 = vmatpush2.bf16.msra.mxu0 %v7463_v33  ;;  %6250 = vmatprep.subr.bf16.mxu1 %v7702_v28  ;;  %v3795_v33 = vld [vmem:[%s12052_s11 + $0x958] sm:$0xff]  ;;  %v7535_v28 = vcombine.low %v3667_v41, %v3671_v3 }
 0xb34   : > { %6301 = vmatprep.subr.bf16.mxu0 %v7456_v1  ;;  %v7671_v1 = vcombine.low %v3803_v40, %v3807_v12  ;;  %v7664_v7 = vcombine.high %v3795_v33, %v3799_v58 }
 0xb36   : > { %6251 = vmatpush2.bf16.msra.mxu1 %v7701_v39  ;;  %v11682_v39 = vpop.f32.mrf.mxu0 }
 0xb37   : > { %6302 = vmatpush2.bf16.msra.mxu0 %v7455_v25  ;;  %6252 = vmatprep.subr.bf16.mxu1 %v7694_v45  ;;  %v3655_v25 = vld [vmem:[%s12052_s11 + $0x4f8] sm:$0xff]  ;;  %v7663_v45 = vcombine.low %v3795_v33, %v3799_v58 }
 0xb38   : > { %6303 = vmatprep.subr.bf16.mxu0 %v7448_v51  ;;  %v3751_v33 = vld [vmem:[%s12052_s11 + $0x7f8] sm:$0xff] }
 0xb39   : > { %v7616_v19 = vcombine.high %v3747_v22, %v3751_v33 }
 0xb3a   : > { %6253 = vmatpush2.bf16.msra.mxu1 %v7693_v55  ;;  %v3643_v55 = vld [vmem:[%s12052_s11 + $0x498] sm:$0xff] }
 0xb3b   : > { %6304 = vmatpush2.bf16.msra.mxu0 %v7447_v38  ;;  %6254 = vmatprep.subr.bf16.mxu1 %v7686_v42  ;;  %v3783_v38 = vld [vmem:[%s12052_s11 + $0x8f8] sm:$0xff] }
 0xb3c   : > { %6305 = vmatprep.subr.bf16.mxu0 %v7440_v54  ;;  %v11701_v54 = vpop.f32.mrf.mxu0  ;;  %v7647_v34 = vcombine.low %v3779_v13, %v3783_v38 }
 0xb3e   : > { %6255 = vmatpush2.bf16.msra.mxu1 %v7685_v9  ;;  %v3635_v9 = vld [vmem:[%s12052_s11 + $0x458] sm:$0xff] }
 0xb3f   : > { %6306 = vmatpush2.bf16.msra.mxu0 %v7439_v36  ;;  %6330 = vmatprep.subr.bf16.mxu1 %v7552_v52  ;;  %v3775_v36 = vld [vmem:[%s12052_s11 + $0x8b8] sm:$0xff] }
 0xb40   : > { %6307 = vmatprep.subr.bf16.mxu0 %v7432_v23  ;;  %v11718_v23 = vpop.f32.mrf.mxu0  ;;  %v7640_v26 = vcombine.high %v3771_v2, %v3775_v36  ;;  %v7639_v41 = vcombine.low %v3771_v2, %v3775_v36 }
 0xb41   : > { %6257 = vmatmul.mubr.bf16.vlgmr.msra.gmra.mxu1 %v11010_v11 }
 0xb42   : > { %6266 = vmatprep.mubr.bf16.mxu1 %v11020_v56  ;;  %6331 = vmatpush1.bf16.msra.mxu1 %v7551_v27  ;;  %v3767_v27 = vld [vmem:[%s12052_s11 + $0x878] sm:$0xff]  ;;  %v5893_v40 = vpop.f32.mrf.mxu0 }
 0xb43   : > { %6308 = vmatpush2.bf16.msra.mxu0 %v7431_v63  ;;  %6332 = vmatprep.subr.bf16.mxu1 %v7544_v62  ;;  %v3763_v63 = vld [vmem:[%s12052_s11 + $0x858] sm:$0xff]  ;;  %v5894_v36 = vadd.f32 %v5893_v40, %v11620_v14  ;;  %v6445_v40 = vld [vmem:[%s12053_s12 + $0x48] sm:$0xff] }
 0xb44   : > { %6383 = vmatprep.subr.bf16.mxu0 %v7680_v35  ;;  %v3627_v62 = vld [vmem:[%s12052_s11 + $0x418] sm:$0xff] }
 0xb45   : > { %v3631_v35 = vld [vmem:[%s12052_s11 + $0x438] sm:$0xff] }
 0xb46   : > { %6310 = vmatmul.mubr.bf16.vlgmr.msra.gmra.mxu0 %v10666_v18  ;;  %6333 = vmatpush1.bf16.msra.mxu1 %v7543_v59  ;;  %v11668_v18 = vpop.f32.mrf.mxu1  ;;  %v11734_v59 = vpop.f32.mrf.mxu0 }
 0xb47   : > { %6319 = vmatprep.mubr.bf16.mxu0 %v10767_v49  ;;  %6384 = vmatpush1.bf16.msra.mxu0 %v7679_v10  ;;  %v3651_v49 = vld [vmem:[%s12052_s11 + $0x4d8] sm:$0xff]  ;;  %v7632_v10 = vcombine.high %v3763_v63, %v3767_v27 }
 0xb48   : > { %6385 = vmatprep.subr.bf16.mxu0 %v7672_v31  ;;  %6334 = vmatprep.subr.bf16.mxu1 %v7536_v30  ;;  %v11684_v51 = vpop.f32.mrf.mxu1  ;;  %v7520_v4 = vcombine.high %v3651_v49, %v3655_v25  ;;  %v7519_v61 = vcombine.low %v3651_v49, %v3655_v25  ;;  %v7496_v31 = vcombine.high %v3627_v62, %v3631_v35  ;;  %v3755_v30 = vld [vmem:[%s12052_s11 + $0x818] sm:$0xff] }
 0xb49   : > { %6267 = vmatmul.mubr.bf16.gmra.mxu1 %v11052_v24  ;;  %v3879_v49 = vld [vmem:[%s12052_s11 + $0xbf8] sm:$0xff] }
 0xb4a   : > { %6335 = vmatpush1.bf16.msra.mxu1 %v7535_v28  ;;  %6362 = vmatprep.mubr.bf16.mxu1 %v10721_v29  ;;  %v3647_v29 = vld [vmem:[%s12052_s11 + $0x4b8] sm:$0xff]  ;;  %v11703_v42 = vpop.f32.mrf.mxu1  ;;  %v7495_v28 = vcombine.low %v3627_v62, %v3631_v35  ;;  %v7743_v2 = vcombine.low %v3875_v32, %v3879_v49 }
 0xb4b   : > { %6386 = vmatpush1.bf16.msra.mxu0 %v7671_v1  ;;  %6336 = vmatprep.subr.bf16.mxu1 %v7528_v47  ;;  %v7512_v16 = vcombine.high %v3643_v55, %v3647_v29  ;;  %v7511_v21 = vcombine.low %v3643_v55, %v3647_v29  ;;  %v7631_v1 = vcombine.low %v3763_v63, %v3767_v27  ;;  %v3739_v25 = vld [vmem:[%s12052_s11 + $0x798] sm:$0xff] }
 0xb4c   : > { %6387 = vmatprep.subr.bf16.mxu0 %v7664_v7  ;;  %v11720_v52 = vpop.f32.mrf.mxu1  ;;  %v7624_v47 = vcombine.high %v3755_v30, %v3759_v48  ;;  %v5899_v7 = vpop.f32.mrf.mxu0  ;;  %v3867_v29 = vld [vmem:[%s12052_s11 + $0xb98] sm:$0xff]  ;;  %v5890_v63 = vadd.f32 %v11701_v54, %v11592_v57 }
 0xb4d   : > { %v5900_v14 = vadd.f32 %v5899_v7, %v11636_v8  ;;  %v3723_v62 = vld [vmem:[%s12052_s11 + $0x718] sm:$0xff]  ;;  %v6461_v7 = vld [vmem:[%s12053_s12 + $0xc8] sm:$0xff] }
 0xb4e   : > { %6320 = vmatmul.mubr.bf16.gmra.mxu0 %v10781_v44  ;;  %6337 = vmatpush1.bf16.msra.mxu1 %v7527_v6  ;;  %v7648_v44 = vcombine.high %v3779_v13, %v3783_v38  ;;  %v5946_v12 = vpop.f32.mrf.mxu1  ;;  %v7744_v13 = vcombine.high %v3875_v32, %v3879_v49  ;;  %v11762_v38 = vpop.f32.mrf.mxu0  ;;  %v3727_v35 = vld [vmem:[%s12052_s11 + $0x738] sm:$0xff]  ;;  %v5943_v54 = vadd.f32 %v11703_v42, %v5890_v63 }
 0xb4f   : > { %6388 = vmatpush1.bf16.msra.mxu0 %v7663_v45  ;;  %6415 = vmatprep.mubr.bf16.mxu0 %v10834_v60  ;;  %v3639_v60 = vld [vmem:[%s12052_s11 + $0x478] sm:$0xff]  ;;  %v5947_v27 = vadd.f32 %v5946_v12, %v5894_v36  ;;  %v6437_v12 = vld [vmem:[%s12053_s12 + $0x8] sm:$0xff] }
 0xb50   : > { %6389 = vmatprep.subr.bf16.mxu0 %v7656_v53  ;;  %6338 = vmatprep.subr.bf16.mxu1 %v7520_v4  ;;  %v7504_v5 = vcombine.high %v3635_v9, %v3639_v60  ;;  %v7503_v3 = vcombine.low %v3635_v9, %v3639_v60  ;;  %v11748_v58 = vpop.f32.mrf.mxu1  ;;  %v3743_v45 = vld [vmem:[%s12052_s11 + $0x7b8] sm:$0xff]  ;;  %v7623_v53 = vcombine.low %v3755_v30, %v3759_v48  ;;  %v6453_v48 = vld [vmem:[%s12053_s12 + $0x88] sm:$0xff] }
 0xb51   : > { %v7615_v4 = vcombine.low %v3747_v22, %v3751_v33  ;;  %v7608_v55 = vcombine.high %v3739_v25, %v3743_v45  ;;  %v7607_v9 = vcombine.low %v3739_v25, %v3743_v45  ;;  %v7592_v22 = vcombine.high %v3723_v62, %v3727_v35  ;;  %v3855_v42 = vld [vmem:[%s12052_s11 + $0xb38] sm:$0xff] }
 0xb52   : > { %6339 = vmatpush1.bf16.msra.mxu1 %v7519_v61  ;;  %v5952_v6 = vpop.f32.mrf.mxu1  ;;  %v3731_v61 = vld [vmem:[%s12052_s11 + $0x758] sm:$0xff]  ;;  %v6477_v33 = vmul.f32 %v6445_v40, %v5947_v27  ;;  %v6469_v49 = vmul.f32 %v6437_v12, %v5943_v54 }
 0xb53   : > { %6390 = vmatpush1.bf16.msra.mxu0 %v7655_v46  ;;  %6340 = vmatprep.subr.bf16.mxu1 %v7512_v16  ;;  %v3871_v46 = vld [vmem:[%s12052_s11 + $0xbb8] sm:$0xff]  ;;  %v5953_v30 = vadd.f32 %v5952_v6, %v5900_v14 }
 0xb54   : > { %6391 = vmatprep.subr.bf16.mxu0 %v7648_v44  ;;  %v3735_v44 = vld [vmem:[%s12052_s11 + $0x778] sm:$0xff]  ;;  %v11776_v16 = vpop.f32.mrf.mxu1  ;;  %v7736_v60 = vcombine.high %v3867_v29, %v3871_v46 }
 0xb55   : > { %v6485_v45 = vmul.f32 %v6453_v48, %v5953_v30  ;;  %v3699_v63 = vld [vmem:[%s12052_s11 + $0x658] sm:$0xff] }
 0xb56   : > { %6341 = vmatpush1.bf16.msra.mxu1 %v7511_v21  ;;  %v3863_v21 = vld [vmem:[%s12052_s11 + $0xb78] sm:$0xff] }
 0xb57   : > { %6392 = vmatpush1.bf16.msra.mxu0 %v7647_v34  ;;  %6342 = vmatprep.subr.bf16.mxu1 %v7504_v5  ;;  %v3859_v34 = vld [vmem:[%s12052_s11 + $0xb58] sm:$0xff]  ;;  %v7600_v5 = vcombine.high %v3731_v61, %v3735_v44 }
 0xb58   : > { %6393 = vmatprep.subr.bf16.mxu0 %v7640_v26  ;;  %v5903_v26 = vpop.f32.mrf.mxu0  ;;  %v7728_v57 = vcombine.high %v3859_v34, %v3863_v21  ;;  %v7727_v32 = vcombine.low %v3859_v34, %v3863_v21  ;;  %v3835_v21 = vld [vmem:[%s12052_s11 + $0xa98] sm:$0xff] }
 0xb59   : > { %v5904_v8 = vadd.f32 %v5903_v26, %v11668_v18  ;;  %v3851_v18 = vld [vmem:[%s12052_s11 + $0xb18] sm:$0xff] }
 0xb5a   : > { %6343 = vmatpush1.bf16.msra.mxu1 %v7503_v3  ;;  %v7599_v3 = vcombine.low %v3731_v61, %v3735_v44  ;;  %v7720_v6 = vcombine.high %v3851_v18, %v3855_v42  ;;  %v3711_v61 = vld [vmem:[%s12052_s11 + $0x6b8] sm:$0xff]  ;;  %v7719_v44 = vcombine.low %v3851_v18, %v3855_v42 }
 0xb5b   : > { %6394 = vmatpush1.bf16.msra.mxu0 %v7639_v41  ;;  %6344 = vmatprep.subr.bf16.mxu1 %v7496_v31  ;;  %v5956_v41 = vpop.f32.mrf.mxu1  ;;  %v11802_v31 = vpop.f32.mrf.mxu0  ;;  %v3839_v26 = vld [vmem:[%s12052_s11 + $0xab8] sm:$0xff] }
 0xb5c   : > { %6395 = vmatprep.subr.bf16.mxu0 %v7632_v10  ;;  %v7735_v10 = vcombine.low %v3867_v29, %v3871_v46  ;;  %v3707_v46 = vld [vmem:[%s12052_s11 + $0x698] sm:$0xff]  ;;  %v7704_v40 = vcombine.high %v3835_v21, %v3839_v26  ;;  %v7703_v12 = vcombine.low %v3835_v21, %v3839_v26 }
 0xb5d   : > { %v11822_v25 = vpop.f32.mrf.mxu0  ;;  %v7576_v34 = vcombine.high %v3707_v46, %v3711_v61  ;;  %v3703_v14 = vld [vmem:[%s12052_s11 + $0x678] sm:$0xff] }
 0xb5e   : > { %6345 = vmatpush1.bf16.msra.mxu1 %v7495_v28  ;;  %v3715_v28 = vld [vmem:[%s12052_s11 + $0x6d8] sm:$0xff]  ;;  %v7567_v48 = vcombine.low %v3699_v63, %v3703_v14 }
 0xb5f   : > { %6396 = vmatpush1.bf16.msra.mxu0 %v7631_v1  ;;  %6346 = vmatprep.subr.bf16.mxu1 %v7616_v19  ;;  %v5957_v1 = vadd.f32 %v5956_v41, %v5904_v8  ;;  %v7591_v19 = vcombine.low %v3723_v62, %v3727_v35  ;;  %v7575_v35 = vcombine.low %v3707_v46, %v3711_v61  ;;  %v3691_v8 = vld [vmem:[%s12052_s11 + $0x618] sm:$0xff]  ;;  %v6635_v61 = vld [vmem:[#allocation11 + $0x1f8] sm:$0xff] }
 0xb60   : > { %6397 = vmatprep.subr.bf16.mxu0 %v7624_v47  ;;  %v3719_v47 = vld [vmem:[%s12052_s11 + $0x6f8] sm:$0xff]  ;;  %v7568_v41 = vcombine.high %v3699_v63, %v3703_v14  ;;  %v6619_v63 = vld [vmem:[#allocation11 + $0x178] sm:$0xff] }
 0xb61   : > { %v6493_v29 = vmul.f32 %v6461_v7, %v5957_v1  ;;  %v3695_v54 = vld [vmem:[%s12052_s11 + $0x638] sm:$0xff]  ;;  %v5892_v1 = vadd.f32 %v11718_v23, %v11606_v50  ;;  %v6444_v50 = vld [vmem:[%s12053_s12 + $0x40] sm:$0xff]  ;;  %v5902_v23 = vadd.f32 %v11762_v38, %v11652_v0 }
 0xb62   : > { %6347 = vmatpush2.bf16.msra.mxu1 %v7615_v4  ;;  %v3843_v4 = vld [vmem:[%s12052_s11 + $0xad8] sm:$0xff] }
 0xb63   : > { %6398 = vmatpush1.bf16.msra.mxu0 %v7623_v53  ;;  %6348 = vmatprep.subr.bf16.mxu1 %v7608_v55  ;;  %v7584_v53 = vcombine.high %v3715_v28, %v3719_v47  ;;  %v6509_v55 = vadd.f32 %v6477_v33, %v6469_v49  ;;  %v3819_v18 = vld [vmem:[%s12052_s11 + $0xa18] sm:$0xff]  ;;  %v7560_v33 = vcombine.high %v3691_v8, %v3695_v54 }
 0xb64   : > { %6399 = vmatprep.subr.bf16.mxu0 %v7744_v13  ;;  %v3847_v13 = vld [vmem:[%s12052_s11 + $0xaf8] sm:$0xff]  ;;  %v5898_v49 = vadd.f32 %v11734_v59, %v11622_v15  ;;  %v6452_v59 = vld [vmem:[%s12053_s12 + $0x80] sm:$0xff] }
 0xb65   : > { %v6510_v36 = vadd.f32 %v6509_v55, %v6485_v45  ;;  %v7711_v27 = vcombine.low %v3843_v4, %v3847_v13  ;;  %v3823_v42 = vld [vmem:[%s12052_s11 + $0xa38] sm:$0xff]  ;;  %v5945_v45 = vadd.f32 %v11720_v52, %v5892_v1  ;;  %v6436_v52 = vld [vmem:[%s12053_s12] sm:$0xff]  ;;  %v5955_v55 = vadd.f32 %v11776_v16, %v5902_v23 }
 0xb66   : > { %6349 = vmatpush2.bf16.msra.mxu1 %v7607_v9  ;;  %v7583_v9 = vcombine.low %v3715_v28, %v3719_v47  ;;  %v7559_v47 = vcombine.low %v3691_v8, %v3695_v54  ;;  %v6602_v46 = vld [vmem:[#allocation11 + $0xf0] sm:$0xff]  ;;  %v6601_v21 = vld [vmem:[#allocation11 + $0xe8] sm:$0xff]  ;;  %v6599_v8 = vld [vmem:[#allocation11 + $0xd8] sm:$0xff] }
 0xb67   : > { %6400 = vmatpush2.bf16.msra.mxu0 %v7743_v2  ;;  %6350 = vmatprep.subr.bf16.mxu1 %v7600_v5  ;;  %v11836_v2 = vpop.f32.mrf.mxu0  ;;  %v6511_v5 = vadd.f32 %v6510_v36, %v6493_v29  ;;  %v6586_v16 = vld [vmem:[#allocation11 + $0x70] sm:$0xff] }
 0xb68   : > { %6401 = vmatprep.subr.bf16.mxu0 %v7736_v60  ;;  %v7712_v60 = vcombine.high %v3843_v4, %v3847_v13  ;;  %v7687_v4 = vcombine.low %v3819_v18, %v3823_v42  ;;  %v6476_v13 = vmul.f32 %v6444_v50, %v5945_v45  ;;  %v6597_v45 = vld [vmem:[#allocation11 + $0xc8] sm:$0xff] }
 0xb69   : > { %v11850_v62 = vpop.f32.mrf.mxu0 }
 0xb6a   : > { %6351 = vmatpush2.bf16.msra.mxu1 %v7599_v3  ;;  %v3827_v3 = vld [vmem:[%s12052_s11 + $0xa58] sm:$0xff] }
 0xb6b   : > { %6402 = vmatpush2.bf16.msra.mxu0 %v7735_v10  ;;  %6352 = vmatprep.subr.bf16.mxu1 %v7592_v22  ;;  %v3831_v10 = vld [vmem:[%s12052_s11 + $0xa78] sm:$0xff]  ;;  %v11864_v30 = vpop.f32.mrf.mxu0 }
 0xb6c   : > { %6403 = vmatprep.subr.bf16.mxu0 %v7728_v57  ;;  %v6512_v57 = vrot.slane %v6511_v5, 4  ;;  %v7696_v22 = vcombine.high %v3827_v3, %v3831_v10  ;;  %v7695_v7 = vcombine.low %v3827_v3, %v3831_v10  ;;  %v6618_v3 = vld [vmem:[#allocation11 + $0x170] sm:$0xff] }
 0xb6e   : > { %6353 = vmatpush2.bf16.msra.mxu1 %v7591_v19  ;;  %v6513_v28 = vadd.f32 %v6512_v57, %v6511_v5  ;;  %v7688_v19 = vcombine.high %v3819_v18, %v3823_v42  ;;  %v6585_v5 = vld [vmem:[#allocation11 + $0x68] sm:$0xff] }
 0xb6f   : > { %6404 = vmatpush2.bf16.msra.mxu0 %v7727_v32  ;;  %6354 = vmatprep.subr.bf16.mxu1 %v7584_v53  ;;  %v5888_v32 = vadd.f32 %v11682_v39, %v11578_v43  ;;  %v5951_v43 = vadd.f32 %v11748_v58, %v5898_v49  ;;  %v6603_v39 = vld [vmem:[#allocation11 + $0xf8] sm:$0xff]  ;;  %v6633_v42 = vld [vmem:[#allocation11 + $0x1e8] sm:$0xff] }
 0xb70   : > { %6405 = vmatprep.subr.bf16.mxu0 %v7720_v6  ;;  %v11879_v6 = vpop.f32.mrf.mxu0  ;;  %v6514_v15 = vrot.slane %v6513_v28, 2  ;;  %v6587_v58 = vld [vmem:[#allocation11 + $0x78] sm:$0xff]  ;;  %v6438_v49 = vld [vmem:[%s12053_s12 + $0x10] sm:$0xff] }
 0xb71   : > { %v5941_v53 = vadd.f32 %v11684_v51, %v5888_v32  ;;  %v6460_v51 = vld [vmem:[%s12053_s12 + $0xc0] sm:$0xff]  ;;  %v6484_v29 = vmul.f32 %v6452_v59, %v5951_v43  ;;  %v6581_v43 = vld [vmem:[#allocation11 + $0x48] sm:$0xff] }
 0xb72   : > { %6355 = vmatpush2.bf16.msra.mxu1 %v7583_v9  ;;  %v11895_v0 = vpop.f32.mrf.mxu0  ;;  %v6454_v59 = vld [vmem:[%s12053_s12 + $0x90] sm:$0xff] }
 0xb73   : > { %6406 = vmatpush2.bf16.msra.mxu0 %v7719_v44  ;;  %6356 = vmatprep.subr.bf16.mxu1 %v7576_v34  ;;  %v6468_v38 = vmul.f32 %v6436_v52, %v5941_v53  ;;  %v6515_v44 = vadd.f32 %v6514_v15, %v6513_v28 }
 0xb74   : > { %6407 = vmatprep.subr.bf16.mxu0 %v7712_v60  ;;  %v6492_v60 = vmul.f32 %v6460_v51, %v5955_v55  ;;  %v11901_v34 = vpop.f32.mrf.mxu0 }
 0xb75   : > { %v6500_v9 = vadd.f32 %v6476_v13, %v6468_v38  ;;  %v6439_v13 = vld [vmem:[%s12053_s12 + $0x18] sm:$0xff]  ;;  %v6631_v38 = vld [vmem:[#allocation11 + $0x1d8] sm:$0xff] }
 0xb76   : > { %6357 = vmatpush2.bf16.msra.mxu1 %v7575_v35  ;;  %v6634_v35 = vld [vmem:[#allocation11 + $0x1f0] sm:$0xff] }
 0xb77   : > { %6408 = vmatpush2.bf16.msra.mxu0 %v7711_v27  ;;  %6358 = vmatprep.subr.bf16.mxu1 %v7568_v41  ;;  %v6501_v14 = vadd.f32 %v6500_v9, %v6484_v29  ;;  %v6580_v29 = vld [vmem:[#allocation11 + $0x40] sm:$0xff]  ;;  %v6615_v9 = vld [vmem:[#allocation11 + $0x158] sm:$0xff] }
 0xb78   : > { %6409 = vmatprep.subr.bf16.mxu0 %v7704_v40  ;;  %v6516_v40 = vrot.slane %v6515_v44, 1 }
 0xb79   : > { %v6502_v10 = vadd.f32 %v6501_v14, %v6492_v60  ;;  %v6595_v60 = vld [vmem:[#allocation11 + $0xb8] sm:$0xff] }
 0xb7a   : > { %6359 = vmatpush2.bf16.msra.mxu1 %v7567_v48  ;;  %v6517_v18 = vadd.f32 %v6516_v40, %v6515_v44  ;;  %v6614_v40 = vld [vmem:[#allocation11 + $0x150] sm:$0xff] }
 0xb7b   : > { %6410 = vmatpush2.bf16.msra.mxu0 %v7703_v12  ;;  %6360 = vmatprep.subr.bf16.mxu1 %v7560_v33 }
 0xb7c   : > { %6411 = vmatprep.subr.bf16.mxu0 %v7696_v22 }
 0xb7e   : > { %6361 = vmatpush2.bf16.msra.mxu1 %v7559_v47  ;;  %v6582_v47 = vld [vmem:[#allocation11 + $0x50] sm:$0xff] }
 0xb7f   : > { %6412 = vmatpush2.bf16.msra.mxu0 %v7695_v7  ;;  %7773 = vmatprep.subr.mxu1 %v6603_v39  ;;  %v6617_v7 = vld [vmem:[#allocation11 + $0x168] sm:$0xff] }
 0xb80   : > { %6413 = vmatprep.subr.bf16.mxu0 %v7688_v19 }
 0xb81   : > { %v6046_v36 = vpop.f32.mrf.mxu1  ;;  %6363 = vmatmul.mubr.bf16.vlgmr.msra.gmra.mxu1 %v10709_v37  ;;  %v6600_v37 = vld [vmem:[#allocation11 + $0xe0] sm:$0xff] }
 0xb82   : > { %6372 = vmatprep.mubr.bf16.mxu1 %v10824_v20  ;;  %7774 = vmatpush3.msra.mxu1 %v6587_v58  ;;  %v6584_v20 = vld [vmem:[#allocation11 + $0x60] sm:$0xff]  ;;  %v6047_v48 = vadd.f32 %v6046_v36, %v11802_v31  ;;  %v6503_v31 = vrot.slane %v6502_v10, 4 }
 0xb83   : > { %6414 = vmatpush2.bf16.msra.mxu0 %v7687_v4  ;;  %v6048_v26 = vpop.f32.mrf.mxu1  ;;  %7775 = vmatprep.subr.mxu1 %v6602_v46  ;;  %v6596_v4 = vld [vmem:[#allocation11 + $0xc0] sm:$0xff] }
 0xb84   : > { %7808 = vmatprep.subr.mxu0 %v6635_v61  ;;  %7776 = vmatpush3.msra.mxu1 %v6586_v16  ;;  %v6049_v19 = vadd.f32 %v6048_v26, %v11822_v25  ;;  %v6632_v25 = vld [vmem:[#allocation11 + $0x1e0] sm:$0xff]  ;;  %v6504_v46 = vadd.f32 %v6503_v31, %v6502_v10  ;;  %v6455_v16 = vld [vmem:[%s12053_s12 + $0x98] sm:$0xff]  ;;  %v6627_v31 = vld [vmem:[#allocation11 + $0x1b8] sm:$0xff] }
 0xb85   : > { %v6050_v41 = vpop.f32.mrf.mxu1  ;;  %7777 = vmatprep.subr.mxu1 %v6601_v21  ;;  %v6629_v10 = vld [vmem:[#allocation11 + $0x1c8] sm:$0xff] }
 0xb86   : > { %v6099_v27 = vpop.f32.mrf.mxu0  ;;  %6416 = vmatmul.mubr.bf16.vlgmr.msra.gmra.mxu0 %v11010_v11  ;;  %7778 = vmatpush3.msra.mxu1 %v6585_v5  ;;  %v6051_v54 = vadd.f32 %v6050_v41, %v11836_v2  ;;  %v6583_v11 = vld [vmem:[#allocation11 + $0x58] sm:$0xff]  ;;  %v6446_v2 = vld [vmem:[%s12053_s12 + $0x50] sm:$0xff]  ;;  %v6630_v5 = vld [vmem:[#allocation11 + $0x1d0] sm:$0xff] }
 0xb87   : > { %6425 = vmatprep.mubr.bf16.mxu0 %v11020_v56  ;;  %7809 = vmatpush3.msra.mxu0 %v6619_v63  ;;  %v6052_v12 = vpop.f32.mrf.mxu1  ;;  %v6598_v56 = vld [vmem:[#allocation11 + $0xd0] sm:$0xff]  ;;  %v6100_v32 = vadd.f32 %v6099_v27, %v6047_v48  ;;  %v6579_v63 = vld [vmem:[#allocation11 + $0x38] sm:$0xff]  ;;  %v6593_v48 = vld [vmem:[#allocation11 + $0xa8] sm:$0xff] }
 0xb88   : > { %v6101_v57 = vpop.f32.mrf.mxu0  ;;  %7779 = vmatprep.subr.mxu1 %v6600_v37  ;;  %7810 = vmatprep.subr.mxu0 %v6634_v35  ;;  %v6053_v33 = vadd.f32 %v6052_v12, %v11850_v62  ;;  %v6462_v35 = vld [vmem:[%s12053_s12 + $0xd0] sm:$0xff]  ;;  %v6594_v41 = vld [vmem:[#allocation11 + $0xb0] sm:$0xff] }
 0xb89   : > { %7780 = vmatpush3.msra.mxu1 %v6584_v20  ;;  %7811 = vmatpush3.msra.mxu0 %v6618_v3  ;;  %v6056_v1 = vpop.f32.mrf.mxu1  ;;  %v6102_v39 = vadd.f32 %v6101_v57, %v6049_v19  ;;  %v6470_v61 = vmul.f32 %v6438_v49, %v6100_v32  ;;  %v6578_v57 = vld [vmem:[#allocation11 + $0x30] sm:$0xff]  ;;  %v6576_v19 = vld [vmem:[#allocation11 + $0x20] sm:$0xff]  ;;  %v6611_v32 = vld [vmem:[#allocation11 + $0x138] sm:$0xff] }
 0xb8a   : > { %v6103_v22 = vpop.f32.mrf.mxu0  ;;  %6373 = vmatmul.mubr.bf16.gmra.mxu1 %v10837_v17  ;;  %7781 = vmatprep.subr.mxu1 %v6599_v8  ;;  %v6057_v50 = vadd.f32 %v6056_v1, %v11864_v30  ;;  %v6447_v17 = vld [vmem:[%s12053_s12 + $0x58] sm:$0xff]  ;;  %v6616_v30 = vld [vmem:[#allocation11 + $0x160] sm:$0xff]  ;;  %v6591_v49 = vld [vmem:[#allocation11 + $0x98] sm:$0xff] }
 0xb8b   : > { %v6104_v28 = vadd.f32 %v6103_v22, %v6051_v54  ;;  %7782 = vmatpush3.msra.mxu1 %v6583_v11  ;;  %6765 = vmatprep.mubr.f32.mxu1 %v6517_v18  ;;  %v6058_v23 = vpop.f32.mrf.mxu1  ;;  %v6471_v14 = vmul.f32 %v6439_v13, %v6102_v39  ;;  %v6463_v12 = vld [vmem:[%s12053_s12 + $0xd8] sm:$0xff]  ;;  %v6505_v22 = vrot.slane %v6504_v46, 2  ;;  %v6612_v1 = vld [vmem:[#allocation11 + $0x140] sm:$0xff] }
 0xb8c   : > { %v6105_v62 = vpop.f32.mrf.mxu0  ;;  %7783 = vmatprep.subr.mxu1 %v6598_v56  ;;  %7812 = vmatprep.subr.mxu0 %v6633_v42  ;;  %v6059_v55 = vadd.f32 %v6058_v23, %v11879_v6  ;;  %v6613_v11 = vld [vmem:[#allocation11 + $0x148] sm:$0xff]  ;;  %v6628_v42 = vld [vmem:[#allocation11 + $0x1c0] sm:$0xff]  ;;  %v6626_v23 = vld [vmem:[#allocation11 + $0x1b0] sm:$0xff] }
 0xb8d   : > { %v6106_v53 = vadd.f32 %v6105_v62, %v6053_v33  ;;  %v6478_v15 = vmul.f32 %v6446_v2, %v6104_v28  ;;  %7784 = vmatpush3.msra.mxu1 %v6582_v47  ;;  %7813 = vmatpush3.msra.mxu0 %v6617_v7  ;;  %v6060_v51 = vpop.f32.mrf.mxu1  ;;  %v6577_v33 = vld [vmem:[#allocation11 + $0x28] sm:$0xff]  ;;  %v6592_v28 = vld [vmem:[#allocation11 + $0xa0] sm:$0xff]  ;;  %v6506_v62 = vadd.f32 %v6505_v22, %v6504_v46  ;;  %v6623_v46 = vld [vmem:[#allocation11 + $0x198] sm:$0xff] }
 0xb8e   : > { %v6109_v52 = vpop.f32.mrf.mxu0  ;;  %6426 = vmatmul.mubr.bf16.gmra.mxu0 %v11052_v24  ;;  %7785 = vmatprep.subr.mxu1 %v6597_v45  ;;  %v6061_v6 = vadd.f32 %v6060_v51, %v11895_v0  ;;  %v6624_v51 = vld [vmem:[#allocation11 + $0x1a0] sm:$0xff]  ;;  %v6661_v22 = vld [vmem:[#allocation11 + $0x2c8] sm:$0xff] }
 0xb8f   : > { %v6110_v58 = vadd.f32 %v6109_v52, %v6057_v50  ;;  %v6479_v44 = vmul.f32 %v6447_v17, %v6106_v53  ;;  %7814 = vmatprep.subr.mxu0 %v6632_v25  ;;  %7786 = vmatpush3.msra.mxu1 %v6581_v43  ;;  %v6062_v24 = vpop.f32.mrf.mxu1  ;;  %v6518_v27 = vadd.f32 %v6478_v15, %v6470_v61  ;;  %v6575_v53 = vld [vmem:[#allocation11 + $0x18] sm:$0xff]  ;;  %v6610_v17 = vld [vmem:[#allocation11 + $0x130] sm:$0xff]  ;;  %v6625_v15 = vld [vmem:[#allocation11 + $0x1a8] sm:$0xff] }
 0xb90   : > { %v6111_v36 = vpop.f32.mrf.mxu0  ;;  %7815 = vmatpush3.msra.mxu0 %v6616_v30  ;;  %7787 = vmatprep.subr.mxu1 %v6596_v4  ;;  %v6063_v0 = vadd.f32 %v6062_v24, %v11901_v34  ;;  %v6590_v25 = vld [vmem:[#allocation11 + $0x90] sm:$0xff]  ;;  %v6589_v30 = vld [vmem:[#allocation11 + $0x88] sm:$0xff]  ;;  %v6507_v4 = vrot.slane %v6506_v62, 1  ;;  %v6572_v61 = vld [vmem:[#allocation11] sm:$0xff] }
 0xb91   : > { %v6486_v21 = vmul.f32 %v6454_v59, %v6110_v58  ;;  %v6112_v26 = vadd.f32 %v6111_v36, %v6059_v55  ;;  %7816 = vmatprep.subr.mxu0 %v6631_v38  ;;  %7788 = vmatpush3.msra.mxu1 %v6580_v29  ;;  %v6527_v8 = vadd.f32 %v6479_v44, %v6471_v14  ;;  %v6574_v52 = vld [vmem:[#allocation11 + $0x10] sm:$0xff]  ;;  %v6609_v59 = vld [vmem:[#allocation11 + $0x128] sm:$0xff]  ;;  %v6608_v38 = vld [vmem:[#allocation11 + $0x120] sm:$0xff] }
 0xb92   : > { %v6113_v37 = vpop.f32.mrf.mxu0  ;;  %7817 = vmatpush3.msra.mxu0 %v6615_v9  ;;  %7789 = vmatprep.subr.mxu1 %v6595_v60  ;;  %v6573_v58 = vld [vmem:[#allocation11 + $0x8] sm:$0xff]  ;;  %v6588_v29 = vld [vmem:[#allocation11 + $0x80] sm:$0xff]  ;;  %v6508_v9 = vadd.f32 %v6507_v4, %v6506_v62  ;;  %v6622_v60 = vld [vmem:[#allocation11 + $0x190] sm:$0xff] }
 0xb93   : > { %v6487_v20 = vmul.f32 %v6455_v16, %v6112_v26  ;;  %v6114_v3 = vadd.f32 %v6113_v37, %v6061_v6  ;;  %7818 = vmatprep.subr.mxu0 %v6630_v5  ;;  %7790 = vmatpush3.msra.mxu1 %v6579_v63  ;;  %v6519_v18 = vadd.f32 %v6518_v27, %v6486_v21  ;;  %v6607_v16 = vld [vmem:[#allocation11 + $0x118] sm:$0xff]  ;;  %v6606_v24 = vld [vmem:[#allocation11 + $0x110] sm:$0xff]  ;;  %v6621_v5 = vld [vmem:[#allocation11 + $0x188] sm:$0xff] }
 0xb94   : > { %v6115_v54 = vpop.f32.mrf.mxu0  ;;  %7819 = vmatpush3.msra.mxu0 %v6614_v40  ;;  %7791 = vmatprep.subr.mxu1 %v6594_v41  ;;  %v6667_v21 = vld [vmem:[#allocation11 + $0x2f8] sm:$0xff]  ;;  %v6666_v14 = vld [vmem:[#allocation11 + $0x2f0] sm:$0xff]  ;;  %v6605_v37 = vld [vmem:[#allocation11 + $0x108] sm:$0xff] }
 0xb95   : > { %v6494_v56 = vmul.f32 %v6462_v35, %v6114_v3  ;;  %v6116_v34 = vadd.f32 %v6115_v54, %v6063_v0  ;;  %7820 = vmatprep.subr.mxu0 %v6629_v10  ;;  %7792 = vmatpush3.msra.mxu1 %v6578_v57  ;;  %v6528_v2 = vadd.f32 %v6527_v8, %v6487_v20  ;;  %v6651_v26 = vld [vmem:[#allocation11 + $0x278] sm:$0xff]  ;;  %v6620_v35 = vld [vmem:[#allocation11 + $0x180] sm:$0xff]  ;;  %v6650_v41 = vld [vmem:[#allocation11 + $0x270] sm:$0xff] }
 0xb96   : > { %7821 = vmatpush3.msra.mxu0 %v6613_v11  ;;  %7793 = vmatprep.subr.mxu1 %v6593_v48  ;;  %v6604_v0 = vld [vmem:[#allocation11 + $0x100] sm:$0xff]  ;;  %v6665_v20 = vld [vmem:[#allocation11 + $0x2e8] sm:$0xff]  ;;  %v6663_v54 = vld [vmem:[#allocation11 + $0x2d8] sm:$0xff] }
 0xb97   : > { %v6520_v47 = vadd.f32 %v6519_v18, %v6494_v56  ;;  %v6495_v7 = vmul.f32 %v6463_v12, %v6116_v34  ;;  %7822 = vmatprep.subr.mxu0 %v6628_v42  ;;  %7794 = vmatpush3.msra.mxu1 %v6577_v33  ;;  %v6649_v3 = vld [vmem:[#allocation11 + $0x268] sm:$0xff]  ;;  %v6664_v57 = vld [vmem:[#allocation11 + $0x2e0] sm:$0xff]  ;;  %v6647_v12 = vld [vmem:[#allocation11 + $0x258] sm:$0xff] }
 0xb98   : > { %7823 = vmatpush3.msra.mxu0 %v6612_v1  ;;  %7795 = vmatprep.subr.mxu1 %v6592_v28  ;;  %v6648_v8 = vld [vmem:[#allocation11 + $0x260] sm:$0xff]  ;;  %v6662_v11 = vld [vmem:[#allocation11 + $0x2d0] sm:$0xff]  ;;  %v6645_v18 = vld [vmem:[#allocation11 + $0x248] sm:$0xff] }
 0xb99   : > { %v6521_v45 = vrot.slane %v6520_v47, 4  ;;  %v6529_v50 = vadd.f32 %v6528_v2, %v6495_v7  ;;  %7824 = vmatprep.subr.mxu0 %v6627_v31  ;;  %7796 = vmatpush3.msra.mxu1 %v6576_v19  ;;  %v6646_v48 = vld [vmem:[#allocation11 + $0x250] sm:$0xff]  ;;  %v6660_v56 = vld [vmem:[#allocation11 + $0x2c0] sm:$0xff]  ;;  %v6659_v42 = vld [vmem:[#allocation11 + $0x2b8] sm:$0xff] }
 0xb9a   : > { %7825 = vmatpush3.msra.mxu0 %v6611_v32  ;;  %7797 = vmatprep.subr.mxu1 %v6591_v49  ;;  %v6644_v34 = vld [vmem:[#allocation11 + $0x240] sm:$0xff]  ;;  %v6643_v33 = vld [vmem:[#allocation11 + $0x238] sm:$0xff]  ;;  %v6658_v1 = vld [vmem:[#allocation11 + $0x2b0] sm:$0xff] }
 0xb9b   : > { %v6522_v43 = vadd.f32 %v6521_v45, %v6520_v47  ;;  %v6530_v39 = vrot.slane %v6529_v50, 4  ;;  %7826 = vmatprep.subr.mxu0 %v6626_v23  ;;  %7798 = vmatpush3.msra.mxu1 %v6575_v53  ;;  %v6642_v28 = vld [vmem:[#allocation11 + $0x230] sm:$0xff]  ;;  %v6657_v2 = vld [vmem:[#allocation11 + $0x2a8] sm:$0xff]  ;;  %v6656_v7 = vld [vmem:[#allocation11 + $0x2a0] sm:$0xff] }
 0xb9c   : > { %7827 = vmatpush3.msra.mxu0 %v6610_v17  ;;  %7799 = vmatprep.subr.mxu1 %v6590_v25  ;;  %v6641_v47 = vld [vmem:[#allocation11 + $0x228] sm:$0xff]  ;;  %v6640_v31 = vld [vmem:[#allocation11 + $0x220] sm:$0xff]  ;;  %v6655_v19 = vld [vmem:[#allocation11 + $0x298] sm:$0xff]  ;;  %v12190_v17 = vmov 0.0  }
 0xb9d   : > { %v6523_v13 = vrot.slane %v6522_v43, 2  ;;  %v6531_v55 = vadd.f32 %v6530_v39, %v6529_v50  ;;  %7828 = vmatprep.subr.mxu0 %v6625_v15  ;;  %7800 = vmatpush3.msra.mxu1 %v6574_v52  ;;  %v6639_v32 = vld [vmem:[#allocation11 + $0x218] sm:$0xff]  ;;  %v6654_v49 = vld [vmem:[#allocation11 + $0x290] sm:$0xff]  ;;  %v6653_v45 = vld [vmem:[#allocation11 + $0x288] sm:$0xff] }
 0xb9e   : > { %7829 = vmatpush3.msra.mxu0 %v6609_v59  ;;  %7801 = vmatprep.subr.mxu1 %v6589_v30  ;;  %v6638_v62 = vld [vmem:[#allocation11 + $0x210] sm:$0xff]  ;;  %v6637_v50 = vld [vmem:[#allocation11 + $0x208] sm:$0xff]  ;;  %v6652_v23 = vld [vmem:[#allocation11 + $0x280] sm:$0xff] }
 0xb9f   : > { %v6532_v44 = vrot.slane %v6531_v55, 2  ;;  %v6524_v36 = vadd.f32 %v6523_v13, %v6522_v43  ;;  %7830 = vmatprep.subr.mxu0 %v6624_v51  ;;  %7802 = vmatpush3.msra.mxu1 %v6573_v58  ;;  %v6636_v53 = vld [vmem:[#allocation11 + $0x200] sm:$0xff]  ;;  %v6699_v25 = vld [vmem:[#allocation11 + $0x3f8] sm:$0xff]  ;;  %v6698_v39 = vld [vmem:[#allocation11 + $0x3f0] sm:$0xff] }
 0xba0   : > { %7831 = vmatpush3.msra.mxu0 %v6608_v38  ;;  %7803 = vmatprep.subr.mxu1 %v6588_v29  ;;  %v6683_v43 = vld [vmem:[#allocation11 + $0x378] sm:$0xff]  ;;  %v6682_v15 = vld [vmem:[#allocation11 + $0x370] sm:$0xff]  ;;  %v6697_v52 = vld [vmem:[#allocation11 + $0x3e8] sm:$0xff] }
 0xba1   : > { %v6533_v6 = vadd.f32 %v6532_v44, %v6531_v55  ;;  %7832 = vmatprep.subr.mxu0 %v6623_v46  ;;  %7804 = vmatpush3.msra.mxu1 %v6572_v61  ;;  %v6525_v27 = vrot.slane %v6524_v36, 1  ;;  %v6681_v59 = vld [vmem:[#allocation11 + $0x368] sm:$0xff]  ;;  %v6696_v30 = vld [vmem:[#allocation11 + $0x3e0] sm:$0xff]  ;;  %v6695_v13 = vld [vmem:[#allocation11 + $0x3d8] sm:$0xff] }
 0xba2   : > { %7833 = vmatpush3.msra.mxu0 %v6607_v16  ;;  %6766 = vmatmul.mubr.f32.vlgmr.msra.gmra.mxu1 %v6508_v9  ;;  %v6680_v4 = vld [vmem:[#allocation11 + $0x360] sm:$0xff]  ;;  %v6679_v55 = vld [vmem:[#allocation11 + $0x358] sm:$0xff]  ;;  %v6694_v51 = vld [vmem:[#allocation11 + $0x3d0] sm:$0xff] }
 0xba3   : > { %v6534_v63 = vrot.slane %v6533_v6, 1  ;;  %7834 = vmatprep.subr.mxu0 %v6622_v60  ;;  %7843 = vmatprep.subr.mxu1 %v6667_v21  ;;  %v6526_v10 = vadd.f32 %v6525_v27, %v6524_v36  ;;  %v6678_v58 = vld [vmem:[#allocation11 + $0x350] sm:$0xff]  ;;  %v6693_v38 = vld [vmem:[#allocation11 + $0x3c8] sm:$0xff]  ;;  %v6692_v46 = vld [vmem:[#allocation11 + $0x3c0] sm:$0xff] }
 0xba4   : > { %7835 = vmatpush3.msra.mxu0 %v6606_v24  ;;  %7844 = vmatpush3.msra.mxu1 %v6651_v26  ;;  %v6677_v29 = vld [vmem:[#allocation11 + $0x348] sm:$0xff]  ;;  %v6676_v61 = vld [vmem:[#allocation11 + $0x340] sm:$0xff]  ;;  %v6691_v44 = vld [vmem:[#allocation11 + $0x3b8] sm:$0xff] }
 0xba5   : > { %v6535_v40 = vadd.f32 %v6534_v63, %v6533_v6  ;;  %7836 = vmatprep.subr.mxu0 %v6621_v5  ;;  %7845 = vmatprep.subr.mxu1 %v6666_v14  ;;  %v6675_v36 = vld [vmem:[#allocation11 + $0x338] sm:$0xff]  ;;  %v6690_v16 = vld [vmem:[#allocation11 + $0x3b0] sm:$0xff]  ;;  %v6689_v6 = vld [vmem:[#allocation11 + $0x3a8] sm:$0xff] }
 0xba6   : > { %7837 = vmatpush3.msra.mxu0 %v6605_v37  ;;  %7846 = vmatpush3.msra.mxu1 %v6650_v41  ;;  %v6674_v9 = vld [vmem:[#allocation11 + $0x330] sm:$0xff]  ;;  %v6673_v21 = vld [vmem:[#allocation11 + $0x328] sm:$0xff]  ;;  %v6688_v24 = vld [vmem:[#allocation11 + $0x3a0] sm:$0xff] }
 0xba7   : > { %6835 = vmatprep.mubr.f32.mxu0 %v6535_v40  ;;  %7838 = vmatprep.subr.mxu0 %v6620_v35  ;;  %v6672_v26 = vld [vmem:[#allocation11 + $0x320] sm:$0xff]  ;;  %v6687_v63 = vld [vmem:[#allocation11 + $0x398] sm:$0xff]  ;;  %v6686_v27 = vld [vmem:[#allocation11 + $0x390] sm:$0xff] }
 0xba8   : > { %7839 = vmatpush3.msra.mxu0 %v6604_v0  ;;  %7847 = vmatprep.subr.mxu1 %v6665_v20  ;;  %v6671_v14 = vld [vmem:[#allocation11 + $0x318] sm:$0xff]  ;;  %v6670_v37 = vld [vmem:[#allocation11 + $0x310] sm:$0xff]  ;;  %v6685_v40 = vld [vmem:[#allocation11 + $0x388] sm:$0xff] }
 0xba9   : > { %6836 = vmatmul.mubr.f32.vlgmr.msra.gmra.mxu0 %v6526_v10  ;;  %7848 = vmatpush3.msra.mxu1 %v6649_v3  ;;  %v6669_v41 = vld [vmem:[#allocation11 + $0x308] sm:$0xff]  ;;  %v6684_v0 = vld [vmem:[#allocation11 + $0x380] sm:$0xff] }
 0xbaa   : > { %7849 = vmatprep.subr.mxu1 %v6664_v57  ;;  %7878 = vmatprep.subr.mxu0 %v6699_v25  ;;  %v6668_v3 = vld [vmem:[#allocation11 + $0x300] sm:$0xff]  ;;  %v6456_v25 = vld [vmem:[%s12053_s12 + $0xa0] sm:$0xff] }
 0xbab   : > { %7850 = vmatpush3.msra.mxu1 %v6648_v8  ;;  %7879 = vmatpush3.msra.mxu0 %v6683_v43 }
 0xbac   : > { %7851 = vmatprep.subr.mxu1 %v6663_v54  ;;  %7880 = vmatprep.subr.mxu0 %v6698_v39 }
 0xbad   : > { %7852 = vmatpush3.msra.mxu1 %v6647_v12  ;;  %7881 = vmatpush3.msra.mxu0 %v6682_v15 }
 0xbae   : > { %7853 = vmatprep.subr.mxu1 %v6662_v11  ;;  %7882 = vmatprep.subr.mxu0 %v6697_v52 }
 0xbaf   : > { %7854 = vmatpush3.msra.mxu1 %v6646_v48  ;;  %7883 = vmatpush3.msra.mxu0 %v6681_v59 }
 0xbb0   : > { %7855 = vmatprep.subr.mxu1 %v6661_v22  ;;  %7884 = vmatprep.subr.mxu0 %v6696_v30 }
 0xbb1   : > { %7856 = vmatpush3.msra.mxu1 %v6645_v18  ;;  %7885 = vmatpush3.msra.mxu0 %v6680_v4  ;;  %v6441_v4 = vld [vmem:[%s12053_s12 + $0x28] sm:$0xff] }
 0xbb2   : > { %7857 = vmatprep.subr.mxu1 %v6660_v56  ;;  %7886 = vmatprep.subr.mxu0 %v6695_v13 }
 0xbb3   : > { %7858 = vmatpush3.msra.mxu1 %v6644_v34  ;;  %7887 = vmatpush3.msra.mxu0 %v6679_v55  ;;  %v6457_v55 = vld [vmem:[%s12053_s12 + $0xa8] sm:$0xff] }
 0xbb4   : > { %7859 = vmatprep.subr.mxu1 %v6659_v42  ;;  %7888 = vmatprep.subr.mxu0 %v6694_v51 }
 0xbb5   : > { %7860 = vmatpush3.msra.mxu1 %v6643_v33  ;;  %7889 = vmatpush3.msra.mxu0 %v6678_v58 }
 0xbb6   : > { %7861 = vmatprep.subr.mxu1 %v6658_v1  ;;  %7890 = vmatprep.subr.mxu0 %v6693_v38 }
 0xbb7   : > { %7862 = vmatpush3.msra.mxu1 %v6642_v28  ;;  %7891 = vmatpush3.msra.mxu0 %v6677_v29 }
 0xbb8   : > { %7863 = vmatprep.subr.mxu1 %v6657_v2  ;;  %7892 = vmatprep.subr.mxu0 %v6692_v46 }
 0xbb9   : > { %7864 = vmatpush3.msra.mxu1 %v6641_v47  ;;  %7893 = vmatpush3.msra.mxu0 %v6676_v61 }
 0xbba   : > { %7865 = vmatprep.subr.mxu1 %v6656_v7  ;;  %7894 = vmatprep.subr.mxu0 %v6691_v44  ;;  %v6464_v44 = vld [vmem:[%s12053_s12 + $0xe0] sm:$0xff] }
 0xbbb   : > { %7866 = vmatpush3.msra.mxu1 %v6640_v31  ;;  %7895 = vmatpush3.msra.mxu0 %v6675_v36  ;;  %v6448_v31 = vld [vmem:[%s12053_s12 + $0x60] sm:$0xff] }
 0xbbc   : > { %7867 = vmatprep.subr.mxu1 %v6655_v19  ;;  %7896 = vmatprep.subr.mxu0 %v6690_v16 }
 0xbbd   : > { %7868 = vmatpush3.msra.mxu1 %v6639_v32  ;;  %7897 = vmatpush3.msra.mxu0 %v6674_v9 }
 0xbbe   : > { %7869 = vmatprep.subr.mxu1 %v6654_v49  ;;  %7898 = vmatprep.subr.mxu0 %v6689_v6 }
 0xbbf   : > { %7870 = vmatpush3.msra.mxu1 %v6638_v62  ;;  %7899 = vmatpush3.msra.mxu0 %v6673_v21  ;;  %v6465_v21 = vld [vmem:[%s12053_s12 + $0xe8] sm:$0xff] }
 0xbc0   : > { %7871 = vmatprep.subr.mxu1 %v6653_v45  ;;  %7900 = vmatprep.subr.mxu0 %v6688_v24 }
 0xbc1   : > { %7872 = vmatpush3.msra.mxu1 %v6637_v50  ;;  %v6152_v60 = vpop.f32.mrf.mxu1  ;;  %7901 = vmatpush3.msra.mxu0 %v6672_v26  ;;  %v6440_v50 = vld [vmem:[%s12053_s12 + $0x20] sm:$0xff] }
 0xbc2   : > { %7873 = vmatprep.subr.mxu1 %v6652_v23  ;;  %7902 = vmatprep.subr.mxu0 %v6687_v63  ;;  %v6449_v23 = vld [vmem:[%s12053_s12 + $0x68] sm:$0xff] }
 0xbc3   : > { %7874 = vmatpush3.msra.mxu1 %v6636_v53  ;;  %v6154_v5 = vpop.f32.mrf.mxu1  ;;  %7903 = vmatpush3.msra.mxu0 %v6671_v14 }
 0xbc4   : > { %7965 = vmatprep.subr.mxu1 %v12190_v17  ;;  %7904 = vmatprep.subr.mxu0 %v6686_v27 }
 0xbc5   : > { %v6156_v35 = vpop.f32.mrf.mxu1  ;;  %7905 = vmatpush3.msra.mxu0 %v6670_v37 }
 0xbc6   : > { %v6205_v20 = vpop.f32.mrf.mxu0  ;;  %7906 = vmatprep.subr.mxu0 %v6685_v40 }
 0xbc7   : > { %v6158_v10 = vpop.f32.mrf.mxu1  ;;  %7907 = vmatpush3.msra.mxu0 %v6669_v41  ;;  %v6206_v28 = vadd.f32 %v6205_v20, %v6152_v60 }
 0xbc8   : > { %7908 = vmatprep.subr.mxu0 %v6684_v0  ;;  %v6207_v57 = vpop.f32.mrf.mxu0 }
 0xbc9   : > { %7909 = vmatpush3.msra.mxu0 %v6668_v3  ;;  %v6162_v8 = vpop.f32.mrf.mxu1  ;;  %v6208_v32 = vadd.f32 %v6207_v57, %v6154_v5 }
 0xbca   : > { %7976 = vmatprep.subr.mxu0 %v12190_v17  ;;  %v6209_v54 = vpop.f32.mrf.mxu0 }
 0xbcb   : > { %v6164_v12 = vpop.f32.mrf.mxu1  ;;  %v6210_v33 = vadd.f32 %v6209_v54, %v6156_v35 }
 0xbcc   : > { %v6211_v11 = vpop.f32.mrf.mxu0 }
 0xbcd   : > { %v6166_v48 = vpop.f32.mrf.mxu1  ;;  %v6212_v2 = vadd.f32 %v6211_v11, %v6158_v10 }
 0xbce   : > { %v6215_v22 = vpop.f32.mrf.mxu0 }
 0xbcf   : > { %v6168_v18 = vpop.f32.mrf.mxu1  ;;  %v6216_v49 = vadd.f32 %v6215_v22, %v6162_v8 }
 0xbd0   : > { %v6217_v34 = vpop.f32.mrf.mxu0 }
 0xbd1   : > { %v6218_v43 = vadd.f32 %v6217_v34, %v6164_v12 }
 0xbd2   : > { %v6219_v47 = vpop.f32.mrf.mxu0 }
 0xbd3   : > { %v6220_v30 = vadd.f32 %v6219_v47, %v6166_v48 }
 0xbd4   : > { %v6221_v39 = vpop.f32.mrf.mxu0 }
 0xbd5   : > { %v6222_v46 = vadd.f32 %v6221_v39, %v6168_v18 }
 0xc01   : > { %v6258_v56 = vpop.f32.mrf.mxu1 }
 0xc02   : > { %v6259_v62 = vadd.f32 %v6258_v56, %v6206_v28 }
 0xc03   : > { %v6260_v42 = vpop.f32.mrf.mxu1 }
 0xc04   : > { %v6261_v15 = vadd.f32 %v6260_v42, %v6208_v32  ;;  %v6472_v51 = vmul.f32 %v6440_v50, %v6259_v62 }
 0xc05   : > { %v6262_v1 = vpop.f32.mrf.mxu1 }
 0xc06   : > { %v6263_v7 = vadd.f32 %v6262_v1, %v6210_v33  ;;  %v6473_v36 = vmul.f32 %v6441_v4, %v6261_v15  ;;  %v6311_v22 = vpop.f32.mrf.mxu0  ;;  %v6450_v15 = vld [vmem:[%s12053_s12 + $0x70] sm:$0xff] }
 0xc07   : > { %v6264_v19 = vpop.f32.mrf.mxu1 }
 0xc08   : > { %v6265_v45 = vadd.f32 %v6264_v19, %v6212_v2  ;;  %v6480_v52 = vmul.f32 %v6448_v31, %v6263_v7  ;;  %v6313_v18 = vpop.f32.mrf.mxu0 }
 0xc09   : > { %v6268_v53 = vpop.f32.mrf.mxu1 }
 0xc0a   : > { %v6269_v59 = vadd.f32 %v6268_v53, %v6216_v49  ;;  %v6481_v58 = vmul.f32 %v6449_v23, %v6265_v45  ;;  %v6536_v16 = vadd.f32 %v6480_v52, %v6472_v51  ;;  %v6315_v56 = vpop.f32.mrf.mxu0 }
 0xc0b   : > { %v6270_v13 = vpop.f32.mrf.mxu1 }
 0xc0c   : > { %v6488_v38 = vmul.f32 %v6456_v25, %v6269_v59  ;;  %v6271_v29 = vadd.f32 %v6270_v13, %v6218_v43  ;;  %v6545_v24 = vadd.f32 %v6481_v58, %v6473_v36  ;;  %v6317_v34 = vpop.f32.mrf.mxu0  ;;  %v6442_v59 = vld [vmem:[%s12053_s12 + $0x30] sm:$0xff] }
 0xc0d   : > { %v6272_v61 = vpop.f32.mrf.mxu1 }
 0xc0e   : > { %v6489_v9 = vmul.f32 %v6457_v55, %v6271_v29  ;;  %v6273_v60 = vadd.f32 %v6272_v61, %v6220_v30  ;;  %v6537_v26 = vadd.f32 %v6536_v16, %v6488_v38  ;;  %v6321_v42 = vpop.f32.mrf.mxu0  ;;  %v6451_v55 = vld [vmem:[%s12053_s12 + $0x78] sm:$0xff]  ;;  %v6458_v38 = vld [vmem:[%s12053_s12 + $0xb0] sm:$0xff] }
 0xc0f   : > { %v6274_v6 = vpop.f32.mrf.mxu1  ;;  %v6443_v29 = vld [vmem:[%s12053_s12 + $0x38] sm:$0xff] }
 0xc10   : > { %v6496_v5 = vmul.f32 %v6464_v44, %v6273_v60  ;;  %v6275_v63 = vadd.f32 %v6274_v6, %v6222_v46  ;;  %v6546_v14 = vadd.f32 %v6545_v24, %v6489_v9  ;;  %v6323_v33 = vpop.f32.mrf.mxu0  ;;  %v6459_v60 = vld [vmem:[%s12053_s12 + $0xb8] sm:$0xff] }
 0xc12   : > { %v6538_v27 = vadd.f32 %v6537_v26, %v6496_v5  ;;  %v6497_v37 = vmul.f32 %v6465_v21, %v6275_v63  ;;  %v6325_v1 = vpop.f32.mrf.mxu0 }
 0xc14   : > { %v6539_v35 = vrot.slane %v6538_v27, 4  ;;  %v6547_v40 = vadd.f32 %v6546_v14, %v6497_v37  ;;  %v6327_v2 = vpop.f32.mrf.mxu0  ;;  %v6466_v14 = vld [vmem:[%s12053_s12 + $0xf0] sm:$0xff] }
 0xc16   : > { %v6540_v41 = vadd.f32 %v6539_v35, %v6538_v27  ;;  %v6548_v0 = vrot.slane %v6547_v40, 4 }
 0xc18   : > { %v6541_v20 = vrot.slane %v6540_v41, 2  ;;  %v6549_v3 = vadd.f32 %v6548_v0, %v6547_v40  ;;  %v6467_v0 = vld [vmem:[%s12053_s12 + $0xf8] sm:$0xff] }
 0xc1a   : > { %v6542_v10 = vadd.f32 %v6541_v20, %v6540_v41  ;;  %v6550_v57 = vrot.slane %v6549_v3, 2 }
 0xc1c   : > { %v6551_v8 = vadd.f32 %v6550_v57, %v6549_v3  ;;  %v6543_v54 = vrot.slane %v6542_v10, 1 }
 0xc1e   : > { %v6552_v12 = vrot.slane %v6551_v8, 1  ;;  %v6544_v48 = vadd.f32 %v6543_v54, %v6542_v10 }
 0xc20   : > { %v6553_v11 = vadd.f32 %v6552_v12, %v6551_v8 }
 0xc22   : > { %6905 = vmatprep.mubr.f32.mxu1 %v6553_v11 }
 0xc23   : > { %6906 = vmatmul.mubr.f32.vlgmr.msra.gmra.mxu1 %v6544_v48 }
 0xc24   : > { %7973 = vmatprep.mubr.msk.f32.mxu1 %vm8462_vm10, %v12190_v17 }
 0xc41   : > { %v6364_v28 = vpop.f32.mrf.mxu1 }
 0xc42   : > { %v6365_v45 = vadd.f32 %v6364_v28, %v6311_v22 }
 0xc43   : > { %v6366_v47 = vpop.f32.mrf.mxu1 }
 0xc44   : > { %v6367_v43 = vadd.f32 %v6366_v47, %v6313_v18 }
 0xc45   : > { %v6368_v31 = vpop.f32.mrf.mxu1 }
 0xc46   : > { %v6417_v7 = vpop.f32.mrf.mxu0  ;;  %v6369_v49 = vadd.f32 %v6368_v31, %v6315_v56  ;;  %v6993_v31 = vld [vmem:[%s12056_s15 + $0x18] sm:$0xff] }
 0xc47   : > { %v6370_v32 = vpop.f32.mrf.mxu1  ;;  %v6418_v39 = vadd.f32 %v6417_v7, %v6365_v45  ;;  %7966 = vmatpush3.msra.mxu1 %v6993_v31 }
 0xc48   : > { %v6419_v19 = vpop.f32.mrf.mxu0  ;;  %v6371_v23 = vadd.f32 %v6370_v32, %v6317_v34  ;;  %7967 = vmatprep.subr.mxu1 %v12190_v17  ;;  %v6991_v32 = vld [vmem:[%s12056_s15 + $0x8] sm:$0xff] }
 0xc49   : > { %v6420_v13 = vadd.f32 %v6419_v19, %v6367_v43  ;;  %v6474_v36 = vmul.f32 %v6442_v59, %v6418_v39  ;;  %v6992_v19 = vld [vmem:[%s12056_s15 + $0x10] sm:$0xff]  ;;  %v6700_v43 = vld [vmem:[#allocation13] sm:$0x1] }
 0xc4a   : > { %v6421_v62 = vpop.f32.mrf.mxu0  ;;  %v6374_v50 = vpop.f32.mrf.mxu1  ;;  %7968 = vmatpush3.msra.mxu1 %v6992_v19 }
 0xc4b   : > { %v6422_v53 = vadd.f32 %v6421_v62, %v6369_v49  ;;  %v6375_v30 = vadd.f32 %v6374_v50, %v6321_v42  ;;  %v6475_v5 = vmul.f32 %v6443_v29, %v6420_v13  ;;  %7969 = vmatprep.subr.mxu1 %v12190_v17  ;;  %v6990_v49 = vld [vmem:[%s12056_s15] sm:$0xff] }
 0xc4c   : > { %v6423_v25 = vpop.f32.mrf.mxu0  ;;  %v6376_v52 = vpop.f32.mrf.mxu1  ;;  %7970 = vmatpush3.msra.mxu1 %v6991_v32 }
 0xc4d   : > { %v6424_v4 = vadd.f32 %v6423_v25, %v6371_v23  ;;  %v6482_v46 = vmul.f32 %v6450_v15, %v6422_v53  ;;  %v6377_v61 = vadd.f32 %v6376_v52, %v6323_v33  ;;  %7971 = vmatprep.subr.mxu1 %v12190_v17 }
 0xc4e   : > { %v6378_v51 = vpop.f32.mrf.mxu1  ;;  %v6427_v58 = vpop.f32.mrf.mxu0  ;;  %7972 = vmatpush3.msra.mxu1 %v6990_v49 }
 0xc4f   : > { %v6428_v44 = vadd.f32 %v6427_v58, %v6375_v30  ;;  %v6483_v6 = vmul.f32 %v6451_v55, %v6424_v4  ;;  %v6379_v21 = vadd.f32 %v6378_v51, %v6325_v1  ;;  %v6554_v27 = vadd.f32 %v6482_v46, %v6474_v36 }
 0xc50   : > { %v6380_v16 = vpop.f32.mrf.mxu1  ;;  %v6429_v9 = vpop.f32.mrf.mxu0 }
 0xc51   : > { %v6490_v24 = vmul.f32 %v6458_v38, %v6428_v44  ;;  %v6430_v26 = vadd.f32 %v6429_v9, %v6377_v61  ;;  %v6381_v37 = vadd.f32 %v6380_v16, %v6327_v2  ;;  %v6563_v20 = vadd.f32 %v6483_v6, %v6475_v5  ;;  %v7080_v6 = vld [vmem:[%s12191_s3 + $0x18] sm:$0xff]  ;;  %v6994_v5 = vld [vmem:[#allocation14] sm:$0x1] }
 0xc52   : > { %v6431_v63 = vpop.f32.mrf.mxu0 }
 0xc53   : > { %v6491_v35 = vmul.f32 %v6459_v60, %v6430_v26  ;;  %v6432_v40 = vadd.f32 %v6431_v63, %v6379_v21  ;;  %v6555_v3 = vadd.f32 %v6554_v27, %v6490_v24  ;;  %v7079_v21 = vld [vmem:[%s12191_s3 + $0x10] sm:$0xff]  ;;  %v7078_v24 = vld [vmem:[%s12191_s3 + $0x8] sm:$0xff]  ;;  %v7077_v26 = vld [vmem:[%s12191_s3] sm:$0xff] }
 0xc54   : > { %v6433_v41 = vpop.f32.mrf.mxu0 }
 0xc55   : > { %v6498_v10 = vmul.f32 %v6466_v14, %v6432_v40  ;;  %v6434_v57 = vadd.f32 %v6433_v41, %v6381_v37  ;;  %v6564_v8 = vadd.f32 %v6563_v20, %v6491_v35 }
 0xc57   : > { %v6556_v54 = vadd.f32 %v6555_v3, %v6498_v10  ;;  %v6499_v12 = vmul.f32 %v6467_v0, %v6434_v57 }
 0xc59   : > { %v6557_v11 = vrot.slane %v6556_v54, 4  ;;  %v6565_v48 = vadd.f32 %v6564_v8, %v6499_v12 }
 0xc5b   : > { %v6558_v22 = vadd.f32 %v6557_v11, %v6556_v54  ;;  %v6566_v18 = vrot.slane %v6565_v48, 4 }
 0xc5d   : > { %v6559_v56 = vrot.slane %v6558_v22, 2  ;;  %v6567_v34 = vadd.f32 %v6566_v18, %v6565_v48 }
 0xc5f   : > { %v6560_v42 = vadd.f32 %v6559_v56, %v6558_v22  ;;  %v6568_v33 = vrot.slane %v6567_v34, 2 }
 0xc61   : > { %v6569_v1 = vadd.f32 %v6568_v33, %v6567_v34  ;;  %v6561_v28 = vrot.slane %v6560_v42, 1 }
 0xc62   : > { %v7805_v62 = vpop.f32.mrf.mxu1 }
 0xc63   : > { %v6570_v2 = vrot.slane %v6569_v1, 1  ;;  %v6562_v7 = vadd.f32 %v6561_v28, %v6560_v42 }
 0xc64   : > { %v7806_v45 = vpop.f32.mrf.mxu1 }
 0xc65   : > { %v6571_v47 = vadd.f32 %v6570_v2, %v6569_v1  ;;  %v7807_v25 = vadd.f32 %v7806_v45, %v7805_v62 }
 0xc67   : > { %6975 = vmatprep.mubr.f32.mxu0 %v6571_v47  ;;  %v6768_v52 = vadd.f32 %v7807_v25, %v6700_v43 }
 0xc68   : > { %6976 = vmatmul.mubr.f32.vlgmr.msra.gmra.mxu0 %v6562_v7 }
 0xc69   : > { %7984 = vmatprep.mubr.msk.f32.mxu0 %vm8462_vm10, %v12190_v17  ;;  %v7840_v50 = vpop.f32.mrf.mxu0  ;;  %7977 = vmatpush3.msra.mxu0 %v7080_v6 }
 0xc6a   : > { %7978 = vmatprep.subr.mxu0 %v12190_v17 }
 0xc6b   : > { %v7841_v53 = vpop.f32.mrf.mxu0  ;;  %7979 = vmatpush3.msra.mxu0 %v7079_v21 }
 0xc6c   : > { %v7842_v15 = vadd.f32 %v7841_v53, %v7840_v50  ;;  %7980 = vmatprep.subr.mxu0 %v12190_v17 }
 0xc6d   : > { %7981 = vmatpush3.msra.mxu0 %v7078_v24 }
 0xc6e   : > { %v6838_v4 = vadd.f32 %v7842_v15, %v6768_v52  ;;  %7982 = vmatprep.subr.mxu0 %v12190_v17  ;;  %v7081_v17 = vld [vmem:[#allocation3] sm:$0x1] }
 0xc6f   : > { %7983 = vmatpush3.msra.mxu0 %v7077_v26 }
 0xce3   : > { %v7875_v23 = vpop.f32.mrf.mxu1 }
 0xce5   : > { %v7876_v39 = vpop.f32.mrf.mxu1 }
 0xce6   : > { %v7877_v59 = vadd.f32 %v7876_v39, %v7875_v23 }
 0xce8   : > { %v6908_v55 = vadd.f32 %v7877_v59, %v6838_v4 }
 0xd28   : > { %v7910_v30 = vpop.f32.mrf.mxu0 }
 0xd2a   : > { %v7911_v13 = vpop.f32.mrf.mxu0 }
 0xd2b   : > { %v7912_v51 = vadd.f32 %v7911_v13, %v7910_v30 }
 0xd2d   : > { %v6978_v58 = vadd.f32 %v7912_v51, %v6908_v55 }
 0xd2f   : > { %v6982_v38 = vand.u32 2147483647, %v6978_v58  ;;  %v6981_v16 = vmax.f32 %v6978_v58, 0.0 }
 0xd31   : > { %v6983_v29 = vsub.f32 0.0, %v6982_v38 }
 0xd33   : > { %v6984_v46 = vmul.f32 1.442695, %v6983_v29 }
 0xd35   : > { %8209 = vpow2.f32 %v6984_v46 }
 0xd42   : > { %v8210_v61 = vpop.eup %8209 }
 0xd43   : > { %v6986_v44 = vadd.f32 1.0, %v8210_v61 }
 0xd45   : > { %8211 = vlog2.f32 %v6986_v44 }
 0xd52   : > { %v8212_v36 = vpop.eup %8211 }
 0xd53   : > { %v6988_v9 = vmul.f32 0.6931472, %v8212_v36 }
 0xd55   : > { %v6989_v60 = vadd.f32 %v6988_v9, %v6981_v16 }
 0xd57   : > { %7974 = vmatmul.mubr.msk.f32.vlgmr.msra.gmra.mxu1 %vm2587_vm8, %v6989_v60 }
 0xe17   : > { %v7064_v63 = vpop.f32.mrf.mxu1 }
 0xe18   : > { %v7065_v14 = vadd.f32 %v7064_v63, %v6994_v5 }
 0xe19   : > { %v7975_v27 = vpop.f32.mrf.mxu1 }
 0xe1a   : > { %v7069_v37 = vand.u32 2147483647, %v7065_v14  ;;  %v7068_v3 = vmax.f32 %v7065_v14, 0.0 }
 0xe1c   : > { %v7070_v35 = vsub.f32 0.0, %v7069_v37 }
 0xe1e   : > { %v7071_v40 = vmul.f32 1.442695, %v7070_v35 }
 0xe20   : > { %8213 = vpow2.f32 %v7071_v40 }
 0xe2d   : > { %v8214_v41 = vpop.eup %8213 }
 0xe2e   : > { %v7073_v0 = vadd.f32 1.0, %v8214_v41 }
 0xe30   : > { %8215 = vlog2.f32 %v7073_v0 }
 0xe3d   : > { %v8216_v20 = vpop.eup %8215 }
 0xe3e   : > { %v7075_v10 = vmul.f32 0.6931472, %v8216_v20 }
 0xe40   : > { %v7076_v57 = vadd.f32 %v7075_v10, %v7068_v3 }
 0xe42   : > { %7985 = vmatmul.mubr.msk.f32.vlgmr.msra.gmra.mxu0 %vm2587_vm8, %v7076_v57 }
 0xf02   : > { %v7151_v8 = vpop.f32.mrf.mxu0 }
 0xf03   : > { %v7152_v54 = vadd.f32 %v7151_v8, %v7081_v17 }
 0xf04   : > { %v7986_v12 = vpop.f32.mrf.mxu0 }
 0xf05   : > { %v7156_v11 = vand.u32 2147483647, %v7152_v54  ;;  %v7155_v42 = vmax.f32 %v7152_v54, 0.0 }
 0xf07   : > { %v7157_v48 = vsub.f32 0.0, %v7156_v11 }
 0xf09   : > { %v7158_v22 = vmul.f32 1.442695, %v7157_v48 }
 0xf0b   : > { %8217 = vpow2.f32 %v7158_v22 }
 0xf18   : > { %v8218_v18 = vpop.eup %8217 }
 0xf19   : > { %v7160_v56 = vadd.f32 1.0, %v8218_v18 }
 0xf1b   : > { %8219 = vlog2.f32 %v7160_v56 }
 0xf28   : > { %v8220_v34 = vpop.eup %8219 }
 0xf29   : > { %v7162_v33 = vmul.f32 0.6931472, %v8220_v34 }
 0xf2b   : > { %v7163_v1 = vadd.f32 %v7162_v33, %v7155_v42 }
 0xf2d   : > { %7165 = vst.msk [vmem:[%s718_s20] sm:$0x1] %vm7164_vm11, %v7163_v1 }
 0xf2e PF: > { %p35_p8 = scmp.ge.s32.totalorder %s8663_s29, 4   ;;  %s12193_s20 = smov %s8436_s21 }
 0xf2f   : > { %s12194_s21 = smov %s8440_s1  ;;  %s12195_s1 = smov %s8675_s18 }
 0xf30   : > { %s12196_s22 = smov %s8663_s29  ;;  %37 = sbr.rel (!%p35_p8) target bundleno = 18 (0x12), region = 169 }
 0xf35   :  { %7183 = vsyncpa [#allocation5], 1 }
 0xf36   :  { %7185 = vsyncpa [#allocation5 + $0x1], 1 }
 0xf37   :  { %7186 = vsyncpa [#allocation8], 1 }
 0xf38   :  { %7187 = vsyncpa [#allocation12], 1 }
 0xf39   :  { %7188 = vsyncpa [#allocation15], 1 }
 0xf3a   :  { %7189 = vsyncpa [#allocation6], 1 }
 0xf3b   :  { %7191 = vsyncpa [#allocation6 + $0x1], 1 }

</bundles_post_ra>
